<compile_context>
chip_gen: v5e
topology: v5e:2x2
jax: 0.10.0
libtpu: 0.0.40
codegen_flags: <defaults>
</compile_context>

<pallas_src>
import functools

import jax
import jax.numpy as jnp
from jax.experimental import pallas as pl
from jax.experimental.pallas import tpu as pltpu

NEG_SLOPE = 0.01  # F.leaky_relu default negative_slope
_TRANS_B = (((1,), (1,)), ((), ()))  # contract both operands' last dim: a @ b.T
_VMEM = pl.BlockSpec(memory_space=pltpu.MemorySpace.VMEM)


# ---------------------------------------------------------------------------
# Fused kernel: prologue + branch-free unrolled dynamic loop + epilogue
# ---------------------------------------------------------------------------
def _stategcn_kernel(a_ref, feat_ref, w1_ref, b1_ref, w2_ref, b2_ref,
                     w3_ref, b3_ref, w5_ref, b5_ref,
                     wih_ref, bih_ref, whh_ref, bhh_ref, we_ref, be_ref,
                     out_ref, cnt_ref, fprob_ref, *, cap, hdim):
    f32 = jnp.float32

    def leaky(v):
        return jnp.where(v >= 0, v, NEG_SLOPE * v)

    def mm(x, y):                       # standard A @ B, f32 accumulate
        return jnp.dot(x, y, preferred_element_type=f32)

    def mm_tb(x, y):                    # A @ B.T without materializing a transpose
        return jax.lax.dot_general(x, y, _TRANS_B, preferred_element_type=f32)

    a = a_ref[...]                      # [N, N] row-normalized adjacency

    def gcn(x, w_ref, b_ref):
        # CustomConv modeled as a dense GCN layer: A @ (X @ W) + b.
        return mm(a, mm(x, w_ref[...])) + b_ref[...]

    def layer3_row(x):
        # leaky(A @ (X @ w3) + b3) transposed, produced directly as a
        # lane-dense [1, N] row:  (X@w3)^T = w3_row @ X^T,  (A@s)^T = s_row @ A^T.
        s_row = mm_tb(w3_ref[...], x)                      # [1, N]
        return leaky(mm_tb(s_row, a) + b3_ref[...])        # [1, N]

    def gru_row(u_row, gh_row, h_prev_row):
        # PyTorch nn.GRUCell, row-major, gate order (r, z, n).
        gi = mm_tb(u_row, wih_ref[...]) + bih_ref[...]     # [1, 3H]
        r = jax.nn.sigmoid(gi[:, 0:hdim] + gh_row[:, 0:hdim])
        z = jax.nn.sigmoid(gi[:, hdim:2 * hdim] + gh_row[:, hdim:2 * hdim])
        n = jnp.tanh(gi[:, 2 * hdim:3 * hdim] + r * gh_row[:, 2 * hdim:3 * hdim])
        return (1.0 - z) * n + z * h_prev_row              # [1, H]

    def end_prob(h_row):
        # nn.Linear(H, 1) + sigmoid, as a lane reduction -> [1, 1].
        pre = jnp.sum(h_row * we_ref[...], axis=1, keepdims=True) + be_ref[...]
        return jax.nn.sigmoid(pre)

    # ------------------------------ prologue --------------------------------
    x = leaky(mm(a, mm(feat_ref[...], w1_ref[...])) + b1_ref[...])   # layer1
    u0 = layer3_row(x)                                               # layer3^T
    h1 = gru_row(u0, bhh_ref[...], jnp.zeros((1, hdim), f32))        # h_prev = 0
    sig = end_prob(h1)                                               # [1, 1]

    # Loop-invariant hidden-side gates (self.state is never reassigned inside
    # the reference while-loop), hoisted out of the loop.
    gh = mm_tb(h1, whh_ref[...]) + bhh_ref[...]                      # [1, 3H]

    acc = x * jnp.broadcast_to(sig, (1, hdim))   # running sum_t sigmoid_t * x_t
    ssum = sig                                   # running sigmoid sum   [1, 1]
    sig_last = sig                               # last committed sigmoid [1, 1]
    count = jnp.zeros((1, 1), f32)               # committed loop iterations
    active = jnp.ones((1, 1), f32)               # "while" still running?

    # ------ dynamic loop: branch-free, fully unrolled, masked commits -------
    for _ in range(cap):
        # while sum(sigmoid(probm)) < 1 - 0.001  (monotone; mask is sticky)
        active = jnp.where(ssum < 1.0 - 0.001, active, jnp.zeros_like(active))

        x_new = leaky(gcn(x, w2_ref, b2_ref))           # layer2
        u = layer3_row(x_new)                           # layer3^T -> GRU input
        h_new = gru_row(u, gh, h1)                      # GRU (frozen state)
        sig = end_prob(h_new)                           # sigmoid(preprob)

        gate = jnp.broadcast_to(active, (1, hdim))
        x = x + gate * (x_new - x)
        acc = acc + jnp.broadcast_to(active * sig, (1, hdim)) * x_new
        ssum = ssum + active * sig
        sig_last = sig_last + active * (sig - sig_last)
        count = count + active

    # ------------------------------ epilogue --------------------------------
    # PyTorch fix-up: if sum(sigmoid(probm)) > 1, the last probability is
    # replaced by sigmoid(log((1 - s_prev) / s_prev)) == 1 - s_prev.
    s_prev = ssum - sig_last
    delta = jnp.where(ssum > 1.0, (1.0 - s_prev) - sig_last, 0.0)    # [1, 1]
    last = acc + jnp.broadcast_to(delta, (1, hdim)) * x

    # layer5 (no activation): [N, 3] final output.
    out = mm(a, mm(last, w5_ref[...])) + b5_ref[...]
    out_ref[...] = out.astype(out_ref.dtype)
    cnt_ref[...] = count.astype(jnp.int32)
    fprob_ref[...] = sig_last.astype(fprob_ref.dtype)


# ---------------------------------------------------------------------------
# Wrapper
# ---------------------------------------------------------------------------
def stategcn_forward(a, features, params, cap):
    n = a.shape[0]
    hdim = params['whh'].shape[1]
    f32 = jnp.float32

    kernel = functools.partial(_stategcn_kernel, cap=int(cap), hdim=int(hdim))
    out, cnt, fprob = pl.pallas_call(
        kernel,
        out_shape=(jax.ShapeDtypeStruct((n, 3), f32),      # layer5 output
                   jax.ShapeDtypeStruct((1, 1), jnp.int32),  # counter
                   jax.ShapeDtypeStruct((1, 1), f32)),       # fprob
        in_specs=[_VMEM] * 16,
        out_specs=(_VMEM, _VMEM, _VMEM),
    )(a, features,
      params['w1'], params['b1'], params['w2'], params['b2'],
      params['w3'], params['b3'], params['w5'], params['b5'],
      params['wih'], params['bih'], params['whh'], params['bhh'],
      params['we'], params['be'])
    return out, cnt[0, 0], fprob


# ---------------------------------------------------------------------------
# Parameter construction and smoke test
# ---------------------------------------------------------------------------
def make_params(key, n_nodes, c_in, hdim):
    ks = jax.random.split(key, 14)

    def init(k, shape, scale=0.1):
        return (scale * jax.random.normal(k, shape)).astype(jnp.float32)

    return {
        # CustomConv layers (GCN): W [Cin, Cout], b [1, Cout]
        'w1': init(ks[0], (c_in, hdim)),  'b1': init(ks[1], (1, hdim)),
        'w2': init(ks[2], (hdim, hdim)),  'b2': init(ks[3], (1, hdim)),
        # layer3 weight stored as a [1, H] row (transpose of the [H, 1] column)
        'w3': init(ks[4], (1, hdim)),     'b3': init(ks[5], (1, 1)),
        'w5': init(ks[6], (hdim, 3)),     'b5': init(ks[7], (1, 3)),
        # nn.GRUCell(n_nodes, hdim): weight_ih [3H, N], weight_hh [3H, H];
        # biases stored as [1, 3H] rows; gate order (r, z, n).
        'wih': init(ks[8], (3 * hdim, n_nodes)),
        'bih': init(ks[9], (1, 3 * hdim)),
        'whh': init(ks[10], (3 * hdim, hdim)),
        'bhh': init(ks[11], (1, 3 * hdim)),
        # end_determine = nn.Linear(H, 1): weight as [1, H] row, bias [1, 1]
        'we': init(ks[12], (1, hdim)),
        'be': init(ks[13], (1, 1)),
    }


if __name__ == "__main__":
    # Original module implies N = 588 graph nodes (GRUCell input size) and 4
    # input node features; scaled down here to N = 128 nodes, hidden = 64.
    N, C_IN, HDIM, CAP = 128, 4, 64, 8

    key = jax.random.PRNGKey(0)
    k_adj, k_feat, k_params = jax.random.split(key, 3)

    # dense row-normalized adjacency with self loops (the "g" argument)
    adj = (jax.random.uniform(k_adj, (N, N)) < 0.05).astype(jnp.float32)
    adj = jnp.maximum(adj, adj.T) + jnp.eye(N, dtype=jnp.float32)
    adj = adj / jnp.sum(adj, axis=1, keepdims=True)

    features = jax.random.normal(k_feat, (N, C_IN), dtype=jnp.float32)
    params = make_params(k_params, N, C_IN, HDIM)

    fwd = jax.jit(functools.partial(stategcn_forward, cap=CAP))
    out, counter, fprob = fwd(adj, features, params)
    jax.block_until_ready((out, counter, fprob))

    assert out.shape == (N, 3)
    assert fprob.shape == (1, 1)
    assert 0 <= int(counter) <= CAP
    assert bool(jnp.all(jnp.isfinite(out)))
    print("KERNEL_OK")
</pallas_src>

<mosaic_0001>
module attributes {stable_mosaic.version = 11 : i64} {
  func.func @_stategcn_kernel(%arg0: memref<128x128xf32, #tpu.memory_space<vmem>>, %arg1: memref<128x4xf32, #tpu.memory_space<vmem>>, %arg2: memref<4x64xf32, #tpu.memory_space<vmem>>, %arg3: memref<1x64xf32, #tpu.memory_space<vmem>>, %arg4: memref<64x64xf32, #tpu.memory_space<vmem>>, %arg5: memref<1x64xf32, #tpu.memory_space<vmem>>, %arg6: memref<1x64xf32, #tpu.memory_space<vmem>>, %arg7: memref<1x1xf32, #tpu.memory_space<vmem>>, %arg8: memref<64x3xf32, #tpu.memory_space<vmem>>, %arg9: memref<1x3xf32, #tpu.memory_space<vmem>>, %arg10: memref<192x128xf32, #tpu.memory_space<vmem>>, %arg11: memref<1x192xf32, #tpu.memory_space<vmem>>, %arg12: memref<192x64xf32, #tpu.memory_space<vmem>>, %arg13: memref<1x192xf32, #tpu.memory_space<vmem>>, %arg14: memref<1x64xf32, #tpu.memory_space<vmem>>, %arg15: memref<1x1xf32, #tpu.memory_space<vmem>>, %arg16: memref<128x3xf32, #tpu.memory_space<vmem>>, %arg17: memref<1x1xi32, #tpu.memory_space<vmem>>, %arg18: memref<1x1xf32, #tpu.memory_space<vmem>>) attributes {dimension_semantics = [], scalar_prefetch = 0 : i64, scratch_operands = 0 : i64, tpu.core_type = #tpu.core_type<tc>} {
    %c0 = arith.constant 0 : index
    %c0_0 = arith.constant 0 : index
    %0 = vector.load %arg0[%c0, %c0_0] : memref<128x128xf32, #tpu.memory_space<vmem>>, vector<128x128xf32>
    %c0_1 = arith.constant 0 : index
    %c0_2 = arith.constant 0 : index
    %1 = vector.load %arg1[%c0_1, %c0_2] : memref<128x4xf32, #tpu.memory_space<vmem>>, vector<128x4xf32>
    %c0_3 = arith.constant 0 : index
    %c0_4 = arith.constant 0 : index
    %2 = vector.load %arg2[%c0_3, %c0_4] : memref<4x64xf32, #tpu.memory_space<vmem>>, vector<4x64xf32>
    %cst = arith.constant dense<0.000000e+00> : vector<128x64xf32>
    %3 = tpu.matmul %1, %2, %cst {dimension_numbers = #tpu.dot_dimension_numbers<[1], [0], [0], [1], [0, 0, 1, 1], [], []>} : vector<128x4xf32>, vector<4x64xf32>, vector<128x64xf32> -> vector<128x64xf32>
    %cst_5 = arith.constant dense<0.000000e+00> : vector<128x64xf32>
    %4 = tpu.matmul %0, %3, %cst_5 {dimension_numbers = #tpu.dot_dimension_numbers<[1], [0], [0], [1], [0, 0, 1, 1], [], []>} : vector<128x128xf32>, vector<128x64xf32>, vector<128x64xf32> -> vector<128x64xf32>
    %c0_6 = arith.constant 0 : index
    %c0_7 = arith.constant 0 : index
    %5 = vector.load %arg3[%c0_6, %c0_7] : memref<1x64xf32, #tpu.memory_space<vmem>>, vector<1x64xf32>
    %6 = vector.broadcast %5 : vector<1x64xf32> to vector<128x64xf32>
    %7 = arith.addf %4, %6 : vector<128x64xf32>
    %cst_8 = arith.constant 0.000000e+00 : f32
    %8 = vector.broadcast %cst_8 : f32 to vector<128x64xf32>
    %9 = arith.cmpf oge, %7, %8 : vector<128x64xf32>
    %cst_9 = arith.constant 0.00999999977 : f32
    %10 = vector.broadcast %cst_9 : f32 to vector<128x64xf32>
    %11 = arith.mulf %10, %7 : vector<128x64xf32>
    %12 = arith.select %9, %7, %11 : vector<128x64xi1>, vector<128x64xf32>
    %c0_10 = arith.constant 0 : index
    %c0_11 = arith.constant 0 : index
    %13 = vector.load %arg6[%c0_10, %c0_11] : memref<1x64xf32, #tpu.memory_space<vmem>>, vector<1x64xf32>
    %cst_12 = arith.constant dense<0.000000e+00> : vector<1x128xf32>
    %14 = tpu.matmul %13, %12, %cst_12 {dimension_numbers = #tpu.dot_dimension_numbers<[1], [1], [0], [0], [0, 0, 1, 0], [], []>} : vector<1x64xf32>, vector<128x64xf32>, vector<1x128xf32> -> vector<1x128xf32>
    %cst_13 = arith.constant dense<0.000000e+00> : vector<1x128xf32>
    %15 = tpu.matmul %14, %0, %cst_13 {dimension_numbers = #tpu.dot_dimension_numbers<[1], [1], [0], [0], [0, 0, 1, 0], [], []>} : vector<1x128xf32>, vector<128x128xf32>, vector<1x128xf32> -> vector<1x128xf32>
    %c0_14 = arith.constant 0 : index
    %c0_15 = arith.constant 0 : index
    %16 = vector.load %arg7[%c0_14, %c0_15] : memref<1x1xf32, #tpu.memory_space<vmem>>, vector<1x1xf32>
    %17 = vector.broadcast %16 : vector<1x1xf32> to vector<1x128xf32>
    %18 = arith.addf %15, %17 : vector<1x128xf32>
    %cst_16 = arith.constant 0.000000e+00 : f32
    %19 = vector.broadcast %cst_16 : f32 to vector<1x128xf32>
    %20 = arith.cmpf oge, %18, %19 : vector<1x128xf32>
    %cst_17 = arith.constant 0.00999999977 : f32
    %21 = vector.broadcast %cst_17 : f32 to vector<1x128xf32>
    %22 = arith.mulf %21, %18 : vector<1x128xf32>
    %23 = arith.select %20, %18, %22 : vector<1x128xi1>, vector<1x128xf32>
    %c0_18 = arith.constant 0 : index
    %c0_19 = arith.constant 0 : index
    %24 = vector.load %arg13[%c0_18, %c0_19] : memref<1x192xf32, #tpu.memory_space<vmem>>, vector<1x192xf32>
    %cst_20 = arith.constant 0.000000e+00 : f32
    %25 = vector.broadcast %cst_20 : f32 to vector<1x64xf32>
    %c0_21 = arith.constant 0 : index
    %c0_22 = arith.constant 0 : index
    %26 = vector.load %arg10[%c0_21, %c0_22] : memref<192x128xf32, #tpu.memory_space<vmem>>, vector<192x128xf32>
    %cst_23 = arith.constant dense<0.000000e+00> : vector<1x192xf32>
    %27 = tpu.matmul %23, %26, %cst_23 {dimension_numbers = #tpu.dot_dimension_numbers<[1], [1], [0], [0], [0, 0, 1, 0], [], []>} : vector<1x128xf32>, vector<192x128xf32>, vector<1x192xf32> -> vector<1x192xf32>
    %c0_24 = arith.constant 0 : index
    %c0_25 = arith.constant 0 : index
    %28 = vector.load %arg11[%c0_24, %c0_25] : memref<1x192xf32, #tpu.memory_space<vmem>>, vector<1x192xf32>
    %29 = arith.addf %27, %28 : vector<1x192xf32>
    %30 = vector.extract_strided_slice %29 {offsets = [0, 0], sizes = [1, 64], strides = [1, 1]} : vector<1x192xf32> to vector<1x64xf32>
    %31 = vector.extract_strided_slice %24 {offsets = [0, 0], sizes = [1, 64], strides = [1, 1]} : vector<1x192xf32> to vector<1x64xf32>
    %32 = arith.addf %30, %31 : vector<1x64xf32>
    %33 = arith.negf %32 : vector<1x64xf32>
    %34 = math.exp %33 : vector<1x64xf32>
    %cst_26 = arith.constant 1.000000e+00 : f32
    %35 = vector.broadcast %cst_26 : f32 to vector<1x64xf32>
    %36 = arith.addf %35, %34 : vector<1x64xf32>
    %37 = arith.divf %35, %36 : vector<1x64xf32>
    %38 = vector.extract_strided_slice %29 {offsets = [0, 64], sizes = [1, 64], strides = [1, 1]} : vector<1x192xf32> to vector<1x64xf32>
    %39 = vector.extract_strided_slice %24 {offsets = [0, 64], sizes = [1, 64], strides = [1, 1]} : vector<1x192xf32> to vector<1x64xf32>
    %40 = arith.addf %38, %39 : vector<1x64xf32>
    %41 = arith.negf %40 : vector<1x64xf32>
    %42 = math.exp %41 : vector<1x64xf32>
    %cst_27 = arith.constant 1.000000e+00 : f32
    %43 = vector.broadcast %cst_27 : f32 to vector<1x64xf32>
    %44 = arith.addf %43, %42 : vector<1x64xf32>
    %45 = arith.divf %43, %44 : vector<1x64xf32>
    %46 = vector.extract_strided_slice %29 {offsets = [0, 128], sizes = [1, 64], strides = [1, 1]} : vector<1x192xf32> to vector<1x64xf32>
    %47 = vector.extract_strided_slice %24 {offsets = [0, 128], sizes = [1, 64], strides = [1, 1]} : vector<1x192xf32> to vector<1x64xf32>
    %48 = arith.mulf %37, %47 : vector<1x64xf32>
    %49 = arith.addf %46, %48 : vector<1x64xf32>
    %50 = math.tanh %49 : vector<1x64xf32>
    %cst_28 = arith.constant 1.000000e+00 : f32
    %51 = vector.broadcast %cst_28 : f32 to vector<1x64xf32>
    %52 = arith.subf %51, %45 : vector<1x64xf32>
    %53 = arith.mulf %52, %50 : vector<1x64xf32>
    %54 = arith.mulf %45, %25 : vector<1x64xf32>
    %55 = arith.addf %53, %54 : vector<1x64xf32>
    %c0_29 = arith.constant 0 : index
    %c0_30 = arith.constant 0 : index
    %56 = vector.load %arg14[%c0_29, %c0_30] : memref<1x64xf32, #tpu.memory_space<vmem>>, vector<1x64xf32>
    %57 = arith.mulf %55, %56 : vector<1x64xf32>
    %cst_31 = arith.constant dense<0.000000e+00> : vector<1xf32>
    %58 = vector.multi_reduction <add>, %57, %cst_31 [1] : vector<1x64xf32> to vector<1xf32>
    %59 = vector.shape_cast %58 : vector<1xf32> to vector<1x1xf32>
    %c0_32 = arith.constant 0 : index
    %c0_33 = arith.constant 0 : index
    %60 = vector.load %arg15[%c0_32, %c0_33] : memref<1x1xf32, #tpu.memory_space<vmem>>, vector<1x1xf32>
    %61 = arith.addf %59, %60 : vector<1x1xf32>
    %62 = arith.negf %61 : vector<1x1xf32>
    %63 = math.exp %62 : vector<1x1xf32>
    %cst_34 = arith.constant 1.000000e+00 : f32
    %64 = vector.broadcast %cst_34 : f32 to vector<1x1xf32>
    %65 = arith.addf %64, %63 : vector<1x1xf32>
    %66 = arith.divf %64, %65 : vector<1x1xf32>
    %c0_35 = arith.constant 0 : index
    %c0_36 = arith.constant 0 : index
    %67 = vector.load %arg12[%c0_35, %c0_36] : memref<192x64xf32, #tpu.memory_space<vmem>>, vector<192x64xf32>
    %cst_37 = arith.constant dense<0.000000e+00> : vector<1x192xf32>
    %68 = tpu.matmul %55, %67, %cst_37 {dimension_numbers = #tpu.dot_dimension_numbers<[1], [1], [0], [0], [0, 0, 1, 0], [], []>} : vector<1x64xf32>, vector<192x64xf32>, vector<1x192xf32> -> vector<1x192xf32>
    %c0_38 = arith.constant 0 : index
    %c0_39 = arith.constant 0 : index
    %69 = vector.load %arg13[%c0_38, %c0_39] : memref<1x192xf32, #tpu.memory_space<vmem>>, vector<1x192xf32>
    %70 = arith.addf %68, %69 : vector<1x192xf32>
    %71 = vector.shape_cast %66 : vector<1x1xf32> to vector<1x1xf32>
    %72 = vector.broadcast %71 : vector<1x1xf32> to vector<1x64xf32>
    %73 = vector.broadcast %72 : vector<1x64xf32> to vector<128x64xf32>
    %74 = arith.mulf %12, %73 : vector<128x64xf32>
    %cst_40 = arith.constant 0.000000e+00 : f32
    %75 = vector.broadcast %cst_40 : f32 to vector<1x1xf32>
    %cst_41 = arith.constant 1.000000e+00 : f32
    %76 = vector.broadcast %cst_41 : f32 to vector<1x1xf32>
    %cst_42 = arith.constant 9.990000e-01 : f32
    %77 = vector.broadcast %cst_42 : f32 to vector<1x1xf32>
    %78 = arith.cmpf olt, %66, %77 : vector<1x1xf32>
    %cst_43 = arith.constant 0.000000e+00 : f32
    %79 = vector.broadcast %cst_43 : f32 to vector<1x1xf32>
    %80 = arith.select %78, %76, %79 : vector<1x1xi1>, vector<1x1xf32>
    %c0_44 = arith.constant 0 : index
    %c0_45 = arith.constant 0 : index
    %81 = vector.load %arg4[%c0_44, %c0_45] : memref<64x64xf32, #tpu.memory_space<vmem>>, vector<64x64xf32>
    %cst_46 = arith.constant dense<0.000000e+00> : vector<128x64xf32>
    %82 = tpu.matmul %12, %81, %cst_46 {dimension_numbers = #tpu.dot_dimension_numbers<[1], [0], [0], [1], [0, 0, 1, 1], [], []>} : vector<128x64xf32>, vector<64x64xf32>, vector<128x64xf32> -> vector<128x64xf32>
    %cst_47 = arith.constant dense<0.000000e+00> : vector<128x64xf32>
    %83 = tpu.matmul %0, %82, %cst_47 {dimension_numbers = #tpu.dot_dimension_numbers<[1], [0], [0], [1], [0, 0, 1, 1], [], []>} : vector<128x128xf32>, vector<128x64xf32>, vector<128x64xf32> -> vector<128x64xf32>
    %c0_48 = arith.constant 0 : index
    %c0_49 = arith.constant 0 : index
    %84 = vector.load %arg5[%c0_48, %c0_49] : memref<1x64xf32, #tpu.memory_space<vmem>>, vector<1x64xf32>
    %85 = vector.broadcast %84 : vector<1x64xf32> to vector<128x64xf32>
    %86 = arith.addf %83, %85 : vector<128x64xf32>
    %cst_50 = arith.constant 0.000000e+00 : f32
    %87 = vector.broadcast %cst_50 : f32 to vector<128x64xf32>
    %88 = arith.cmpf oge, %86, %87 : vector<128x64xf32>
    %cst_51 = arith.constant 0.00999999977 : f32
    %89 = vector.broadcast %cst_51 : f32 to vector<128x64xf32>
    %90 = arith.mulf %89, %86 : vector<128x64xf32>
    %91 = arith.select %88, %86, %90 : vector<128x64xi1>, vector<128x64xf32>
    %c0_52 = arith.constant 0 : index
    %c0_53 = arith.constant 0 : index
    %92 = vector.load %arg6[%c0_52, %c0_53] : memref<1x64xf32, #tpu.memory_space<vmem>>, vector<1x64xf32>
    %cst_54 = arith.constant dense<0.000000e+00> : vector<1x128xf32>
    %93 = tpu.matmul %92, %91, %cst_54 {dimension_numbers = #tpu.dot_dimension_numbers<[1], [1], [0], [0], [0, 0, 1, 0], [], []>} : vector<1x64xf32>, vector<128x64xf32>, vector<1x128xf32> -> vector<1x128xf32>
    %cst_55 = arith.constant dense<0.000000e+00> : vector<1x128xf32>
    %94 = tpu.matmul %93, %0, %cst_55 {dimension_numbers = #tpu.dot_dimension_numbers<[1], [1], [0], [0], [0, 0, 1, 0], [], []>} : vector<1x128xf32>, vector<128x128xf32>, vector<1x128xf32> -> vector<1x128xf32>
    %c0_56 = arith.constant 0 : index
    %c0_57 = arith.constant 0 : index
    %95 = vector.load %arg7[%c0_56, %c0_57] : memref<1x1xf32, #tpu.memory_space<vmem>>, vector<1x1xf32>
    %96 = vector.broadcast %95 : vector<1x1xf32> to vector<1x128xf32>
    %97 = arith.addf %94, %96 : vector<1x128xf32>
    %cst_58 = arith.constant 0.000000e+00 : f32
    %98 = vector.broadcast %cst_58 : f32 to vector<1x128xf32>
    %99 = arith.cmpf oge, %97, %98 : vector<1x128xf32>
    %cst_59 = arith.constant 0.00999999977 : f32
    %100 = vector.broadcast %cst_59 : f32 to vector<1x128xf32>
    %101 = arith.mulf %100, %97 : vector<1x128xf32>
    %102 = arith.select %99, %97, %101 : vector<1x128xi1>, vector<1x128xf32>
    %c0_60 = arith.constant 0 : index
    %c0_61 = arith.constant 0 : index
    %103 = vector.load %arg10[%c0_60, %c0_61] : memref<192x128xf32, #tpu.memory_space<vmem>>, vector<192x128xf32>
    %cst_62 = arith.constant dense<0.000000e+00> : vector<1x192xf32>
    %104 = tpu.matmul %102, %103, %cst_62 {dimension_numbers = #tpu.dot_dimension_numbers<[1], [1], [0], [0], [0, 0, 1, 0], [], []>} : vector<1x128xf32>, vector<192x128xf32>, vector<1x192xf32> -> vector<1x192xf32>
    %c0_63 = arith.constant 0 : index
    %c0_64 = arith.constant 0 : index
    %105 = vector.load %arg11[%c0_63, %c0_64] : memref<1x192xf32, #tpu.memory_space<vmem>>, vector<1x192xf32>
    %106 = arith.addf %104, %105 : vector<1x192xf32>
    %107 = vector.extract_strided_slice %106 {offsets = [0, 0], sizes = [1, 64], strides = [1, 1]} : vector<1x192xf32> to vector<1x64xf32>
    %108 = vector.extract_strided_slice %70 {offsets = [0, 0], sizes = [1, 64], strides = [1, 1]} : vector<1x192xf32> to vector<1x64xf32>
    %109 = arith.addf %107, %108 : vector<1x64xf32>
    %110 = arith.negf %109 : vector<1x64xf32>
    %111 = math.exp %110 : vector<1x64xf32>
    %cst_65 = arith.constant 1.000000e+00 : f32
    %112 = vector.broadcast %cst_65 : f32 to vector<1x64xf32>
    %113 = arith.addf %112, %111 : vector<1x64xf32>
    %114 = arith.divf %112, %113 : vector<1x64xf32>
    %115 = vector.extract_strided_slice %106 {offsets = [0, 64], sizes = [1, 64], strides = [1, 1]} : vector<1x192xf32> to vector<1x64xf32>
    %116 = vector.extract_strided_slice %70 {offsets = [0, 64], sizes = [1, 64], strides = [1, 1]} : vector<1x192xf32> to vector<1x64xf32>
    %117 = arith.addf %115, %116 : vector<1x64xf32>
    %118 = arith.negf %117 : vector<1x64xf32>
    %119 = math.exp %118 : vector<1x64xf32>
    %cst_66 = arith.constant 1.000000e+00 : f32
    %120 = vector.broadcast %cst_66 : f32 to vector<1x64xf32>
    %121 = arith.addf %120, %119 : vector<1x64xf32>
    %122 = arith.divf %120, %121 : vector<1x64xf32>
    %123 = vector.extract_strided_slice %106 {offsets = [0, 128], sizes = [1, 64], strides = [1, 1]} : vector<1x192xf32> to vector<1x64xf32>
    %124 = vector.extract_strided_slice %70 {offsets = [0, 128], sizes = [1, 64], strides = [1, 1]} : vector<1x192xf32> to vector<1x64xf32>
    %125 = arith.mulf %114, %124 : vector<1x64xf32>
    %126 = arith.addf %123, %125 : vector<1x64xf32>
    %127 = math.tanh %126 : vector<1x64xf32>
    %cst_67 = arith.constant 1.000000e+00 : f32
    %128 = vector.broadcast %cst_67 : f32 to vector<1x64xf32>
    %129 = arith.subf %128, %122 : vector<1x64xf32>
    %130 = arith.mulf %129, %127 : vector<1x64xf32>
    %131 = arith.mulf %122, %55 : vector<1x64xf32>
    %132 = arith.addf %130, %131 : vector<1x64xf32>
    %c0_68 = arith.constant 0 : index
    %c0_69 = arith.constant 0 : index
    %133 = vector.load %arg14[%c0_68, %c0_69] : memref<1x64xf32, #tpu.memory_space<vmem>>, vector<1x64xf32>
    %134 = arith.mulf %132, %133 : vector<1x64xf32>
    %cst_70 = arith.constant dense<0.000000e+00> : vector<1xf32>
    %135 = vector.multi_reduction <add>, %134, %cst_70 [1] : vector<1x64xf32> to vector<1xf32>
    %136 = vector.shape_cast %135 : vector<1xf32> to vector<1x1xf32>
    %c0_71 = arith.constant 0 : index
    %c0_72 = arith.constant 0 : index
    %137 = vector.load %arg15[%c0_71, %c0_72] : memref<1x1xf32, #tpu.memory_space<vmem>>, vector<1x1xf32>
    %138 = arith.addf %136, %137 : vector<1x1xf32>
    %139 = arith.negf %138 : vector<1x1xf32>
    %140 = math.exp %139 : vector<1x1xf32>
    %cst_73 = arith.constant 1.000000e+00 : f32
    %141 = vector.broadcast %cst_73 : f32 to vector<1x1xf32>
    %142 = arith.addf %141, %140 : vector<1x1xf32>
    %143 = arith.divf %141, %142 : vector<1x1xf32>
    %144 = vector.shape_cast %80 : vector<1x1xf32> to vector<1x1xf32>
    %145 = vector.broadcast %144 : vector<1x1xf32> to vector<1x64xf32>
    %146 = arith.subf %91, %12 : vector<128x64xf32>
    %147 = vector.broadcast %145 : vector<1x64xf32> to vector<128x64xf32>
    %148 = arith.mulf %147, %146 : vector<128x64xf32>
    %149 = arith.addf %12, %148 : vector<128x64xf32>
    %150 = arith.mulf %80, %143 : vector<1x1xf32>
    %151 = vector.shape_cast %150 : vector<1x1xf32> to vector<1x1xf32>
    %152 = vector.broadcast %151 : vector<1x1xf32> to vector<1x64xf32>
    %153 = vector.broadcast %152 : vector<1x64xf32> to vector<128x64xf32>
    %154 = arith.mulf %153, %91 : vector<128x64xf32>
    %155 = arith.addf %74, %154 : vector<128x64xf32>
    %156 = arith.mulf %80, %143 : vector<1x1xf32>
    %157 = arith.addf %66, %156 : vector<1x1xf32>
    %158 = arith.subf %143, %66 : vector<1x1xf32>
    %159 = arith.mulf %80, %158 : vector<1x1xf32>
    %160 = arith.addf %66, %159 : vector<1x1xf32>
    %161 = arith.addf %75, %80 : vector<1x1xf32>
    %cst_74 = arith.constant 9.990000e-01 : f32
    %162 = vector.broadcast %cst_74 : f32 to vector<1x1xf32>
    %163 = arith.cmpf olt, %157, %162 : vector<1x1xf32>
    %cst_75 = arith.constant 0.000000e+00 : f32
    %164 = vector.broadcast %cst_75 : f32 to vector<1x1xf32>
    %165 = arith.select %163, %80, %164 : vector<1x1xi1>, vector<1x1xf32>
    %c0_76 = arith.constant 0 : index
    %c0_77 = arith.constant 0 : index
    %166 = vector.load %arg4[%c0_76, %c0_77] : memref<64x64xf32, #tpu.memory_space<vmem>>, vector<64x64xf32>
    %cst_78 = arith.constant dense<0.000000e+00> : vector<128x64xf32>
    %167 = tpu.matmul %149, %166, %cst_78 {dimension_numbers = #tpu.dot_dimension_numbers<[1], [0], [0], [1], [0, 0, 1, 1], [], []>} : vector<128x64xf32>, vector<64x64xf32>, vector<128x64xf32> -> vector<128x64xf32>
    %cst_79 = arith.constant dense<0.000000e+00> : vector<128x64xf32>
    %168 = tpu.matmul %0, %167, %cst_79 {dimension_numbers = #tpu.dot_dimension_numbers<[1], [0], [0], [1], [0, 0, 1, 1], [], []>} : vector<128x128xf32>, vector<128x64xf32>, vector<128x64xf32> -> vector<128x64xf32>
    %c0_80 = arith.constant 0 : index
    %c0_81 = arith.constant 0 : index
    %169 = vector.load %arg5[%c0_80, %c0_81] : memref<1x64xf32, #tpu.memory_space<vmem>>, vector<1x64xf32>
    %170 = vector.broadcast %169 : vector<1x64xf32> to vector<128x64xf32>
    %171 = arith.addf %168, %170 : vector<128x64xf32>
    %cst_82 = arith.constant 0.000000e+00 : f32
    %172 = vector.broadcast %cst_82 : f32 to vector<128x64xf32>
    %173 = arith.cmpf oge, %171, %172 : vector<128x64xf32>
    %cst_83 = arith.constant 0.00999999977 : f32
    %174 = vector.broadcast %cst_83 : f32 to vector<128x64xf32>
    %175 = arith.mulf %174, %171 : vector<128x64xf32>
    %176 = arith.select %173, %171, %175 : vector<128x64xi1>, vector<128x64xf32>
    %c0_84 = arith.constant 0 : index
    %c0_85 = arith.constant 0 : index
    %177 = vector.load %arg6[%c0_84, %c0_85] : memref<1x64xf32, #tpu.memory_space<vmem>>, vector<1x64xf32>
    %cst_86 = arith.constant dense<0.000000e+00> : vector<1x128xf32>
    %178 = tpu.matmul %177, %176, %cst_86 {dimension_numbers = #tpu.dot_dimension_numbers<[1], [1], [0], [0], [0, 0, 1, 0], [], []>} : vector<1x64xf32>, vector<128x64xf32>, vector<1x128xf32> -> vector<1x128xf32>
    %cst_87 = arith.constant dense<0.000000e+00> : vector<1x128xf32>
    %179 = tpu.matmul %178, %0, %cst_87 {dimension_numbers = #tpu.dot_dimension_numbers<[1], [1], [0], [0], [0, 0, 1, 0], [], []>} : vector<1x128xf32>, vector<128x128xf32>, vector<1x128xf32> -> vector<1x128xf32>
    %c0_88 = arith.constant 0 : index
    %c0_89 = arith.constant 0 : index
    %180 = vector.load %arg7[%c0_88, %c0_89] : memref<1x1xf32, #tpu.memory_space<vmem>>, vector<1x1xf32>
    %181 = vector.broadcast %180 : vector<1x1xf32> to vector<1x128xf32>
    %182 = arith.addf %179, %181 : vector<1x128xf32>
    %cst_90 = arith.constant 0.000000e+00 : f32
    %183 = vector.broadcast %cst_90 : f32 to vector<1x128xf32>
    %184 = arith.cmpf oge, %182, %183 : vector<1x128xf32>
    %cst_91 = arith.constant 0.00999999977 : f32
    %185 = vector.broadcast %cst_91 : f32 to vector<1x128xf32>
    %186 = arith.mulf %185, %182 : vector<1x128xf32>
    %187 = arith.select %184, %182, %186 : vector<1x128xi1>, vector<1x128xf32>
    %c0_92 = arith.constant 0 : index
    %c0_93 = arith.constant 0 : index
    %188 = vector.load %arg10[%c0_92, %c0_93] : memref<192x128xf32, #tpu.memory_space<vmem>>, vector<192x128xf32>
    %cst_94 = arith.constant dense<0.000000e+00> : vector<1x192xf32>
    %189 = tpu.matmul %187, %188, %cst_94 {dimension_numbers = #tpu.dot_dimension_numbers<[1], [1], [0], [0], [0, 0, 1, 0], [], []>} : vector<1x128xf32>, vector<192x128xf32>, vector<1x192xf32> -> vector<1x192xf32>
    %c0_95 = arith.constant 0 : index
    %c0_96 = arith.constant 0 : index
    %190 = vector.load %arg11[%c0_95, %c0_96] : memref<1x192xf32, #tpu.memory_space<vmem>>, vector<1x192xf32>
    %191 = arith.addf %189, %190 : vector<1x192xf32>
    %192 = vector.extract_strided_slice %191 {offsets = [0, 0], sizes = [1, 64], strides = [1, 1]} : vector<1x192xf32> to vector<1x64xf32>
    %193 = vector.extract_strided_slice %70 {offsets = [0, 0], sizes = [1, 64], strides = [1, 1]} : vector<1x192xf32> to vector<1x64xf32>
    %194 = arith.addf %192, %193 : vector<1x64xf32>
    %195 = arith.negf %194 : vector<1x64xf32>
    %196 = math.exp %195 : vector<1x64xf32>
    %cst_97 = arith.constant 1.000000e+00 : f32
    %197 = vector.broadcast %cst_97 : f32 to vector<1x64xf32>
    %198 = arith.addf %197, %196 : vector<1x64xf32>
    %199 = arith.divf %197, %198 : vector<1x64xf32>
    %200 = vector.extract_strided_slice %191 {offsets = [0, 64], sizes = [1, 64], strides = [1, 1]} : vector<1x192xf32> to vector<1x64xf32>
    %201 = vector.extract_strided_slice %70 {offsets = [0, 64], sizes = [1, 64], strides = [1, 1]} : vector<1x192xf32> to vector<1x64xf32>
    %202 = arith.addf %200, %201 : vector<1x64xf32>
    %203 = arith.negf %202 : vector<1x64xf32>
    %204 = math.exp %203 : vector<1x64xf32>
    %cst_98 = arith.constant 1.000000e+00 : f32
    %205 = vector.broadcast %cst_98 : f32 to vector<1x64xf32>
    %206 = arith.addf %205, %204 : vector<1x64xf32>
    %207 = arith.divf %205, %206 : vector<1x64xf32>
    %208 = vector.extract_strided_slice %191 {offsets = [0, 128], sizes = [1, 64], strides = [1, 1]} : vector<1x192xf32> to vector<1x64xf32>
    %209 = vector.extract_strided_slice %70 {offsets = [0, 128], sizes = [1, 64], strides = [1, 1]} : vector<1x192xf32> to vector<1x64xf32>
    %210 = arith.mulf %199, %209 : vector<1x64xf32>
    %211 = arith.addf %208, %210 : vector<1x64xf32>
    %212 = math.tanh %211 : vector<1x64xf32>
    %cst_99 = arith.constant 1.000000e+00 : f32
    %213 = vector.broadcast %cst_99 : f32 to vector<1x64xf32>
    %214 = arith.subf %213, %207 : vector<1x64xf32>
    %215 = arith.mulf %214, %212 : vector<1x64xf32>
    %216 = arith.mulf %207, %55 : vector<1x64xf32>
    %217 = arith.addf %215, %216 : vector<1x64xf32>
    %c0_100 = arith.constant 0 : index
    %c0_101 = arith.constant 0 : index
    %218 = vector.load %arg14[%c0_100, %c0_101] : memref<1x64xf32, #tpu.memory_space<vmem>>, vector<1x64xf32>
    %219 = arith.mulf %217, %218 : vector<1x64xf32>
    %cst_102 = arith.constant dense<0.000000e+00> : vector<1xf32>
    %220 = vector.multi_reduction <add>, %219, %cst_102 [1] : vector<1x64xf32> to vector<1xf32>
    %221 = vector.shape_cast %220 : vector<1xf32> to vector<1x1xf32>
    %c0_103 = arith.constant 0 : index
    %c0_104 = arith.constant 0 : index
    %222 = vector.load %arg15[%c0_103, %c0_104] : memref<1x1xf32, #tpu.memory_space<vmem>>, vector<1x1xf32>
    %223 = arith.addf %221, %222 : vector<1x1xf32>
    %224 = arith.negf %223 : vector<1x1xf32>
    %225 = math.exp %224 : vector<1x1xf32>
    %cst_105 = arith.constant 1.000000e+00 : f32
    %226 = vector.broadcast %cst_105 : f32 to vector<1x1xf32>
    %227 = arith.addf %226, %225 : vector<1x1xf32>
    %228 = arith.divf %226, %227 : vector<1x1xf32>
    %229 = vector.shape_cast %165 : vector<1x1xf32> to vector<1x1xf32>
    %230 = vector.broadcast %229 : vector<1x1xf32> to vector<1x64xf32>
    %231 = arith.subf %176, %149 : vector<128x64xf32>
    %232 = vector.broadcast %230 : vector<1x64xf32> to vector<128x64xf32>
    %233 = arith.mulf %232, %231 : vector<128x64xf32>
    %234 = arith.addf %149, %233 : vector<128x64xf32>
    %235 = arith.mulf %165, %228 : vector<1x1xf32>
    %236 = vector.shape_cast %235 : vector<1x1xf32> to vector<1x1xf32>
    %237 = vector.broadcast %236 : vector<1x1xf32> to vector<1x64xf32>
    %238 = vector.broadcast %237 : vector<1x64xf32> to vector<128x64xf32>
    %239 = arith.mulf %238, %176 : vector<128x64xf32>
    %240 = arith.addf %155, %239 : vector<128x64xf32>
    %241 = arith.mulf %165, %228 : vector<1x1xf32>
    %242 = arith.addf %157, %241 : vector<1x1xf32>
    %243 = arith.subf %228, %160 : vector<1x1xf32>
    %244 = arith.mulf %165, %243 : vector<1x1xf32>
    %245 = arith.addf %160, %244 : vector<1x1xf32>
    %246 = arith.addf %161, %165 : vector<1x1xf32>
    %cst_106 = arith.constant 9.990000e-01 : f32
    %247 = vector.broadcast %cst_106 : f32 to vector<1x1xf32>
    %248 = arith.cmpf olt, %242, %247 : vector<1x1xf32>
    %cst_107 = arith.constant 0.000000e+00 : f32
    %249 = vector.broadcast %cst_107 : f32 to vector<1x1xf32>
    %250 = arith.select %248, %165, %249 : vector<1x1xi1>, vector<1x1xf32>
    %c0_108 = arith.constant 0 : index
    %c0_109 = arith.constant 0 : index
    %251 = vector.load %arg4[%c0_108, %c0_109] : memref<64x64xf32, #tpu.memory_space<vmem>>, vector<64x64xf32>
    %cst_110 = arith.constant dense<0.000000e+00> : vector<128x64xf32>
    %252 = tpu.matmul %234, %251, %cst_110 {dimension_numbers = #tpu.dot_dimension_numbers<[1], [0], [0], [1], [0, 0, 1, 1], [], []>} : vector<128x64xf32>, vector<64x64xf32>, vector<128x64xf32> -> vector<128x64xf32>
    %cst_111 = arith.constant dense<0.000000e+00> : vector<128x64xf32>
    %253 = tpu.matmul %0, %252, %cst_111 {dimension_numbers = #tpu.dot_dimension_numbers<[1], [0], [0], [1], [0, 0, 1, 1], [], []>} : vector<128x128xf32>, vector<128x64xf32>, vector<128x64xf32> -> vector<128x64xf32>
    %c0_112 = arith.constant 0 : index
    %c0_113 = arith.constant 0 : index
    %254 = vector.load %arg5[%c0_112, %c0_113] : memref<1x64xf32, #tpu.memory_space<vmem>>, vector<1x64xf32>
    %255 = vector.broadcast %254 : vector<1x64xf32> to vector<128x64xf32>
    %256 = arith.addf %253, %255 : vector<128x64xf32>
    %cst_114 = arith.constant 0.000000e+00 : f32
    %257 = vector.broadcast %cst_114 : f32 to vector<128x64xf32>
    %258 = arith.cmpf oge, %256, %257 : vector<128x64xf32>
    %cst_115 = arith.constant 0.00999999977 : f32
    %259 = vector.broadcast %cst_115 : f32 to vector<128x64xf32>
    %260 = arith.mulf %259, %256 : vector<128x64xf32>
    %261 = arith.select %258, %256, %260 : vector<128x64xi1>, vector<128x64xf32>
    %c0_116 = arith.constant 0 : index
    %c0_117 = arith.constant 0 : index
    %262 = vector.load %arg6[%c0_116, %c0_117] : memref<1x64xf32, #tpu.memory_space<vmem>>, vector<1x64xf32>
    %cst_118 = arith.constant dense<0.000000e+00> : vector<1x128xf32>
    %263 = tpu.matmul %262, %261, %cst_118 {dimension_numbers = #tpu.dot_dimension_numbers<[1], [1], [0], [0], [0, 0, 1, 0], [], []>} : vector<1x64xf32>, vector<128x64xf32>, vector<1x128xf32> -> vector<1x128xf32>
    %cst_119 = arith.constant dense<0.000000e+00> : vector<1x128xf32>
    %264 = tpu.matmul %263, %0, %cst_119 {dimension_numbers = #tpu.dot_dimension_numbers<[1], [1], [0], [0], [0, 0, 1, 0], [], []>} : vector<1x128xf32>, vector<128x128xf32>, vector<1x128xf32> -> vector<1x128xf32>
    %c0_120 = arith.constant 0 : index
    %c0_121 = arith.constant 0 : index
    %265 = vector.load %arg7[%c0_120, %c0_121] : memref<1x1xf32, #tpu.memory_space<vmem>>, vector<1x1xf32>
    %266 = vector.broadcast %265 : vector<1x1xf32> to vector<1x128xf32>
    %267 = arith.addf %264, %266 : vector<1x128xf32>
    %cst_122 = arith.constant 0.000000e+00 : f32
    %268 = vector.broadcast %cst_122 : f32 to vector<1x128xf32>
    %269 = arith.cmpf oge, %267, %268 : vector<1x128xf32>
    %cst_123 = arith.constant 0.00999999977 : f32
    %270 = vector.broadcast %cst_123 : f32 to vector<1x128xf32>
    %271 = arith.mulf %270, %267 : vector<1x128xf32>
    %272 = arith.select %269, %267, %271 : vector<1x128xi1>, vector<1x128xf32>
    %c0_124 = arith.constant 0 : index
    %c0_125 = arith.constant 0 : index
    %273 = vector.load %arg10[%c0_124, %c0_125] : memref<192x128xf32, #tpu.memory_space<vmem>>, vector<192x128xf32>
    %cst_126 = arith.constant dense<0.000000e+00> : vector<1x192xf32>
    %274 = tpu.matmul %272, %273, %cst_126 {dimension_numbers = #tpu.dot_dimension_numbers<[1], [1], [0], [0], [0, 0, 1, 0], [], []>} : vector<1x128xf32>, vector<192x128xf32>, vector<1x192xf32> -> vector<1x192xf32>
    %c0_127 = arith.constant 0 : index
    %c0_128 = arith.constant 0 : index
    %275 = vector.load %arg11[%c0_127, %c0_128] : memref<1x192xf32, #tpu.memory_space<vmem>>, vector<1x192xf32>
    %276 = arith.addf %274, %275 : vector<1x192xf32>
    %277 = vector.extract_strided_slice %276 {offsets = [0, 0], sizes = [1, 64], strides = [1, 1]} : vector<1x192xf32> to vector<1x64xf32>
    %278 = vector.extract_strided_slice %70 {offsets = [0, 0], sizes = [1, 64], strides = [1, 1]} : vector<1x192xf32> to vector<1x64xf32>
    %279 = arith.addf %277, %278 : vector<1x64xf32>
    %280 = arith.negf %279 : vector<1x64xf32>
    %281 = math.exp %280 : vector<1x64xf32>
    %cst_129 = arith.constant 1.000000e+00 : f32
    %282 = vector.broadcast %cst_129 : f32 to vector<1x64xf32>
    %283 = arith.addf %282, %281 : vector<1x64xf32>
    %284 = arith.divf %282, %283 : vector<1x64xf32>
    %285 = vector.extract_strided_slice %276 {offsets = [0, 64], sizes = [1, 64], strides = [1, 1]} : vector<1x192xf32> to vector<1x64xf32>
    %286 = vector.extract_strided_slice %70 {offsets = [0, 64], sizes = [1, 64], strides = [1, 1]} : vector<1x192xf32> to vector<1x64xf32>
    %287 = arith.addf %285, %286 : vector<1x64xf32>
    %288 = arith.negf %287 : vector<1x64xf32>
    %289 = math.exp %288 : vector<1x64xf32>
    %cst_130 = arith.constant 1.000000e+00 : f32
    %290 = vector.broadcast %cst_130 : f32 to vector<1x64xf32>
    %291 = arith.addf %290, %289 : vector<1x64xf32>
    %292 = arith.divf %290, %291 : vector<1x64xf32>
    %293 = vector.extract_strided_slice %276 {offsets = [0, 128], sizes = [1, 64], strides = [1, 1]} : vector<1x192xf32> to vector<1x64xf32>
    %294 = vector.extract_strided_slice %70 {offsets = [0, 128], sizes = [1, 64], strides = [1, 1]} : vector<1x192xf32> to vector<1x64xf32>
    %295 = arith.mulf %284, %294 : vector<1x64xf32>
    %296 = arith.addf %293, %295 : vector<1x64xf32>
    %297 = math.tanh %296 : vector<1x64xf32>
    %cst_131 = arith.constant 1.000000e+00 : f32
    %298 = vector.broadcast %cst_131 : f32 to vector<1x64xf32>
    %299 = arith.subf %298, %292 : vector<1x64xf32>
    %300 = arith.mulf %299, %297 : vector<1x64xf32>
    %301 = arith.mulf %292, %55 : vector<1x64xf32>
    %302 = arith.addf %300, %301 : vector<1x64xf32>
    %c0_132 = arith.constant 0 : index
    %c0_133 = arith.constant 0 : index
    %303 = vector.load %arg14[%c0_132, %c0_133] : memref<1x64xf32, #tpu.memory_space<vmem>>, vector<1x64xf32>
    %304 = arith.mulf %302, %303 : vector<1x64xf32>
    %cst_134 = arith.constant dense<0.000000e+00> : vector<1xf32>
    %305 = vector.multi_reduction <add>, %304, %cst_134 [1] : vector<1x64xf32> to vector<1xf32>
    %306 = vector.shape_cast %305 : vector<1xf32> to vector<1x1xf32>
    %c0_135 = arith.constant 0 : index
    %c0_136 = arith.constant 0 : index
    %307 = vector.load %arg15[%c0_135, %c0_136] : memref<1x1xf32, #tpu.memory_space<vmem>>, vector<1x1xf32>
    %308 = arith.addf %306, %307 : vector<1x1xf32>
    %309 = arith.negf %308 : vector<1x1xf32>
    %310 = math.exp %309 : vector<1x1xf32>
    %cst_137 = arith.constant 1.000000e+00 : f32
    %311 = vector.broadcast %cst_137 : f32 to vector<1x1xf32>
    %312 = arith.addf %311, %310 : vector<1x1xf32>
    %313 = arith.divf %311, %312 : vector<1x1xf32>
    %314 = vector.shape_cast %250 : vector<1x1xf32> to vector<1x1xf32>
    %315 = vector.broadcast %314 : vector<1x1xf32> to vector<1x64xf32>
    %316 = arith.subf %261, %234 : vector<128x64xf32>
    %317 = vector.broadcast %315 : vector<1x64xf32> to vector<128x64xf32>
    %318 = arith.mulf %317, %316 : vector<128x64xf32>
    %319 = arith.addf %234, %318 : vector<128x64xf32>
    %320 = arith.mulf %250, %313 : vector<1x1xf32>
    %321 = vector.shape_cast %320 : vector<1x1xf32> to vector<1x1xf32>
    %322 = vector.broadcast %321 : vector<1x1xf32> to vector<1x64xf32>
    %323 = vector.broadcast %322 : vector<1x64xf32> to vector<128x64xf32>
    %324 = arith.mulf %323, %261 : vector<128x64xf32>
    %325 = arith.addf %240, %324 : vector<128x64xf32>
    %326 = arith.mulf %250, %313 : vector<1x1xf32>
    %327 = arith.addf %242, %326 : vector<1x1xf32>
    %328 = arith.subf %313, %245 : vector<1x1xf32>
    %329 = arith.mulf %250, %328 : vector<1x1xf32>
    %330 = arith.addf %245, %329 : vector<1x1xf32>
    %331 = arith.addf %246, %250 : vector<1x1xf32>
    %cst_138 = arith.constant 9.990000e-01 : f32
    %332 = vector.broadcast %cst_138 : f32 to vector<1x1xf32>
    %333 = arith.cmpf olt, %327, %332 : vector<1x1xf32>
    %cst_139 = arith.constant 0.000000e+00 : f32
    %334 = vector.broadcast %cst_139 : f32 to vector<1x1xf32>
    %335 = arith.select %333, %250, %334 : vector<1x1xi1>, vector<1x1xf32>
    %c0_140 = arith.constant 0 : index
    %c0_141 = arith.constant 0 : index
    %336 = vector.load %arg4[%c0_140, %c0_141] : memref<64x64xf32, #tpu.memory_space<vmem>>, vector<64x64xf32>
    %cst_142 = arith.constant dense<0.000000e+00> : vector<128x64xf32>
    %337 = tpu.matmul %319, %336, %cst_142 {dimension_numbers = #tpu.dot_dimension_numbers<[1], [0], [0], [1], [0, 0, 1, 1], [], []>} : vector<128x64xf32>, vector<64x64xf32>, vector<128x64xf32> -> vector<128x64xf32>
    %cst_143 = arith.constant dense<0.000000e+00> : vector<128x64xf32>
    %338 = tpu.matmul %0, %337, %cst_143 {dimension_numbers = #tpu.dot_dimension_numbers<[1], [0], [0], [1], [0, 0, 1, 1], [], []>} : vector<128x128xf32>, vector<128x64xf32>, vector<128x64xf32> -> vector<128x64xf32>
    %c0_144 = arith.constant 0 : index
    %c0_145 = arith.constant 0 : index
    %339 = vector.load %arg5[%c0_144, %c0_145] : memref<1x64xf32, #tpu.memory_space<vmem>>, vector<1x64xf32>
    %340 = vector.broadcast %339 : vector<1x64xf32> to vector<128x64xf32>
    %341 = arith.addf %338, %340 : vector<128x64xf32>
    %cst_146 = arith.constant 0.000000e+00 : f32
    %342 = vector.broadcast %cst_146 : f32 to vector<128x64xf32>
    %343 = arith.cmpf oge, %341, %342 : vector<128x64xf32>
    %cst_147 = arith.constant 0.00999999977 : f32
    %344 = vector.broadcast %cst_147 : f32 to vector<128x64xf32>
    %345 = arith.mulf %344, %341 : vector<128x64xf32>
    %346 = arith.select %343, %341, %345 : vector<128x64xi1>, vector<128x64xf32>
    %c0_148 = arith.constant 0 : index
    %c0_149 = arith.constant 0 : index
    %347 = vector.load %arg6[%c0_148, %c0_149] : memref<1x64xf32, #tpu.memory_space<vmem>>, vector<1x64xf32>
    %cst_150 = arith.constant dense<0.000000e+00> : vector<1x128xf32>
    %348 = tpu.matmul %347, %346, %cst_150 {dimension_numbers = #tpu.dot_dimension_numbers<[1], [1], [0], [0], [0, 0, 1, 0], [], []>} : vector<1x64xf32>, vector<128x64xf32>, vector<1x128xf32> -> vector<1x128xf32>
    %cst_151 = arith.constant dense<0.000000e+00> : vector<1x128xf32>
    %349 = tpu.matmul %348, %0, %cst_151 {dimension_numbers = #tpu.dot_dimension_numbers<[1], [1], [0], [0], [0, 0, 1, 0], [], []>} : vector<1x128xf32>, vector<128x128xf32>, vector<1x128xf32> -> vector<1x128xf32>
    %c0_152 = arith.constant 0 : index
    %c0_153 = arith.constant 0 : index
    %350 = vector.load %arg7[%c0_152, %c0_153] : memref<1x1xf32, #tpu.memory_space<vmem>>, vector<1x1xf32>
    %351 = vector.broadcast %350 : vector<1x1xf32> to vector<1x128xf32>
    %352 = arith.addf %349, %351 : vector<1x128xf32>
    %cst_154 = arith.constant 0.000000e+00 : f32
    %353 = vector.broadcast %cst_154 : f32 to vector<1x128xf32>
    %354 = arith.cmpf oge, %352, %353 : vector<1x128xf32>
    %cst_155 = arith.constant 0.00999999977 : f32
    %355 = vector.broadcast %cst_155 : f32 to vector<1x128xf32>
    %356 = arith.mulf %355, %352 : vector<1x128xf32>
    %357 = arith.select %354, %352, %356 : vector<1x128xi1>, vector<1x128xf32>
    %c0_156 = arith.constant 0 : index
    %c0_157 = arith.constant 0 : index
    %358 = vector.load %arg10[%c0_156, %c0_157] : memref<192x128xf32, #tpu.memory_space<vmem>>, vector<192x128xf32>
    %cst_158 = arith.constant dense<0.000000e+00> : vector<1x192xf32>
    %359 = tpu.matmul %357, %358, %cst_158 {dimension_numbers = #tpu.dot_dimension_numbers<[1], [1], [0], [0], [0, 0, 1, 0], [], []>} : vector<1x128xf32>, vector<192x128xf32>, vector<1x192xf32> -> vector<1x192xf32>
    %c0_159 = arith.constant 0 : index
    %c0_160 = arith.constant 0 : index
    %360 = vector.load %arg11[%c0_159, %c0_160] : memref<1x192xf32, #tpu.memory_space<vmem>>, vector<1x192xf32>
    %361 = arith.addf %359, %360 : vector<1x192xf32>
    %362 = vector.extract_strided_slice %361 {offsets = [0, 0], sizes = [1, 64], strides = [1, 1]} : vector<1x192xf32> to vector<1x64xf32>
    %363 = vector.extract_strided_slice %70 {offsets = [0, 0], sizes = [1, 64], strides = [1, 1]} : vector<1x192xf32> to vector<1x64xf32>
    %364 = arith.addf %362, %363 : vector<1x64xf32>
    %365 = arith.negf %364 : vector<1x64xf32>
    %366 = math.exp %365 : vector<1x64xf32>
    %cst_161 = arith.constant 1.000000e+00 : f32
    %367 = vector.broadcast %cst_161 : f32 to vector<1x64xf32>
    %368 = arith.addf %367, %366 : vector<1x64xf32>
    %369 = arith.divf %367, %368 : vector<1x64xf32>
    %370 = vector.extract_strided_slice %361 {offsets = [0, 64], sizes = [1, 64], strides = [1, 1]} : vector<1x192xf32> to vector<1x64xf32>
    %371 = vector.extract_strided_slice %70 {offsets = [0, 64], sizes = [1, 64], strides = [1, 1]} : vector<1x192xf32> to vector<1x64xf32>
    %372 = arith.addf %370, %371 : vector<1x64xf32>
    %373 = arith.negf %372 : vector<1x64xf32>
    %374 = math.exp %373 : vector<1x64xf32>
    %cst_162 = arith.constant 1.000000e+00 : f32
    %375 = vector.broadcast %cst_162 : f32 to vector<1x64xf32>
    %376 = arith.addf %375, %374 : vector<1x64xf32>
    %377 = arith.divf %375, %376 : vector<1x64xf32>
    %378 = vector.extract_strided_slice %361 {offsets = [0, 128], sizes = [1, 64], strides = [1, 1]} : vector<1x192xf32> to vector<1x64xf32>
    %379 = vector.extract_strided_slice %70 {offsets = [0, 128], sizes = [1, 64], strides = [1, 1]} : vector<1x192xf32> to vector<1x64xf32>
    %380 = arith.mulf %369, %379 : vector<1x64xf32>
    %381 = arith.addf %378, %380 : vector<1x64xf32>
    %382 = math.tanh %381 : vector<1x64xf32>
    %cst_163 = arith.constant 1.000000e+00 : f32
    %383 = vector.broadcast %cst_163 : f32 to vector<1x64xf32>
    %384 = arith.subf %383, %377 : vector<1x64xf32>
    %385 = arith.mulf %384, %382 : vector<1x64xf32>
    %386 = arith.mulf %377, %55 : vector<1x64xf32>
    %387 = arith.addf %385, %386 : vector<1x64xf32>
    %c0_164 = arith.constant 0 : index
    %c0_165 = arith.constant 0 : index
    %388 = vector.load %arg14[%c0_164, %c0_165] : memref<1x64xf32, #tpu.memory_space<vmem>>, vector<1x64xf32>
    %389 = arith.mulf %387, %388 : vector<1x64xf32>
    %cst_166 = arith.constant dense<0.000000e+00> : vector<1xf32>
    %390 = vector.multi_reduction <add>, %389, %cst_166 [1] : vector<1x64xf32> to vector<1xf32>
    %391 = vector.shape_cast %390 : vector<1xf32> to vector<1x1xf32>
    %c0_167 = arith.constant 0 : index
    %c0_168 = arith.constant 0 : index
    %392 = vector.load %arg15[%c0_167, %c0_168] : memref<1x1xf32, #tpu.memory_space<vmem>>, vector<1x1xf32>
    %393 = arith.addf %391, %392 : vector<1x1xf32>
    %394 = arith.negf %393 : vector<1x1xf32>
    %395 = math.exp %394 : vector<1x1xf32>
    %cst_169 = arith.constant 1.000000e+00 : f32
    %396 = vector.broadcast %cst_169 : f32 to vector<1x1xf32>
    %397 = arith.addf %396, %395 : vector<1x1xf32>
    %398 = arith.divf %396, %397 : vector<1x1xf32>
    %399 = vector.shape_cast %335 : vector<1x1xf32> to vector<1x1xf32>
    %400 = vector.broadcast %399 : vector<1x1xf32> to vector<1x64xf32>
    %401 = arith.subf %346, %319 : vector<128x64xf32>
    %402 = vector.broadcast %400 : vector<1x64xf32> to vector<128x64xf32>
    %403 = arith.mulf %402, %401 : vector<128x64xf32>
    %404 = arith.addf %319, %403 : vector<128x64xf32>
    %405 = arith.mulf %335, %398 : vector<1x1xf32>
    %406 = vector.shape_cast %405 : vector<1x1xf32> to vector<1x1xf32>
    %407 = vector.broadcast %406 : vector<1x1xf32> to vector<1x64xf32>
    %408 = vector.broadcast %407 : vector<1x64xf32> to vector<128x64xf32>
    %409 = arith.mulf %408, %346 : vector<128x64xf32>
    %410 = arith.addf %325, %409 : vector<128x64xf32>
    %411 = arith.mulf %335, %398 : vector<1x1xf32>
    %412 = arith.addf %327, %411 : vector<1x1xf32>
    %413 = arith.subf %398, %330 : vector<1x1xf32>
    %414 = arith.mulf %335, %413 : vector<1x1xf32>
    %415 = arith.addf %330, %414 : vector<1x1xf32>
    %416 = arith.addf %331, %335 : vector<1x1xf32>
    %cst_170 = arith.constant 9.990000e-01 : f32
    %417 = vector.broadcast %cst_170 : f32 to vector<1x1xf32>
    %418 = arith.cmpf olt, %412, %417 : vector<1x1xf32>
    %cst_171 = arith.constant 0.000000e+00 : f32
    %419 = vector.broadcast %cst_171 : f32 to vector<1x1xf32>
    %420 = arith.select %418, %335, %419 : vector<1x1xi1>, vector<1x1xf32>
    %c0_172 = arith.constant 0 : index
    %c0_173 = arith.constant 0 : index
    %421 = vector.load %arg4[%c0_172, %c0_173] : memref<64x64xf32, #tpu.memory_space<vmem>>, vector<64x64xf32>
    %cst_174 = arith.constant dense<0.000000e+00> : vector<128x64xf32>
    %422 = tpu.matmul %404, %421, %cst_174 {dimension_numbers = #tpu.dot_dimension_numbers<[1], [0], [0], [1], [0, 0, 1, 1], [], []>} : vector<128x64xf32>, vector<64x64xf32>, vector<128x64xf32> -> vector<128x64xf32>
    %cst_175 = arith.constant dense<0.000000e+00> : vector<128x64xf32>
    %423 = tpu.matmul %0, %422, %cst_175 {dimension_numbers = #tpu.dot_dimension_numbers<[1], [0], [0], [1], [0, 0, 1, 1], [], []>} : vector<128x128xf32>, vector<128x64xf32>, vector<128x64xf32> -> vector<128x64xf32>
    %c0_176 = arith.constant 0 : index
    %c0_177 = arith.constant 0 : index
    %424 = vector.load %arg5[%c0_176, %c0_177] : memref<1x64xf32, #tpu.memory_space<vmem>>, vector<1x64xf32>
    %425 = vector.broadcast %424 : vector<1x64xf32> to vector<128x64xf32>
    %426 = arith.addf %423, %425 : vector<128x64xf32>
    %cst_178 = arith.constant 0.000000e+00 : f32
    %427 = vector.broadcast %cst_178 : f32 to vector<128x64xf32>
    %428 = arith.cmpf oge, %426, %427 : vector<128x64xf32>
    %cst_179 = arith.constant 0.00999999977 : f32
    %429 = vector.broadcast %cst_179 : f32 to vector<128x64xf32>
    %430 = arith.mulf %429, %426 : vector<128x64xf32>
    %431 = arith.select %428, %426, %430 : vector<128x64xi1>, vector<128x64xf32>
    %c0_180 = arith.constant 0 : index
    %c0_181 = arith.constant 0 : index
    %432 = vector.load %arg6[%c0_180, %c0_181] : memref<1x64xf32, #tpu.memory_space<vmem>>, vector<1x64xf32>
    %cst_182 = arith.constant dense<0.000000e+00> : vector<1x128xf32>
    %433 = tpu.matmul %432, %431, %cst_182 {dimension_numbers = #tpu.dot_dimension_numbers<[1], [1], [0], [0], [0, 0, 1, 0], [], []>} : vector<1x64xf32>, vector<128x64xf32>, vector<1x128xf32> -> vector<1x128xf32>
    %cst_183 = arith.constant dense<0.000000e+00> : vector<1x128xf32>
    %434 = tpu.matmul %433, %0, %cst_183 {dimension_numbers = #tpu.dot_dimension_numbers<[1], [1], [0], [0], [0, 0, 1, 0], [], []>} : vector<1x128xf32>, vector<128x128xf32>, vector<1x128xf32> -> vector<1x128xf32>
    %c0_184 = arith.constant 0 : index
    %c0_185 = arith.constant 0 : index
    %435 = vector.load %arg7[%c0_184, %c0_185] : memref<1x1xf32, #tpu.memory_space<vmem>>, vector<1x1xf32>
    %436 = vector.broadcast %435 : vector<1x1xf32> to vector<1x128xf32>
    %437 = arith.addf %434, %436 : vector<1x128xf32>
    %cst_186 = arith.constant 0.000000e+00 : f32
    %438 = vector.broadcast %cst_186 : f32 to vector<1x128xf32>
    %439 = arith.cmpf oge, %437, %438 : vector<1x128xf32>
    %cst_187 = arith.constant 0.00999999977 : f32
    %440 = vector.broadcast %cst_187 : f32 to vector<1x128xf32>
    %441 = arith.mulf %440, %437 : vector<1x128xf32>
    %442 = arith.select %439, %437, %441 : vector<1x128xi1>, vector<1x128xf32>
    %c0_188 = arith.constant 0 : index
    %c0_189 = arith.constant 0 : index
    %443 = vector.load %arg10[%c0_188, %c0_189] : memref<192x128xf32, #tpu.memory_space<vmem>>, vector<192x128xf32>
    %cst_190 = arith.constant dense<0.000000e+00> : vector<1x192xf32>
    %444 = tpu.matmul %442, %443, %cst_190 {dimension_numbers = #tpu.dot_dimension_numbers<[1], [1], [0], [0], [0, 0, 1, 0], [], []>} : vector<1x128xf32>, vector<192x128xf32>, vector<1x192xf32> -> vector<1x192xf32>
    %c0_191 = arith.constant 0 : index
    %c0_192 = arith.constant 0 : index
    %445 = vector.load %arg11[%c0_191, %c0_192] : memref<1x192xf32, #tpu.memory_space<vmem>>, vector<1x192xf32>
    %446 = arith.addf %444, %445 : vector<1x192xf32>
    %447 = vector.extract_strided_slice %446 {offsets = [0, 0], sizes = [1, 64], strides = [1, 1]} : vector<1x192xf32> to vector<1x64xf32>
    %448 = vector.extract_strided_slice %70 {offsets = [0, 0], sizes = [1, 64], strides = [1, 1]} : vector<1x192xf32> to vector<1x64xf32>
    %449 = arith.addf %447, %448 : vector<1x64xf32>
    %450 = arith.negf %449 : vector<1x64xf32>
    %451 = math.exp %450 : vector<1x64xf32>
    %cst_193 = arith.constant 1.000000e+00 : f32
    %452 = vector.broadcast %cst_193 : f32 to vector<1x64xf32>
    %453 = arith.addf %452, %451 : vector<1x64xf32>
    %454 = arith.divf %452, %453 : vector<1x64xf32>
    %455 = vector.extract_strided_slice %446 {offsets = [0, 64], sizes = [1, 64], strides = [1, 1]} : vector<1x192xf32> to vector<1x64xf32>
    %456 = vector.extract_strided_slice %70 {offsets = [0, 64], sizes = [1, 64], strides = [1, 1]} : vector<1x192xf32> to vector<1x64xf32>
    %457 = arith.addf %455, %456 : vector<1x64xf32>
    %458 = arith.negf %457 : vector<1x64xf32>
    %459 = math.exp %458 : vector<1x64xf32>
    %cst_194 = arith.constant 1.000000e+00 : f32
    %460 = vector.broadcast %cst_194 : f32 to vector<1x64xf32>
    %461 = arith.addf %460, %459 : vector<1x64xf32>
    %462 = arith.divf %460, %461 : vector<1x64xf32>
    %463 = vector.extract_strided_slice %446 {offsets = [0, 128], sizes = [1, 64], strides = [1, 1]} : vector<1x192xf32> to vector<1x64xf32>
    %464 = vector.extract_strided_slice %70 {offsets = [0, 128], sizes = [1, 64], strides = [1, 1]} : vector<1x192xf32> to vector<1x64xf32>
    %465 = arith.mulf %454, %464 : vector<1x64xf32>
    %466 = arith.addf %463, %465 : vector<1x64xf32>
    %467 = math.tanh %466 : vector<1x64xf32>
    %cst_195 = arith.constant 1.000000e+00 : f32
    %468 = vector.broadcast %cst_195 : f32 to vector<1x64xf32>
    %469 = arith.subf %468, %462 : vector<1x64xf32>
    %470 = arith.mulf %469, %467 : vector<1x64xf32>
    %471 = arith.mulf %462, %55 : vector<1x64xf32>
    %472 = arith.addf %470, %471 : vector<1x64xf32>
    %c0_196 = arith.constant 0 : index
    %c0_197 = arith.constant 0 : index
    %473 = vector.load %arg14[%c0_196, %c0_197] : memref<1x64xf32, #tpu.memory_space<vmem>>, vector<1x64xf32>
    %474 = arith.mulf %472, %473 : vector<1x64xf32>
    %cst_198 = arith.constant dense<0.000000e+00> : vector<1xf32>
    %475 = vector.multi_reduction <add>, %474, %cst_198 [1] : vector<1x64xf32> to vector<1xf32>
    %476 = vector.shape_cast %475 : vector<1xf32> to vector<1x1xf32>
    %c0_199 = arith.constant 0 : index
    %c0_200 = arith.constant 0 : index
    %477 = vector.load %arg15[%c0_199, %c0_200] : memref<1x1xf32, #tpu.memory_space<vmem>>, vector<1x1xf32>
    %478 = arith.addf %476, %477 : vector<1x1xf32>
    %479 = arith.negf %478 : vector<1x1xf32>
    %480 = math.exp %479 : vector<1x1xf32>
    %cst_201 = arith.constant 1.000000e+00 : f32
    %481 = vector.broadcast %cst_201 : f32 to vector<1x1xf32>
    %482 = arith.addf %481, %480 : vector<1x1xf32>
    %483 = arith.divf %481, %482 : vector<1x1xf32>
    %484 = vector.shape_cast %420 : vector<1x1xf32> to vector<1x1xf32>
    %485 = vector.broadcast %484 : vector<1x1xf32> to vector<1x64xf32>
    %486 = arith.subf %431, %404 : vector<128x64xf32>
    %487 = vector.broadcast %485 : vector<1x64xf32> to vector<128x64xf32>
    %488 = arith.mulf %487, %486 : vector<128x64xf32>
    %489 = arith.addf %404, %488 : vector<128x64xf32>
    %490 = arith.mulf %420, %483 : vector<1x1xf32>
    %491 = vector.shape_cast %490 : vector<1x1xf32> to vector<1x1xf32>
    %492 = vector.broadcast %491 : vector<1x1xf32> to vector<1x64xf32>
    %493 = vector.broadcast %492 : vector<1x64xf32> to vector<128x64xf32>
    %494 = arith.mulf %493, %431 : vector<128x64xf32>
    %495 = arith.addf %410, %494 : vector<128x64xf32>
    %496 = arith.mulf %420, %483 : vector<1x1xf32>
    %497 = arith.addf %412, %496 : vector<1x1xf32>
    %498 = arith.subf %483, %415 : vector<1x1xf32>
    %499 = arith.mulf %420, %498 : vector<1x1xf32>
    %500 = arith.addf %415, %499 : vector<1x1xf32>
    %501 = arith.addf %416, %420 : vector<1x1xf32>
    %cst_202 = arith.constant 9.990000e-01 : f32
    %502 = vector.broadcast %cst_202 : f32 to vector<1x1xf32>
    %503 = arith.cmpf olt, %497, %502 : vector<1x1xf32>
    %cst_203 = arith.constant 0.000000e+00 : f32
    %504 = vector.broadcast %cst_203 : f32 to vector<1x1xf32>
    %505 = arith.select %503, %420, %504 : vector<1x1xi1>, vector<1x1xf32>
    %c0_204 = arith.constant 0 : index
    %c0_205 = arith.constant 0 : index
    %506 = vector.load %arg4[%c0_204, %c0_205] : memref<64x64xf32, #tpu.memory_space<vmem>>, vector<64x64xf32>
    %cst_206 = arith.constant dense<0.000000e+00> : vector<128x64xf32>
    %507 = tpu.matmul %489, %506, %cst_206 {dimension_numbers = #tpu.dot_dimension_numbers<[1], [0], [0], [1], [0, 0, 1, 1], [], []>} : vector<128x64xf32>, vector<64x64xf32>, vector<128x64xf32> -> vector<128x64xf32>
    %cst_207 = arith.constant dense<0.000000e+00> : vector<128x64xf32>
    %508 = tpu.matmul %0, %507, %cst_207 {dimension_numbers = #tpu.dot_dimension_numbers<[1], [0], [0], [1], [0, 0, 1, 1], [], []>} : vector<128x128xf32>, vector<128x64xf32>, vector<128x64xf32> -> vector<128x64xf32>
    %c0_208 = arith.constant 0 : index
    %c0_209 = arith.constant 0 : index
    %509 = vector.load %arg5[%c0_208, %c0_209] : memref<1x64xf32, #tpu.memory_space<vmem>>, vector<1x64xf32>
    %510 = vector.broadcast %509 : vector<1x64xf32> to vector<128x64xf32>
    %511 = arith.addf %508, %510 : vector<128x64xf32>
    %cst_210 = arith.constant 0.000000e+00 : f32
    %512 = vector.broadcast %cst_210 : f32 to vector<128x64xf32>
    %513 = arith.cmpf oge, %511, %512 : vector<128x64xf32>
    %cst_211 = arith.constant 0.00999999977 : f32
    %514 = vector.broadcast %cst_211 : f32 to vector<128x64xf32>
    %515 = arith.mulf %514, %511 : vector<128x64xf32>
    %516 = arith.select %513, %511, %515 : vector<128x64xi1>, vector<128x64xf32>
    %c0_212 = arith.constant 0 : index
    %c0_213 = arith.constant 0 : index
    %517 = vector.load %arg6[%c0_212, %c0_213] : memref<1x64xf32, #tpu.memory_space<vmem>>, vector<1x64xf32>
    %cst_214 = arith.constant dense<0.000000e+00> : vector<1x128xf32>
    %518 = tpu.matmul %517, %516, %cst_214 {dimension_numbers = #tpu.dot_dimension_numbers<[1], [1], [0], [0], [0, 0, 1, 0], [], []>} : vector<1x64xf32>, vector<128x64xf32>, vector<1x128xf32> -> vector<1x128xf32>
    %cst_215 = arith.constant dense<0.000000e+00> : vector<1x128xf32>
    %519 = tpu.matmul %518, %0, %cst_215 {dimension_numbers = #tpu.dot_dimension_numbers<[1], [1], [0], [0], [0, 0, 1, 0], [], []>} : vector<1x128xf32>, vector<128x128xf32>, vector<1x128xf32> -> vector<1x128xf32>
    %c0_216 = arith.constant 0 : index
    %c0_217 = arith.constant 0 : index
    %520 = vector.load %arg7[%c0_216, %c0_217] : memref<1x1xf32, #tpu.memory_space<vmem>>, vector<1x1xf32>
    %521 = vector.broadcast %520 : vector<1x1xf32> to vector<1x128xf32>
    %522 = arith.addf %519, %521 : vector<1x128xf32>
    %cst_218 = arith.constant 0.000000e+00 : f32
    %523 = vector.broadcast %cst_218 : f32 to vector<1x128xf32>
    %524 = arith.cmpf oge, %522, %523 : vector<1x128xf32>
    %cst_219 = arith.constant 0.00999999977 : f32
    %525 = vector.broadcast %cst_219 : f32 to vector<1x128xf32>
    %526 = arith.mulf %525, %522 : vector<1x128xf32>
    %527 = arith.select %524, %522, %526 : vector<1x128xi1>, vector<1x128xf32>
    %c0_220 = arith.constant 0 : index
    %c0_221 = arith.constant 0 : index
    %528 = vector.load %arg10[%c0_220, %c0_221] : memref<192x128xf32, #tpu.memory_space<vmem>>, vector<192x128xf32>
    %cst_222 = arith.constant dense<0.000000e+00> : vector<1x192xf32>
    %529 = tpu.matmul %527, %528, %cst_222 {dimension_numbers = #tpu.dot_dimension_numbers<[1], [1], [0], [0], [0, 0, 1, 0], [], []>} : vector<1x128xf32>, vector<192x128xf32>, vector<1x192xf32> -> vector<1x192xf32>
    %c0_223 = arith.constant 0 : index
    %c0_224 = arith.constant 0 : index
    %530 = vector.load %arg11[%c0_223, %c0_224] : memref<1x192xf32, #tpu.memory_space<vmem>>, vector<1x192xf32>
    %531 = arith.addf %529, %530 : vector<1x192xf32>
    %532 = vector.extract_strided_slice %531 {offsets = [0, 0], sizes = [1, 64], strides = [1, 1]} : vector<1x192xf32> to vector<1x64xf32>
    %533 = vector.extract_strided_slice %70 {offsets = [0, 0], sizes = [1, 64], strides = [1, 1]} : vector<1x192xf32> to vector<1x64xf32>
    %534 = arith.addf %532, %533 : vector<1x64xf32>
    %535 = arith.negf %534 : vector<1x64xf32>
    %536 = math.exp %535 : vector<1x64xf32>
    %cst_225 = arith.constant 1.000000e+00 : f32
    %537 = vector.broadcast %cst_225 : f32 to vector<1x64xf32>
    %538 = arith.addf %537, %536 : vector<1x64xf32>
    %539 = arith.divf %537, %538 : vector<1x64xf32>
    %540 = vector.extract_strided_slice %531 {offsets = [0, 64], sizes = [1, 64], strides = [1, 1]} : vector<1x192xf32> to vector<1x64xf32>
    %541 = vector.extract_strided_slice %70 {offsets = [0, 64], sizes = [1, 64], strides = [1, 1]} : vector<1x192xf32> to vector<1x64xf32>
    %542 = arith.addf %540, %541 : vector<1x64xf32>
    %543 = arith.negf %542 : vector<1x64xf32>
    %544 = math.exp %543 : vector<1x64xf32>
    %cst_226 = arith.constant 1.000000e+00 : f32
    %545 = vector.broadcast %cst_226 : f32 to vector<1x64xf32>
    %546 = arith.addf %545, %544 : vector<1x64xf32>
    %547 = arith.divf %545, %546 : vector<1x64xf32>
    %548 = vector.extract_strided_slice %531 {offsets = [0, 128], sizes = [1, 64], strides = [1, 1]} : vector<1x192xf32> to vector<1x64xf32>
    %549 = vector.extract_strided_slice %70 {offsets = [0, 128], sizes = [1, 64], strides = [1, 1]} : vector<1x192xf32> to vector<1x64xf32>
    %550 = arith.mulf %539, %549 : vector<1x64xf32>
    %551 = arith.addf %548, %550 : vector<1x64xf32>
    %552 = math.tanh %551 : vector<1x64xf32>
    %cst_227 = arith.constant 1.000000e+00 : f32
    %553 = vector.broadcast %cst_227 : f32 to vector<1x64xf32>
    %554 = arith.subf %553, %547 : vector<1x64xf32>
    %555 = arith.mulf %554, %552 : vector<1x64xf32>
    %556 = arith.mulf %547, %55 : vector<1x64xf32>
    %557 = arith.addf %555, %556 : vector<1x64xf32>
    %c0_228 = arith.constant 0 : index
    %c0_229 = arith.constant 0 : index
    %558 = vector.load %arg14[%c0_228, %c0_229] : memref<1x64xf32, #tpu.memory_space<vmem>>, vector<1x64xf32>
    %559 = arith.mulf %557, %558 : vector<1x64xf32>
    %cst_230 = arith.constant dense<0.000000e+00> : vector<1xf32>
    %560 = vector.multi_reduction <add>, %559, %cst_230 [1] : vector<1x64xf32> to vector<1xf32>
    %561 = vector.shape_cast %560 : vector<1xf32> to vector<1x1xf32>
    %c0_231 = arith.constant 0 : index
    %c0_232 = arith.constant 0 : index
    %562 = vector.load %arg15[%c0_231, %c0_232] : memref<1x1xf32, #tpu.memory_space<vmem>>, vector<1x1xf32>
    %563 = arith.addf %561, %562 : vector<1x1xf32>
    %564 = arith.negf %563 : vector<1x1xf32>
    %565 = math.exp %564 : vector<1x1xf32>
    %cst_233 = arith.constant 1.000000e+00 : f32
    %566 = vector.broadcast %cst_233 : f32 to vector<1x1xf32>
    %567 = arith.addf %566, %565 : vector<1x1xf32>
    %568 = arith.divf %566, %567 : vector<1x1xf32>
    %569 = vector.shape_cast %505 : vector<1x1xf32> to vector<1x1xf32>
    %570 = vector.broadcast %569 : vector<1x1xf32> to vector<1x64xf32>
    %571 = arith.subf %516, %489 : vector<128x64xf32>
    %572 = vector.broadcast %570 : vector<1x64xf32> to vector<128x64xf32>
    %573 = arith.mulf %572, %571 : vector<128x64xf32>
    %574 = arith.addf %489, %573 : vector<128x64xf32>
    %575 = arith.mulf %505, %568 : vector<1x1xf32>
    %576 = vector.shape_cast %575 : vector<1x1xf32> to vector<1x1xf32>
    %577 = vector.broadcast %576 : vector<1x1xf32> to vector<1x64xf32>
    %578 = vector.broadcast %577 : vector<1x64xf32> to vector<128x64xf32>
    %579 = arith.mulf %578, %516 : vector<128x64xf32>
    %580 = arith.addf %495, %579 : vector<128x64xf32>
    %581 = arith.mulf %505, %568 : vector<1x1xf32>
    %582 = arith.addf %497, %581 : vector<1x1xf32>
    %583 = arith.subf %568, %500 : vector<1x1xf32>
    %584 = arith.mulf %505, %583 : vector<1x1xf32>
    %585 = arith.addf %500, %584 : vector<1x1xf32>
    %586 = arith.addf %501, %505 : vector<1x1xf32>
    %cst_234 = arith.constant 9.990000e-01 : f32
    %587 = vector.broadcast %cst_234 : f32 to vector<1x1xf32>
    %588 = arith.cmpf olt, %582, %587 : vector<1x1xf32>
    %cst_235 = arith.constant 0.000000e+00 : f32
    %589 = vector.broadcast %cst_235 : f32 to vector<1x1xf32>
    %590 = arith.select %588, %505, %589 : vector<1x1xi1>, vector<1x1xf32>
    %c0_236 = arith.constant 0 : index
    %c0_237 = arith.constant 0 : index
    %591 = vector.load %arg4[%c0_236, %c0_237] : memref<64x64xf32, #tpu.memory_space<vmem>>, vector<64x64xf32>
    %cst_238 = arith.constant dense<0.000000e+00> : vector<128x64xf32>
    %592 = tpu.matmul %574, %591, %cst_238 {dimension_numbers = #tpu.dot_dimension_numbers<[1], [0], [0], [1], [0, 0, 1, 1], [], []>} : vector<128x64xf32>, vector<64x64xf32>, vector<128x64xf32> -> vector<128x64xf32>
    %cst_239 = arith.constant dense<0.000000e+00> : vector<128x64xf32>
    %593 = tpu.matmul %0, %592, %cst_239 {dimension_numbers = #tpu.dot_dimension_numbers<[1], [0], [0], [1], [0, 0, 1, 1], [], []>} : vector<128x128xf32>, vector<128x64xf32>, vector<128x64xf32> -> vector<128x64xf32>
    %c0_240 = arith.constant 0 : index
    %c0_241 = arith.constant 0 : index
    %594 = vector.load %arg5[%c0_240, %c0_241] : memref<1x64xf32, #tpu.memory_space<vmem>>, vector<1x64xf32>
    %595 = vector.broadcast %594 : vector<1x64xf32> to vector<128x64xf32>
    %596 = arith.addf %593, %595 : vector<128x64xf32>
    %cst_242 = arith.constant 0.000000e+00 : f32
    %597 = vector.broadcast %cst_242 : f32 to vector<128x64xf32>
    %598 = arith.cmpf oge, %596, %597 : vector<128x64xf32>
    %cst_243 = arith.constant 0.00999999977 : f32
    %599 = vector.broadcast %cst_243 : f32 to vector<128x64xf32>
    %600 = arith.mulf %599, %596 : vector<128x64xf32>
    %601 = arith.select %598, %596, %600 : vector<128x64xi1>, vector<128x64xf32>
    %c0_244 = arith.constant 0 : index
    %c0_245 = arith.constant 0 : index
    %602 = vector.load %arg6[%c0_244, %c0_245] : memref<1x64xf32, #tpu.memory_space<vmem>>, vector<1x64xf32>
    %cst_246 = arith.constant dense<0.000000e+00> : vector<1x128xf32>
    %603 = tpu.matmul %602, %601, %cst_246 {dimension_numbers = #tpu.dot_dimension_numbers<[1], [1], [0], [0], [0, 0, 1, 0], [], []>} : vector<1x64xf32>, vector<128x64xf32>, vector<1x128xf32> -> vector<1x128xf32>
    %cst_247 = arith.constant dense<0.000000e+00> : vector<1x128xf32>
    %604 = tpu.matmul %603, %0, %cst_247 {dimension_numbers = #tpu.dot_dimension_numbers<[1], [1], [0], [0], [0, 0, 1, 0], [], []>} : vector<1x128xf32>, vector<128x128xf32>, vector<1x128xf32> -> vector<1x128xf32>
    %c0_248 = arith.constant 0 : index
    %c0_249 = arith.constant 0 : index
    %605 = vector.load %arg7[%c0_248, %c0_249] : memref<1x1xf32, #tpu.memory_space<vmem>>, vector<1x1xf32>
    %606 = vector.broadcast %605 : vector<1x1xf32> to vector<1x128xf32>
    %607 = arith.addf %604, %606 : vector<1x128xf32>
    %cst_250 = arith.constant 0.000000e+00 : f32
    %608 = vector.broadcast %cst_250 : f32 to vector<1x128xf32>
    %609 = arith.cmpf oge, %607, %608 : vector<1x128xf32>
    %cst_251 = arith.constant 0.00999999977 : f32
    %610 = vector.broadcast %cst_251 : f32 to vector<1x128xf32>
    %611 = arith.mulf %610, %607 : vector<1x128xf32>
    %612 = arith.select %609, %607, %611 : vector<1x128xi1>, vector<1x128xf32>
    %c0_252 = arith.constant 0 : index
    %c0_253 = arith.constant 0 : index
    %613 = vector.load %arg10[%c0_252, %c0_253] : memref<192x128xf32, #tpu.memory_space<vmem>>, vector<192x128xf32>
    %cst_254 = arith.constant dense<0.000000e+00> : vector<1x192xf32>
    %614 = tpu.matmul %612, %613, %cst_254 {dimension_numbers = #tpu.dot_dimension_numbers<[1], [1], [0], [0], [0, 0, 1, 0], [], []>} : vector<1x128xf32>, vector<192x128xf32>, vector<1x192xf32> -> vector<1x192xf32>
    %c0_255 = arith.constant 0 : index
    %c0_256 = arith.constant 0 : index
    %615 = vector.load %arg11[%c0_255, %c0_256] : memref<1x192xf32, #tpu.memory_space<vmem>>, vector<1x192xf32>
    %616 = arith.addf %614, %615 : vector<1x192xf32>
    %617 = vector.extract_strided_slice %616 {offsets = [0, 0], sizes = [1, 64], strides = [1, 1]} : vector<1x192xf32> to vector<1x64xf32>
    %618 = vector.extract_strided_slice %70 {offsets = [0, 0], sizes = [1, 64], strides = [1, 1]} : vector<1x192xf32> to vector<1x64xf32>
    %619 = arith.addf %617, %618 : vector<1x64xf32>
    %620 = arith.negf %619 : vector<1x64xf32>
    %621 = math.exp %620 : vector<1x64xf32>
    %cst_257 = arith.constant 1.000000e+00 : f32
    %622 = vector.broadcast %cst_257 : f32 to vector<1x64xf32>
    %623 = arith.addf %622, %621 : vector<1x64xf32>
    %624 = arith.divf %622, %623 : vector<1x64xf32>
    %625 = vector.extract_strided_slice %616 {offsets = [0, 64], sizes = [1, 64], strides = [1, 1]} : vector<1x192xf32> to vector<1x64xf32>
    %626 = vector.extract_strided_slice %70 {offsets = [0, 64], sizes = [1, 64], strides = [1, 1]} : vector<1x192xf32> to vector<1x64xf32>
    %627 = arith.addf %625, %626 : vector<1x64xf32>
    %628 = arith.negf %627 : vector<1x64xf32>
    %629 = math.exp %628 : vector<1x64xf32>
    %cst_258 = arith.constant 1.000000e+00 : f32
    %630 = vector.broadcast %cst_258 : f32 to vector<1x64xf32>
    %631 = arith.addf %630, %629 : vector<1x64xf32>
    %632 = arith.divf %630, %631 : vector<1x64xf32>
    %633 = vector.extract_strided_slice %616 {offsets = [0, 128], sizes = [1, 64], strides = [1, 1]} : vector<1x192xf32> to vector<1x64xf32>
    %634 = vector.extract_strided_slice %70 {offsets = [0, 128], sizes = [1, 64], strides = [1, 1]} : vector<1x192xf32> to vector<1x64xf32>
    %635 = arith.mulf %624, %634 : vector<1x64xf32>
    %636 = arith.addf %633, %635 : vector<1x64xf32>
    %637 = math.tanh %636 : vector<1x64xf32>
    %cst_259 = arith.constant 1.000000e+00 : f32
    %638 = vector.broadcast %cst_259 : f32 to vector<1x64xf32>
    %639 = arith.subf %638, %632 : vector<1x64xf32>
    %640 = arith.mulf %639, %637 : vector<1x64xf32>
    %641 = arith.mulf %632, %55 : vector<1x64xf32>
    %642 = arith.addf %640, %641 : vector<1x64xf32>
    %c0_260 = arith.constant 0 : index
    %c0_261 = arith.constant 0 : index
    %643 = vector.load %arg14[%c0_260, %c0_261] : memref<1x64xf32, #tpu.memory_space<vmem>>, vector<1x64xf32>
    %644 = arith.mulf %642, %643 : vector<1x64xf32>
    %cst_262 = arith.constant dense<0.000000e+00> : vector<1xf32>
    %645 = vector.multi_reduction <add>, %644, %cst_262 [1] : vector<1x64xf32> to vector<1xf32>
    %646 = vector.shape_cast %645 : vector<1xf32> to vector<1x1xf32>
    %c0_263 = arith.constant 0 : index
    %c0_264 = arith.constant 0 : index
    %647 = vector.load %arg15[%c0_263, %c0_264] : memref<1x1xf32, #tpu.memory_space<vmem>>, vector<1x1xf32>
    %648 = arith.addf %646, %647 : vector<1x1xf32>
    %649 = arith.negf %648 : vector<1x1xf32>
    %650 = math.exp %649 : vector<1x1xf32>
    %cst_265 = arith.constant 1.000000e+00 : f32
    %651 = vector.broadcast %cst_265 : f32 to vector<1x1xf32>
    %652 = arith.addf %651, %650 : vector<1x1xf32>
    %653 = arith.divf %651, %652 : vector<1x1xf32>
    %654 = vector.shape_cast %590 : vector<1x1xf32> to vector<1x1xf32>
    %655 = vector.broadcast %654 : vector<1x1xf32> to vector<1x64xf32>
    %656 = arith.subf %601, %574 : vector<128x64xf32>
    %657 = vector.broadcast %655 : vector<1x64xf32> to vector<128x64xf32>
    %658 = arith.mulf %657, %656 : vector<128x64xf32>
    %659 = arith.addf %574, %658 : vector<128x64xf32>
    %660 = arith.mulf %590, %653 : vector<1x1xf32>
    %661 = vector.shape_cast %660 : vector<1x1xf32> to vector<1x1xf32>
    %662 = vector.broadcast %661 : vector<1x1xf32> to vector<1x64xf32>
    %663 = vector.broadcast %662 : vector<1x64xf32> to vector<128x64xf32>
    %664 = arith.mulf %663, %601 : vector<128x64xf32>
    %665 = arith.addf %580, %664 : vector<128x64xf32>
    %666 = arith.mulf %590, %653 : vector<1x1xf32>
    %667 = arith.addf %582, %666 : vector<1x1xf32>
    %668 = arith.subf %653, %585 : vector<1x1xf32>
    %669 = arith.mulf %590, %668 : vector<1x1xf32>
    %670 = arith.addf %585, %669 : vector<1x1xf32>
    %671 = arith.addf %586, %590 : vector<1x1xf32>
    %cst_266 = arith.constant 9.990000e-01 : f32
    %672 = vector.broadcast %cst_266 : f32 to vector<1x1xf32>
    %673 = arith.cmpf olt, %667, %672 : vector<1x1xf32>
    %cst_267 = arith.constant 0.000000e+00 : f32
    %674 = vector.broadcast %cst_267 : f32 to vector<1x1xf32>
    %675 = arith.select %673, %590, %674 : vector<1x1xi1>, vector<1x1xf32>
    %c0_268 = arith.constant 0 : index
    %c0_269 = arith.constant 0 : index
    %676 = vector.load %arg4[%c0_268, %c0_269] : memref<64x64xf32, #tpu.memory_space<vmem>>, vector<64x64xf32>
    %cst_270 = arith.constant dense<0.000000e+00> : vector<128x64xf32>
    %677 = tpu.matmul %659, %676, %cst_270 {dimension_numbers = #tpu.dot_dimension_numbers<[1], [0], [0], [1], [0, 0, 1, 1], [], []>} : vector<128x64xf32>, vector<64x64xf32>, vector<128x64xf32> -> vector<128x64xf32>
    %cst_271 = arith.constant dense<0.000000e+00> : vector<128x64xf32>
    %678 = tpu.matmul %0, %677, %cst_271 {dimension_numbers = #tpu.dot_dimension_numbers<[1], [0], [0], [1], [0, 0, 1, 1], [], []>} : vector<128x128xf32>, vector<128x64xf32>, vector<128x64xf32> -> vector<128x64xf32>
    %c0_272 = arith.constant 0 : index
    %c0_273 = arith.constant 0 : index
    %679 = vector.load %arg5[%c0_272, %c0_273] : memref<1x64xf32, #tpu.memory_space<vmem>>, vector<1x64xf32>
    %680 = vector.broadcast %679 : vector<1x64xf32> to vector<128x64xf32>
    %681 = arith.addf %678, %680 : vector<128x64xf32>
    %cst_274 = arith.constant 0.000000e+00 : f32
    %682 = vector.broadcast %cst_274 : f32 to vector<128x64xf32>
    %683 = arith.cmpf oge, %681, %682 : vector<128x64xf32>
    %cst_275 = arith.constant 0.00999999977 : f32
    %684 = vector.broadcast %cst_275 : f32 to vector<128x64xf32>
    %685 = arith.mulf %684, %681 : vector<128x64xf32>
    %686 = arith.select %683, %681, %685 : vector<128x64xi1>, vector<128x64xf32>
    %c0_276 = arith.constant 0 : index
    %c0_277 = arith.constant 0 : index
    %687 = vector.load %arg6[%c0_276, %c0_277] : memref<1x64xf32, #tpu.memory_space<vmem>>, vector<1x64xf32>
    %cst_278 = arith.constant dense<0.000000e+00> : vector<1x128xf32>
    %688 = tpu.matmul %687, %686, %cst_278 {dimension_numbers = #tpu.dot_dimension_numbers<[1], [1], [0], [0], [0, 0, 1, 0], [], []>} : vector<1x64xf32>, vector<128x64xf32>, vector<1x128xf32> -> vector<1x128xf32>
    %cst_279 = arith.constant dense<0.000000e+00> : vector<1x128xf32>
    %689 = tpu.matmul %688, %0, %cst_279 {dimension_numbers = #tpu.dot_dimension_numbers<[1], [1], [0], [0], [0, 0, 1, 0], [], []>} : vector<1x128xf32>, vector<128x128xf32>, vector<1x128xf32> -> vector<1x128xf32>
    %c0_280 = arith.constant 0 : index
    %c0_281 = arith.constant 0 : index
    %690 = vector.load %arg7[%c0_280, %c0_281] : memref<1x1xf32, #tpu.memory_space<vmem>>, vector<1x1xf32>
    %691 = vector.broadcast %690 : vector<1x1xf32> to vector<1x128xf32>
    %692 = arith.addf %689, %691 : vector<1x128xf32>
    %cst_282 = arith.constant 0.000000e+00 : f32
    %693 = vector.broadcast %cst_282 : f32 to vector<1x128xf32>
    %694 = arith.cmpf oge, %692, %693 : vector<1x128xf32>
    %cst_283 = arith.constant 0.00999999977 : f32
    %695 = vector.broadcast %cst_283 : f32 to vector<1x128xf32>
    %696 = arith.mulf %695, %692 : vector<1x128xf32>
    %697 = arith.select %694, %692, %696 : vector<1x128xi1>, vector<1x128xf32>
    %c0_284 = arith.constant 0 : index
    %c0_285 = arith.constant 0 : index
    %698 = vector.load %arg10[%c0_284, %c0_285] : memref<192x128xf32, #tpu.memory_space<vmem>>, vector<192x128xf32>
    %cst_286 = arith.constant dense<0.000000e+00> : vector<1x192xf32>
    %699 = tpu.matmul %697, %698, %cst_286 {dimension_numbers = #tpu.dot_dimension_numbers<[1], [1], [0], [0], [0, 0, 1, 0], [], []>} : vector<1x128xf32>, vector<192x128xf32>, vector<1x192xf32> -> vector<1x192xf32>
    %c0_287 = arith.constant 0 : index
    %c0_288 = arith.constant 0 : index
    %700 = vector.load %arg11[%c0_287, %c0_288] : memref<1x192xf32, #tpu.memory_space<vmem>>, vector<1x192xf32>
    %701 = arith.addf %699, %700 : vector<1x192xf32>
    %702 = vector.extract_strided_slice %701 {offsets = [0, 0], sizes = [1, 64], strides = [1, 1]} : vector<1x192xf32> to vector<1x64xf32>
    %703 = vector.extract_strided_slice %70 {offsets = [0, 0], sizes = [1, 64], strides = [1, 1]} : vector<1x192xf32> to vector<1x64xf32>
    %704 = arith.addf %702, %703 : vector<1x64xf32>
    %705 = arith.negf %704 : vector<1x64xf32>
    %706 = math.exp %705 : vector<1x64xf32>
    %cst_289 = arith.constant 1.000000e+00 : f32
    %707 = vector.broadcast %cst_289 : f32 to vector<1x64xf32>
    %708 = arith.addf %707, %706 : vector<1x64xf32>
    %709 = arith.divf %707, %708 : vector<1x64xf32>
    %710 = vector.extract_strided_slice %701 {offsets = [0, 64], sizes = [1, 64], strides = [1, 1]} : vector<1x192xf32> to vector<1x64xf32>
    %711 = vector.extract_strided_slice %70 {offsets = [0, 64], sizes = [1, 64], strides = [1, 1]} : vector<1x192xf32> to vector<1x64xf32>
    %712 = arith.addf %710, %711 : vector<1x64xf32>
    %713 = arith.negf %712 : vector<1x64xf32>
    %714 = math.exp %713 : vector<1x64xf32>
    %cst_290 = arith.constant 1.000000e+00 : f32
    %715 = vector.broadcast %cst_290 : f32 to vector<1x64xf32>
    %716 = arith.addf %715, %714 : vector<1x64xf32>
    %717 = arith.divf %715, %716 : vector<1x64xf32>
    %718 = vector.extract_strided_slice %701 {offsets = [0, 128], sizes = [1, 64], strides = [1, 1]} : vector<1x192xf32> to vector<1x64xf32>
    %719 = vector.extract_strided_slice %70 {offsets = [0, 128], sizes = [1, 64], strides = [1, 1]} : vector<1x192xf32> to vector<1x64xf32>
    %720 = arith.mulf %709, %719 : vector<1x64xf32>
    %721 = arith.addf %718, %720 : vector<1x64xf32>
    %722 = math.tanh %721 : vector<1x64xf32>
    %cst_291 = arith.constant 1.000000e+00 : f32
    %723 = vector.broadcast %cst_291 : f32 to vector<1x64xf32>
    %724 = arith.subf %723, %717 : vector<1x64xf32>
    %725 = arith.mulf %724, %722 : vector<1x64xf32>
    %726 = arith.mulf %717, %55 : vector<1x64xf32>
    %727 = arith.addf %725, %726 : vector<1x64xf32>
    %c0_292 = arith.constant 0 : index
    %c0_293 = arith.constant 0 : index
    %728 = vector.load %arg14[%c0_292, %c0_293] : memref<1x64xf32, #tpu.memory_space<vmem>>, vector<1x64xf32>
    %729 = arith.mulf %727, %728 : vector<1x64xf32>
    %cst_294 = arith.constant dense<0.000000e+00> : vector<1xf32>
    %730 = vector.multi_reduction <add>, %729, %cst_294 [1] : vector<1x64xf32> to vector<1xf32>
    %731 = vector.shape_cast %730 : vector<1xf32> to vector<1x1xf32>
    %c0_295 = arith.constant 0 : index
    %c0_296 = arith.constant 0 : index
    %732 = vector.load %arg15[%c0_295, %c0_296] : memref<1x1xf32, #tpu.memory_space<vmem>>, vector<1x1xf32>
    %733 = arith.addf %731, %732 : vector<1x1xf32>
    %734 = arith.negf %733 : vector<1x1xf32>
    %735 = math.exp %734 : vector<1x1xf32>
    %cst_297 = arith.constant 1.000000e+00 : f32
    %736 = vector.broadcast %cst_297 : f32 to vector<1x1xf32>
    %737 = arith.addf %736, %735 : vector<1x1xf32>
    %738 = arith.divf %736, %737 : vector<1x1xf32>
    %739 = vector.shape_cast %675 : vector<1x1xf32> to vector<1x1xf32>
    %740 = vector.broadcast %739 : vector<1x1xf32> to vector<1x64xf32>
    %741 = arith.subf %686, %659 : vector<128x64xf32>
    %742 = vector.broadcast %740 : vector<1x64xf32> to vector<128x64xf32>
    %743 = arith.mulf %742, %741 : vector<128x64xf32>
    %744 = arith.addf %659, %743 : vector<128x64xf32>
    %745 = arith.mulf %675, %738 : vector<1x1xf32>
    %746 = vector.shape_cast %745 : vector<1x1xf32> to vector<1x1xf32>
    %747 = vector.broadcast %746 : vector<1x1xf32> to vector<1x64xf32>
    %748 = vector.broadcast %747 : vector<1x64xf32> to vector<128x64xf32>
    %749 = arith.mulf %748, %686 : vector<128x64xf32>
    %750 = arith.addf %665, %749 : vector<128x64xf32>
    %751 = arith.mulf %675, %738 : vector<1x1xf32>
    %752 = arith.addf %667, %751 : vector<1x1xf32>
    %753 = arith.subf %738, %670 : vector<1x1xf32>
    %754 = arith.mulf %675, %753 : vector<1x1xf32>
    %755 = arith.addf %670, %754 : vector<1x1xf32>
    %756 = arith.addf %671, %675 : vector<1x1xf32>
    %757 = arith.subf %752, %755 : vector<1x1xf32>
    %cst_298 = arith.constant 1.000000e+00 : f32
    %758 = vector.broadcast %cst_298 : f32 to vector<1x1xf32>
    %759 = arith.cmpf ogt, %752, %758 : vector<1x1xf32>
    %cst_299 = arith.constant 1.000000e+00 : f32
    %760 = vector.broadcast %cst_299 : f32 to vector<1x1xf32>
    %761 = arith.subf %760, %757 : vector<1x1xf32>
    %762 = arith.subf %761, %755 : vector<1x1xf32>
    %cst_300 = arith.constant 0.000000e+00 : f32
    %763 = vector.broadcast %cst_300 : f32 to vector<1x1xf32>
    %764 = arith.select %759, %762, %763 : vector<1x1xi1>, vector<1x1xf32>
    %765 = vector.shape_cast %764 : vector<1x1xf32> to vector<1x1xf32>
    %766 = vector.broadcast %765 : vector<1x1xf32> to vector<1x64xf32>
    %767 = vector.broadcast %766 : vector<1x64xf32> to vector<128x64xf32>
    %768 = arith.mulf %767, %744 : vector<128x64xf32>
    %769 = arith.addf %750, %768 : vector<128x64xf32>
    %c0_301 = arith.constant 0 : index
    %c0_302 = arith.constant 0 : index
    %770 = vector.load %arg8[%c0_301, %c0_302] : memref<64x3xf32, #tpu.memory_space<vmem>>, vector<64x3xf32>
    %cst_303 = arith.constant dense<0.000000e+00> : vector<128x3xf32>
    %771 = tpu.matmul %769, %770, %cst_303 {dimension_numbers = #tpu.dot_dimension_numbers<[1], [0], [0], [1], [0, 0, 1, 1], [], []>} : vector<128x64xf32>, vector<64x3xf32>, vector<128x3xf32> -> vector<128x3xf32>
    %cst_304 = arith.constant dense<0.000000e+00> : vector<128x3xf32>
    %772 = tpu.matmul %0, %771, %cst_304 {dimension_numbers = #tpu.dot_dimension_numbers<[1], [0], [0], [1], [0, 0, 1, 1], [], []>} : vector<128x128xf32>, vector<128x3xf32>, vector<128x3xf32> -> vector<128x3xf32>
    %c0_305 = arith.constant 0 : index
    %c0_306 = arith.constant 0 : index
    %773 = vector.load %arg9[%c0_305, %c0_306] : memref<1x3xf32, #tpu.memory_space<vmem>>, vector<1x3xf32>
    %774 = vector.broadcast %773 : vector<1x3xf32> to vector<128x3xf32>
    %775 = arith.addf %772, %774 : vector<128x3xf32>
    %c0_307 = arith.constant 0 : index
    %c0_308 = arith.constant 0 : index
    %776 = vector.load %arg16[%c0_307, %c0_308] : memref<128x3xf32, #tpu.memory_space<vmem>>, vector<128x3xf32>
    tpu.vector_store %arg16[%c0_307, %c0_308], %775 {strides = array<i32>} : memref<128x3xf32, #tpu.memory_space<vmem>>, vector<128x3xf32>,
    %777 = arith.fptosi %756 : vector<1x1xf32> to vector<1x1xi32>
    %c0_309 = arith.constant 0 : index
    %c0_310 = arith.constant 0 : index
    %778 = vector.load %arg17[%c0_309, %c0_310] : memref<1x1xi32, #tpu.memory_space<vmem>>, vector<1x1xi32>
    tpu.vector_store %arg17[%c0_309, %c0_310], %777 {strides = array<i32>} : memref<1x1xi32, #tpu.memory_space<vmem>>, vector<1x1xi32>,
    %c0_311 = arith.constant 0 : index
    %c0_312 = arith.constant 0 : index
    %779 = vector.load %arg18[%c0_311, %c0_312] : memref<1x1xf32, #tpu.memory_space<vmem>>, vector<1x1xf32>
    tpu.vector_store %arg18[%c0_311, %c0_312], %755 {strides = array<i32>} : memref<1x1xf32, #tpu.memory_space<vmem>>, vector<1x1xf32>,
    return
  }
}

</mosaic_0001>

<bundles_post_ra>
// kernel: stategcn_forward.1
= control target key start
LH: loop header
LB: loop body
LE: loop exit
PB: predicated region body
PF: predicated region fallthrough
CT: control target
= control target key end

     0   :  { %s10744_s0 = inlined_call_operand.vmem [shape: f32[128,128], index: 0, kind: input, shape index: {}]   ;;  %s10745_s1 = inlined_call_operand.vmem [shape: f32[128,4], index: 1, kind: input, shape index: {}]   ;;  %s10746_s2 = inlined_call_operand.vmem [shape: f32[4,64], index: 2, kind: input, shape index: {}]   ;;  %s10747_s3 = inlined_call_operand.vmem [shape: f32[1,64], index: 3, kind: input, shape index: {}]   ;;  %s10748_s4 = inlined_call_operand.vmem [shape: f32[64,64], index: 4, kind: input, shape index: {}]   ;;  %s10749_s5 = inlined_call_operand.vmem [shape: f32[1,64], index: 5, kind: input, shape index: {}]   ;;  %s10750_s6 = inlined_call_operand.vmem [shape: f32[1,64], index: 6, kind: input, shape index: {}]   ;;  %s10751_s7 = inlined_call_operand.<no memory space> [shape: f32[1,1], index: 7, kind: input, shape index: {}]   ;;  %s10752_s8 = inlined_call_operand.vmem [shape: f32[64,3], index: 8, kind: input, shape index: {}]   ;;  %s10753_s9 = inlined_call_operand.vmem [shape: f32[1,3], index: 9, kind: input, shape index: {}]   ;;  %s10754_s10 = inlined_call_operand.vmem [shape: f32[192,128], index: 10, kind: input, shape index: {}]   ;;  %s10755_s11 = inlined_call_operand.vmem [shape: f32[1,192], index: 11, kind: input, shape index: {}]   ;;  %s10756_s12 = inlined_call_operand.vmem [shape: f32[192,64], index: 12, kind: input, shape index: {}]   ;;  %s10757_s13 = inlined_call_operand.vmem [shape: f32[1,192], index: 13, kind: input, shape index: {}]   ;;  %s10758_s14 = inlined_call_operand.vmem [shape: f32[1,64], index: 14, kind: input, shape index: {}]   ;;  %s10759_s16 = inlined_call_operand.vmem [shape: f32[128,3], index: 16, kind: output, shape index: {0}]   ;;  %s10760_s17 = inlined_call_operand.hbm [shape: s32[1,1], index: 17, kind: output, shape index: {1}]   ;;  %s10761_s18 = inlined_call_operand.hbm [shape: f32[1,1], index: 18, kind: output, shape index: {2}]   ;;  %s10762_s15 = inlined_call_operand.<no memory space> [shape: f32[1,1], index: 15, kind: input, shape index: {}]  }
   0x1   :  { %11267 = sst [smem:[#allocation94_spill]] %s10744_s0  ;;  %v24_v0 = vstv %s10751_s7  ;;  %v26_v1 = vstv %s10762_s15 }
   0x2   :  { %11268 = sst [smem:[#allocation95_spill]] %s10745_s1  ;;  %25 = vst [vmem:[#allocation2] sm:$0x1] %v24_v0 }
   0x3   :  { %11269 = sst [smem:[#allocation96_spill]] %s10746_s2  ;;  %27 = vst [vmem:[#allocation3] sm:$0x1] %v26_v1 }
   0x4   :  { %28 = vsyncpa [#allocation5], 0  ;;  %s11270_s1 = sld [smem:[#allocation96_spill]]  ;;  %vm144_vm0 = vcmask 1043456   ;;  %vm95_vm1 = vcmask 31744  }
   0x5   :  { %s11271_s22 = sld [smem:[#allocation95_spill]] }
   0xa   :  { %v94_v2 = vld [vmem:[%s11270_s1] sm:$0xf] }
   0xb   :  { %v78_v3 = vld [vmem:[%s11271_s22] sm:$0xff]  ;;  %5085 = vmatpush.msk.msra.mxu0 %vm144_vm0, %v94_v2 }
   0xc   :  { %5086 = vmatmul.msk.f32.vlgmr.msra.gmra.mxu0 %vm95_vm1, %v78_v3 }
   0xd   :  { %29 = vsyncpa [#allocation7], 0  ;;  %v79_v4 = vld [vmem:[%s11271_s22 + $0x8] sm:$0xff]  ;;  %v80_v5 = vld [vmem:[%s11271_s22 + $0x10] sm:$0xff]  ;;  %s11272_s21 = sld [smem:[#allocation94_spill]]  ;;  %vm331_vm3 = vcmask 523264  }
   0xe   :  { %v81_v6 = vld [vmem:[%s11271_s22 + $0x18] sm:$0xff]  ;;  %v82_v7 = vld [vmem:[%s11271_s22 + $0x20] sm:$0xff]  ;;  %v83_v8 = vld [vmem:[%s11271_s22 + $0x28] sm:$0xff] }
   0xf   :  { %v84_v9 = vld [vmem:[%s11271_s22 + $0x30] sm:$0xff]  ;;  %v85_v10 = vld [vmem:[%s11271_s22 + $0x38] sm:$0xff]  ;;  %v86_v11 = vld [vmem:[%s11271_s22 + $0x40] sm:$0xff] }
  0x10   :  { %v87_v12 = vld [vmem:[%s11271_s22 + $0x48] sm:$0xff]  ;;  %v88_v13 = vld [vmem:[%s11271_s22 + $0x50] sm:$0xff]  ;;  %v89_v14 = vld [vmem:[%s11271_s22 + $0x58] sm:$0xff] }
  0x11   :  { %v90_v15 = vld [vmem:[%s11271_s22 + $0x60] sm:$0xff]  ;;  %v91_v16 = vld [vmem:[%s11271_s22 + $0x68] sm:$0xff]  ;;  %v92_v17 = vld [vmem:[%s11271_s22 + $0x70] sm:$0xff] }
  0x12   :  { %v93_v18 = vld [vmem:[%s11271_s22 + $0x78] sm:$0xff]  ;;  %v6137_v2 = vld [vmem:[%s10747_s3] ss:$0 sm:$0xff] }
  0x13   :  { %v6015_v35 = vld [vmem:[%s11272_s21] sm:$0xff]  ;;  %v6021_v36 = vld [vmem:[%s11272_s21 + $0x8] sm:$0xff]  ;;  %v6027_v37 = vld [vmem:[%s11272_s21 + $0x10] sm:$0xff] }
  0x14   :  { %5087 = vmatmul.msk.f32.gmra.mxu0 %vm95_vm1, %v79_v4  ;;  %v6033_v38 = vld [vmem:[%s11272_s21 + $0x18] sm:$0xff]  ;;  %v6039_v39 = vld [vmem:[%s11272_s21 + $0x20] sm:$0xff]  ;;  %v6045_v40 = vld [vmem:[%s11272_s21 + $0x28] sm:$0xff] }
  0x15   :  { %v6051_v41 = vld [vmem:[%s11272_s21 + $0x30] sm:$0xff]  ;;  %v6057_v42 = vld [vmem:[%s11272_s21 + $0x38] sm:$0xff]  ;;  %v6063_v43 = vld [vmem:[%s11272_s21 + $0x40] sm:$0xff] }
  0x16   :  { %v6069_v44 = vld [vmem:[%s11272_s21 + $0x48] sm:$0xff]  ;;  %v6075_v45 = vld [vmem:[%s11272_s21 + $0x50] sm:$0xff]  ;;  %v6081_v46 = vld [vmem:[%s11272_s21 + $0x78] sm:$0xff] }
  0x17   :  { %410 = vmatpush.xpose.msrb.mxu0 %v6081_v46  ;;  %v6087_v47 = vld [vmem:[%s11272_s21 + $0x70] sm:$0xff]  ;;  %v6092_v48 = vld [vmem:[%s11272_s21 + $0x58] sm:$0xff]  ;;  %v6099_v49 = vld [vmem:[%s11272_s21 + $0x68] sm:$0xff] }
  0x18   :  { %v6105_v50 = vld [vmem:[%s11272_s21 + $0x60] sm:$0xff] }
  0x1b   :  { %411 = vmatpush.xpose.msrb.mxu0 %v6087_v47 }
  0x1c   :  { %5088 = vmatmul.msk.f32.gmra.mxu0 %vm95_vm1, %v80_v5 }
  0x1f   :  { %412 = vmatpush.xpose.msrb.mxu0 %v6099_v49 }
  0x23   :  { %413 = vmatpush.xpose.msrb.mxu0 %v6105_v50 }
  0x24   :  { %5089 = vmatmul.msk.f32.gmra.mxu0 %vm95_vm1, %v81_v6 }
  0x27   :  { %414 = vmatpush.xpose.msrb.mxu0 %v6092_v48 }
  0x2b   :  { %415 = vmatpush.xpose.msrb.mxu0 %v6075_v45 }
  0x2c   :  { %5090 = vmatmul.msk.f32.gmra.mxu0 %vm95_vm1, %v82_v7 }
  0x2f   :  { %416 = vmatpush.xpose.msrb.mxu0 %v6069_v44 }
  0x33   :  { %417 = vmatpush.xpose.msrb.mxu0 %v6063_v43 }
  0x34   :  { %5091 = vmatmul.msk.f32.gmra.mxu0 %vm95_vm1, %v83_v8 }
  0x37   :  { %418 = vmatpush.xpose.msrb.mxu0 %v6057_v42 }
  0x3b   :  { %419 = vmatpush.xpose.msrb.mxu0 %v6051_v41 }
  0x3c   :  { %5092 = vmatmul.msk.f32.gmra.mxu0 %vm95_vm1, %v84_v9 }
  0x3f   :  { %420 = vmatpush.xpose.msrb.mxu0 %v6045_v40 }
  0x43   :  { %421 = vmatpush.xpose.msrb.mxu0 %v6039_v39 }
  0x44   :  { %5093 = vmatmul.msk.f32.gmra.mxu0 %vm95_vm1, %v85_v10 }
  0x47   :  { %422 = vmatpush.xpose.msrb.mxu0 %v6033_v38 }
  0x4b   :  { %423 = vmatpush.xpose.msrb.mxu0 %v6027_v37 }
  0x4c   :  { %5094 = vmatmul.msk.f32.gmra.mxu0 %vm95_vm1, %v86_v11 }
  0x4f   :  { %424 = vmatpush.xpose.msrb.mxu0 %v6021_v36 }
  0x53   :  { %425 = vmatpush.xpose.msrb.mxu0 %v6015_v35 }
  0x54   :  { %5095 = vmatmul.msk.f32.gmra.mxu0 %vm95_vm1, %v87_v12 }
  0x5c   :  { %5096 = vmatmul.msk.f32.gmra.mxu0 %vm95_vm1, %v88_v13 }
  0x64   :  { %5097 = vmatmul.msk.f32.gmra.mxu0 %vm95_vm1, %v89_v14 }
  0x6c   :  { %5098 = vmatmul.msk.f32.gmra.mxu0 %vm95_vm1, %v90_v15 }
  0x74   :  { %5099 = vmatmul.msk.f32.gmra.mxu0 %vm95_vm1, %v91_v16 }
  0x7c   :  { %5100 = vmatmul.msk.f32.gmra.mxu0 %vm95_vm1, %v92_v17 }
  0x84   :  { %5101 = vmatmul.msk.f32.gmra.mxu0 %vm95_vm1, %v93_v18 }
  0x89   :  { %v165_v19 = vpop.f32.mrf.mxu0 }
  0x91   :  { %v168_v20 = vpop.f32.mrf.mxu0 }
  0x99   :  { %v171_v21 = vpop.f32.mrf.mxu0 }
  0xa1   :  { %v174_v22 = vpop.f32.mrf.mxu0 }
  0xa9   :  { %v177_v23 = vpop.f32.mrf.mxu0 }
  0xb1   :  { %v180_v24 = vpop.f32.mrf.mxu0 }
  0xb9   :  { %v183_v25 = vpop.f32.mrf.mxu0 }
  0xc1   :  { %v186_v26 = vpop.f32.mrf.mxu0 }
  0xc9   :  { %v189_v27 = vpop.f32.mrf.mxu0 }
  0xd1   :  { %v192_v28 = vpop.f32.mrf.mxu0 }
  0xd9   :  { %v195_v29 = vpop.f32.mrf.mxu0 }
  0xe1   :  { %v198_v30 = vpop.f32.mrf.mxu0 }
  0xe9   :  { %v201_v31 = vpop.f32.mrf.mxu0 }
  0xf1   :  { %v204_v32 = vpop.f32.mrf.mxu0 }
  0xf9   :  { %v207_v33 = vpop.f32.mrf.mxu0 }
 0x101   :  { %v210_v34 = vpop.f32.mrf.mxu0 }
 0x102   :  { %217 = vmatpush.msra.mxu1 %v210_v34 }
 0x104   :  { %218 = vmatpush.msra.mxu1 %v207_v33 }
 0x106   :  { %219 = vmatpush.msra.mxu1 %v204_v32 }
 0x108   :  { %220 = vmatpush.msra.mxu1 %v201_v31 }
 0x10a   :  { %221 = vmatpush.msra.mxu1 %v198_v30 }
 0x10c   :  { %222 = vmatpush.msra.mxu1 %v195_v29 }
 0x10e   :  { %223 = vmatpush.msra.mxu1 %v192_v28 }
 0x110   :  { %224 = vmatpush.msra.mxu1 %v189_v27 }
 0x112   :  { %225 = vmatpush.msra.mxu1 %v186_v26 }
 0x114   :  { %226 = vmatpush.msra.mxu1 %v183_v25 }
 0x116   :  { %227 = vmatpush.msra.mxu1 %v180_v24 }
 0x118   :  { %228 = vmatpush.msra.mxu1 %v177_v23 }
 0x11a   :  { %229 = vmatpush.msra.mxu1 %v174_v22 }
 0x11c   :  { %230 = vmatpush.msra.mxu1 %v171_v21 }
 0x11e   :  { %231 = vmatpush.msra.mxu1 %v168_v20 }
 0x120   :  { %232 = vmatpush.msra.mxu1 %v165_v19 }
 0x121   :  { %233 = vmatmul.f32.vlgmr.msra.gmra.mxu1 %v6015_v35 }
 0x129   :  { %236 = vmatmul.f32.gmra.mxu1 %v6021_v36 }
 0x131   :  { %239 = vmatmul.f32.gmra.mxu1 %v6027_v37 }
 0x139   :  { %242 = vmatmul.f32.gmra.mxu1 %v6033_v38 }
 0x141   :  { %245 = vmatmul.f32.gmra.mxu1 %v6039_v39 }
 0x149   :  { %248 = vmatmul.f32.gmra.mxu1 %v6045_v40 }
 0x151   :  { %251 = vmatmul.f32.gmra.mxu1 %v6051_v41 }
 0x159   :  { %254 = vmatmul.f32.gmra.mxu1 %v6057_v42 }
 0x161   :  { %257 = vmatmul.f32.gmra.mxu1 %v6063_v43 }
 0x169   :  { %260 = vmatmul.f32.gmra.mxu1 %v6069_v44 }
 0x171   :  { %263 = vmatmul.f32.gmra.mxu1 %v6075_v45 }
 0x179   :  { %266 = vmatmul.f32.gmra.mxu1 %v6092_v48 }
 0x181   :  { %269 = vmatmul.f32.gmra.mxu1 %v6105_v50 }
 0x189   :  { %272 = vmatmul.f32.gmra.mxu1 %v6099_v49 }
 0x191   :  { %275 = vmatmul.f32.gmra.mxu1 %v6087_v47 }
 0x199   :  { %278 = vmatmul.f32.gmra.mxu1 %v6081_v46 }
 0x19e   :  { %v6119_v51 = vpop.f32.mrf.mxu1 }
 0x1a6   :  { %v6123_v52 = vpop.f32.mrf.mxu1 }
 0x1ae   :  { %v6127_v53 = vpop.f32.mrf.mxu1 }
 0x1b6   :  { %v6130_v54 = vpop.f32.mrf.mxu1 }
 0x1be   :  { %v6132_v55 = vpop.f32.mrf.mxu1 }
 0x1bf   :  { %v247_v34 = vadd.f32 %v6137_v2, %v6132_v55  ;;  %v241_v55 = vadd.f32 %v6137_v2, %v6127_v53  ;;  %v235_v53 = vadd.f32 %v6137_v2, %v6119_v51  ;;  %v6227_v51 = vld [vmem:[%s10750_s6] sm:$0x1] }
 0x1c1   :  { %vm286_vm14 = vcmp.ge.f32.partialorder %v247_v34, 0.0  ;;  %vm284_vm0 = vcmp.ge.f32.partialorder %v241_v55, 0.0 }
 0x1c6   :  { %v249_v56 = vpop.f32.mrf.mxu1 }
 0x1c7   :  { %v250_v31 = vadd.f32 %v6137_v2, %v249_v56  ;;  %v244_v56 = vadd.f32 %v6137_v2, %v6130_v54  ;;  %v238_v54 = vadd.f32 %v6137_v2, %v6123_v52 }
 0x1c9   :  { %vm287_vm13 = vcmp.ge.f32.partialorder %v250_v31, 0.0  ;;  %vm285_vm15 = vcmp.ge.f32.partialorder %v244_v56, 0.0  ;;  %vm283_vm1 = vcmp.ge.f32.partialorder %v238_v54, 0.0 }
 0x1ce   :  { %v252_v57 = vpop.f32.mrf.mxu1 }
 0x1cf   :  { %v253_v28 = vadd.f32 %v6137_v2, %v252_v57  ;;  %v303_v57 = vmul.f32 0.01, %v250_v31 }
 0x1d1   :  { %v304_v32 = vmul.f32 0.01, %v253_v28  ;;  %vm288_vm12 = vcmp.ge.f32.partialorder %v253_v28, 0.0 }
 0x1d6   :  { %v255_v58 = vpop.f32.mrf.mxu1 }
 0x1d7   :  { %v256_v25 = vadd.f32 %v6137_v2, %v255_v58  ;;  %v6188_v58 = vsel %vm288_vm12, %v253_v28, %v304_v32  ;;  %v6318_v28 = vld [vmem:[%s10754_s10 + $0x38] sm:$0xff]  ;;  %v6330_v32 = vld [vmem:[%s10754_s10 + $0x28] sm:$0xff] }
 0x1d8   :  { %11282 = vst [vmem:[#allocation19_spill] sm:$0xff] %v6188_v58 }
 0x1d9   :  { %v305_v29 = vmul.f32 0.01, %v256_v25  ;;  %vm289_vm11 = vcmp.ge.f32.partialorder %v256_v25, 0.0 }
 0x1db   :  { %v6182_v33 = vsel %vm289_vm11, %v256_v25, %v305_v29  ;;  %v6306_v25 = vld [vmem:[%s10754_s10 + $0x90] sm:$0xff] }
 0x1dc   :  { %11281 = vst [vmem:[#allocation18_spill] sm:$0xff] %v6182_v33 }
 0x1de   :  { %v258_v59 = vpop.f32.mrf.mxu1 }
 0x1df   :  { %v259_v22 = vadd.f32 %v6137_v2, %v258_v59  ;;  %v302_v59 = vmul.f32 0.01, %v247_v34 }
 0x1e1   :  { %v306_v26 = vmul.f32 0.01, %v259_v22  ;;  %vm290_vm10 = vcmp.ge.f32.partialorder %v259_v22, 0.0 }
 0x1e3   :  { %v6177_v30 = vsel %vm290_vm10, %v259_v22, %v306_v26  ;;  %v6294_v22 = vld [vmem:[%s10754_s10 + $0x98] sm:$0xff]  ;;  %v6311_v26 = vld [vmem:[%s10754_s10 + $0x40] sm:$0xff] }
 0x1e4   :  { %11280 = vst [vmem:[#allocation17_spill] sm:$0xff] %v6177_v30 }
 0x1e6   :  { %v261_v60 = vpop.f32.mrf.mxu1 }
 0x1e7   :  { %v262_v19 = vadd.f32 %v6137_v2, %v261_v60  ;;  %v6194_v60 = vsel %vm287_vm13, %v250_v31, %v303_v57  ;;  %v6324_v31 = vld [vmem:[%s10754_s10 + $0x30] sm:$0xff]  ;;  %v6342_v57 = vld [vmem:[%s10754_s10 + $0x18] sm:$0xff] }
 0x1e8   :  { %11283 = vst [vmem:[#allocation20_spill] sm:$0xff] %v6194_v60 }
 0x1e9   :  { %v307_v23 = vmul.f32 0.01, %v262_v19  ;;  %vm291_vm9 = vcmp.ge.f32.partialorder %v262_v19, 0.0 }
 0x1eb   :  { %v6172_v27 = vsel %vm291_vm9, %v262_v19, %v307_v23  ;;  %v6282_v19 = vld [vmem:[%s10754_s10 + $0xa0] sm:$0xff]  ;;  %v6299_v23 = vld [vmem:[%s10754_s10 + $0x48] sm:$0xff]  ;;  %vm549_vm9 = vcmask 516096  }
 0x1ec   :  { %11279 = vst [vmem:[#allocation16_spill] sm:$0xff] %v6172_v27 }
 0x1ee   :  { %v264_v61 = vpop.f32.mrf.mxu1 }
 0x1ef   :  { %v265_v16 = vadd.f32 %v6137_v2, %v264_v61  ;;  %v301_v61 = vmul.f32 0.01, %v244_v56 }
 0x1f1   :  { %v308_v20 = vmul.f32 0.01, %v265_v16  ;;  %vm292_vm8 = vcmp.ge.f32.partialorder %v265_v16, 0.0 }
 0x1f3   :  { %v6167_v24 = vsel %vm292_vm8, %v265_v16, %v308_v20  ;;  %v6270_v16 = vld [vmem:[%s10754_s10 + $0xa8] sm:$0xff]  ;;  %v6287_v20 = vld [vmem:[%s10754_s10 + $0x50] sm:$0xff] }
 0x1f4   :  { %11278 = vst [vmem:[#allocation15_spill] sm:$0xff] %v6167_v24 }
 0x1f6   :  { %v267_v62 = vpop.f32.mrf.mxu1 }
 0x1f7   :  { %v268_v13 = vadd.f32 %v6137_v2, %v267_v62  ;;  %v6200_v62 = vsel %vm286_vm14, %v247_v34, %v302_v59  ;;  %v6336_v34 = vld [vmem:[%s10754_s10 + $0x20] sm:$0xff]  ;;  %v6354_v59 = vld [vmem:[%s10754_s10 + $0x8] sm:$0xff] }
 0x1f8   :  { %11284 = vst [vmem:[#allocation21_spill] sm:$0xff] %v6200_v62 }
 0x1f9   :  { %v309_v17 = vmul.f32 0.01, %v268_v13  ;;  %vm293_vm7 = vcmp.ge.f32.partialorder %v268_v13, 0.0  ;;  %11289 = vst [vmem:[#allocation26_spill] sm:$0xff] %v6354_v59 }
 0x1fb   :  { %v6162_v21 = vsel %vm293_vm7, %v268_v13, %v309_v17  ;;  %v6258_v13 = vld [vmem:[%s10754_s10 + $0xb0] sm:$0xff]  ;;  %v6275_v17 = vld [vmem:[%s10754_s10 + $0x58] sm:$0xff] }
 0x1fc   :  { %11277 = vst [vmem:[#allocation14_spill] sm:$0xff] %v6162_v21 }
 0x1fe   :  { %v270_v63 = vpop.f32.mrf.mxu1 }
 0x1ff   :  { %v271_v10 = vadd.f32 %v6137_v2, %v270_v63  ;;  %v300_v63 = vmul.f32 0.01, %v241_v55 }
 0x201   :  { %v310_v14 = vmul.f32 0.01, %v271_v10  ;;  %vm294_vm6 = vcmp.ge.f32.partialorder %v271_v10, 0.0 }
 0x203   :  { %v6157_v18 = vsel %vm294_vm6, %v271_v10, %v310_v14  ;;  %v6246_v10 = vld [vmem:[%s10754_s10 + $0xb8] sm:$0xff]  ;;  %v6263_v14 = vld [vmem:[%s10754_s10 + $0x60] sm:$0xff] }
 0x204   :  { %11276 = vst [vmem:[#allocation13_spill] sm:$0xff] %v6157_v18  ;;  %492 = vmatpush.xpose.msra.mxu3 %v6246_v10 }
 0x206   :  { %v273_v0 = vpop.f32.mrf.mxu1 }
 0x207   :  { %v274_v7 = vadd.f32 %v6137_v2, %v273_v0  ;;  %v6206_v0 = vsel %vm285_vm15, %v244_v56, %v301_v61  ;;  %v6348_v56 = vld [vmem:[%s10754_s10 + $0x10] sm:$0xff]  ;;  %v6365_v61 = vld [vmem:[%s10754_s10 + $0x88] sm:$0xff] }
 0x208   :  { %11285 = vst [vmem:[#allocation22_spill] sm:$0xff] %v6206_v0  ;;  %493 = vmatpush.xpose.msra.mxu3 %v6258_v13 }
 0x209   :  { %v311_v11 = vmul.f32 0.01, %v274_v7  ;;  %vm295_vm5 = vcmp.ge.f32.partialorder %v274_v7, 0.0 }
 0x20b   :  { %v6152_v15 = vsel %vm295_vm5, %v274_v7, %v311_v11  ;;  %v5839_v7 = vmov 0   ;;  %v6251_v11 = vld [vmem:[%s10754_s10 + $0x68] sm:$0xff] }
 0x20c   :  { %11275 = vst [vmem:[#allocation12_spill] sm:$0xff] %v6152_v15  ;;  %5489 = vset.pattern.permute.xlu0 %v5839_v7  ;;  %494 = vmatpush.xpose.msra.mxu3 %v6270_v16  ;;  %v6407_v7 = vld [vmem:[%s10748_s4 + $0x10] sm:$0xff] }
 0x20e   :  { %v276_v1 = vpop.f32.mrf.mxu1 }
 0x20f   :  { %v277_v4 = vadd.f32 %v6137_v2, %v276_v1  ;;  %v299_v1 = vmul.f32 0.01, %v238_v54 }
 0x210   :  { %495 = vmatpush.xpose.msra.mxu3 %v6282_v19 }
 0x211   :  { %v312_v8 = vmul.f32 0.01, %v277_v4  ;;  %vm296_vm4 = vcmp.ge.f32.partialorder %v277_v4, 0.0 }
 0x213   :  { %v6147_v12 = vsel %vm296_vm4, %v277_v4, %v312_v8  ;;  %v298_v4 = vmul.f32 0.01, %v235_v53  ;;  %v6240_v8 = vld [vmem:[%s10754_s10 + $0x70] sm:$0xff] }
 0x214   :  { %11274 = vst [vmem:[#allocation11_spill] sm:$0xff] %v6147_v12  ;;  %496 = vmatpush.xpose.msra.mxu3 %v6294_v22 }
 0x216   :  { %v279_v3 = vpop.f32.mrf.mxu1 }
 0x217   :  { %v280_v5 = vadd.f32 %v6137_v2, %v279_v3  ;;  %v6212_v3 = vsel %vm284_vm0, %v241_v55, %v300_v63  ;;  %v403_v2 = vld [vmem:[#allocation2] sm:$0x1]  ;;  %v6378_v63 = vld [vmem:[%s10748_s4 + $0x30] sm:$0xff] }
 0x218   :  { %11286 = vst [vmem:[#allocation23_spill] sm:$0xff] %v6212_v3  ;;  %406 = vperm.xlu0 %5489, %v403_v2   ;;  %497 = vmatpush.xpose.msra.mxu3 %v6306_v25  ;;  %v6360_v55 = vld [vmem:[%s10754_s10] sm:$0xff]  ;;  %v6402_v2 = vld [vmem:[%s10748_s4 + $0x18] sm:$0xff] }
 0x219   :  { %vm297_vm2 = vcmp.ge.f32.partialorder %v280_v5, 0.0  ;;  %v313_v6 = vmul.f32 0.01, %v280_v5  ;;  %11290 = vst [vmem:[#allocation27_spill] sm:$0xff] %v6360_v55 }
 0x21a   :  { %11292 = vst [vmem:[#allocation29_spill] sm:$0xff] %v6378_v63 }
 0x21b   :  { %v6142_v9 = vsel %vm297_vm2, %v280_v5, %v313_v6  ;;  %v6216_v5 = vsel %vm283_vm1, %v238_v54, %v299_v1  ;;  %vm282_vm2 = vcmp.ge.f32.partialorder %v235_v53, 0.0  ;;  %v6234_v6 = vld [vmem:[%s10754_s10 + $0x78] sm:$0xff]  ;;  %v6389_v1 = vld [vmem:[%s10748_s4 + $0x28] sm:$0xff]  ;;  %11295 = vst [vmem:[#allocation32_spill] sm:$0xff] %v6402_v2 }
 0x21c   :  { %11273 = vst [vmem:[#allocation10_spill] sm:$0xff] %v6142_v9  ;;  %5102 = vmatpush.xpose.msk.msra.mxu2 %vm331_vm3, %v6142_v9  ;;  %v6220_v52 = vsel %vm282_vm2, %v235_v53, %v298_v4  ;;  %v6370_v54 = vld [vmem:[%s10748_s4 + $0x38] sm:$0xff]  ;;  %498 = vmatpush.xpose.msra.mxu3 %v6365_v61  ;;  %v6384_v53 = vld [vmem:[%s10754_s10 + $0x80] sm:$0xff] }
 0x21d   :  { %11287 = vst [vmem:[#allocation24_spill] sm:$0xff] %v6216_v5  ;;  %v6395_v4 = vld [vmem:[%s10748_s4 + $0x20] sm:$0xff] }
 0x21e   :  { %11288 = vst [vmem:[#allocation25_spill] sm:$0xff] %v6220_v52 }
 0x21f   :  { %11291 = vst [vmem:[#allocation28_spill] sm:$0xff] %v6370_v54 }
 0x220   :  { %5103 = vmatpush.xpose.msk.msra.mxu2 %vm331_vm3, %v6147_v12  ;;  %11293 = vst [vmem:[#allocation30_spill] sm:$0xff] %v6389_v1  ;;  %499 = vmatpush.xpose.msra.mxu3 %v6384_v53 }
 0x221   :  { %11294 = vst [vmem:[#allocation31_spill] sm:$0xff] %v6395_v4 }
 0x224   :  { %5104 = vmatpush.xpose.msk.msra.mxu2 %vm331_vm3, %v6152_v15 }
 0x228   :  { %5105 = vmatpush.xpose.msk.msra.mxu2 %vm331_vm3, %v6157_v18 }
 0x22c   :  { %5106 = vmatpush.xpose.msk.msra.mxu2 %vm331_vm3, %v6162_v21 }
 0x230   :  { %5107 = vmatpush.xpose.msk.msra.mxu2 %vm331_vm3, %v6167_v24 }
 0x234   :  { %5108 = vmatpush.xpose.msk.msra.mxu2 %vm331_vm3, %v6172_v27 }
 0x238   :  { %5109 = vmatpush.xpose.msk.msra.mxu2 %vm331_vm3, %v6177_v30 }
 0x23c   :  { %5110 = vmatpush.xpose.msk.msra.mxu2 %vm331_vm3, %v6182_v33 }
 0x240   :  { %5111 = vmatpush.xpose.msk.msra.mxu2 %vm331_vm3, %v6188_v58 }
 0x244   :  { %5112 = vmatpush.xpose.msk.msra.mxu2 %vm331_vm3, %v6194_v60 }
 0x248   :  { %5113 = vmatpush.xpose.msk.msra.mxu2 %vm331_vm3, %v6200_v62 }
 0x24c   :  { %5114 = vmatpush.xpose.msk.msra.mxu2 %vm331_vm3, %v6206_v0 }
 0x250   :  { %5115 = vmatpush.xpose.msk.msra.mxu2 %vm331_vm3, %v6212_v3 }
 0x254   :  { %5116 = vmatpush.xpose.msk.msra.mxu2 %vm331_vm3, %v6216_v5 }
 0x258   :  { %5117 = vmatpush.xpose.msk.msra.mxu2 %vm331_vm3, %v6220_v52 }
 0x25b   :  { %5118 = vmatmul.msk.f32.vlgmr.msra.gmra.mxu2 %vm331_vm3, %v6227_v51 }
 0x25c   :  { %464 = vmatpush.xpose.msrb.mxu2 %v6234_v6 }
 0x260   :  { %465 = vmatpush.xpose.msrb.mxu2 %v6240_v8 }
 0x264   :  { %466 = vmatpush.xpose.msrb.mxu2 %v6251_v11 }
 0x268   :  { %467 = vmatpush.xpose.msrb.mxu2 %v6263_v14 }
 0x26c   :  { %468 = vmatpush.xpose.msrb.mxu2 %v6275_v17 }
 0x270   :  { %469 = vmatpush.xpose.msrb.mxu2 %v6287_v20 }
 0x274   :  { %470 = vmatpush.xpose.msrb.mxu2 %v6299_v23 }
 0x278   :  { %471 = vmatpush.xpose.msrb.mxu2 %v6311_v26 }
 0x27c   :  { %472 = vmatpush.xpose.msrb.mxu2 %v6318_v28 }
 0x280   :  { %473 = vmatpush.xpose.msrb.mxu2 %v6324_v31 }
 0x284   :  { %474 = vmatpush.xpose.msrb.mxu2 %v6330_v32 }
 0x288   :  { %475 = vmatpush.xpose.msrb.mxu2 %v6336_v34 }
 0x28c   :  { %476 = vmatpush.xpose.msrb.mxu2 %v6342_v57 }
 0x290   :  { %477 = vmatpush.xpose.msrb.mxu2 %v6348_v56 }
 0x294   :  { %478 = vmatpush.xpose.msrb.mxu2 %v6354_v59 }
 0x298   :  { %479 = vmatpush.xpose.msrb.mxu2 %v6360_v55 }
 0x29c   :  { %755 = vmatpush.msra.mxu2 %v6370_v54 }
 0x29e   :  { %756 = vmatpush.msra.mxu2 %v6378_v63 }
 0x2a0   :  { %757 = vmatpush.msra.mxu2 %v6389_v1  ;;  %v407_v1 = vpop.permute.xlu0 %406 }
 0x2a1   :  { %v6423_v63 = vperm.slane %v407_v1, 0 }
 0x2a2   :  { %758 = vmatpush.msra.mxu2 %v6395_v4  ;;  %v6419_v4 = vld [vmem:[%s10748_s4] sm:$0xff] }
 0x2a3   :  { %11296 = vst [vmem:[#allocation33_spill] sm:$0xff] %v6419_v4 }
 0x2a4   :  { %759 = vmatpush.msra.mxu2 %v6402_v2  ;;  %11297 = vst [vmem:[#allocation34_spill] sm:$0xff] %v6423_v63 }
 0x2a6   :  { %760 = vmatpush.msra.mxu2 %v6407_v7 }
 0x2de   :  { %v400_v29 = vpop.f32.mrf.mxu2 }
 0x2df   :  { %426 = vmatmul.f32.vlgmr.msrb.gmra.mxu0 %v400_v29  ;;  %v6413_v29 = vld [vmem:[%s10748_s4 + $0x8] sm:$0xff] }
 0x2e0   :  { %761 = vmatpush.msra.mxu2 %v6413_v29 }
 0x2e2   :  { %762 = vmatpush.msra.mxu2 %v6419_v4 }
 0x35c   :  { %v427_v2 = vpop.f32.mrf.mxu0 }
 0x35d   :  { %v428_v54 = vadd.f32 %v427_v2, %v6423_v63 }
 0x35f   :  { %vm430_vm4 = vcmp.ge.f32.partialorder %v428_v54, 0.0  ;;  %v431_v55 = vmul.f32 0.01, %v428_v54 }
 0x361   :  { %v432_v59 = vsel %vm430_vm4, %v428_v54, %v431_v55  ;;  %v6466_v54 = vld [vmem:[%s10757_s13] sm:$0x3] }
 0x362   :  { %480 = vmatmul.f32.vlgmr.msrb.gmra.mxu2 %v432_v59  ;;  %500 = vmatmul.f32.vlgmr.msra.gmra.mxu3 %v432_v59  ;;  %v458_v59 = vld [vmem:[%s10755_s11] sm:$0x3]  ;;  %s5840_s11 = smov 64  }
 0x363   :  { %v6461_v55 = vperm.slane %v458_v59, 0 }
 0x365   :  { %11298 = vst [vmem:[#allocation35_spill] sm:$0xff] %v6461_v55 }
 0x36a   :  { %5147 = vmatmul.msk.f32.vlgmr.msra.gmra.mxu2 %vm331_vm3, %v6220_v52 }
 0x372   :  { %5148 = vmatmul.msk.f32.gmra.mxu2 %vm331_vm3, %v6216_v5 }
 0x37a   :  { %5149 = vmatmul.msk.f32.gmra.mxu2 %vm331_vm3, %v6212_v3  ;;  %v6470_v3 = vperm.slane %v458_v59, 1 }
 0x37c   :  { %11299 = vst [vmem:[#allocation36_spill] sm:$0xff] %v6470_v3 }
 0x382   :  { %5150 = vmatmul.msk.f32.gmra.mxu2 %vm331_vm3, %v6206_v0 }
 0x38a   :  { %5151 = vmatmul.msk.f32.gmra.mxu2 %vm331_vm3, %v6200_v62 }
 0x392   :  { %5152 = vmatmul.msk.f32.gmra.mxu2 %vm331_vm3, %v6194_v60 }
 0x39a   :  { %5153 = vmatmul.msk.f32.gmra.mxu2 %vm331_vm3, %v6188_v58 }
 0x3a2   :  { %5154 = vmatmul.msk.f32.gmra.mxu2 %vm331_vm3, %v6182_v33 }
 0x3aa   :  { %5155 = vmatmul.msk.f32.gmra.mxu2 %vm331_vm3, %v6177_v30 }
 0x3b2   :  { %5156 = vmatmul.msk.f32.gmra.mxu2 %vm331_vm3, %v6172_v27 }
 0x3ba   :  { %5157 = vmatmul.msk.f32.gmra.mxu2 %vm331_vm3, %v6167_v24 }
 0x3c2   :  { %5158 = vmatmul.msk.f32.gmra.mxu2 %vm331_vm3, %v6162_v21 }
 0x3ca   :  { %5159 = vmatmul.msk.f32.gmra.mxu2 %vm331_vm3, %v6157_v18 }
 0x3d2   :  { %5160 = vmatmul.msk.f32.gmra.mxu2 %vm331_vm3, %v6152_v15 }
 0x3da   :  { %5161 = vmatmul.msk.f32.gmra.mxu2 %vm331_vm3, %v6147_v12 }
 0x3e2   :  { %5162 = vmatmul.msk.f32.gmra.mxu2 %vm331_vm3, %v6142_v9 }
 0x3e5   :  { %v481_v1 = vpop.f32.mrf.mxu2 }
 0x3e6   :  { %v482_v2 = vadd.f32 %v481_v1, %v6461_v55 }
 0x3e8   :  { %v504_v15 = vadd.f32 %v482_v2, %v6466_v54 }
 0x3ea   :  { %v5119_v12 = vmul.f32 -1.442695, %v504_v15  ;;  %v10811_v15 = vperm.slane %v6466_v54, 1 }
 0x3ec   :  { %5494 = vpow2.f32 %v5119_v12  ;;  %v501_v12 = vpop.f32.mrf.mxu3 }
 0x3ed   :  { %v764_v18 = vpop.f32.mrf.mxu2  ;;  %v502_v52 = vadd.f32 %v501_v12, %v6470_v3 }
 0x3f2   :  { %v5495_v21 = vpop.eup %5494 }
 0x3f3   :  { %v508_v24 = vadd.f32 1.0, %v5495_v21 }
 0x3f5   :  { %5496 = vrcp.f32 %v508_v24  ;;  %v767_v27 = vpop.f32.mrf.mxu2  ;;  %v520_v60 = vand.u32 2147483648, %v508_v24  ;;  %v518_v0 = vand.u32 2147483647, %v508_v24  ;;  %vm514_vm6 = vweird.f32 %v508_v24 }
 0x3f7   :  { %v521_v2 = vor.u32 1.1754944e-38, %v520_v60  ;;  %vm519_vm8 = vcmp.eq.f32.partialorder %v518_v0, 8.507059e+37 }
 0x3fb   :  { %v5497_v9 = vpop.eup %5496 }
 0x3fc   :  { %v510_v30 = vmul.f32 %v5497_v9, %v508_v24  ;;  %vm515_vm5 = vweird.f32 %v5497_v9 }
 0x3fd   :  { %v770_v33 = vpop.f32.mrf.mxu2  ;;  %vm516_vm7 = vmor %vm514_vm6, %vm515_vm5 }
 0x3fe   :  { %v511_v58 = vsub.f32 1.0, %v510_v30 }
 0x400   :  { %v512_v62 = vmul.f32 %v5497_v9, %v511_v58 }
 0x402   :  { %v513_v1 = vadd.f32 %v5497_v9, %v512_v62 }
 0x404   :  { %v517_v21 = vsel %vm516_vm7, %v5497_v9, %v513_v1 }
 0x405   :  { %v522_v55 = vsel %vm519_vm8, %v521_v2, %v517_v21  ;;  %v773_v5 = vpop.f32.mrf.mxu2 }
 0x406   :  { %v527_v30 = vmul.f32 %v10811_v15, %v522_v55  ;;  %v11337_v15 = vld [vmem:[#allocation17_spill] sm:$0xff] }
 0x408   :  { %v528_v58 = vadd.f32 %v527_v30, %v502_v52  ;;  %v530_v52 = vsub.f32 1.0, %v522_v55  ;;  %v536_v30 = vmul.f32 0.0, %v522_v55  ;;  %v585_v55 = vld [vmem:[%s10756_s12 + $0x58] sm:$0xff] }
 0x40a   :  { %5498 = vtanh.f32 %v528_v58 }
 0x40d   :  { %v776_v59 = vpop.f32.mrf.mxu2 }
 0x410   :  { %v5499_v63 = vpop.eup %5498 }
 0x411   :  { %532 = vrot.lane.b32.xlu0 %v5499_v63, %s5840_s11 }
 0x415   :  { %v779_v24 = vpop.f32.mrf.mxu2 }
 0x41d   :  { %v782_v62 = vpop.f32.mrf.mxu2 }
 0x425   :  { %v785_v4 = vpop.f32.mrf.mxu2 }
 0x42d   :  { %v788_v60 = vpop.f32.mrf.mxu2 }
 0x435   :  { %v791_v9 = vpop.f32.mrf.mxu2 }
 0x43d   :  { %v794_v0 = vpop.f32.mrf.mxu2 }
 0x445   :  { %v797_v1 = vpop.f32.mrf.mxu2 }
 0x44d   :  { %v800_v2 = vpop.f32.mrf.mxu2 }
 0x455   :  { %v803_v21 = vpop.f32.mrf.mxu2 }
 0x45d   :  { %v806_v12 = vpop.f32.mrf.mxu2 }
 0x465   :  { %v809_v3 = vpop.f32.mrf.mxu2 }
 0x466   :  { %816 = vmatpush.msrb.mxu1 %v809_v3 }
 0x468   :  { %817 = vmatpush.msrb.mxu1 %v806_v12  ;;  %v578_v12 = vld [vmem:[%s10756_s12 + $0x20] sm:$0xff] }
 0x46a   :  { %818 = vmatpush.msrb.mxu1 %v803_v21  ;;  %v595_v21 = vld [vmem:[%s10756_s12 + $0xa8] sm:$0xff] }
 0x46c   :  { %819 = vmatpush.msrb.mxu1 %v800_v2  ;;  %v579_v2 = vld [vmem:[%s10756_s12 + $0x28] sm:$0xff] }
 0x46e   :  { %820 = vmatpush.msrb.mxu1 %v797_v1  ;;  %v596_v1 = vld [vmem:[%s10756_s12 + $0xb0] sm:$0xff] }
 0x470   :  { %821 = vmatpush.msrb.mxu1 %v794_v0  ;;  %v580_v0 = vld [vmem:[%s10756_s12 + $0x30] sm:$0xff] }
 0x472   :  { %822 = vmatpush.msrb.mxu1 %v791_v9  ;;  %v581_v9 = vld [vmem:[%s10756_s12 + $0x38] sm:$0xff] }
 0x474   :  { %823 = vmatpush.msrb.mxu1 %v788_v60  ;;  %v597_v60 = vld [vmem:[%s10756_s12 + $0xb8] sm:$0xff] }
 0x475   :  { %5138 = vmatpush.xpose.msk.msrb.mxu3 %vm331_vm3, %v597_v60  ;;  %v6642_v60 = vld [vmem:[%s10749_s5] ss:$0 sm:$0xff] }
 0x476   :  { %824 = vmatpush.msrb.mxu1 %v785_v4  ;;  %v5491_v4 = vld [vmem:[%s10758_s14] ss:$0 sm:$0xff] }
 0x478   :  { %825 = vmatpush.msrb.mxu1 %v782_v62  ;;  %v582_v62 = vld [vmem:[%s10756_s12 + $0x40] sm:$0xff] }
 0x479   :  { %5139 = vmatpush.xpose.msk.msrb.mxu3 %vm331_vm3, %v596_v1 }
 0x47a   :  { %826 = vmatpush.msrb.mxu1 %v779_v24  ;;  %v583_v24 = vld [vmem:[%s10756_s12 + $0x48] sm:$0xff] }
 0x47c   :  { %827 = vmatpush.msrb.mxu1 %v776_v59  ;;  %v584_v59 = vld [vmem:[%s10756_s12 + $0x50] sm:$0xff] }
 0x47d   :  { %5140 = vmatpush.xpose.msk.msrb.mxu3 %vm331_vm3, %v595_v21 }
 0x47e   :  { %828 = vmatpush.msrb.mxu1 %v773_v5  ;;  %v586_v5 = vld [vmem:[%s10756_s12 + $0x60] sm:$0xff] }
 0x480   :  { %829 = vmatpush.msrb.mxu1 %v770_v33  ;;  %v587_v33 = vld [vmem:[%s10756_s12 + $0x68] sm:$0xff] }
 0x482   :  { %830 = vmatpush.msrb.mxu1 %v767_v27  ;;  %v588_v27 = vld [vmem:[%s10756_s12 + $0x70] sm:$0xff] }
 0x483   :  { %v533_v63 = vpop.permute.xlu0 %532 }
 0x484   :  { %v535_v58 = vmul.f32 %v533_v63, %v530_v52  ;;  %831 = vmatpush.msrb.mxu1 %v764_v18  ;;  %v589_v18 = vld [vmem:[%s10756_s12 + $0x78] sm:$0xff]  ;;  %v594_v52 = vld [vmem:[%s10756_s12 + $0xa0] sm:$0xff] }
 0x485   :  { %832 = vmatmul.f32.vlgmr.msrb.gmra.mxu1 %v6015_v35  ;;  %5121 = vmatpush.xpose.msk.msra.mxu0 %vm331_vm3, %v589_v18  ;;  %v577_v63 = vld [vmem:[%s10756_s12 + $0x18] sm:$0xff]  ;;  %v575_v18 = vld [vmem:[%s10756_s12 + $0x8] sm:$0xff] }
 0x486   :  { %v6478_v3 = vadd.f32 %v536_v30, %v535_v58  ;;  %5141 = vmatpush.xpose.msk.msrb.mxu3 %vm331_vm3, %v594_v52  ;;  %v593_v30 = vld [vmem:[%s10756_s12 + $0x98] sm:$0xff]  ;;  %v576_v58 = vld [vmem:[%s10756_s12 + $0x10] sm:$0xff] }
 0x488   :  { %11300 = vst [vmem:[#allocation37_spill] sm:$0xff] %v6478_v3  ;;  %599 = vrot.lane.b32.xlu1 %v6478_v3, %s5840_s11 }
 0x489   :  { %5122 = vmatpush.xpose.msk.msra.mxu0 %vm331_vm3, %v588_v27  ;;  %v591_v27 = vld [vmem:[%s10756_s12 + $0x88] sm:$0xff] }
 0x48a   :  { %5142 = vmatpush.xpose.msk.msrb.mxu3 %vm331_vm3, %v593_v30 }
 0x48d   :  { %835 = vmatmul.f32.gmra.mxu1 %v6021_v36  ;;  %5123 = vmatpush.xpose.msk.msra.mxu0 %vm331_vm3, %v587_v33  ;;  %v574_v33 = vld [vmem:[%s10756_s12] sm:$0xff] }
 0x490   :  { %541 = vrot.lane.b32.xlu1 %v5491_v4, %s5840_s11  ;;  %v592_v4 = vld [vmem:[%s10756_s12 + $0x90] sm:$0xff] }
 0x491   :  { %5124 = vmatpush.xpose.msk.msra.mxu0 %vm331_vm3, %v586_v5  ;;  %5143 = vmatpush.xpose.msk.msrb.mxu3 %vm331_vm3, %v592_v4  ;;  %v590_v5 = vld [vmem:[%s10756_s12 + $0x80] sm:$0xff] }
 0x495   :  { %838 = vmatmul.f32.gmra.mxu1 %v6027_v37  ;;  %5125 = vmatpush.xpose.msk.msra.mxu0 %vm331_vm3, %v585_v55 }
 0x496   :  { %5144 = vmatpush.xpose.msk.msrb.mxu3 %vm331_vm3, %v591_v27 }
 0x499   :  { %5126 = vmatpush.xpose.msk.msra.mxu0 %vm331_vm3, %v584_v59 }
 0x49a   :  { %5145 = vmatpush.xpose.msk.msrb.mxu3 %vm331_vm3, %v590_v5 }
 0x49d   :  { %841 = vmatmul.f32.gmra.mxu1 %v6033_v38  ;;  %5127 = vmatpush.xpose.msk.msra.mxu0 %vm331_vm3, %v583_v24 }
 0x4a1   :  { %5128 = vmatpush.xpose.msk.msra.mxu0 %vm331_vm3, %v582_v62 }
 0x4a5   :  { %844 = vmatmul.f32.gmra.mxu1 %v6039_v39  ;;  %5129 = vmatpush.xpose.msk.msra.mxu0 %vm331_vm3, %v581_v9 }
 0x4a9   :  { %5130 = vmatpush.xpose.msk.msra.mxu0 %vm331_vm3, %v580_v0 }
 0x4ad   :  { %847 = vmatmul.f32.gmra.mxu1 %v6045_v40  ;;  %5131 = vmatpush.xpose.msk.msra.mxu0 %vm331_vm3, %v579_v2 }
 0x4b1   :  { %5132 = vmatpush.xpose.msk.msra.mxu0 %vm331_vm3, %v578_v12 }
 0x4b5   :  { %850 = vmatmul.f32.gmra.mxu1 %v6051_v41  ;;  %5133 = vmatpush.xpose.msk.msra.mxu0 %vm331_vm3, %v577_v63 }
 0x4b9   :  { %5134 = vmatpush.xpose.msk.msra.mxu0 %vm331_vm3, %v576_v58 }
 0x4bd   :  { %853 = vmatmul.f32.gmra.mxu1 %v6057_v42  ;;  %5135 = vmatpush.xpose.msk.msra.mxu0 %vm331_vm3, %v575_v18 }
 0x4c1   :  { %5136 = vmatpush.xpose.msk.msra.mxu0 %vm331_vm3, %v574_v33 }
 0x4c5   :  { %856 = vmatmul.f32.gmra.mxu1 %v6063_v43  ;;  %997 = vmatpush.xpose.msrb.mxu0 %v6081_v46 }
 0x4c9   :  { %998 = vmatpush.xpose.msrb.mxu0 %v6087_v47 }
 0x4cd   :  { %859 = vmatmul.f32.gmra.mxu1 %v6069_v44  ;;  %999 = vmatpush.xpose.msrb.mxu0 %v6099_v49 }
 0x4d1   :  { %1000 = vmatpush.xpose.msrb.mxu0 %v6105_v50 }
 0x4d5   :  { %862 = vmatmul.f32.gmra.mxu1 %v6075_v45  ;;  %1001 = vmatpush.xpose.msrb.mxu0 %v6092_v48 }
 0x4d9   :  { %1002 = vmatpush.xpose.msrb.mxu0 %v6075_v45 }
 0x4dd   :  { %865 = vmatmul.f32.gmra.mxu1 %v6092_v48  ;;  %1003 = vmatpush.xpose.msrb.mxu0 %v6069_v44 }
 0x4e1   :  { %1004 = vmatpush.xpose.msrb.mxu0 %v6063_v43 }
 0x4e5   :  { %868 = vmatmul.f32.gmra.mxu1 %v6105_v50  ;;  %1005 = vmatpush.xpose.msrb.mxu0 %v6057_v42 }
 0x4e9   :  { %1006 = vmatpush.xpose.msrb.mxu0 %v6051_v41 }
 0x4ed   :  { %871 = vmatmul.f32.gmra.mxu1 %v6099_v49  ;;  %1007 = vmatpush.xpose.msrb.mxu0 %v6045_v40 }
 0x4f1   :  { %1008 = vmatpush.xpose.msrb.mxu0 %v6039_v39 }
 0x4f5   :  { %874 = vmatmul.f32.gmra.mxu1 %v6087_v47  ;;  %1009 = vmatpush.xpose.msrb.mxu0 %v6033_v38 }
 0x4f9   :  { %1010 = vmatpush.xpose.msrb.mxu0 %v6027_v37 }
 0x4fa   :  { %v600_v55 = vpop.permute.xlu1 %599 }
 0x4fb   :  { %5137 = vmatmul.msk.f32.vlgmr.msra.gmra.mxu0 %vm331_vm3, %v600_v55  ;;  %5146 = vmatmul.msk.f32.vlgmr.msrb.gmra.mxu3 %vm331_vm3, %v600_v55 }
 0x4fd   :  { %877 = vmatmul.f32.gmra.mxu1 %v6081_v46  ;;  %1011 = vmatpush.xpose.msrb.mxu0 %v6021_v36 }
 0x501   :  { %1012 = vmatpush.xpose.msrb.mxu0 %v6015_v35 }
 0x502   :  { %v6610_v45 = vpop.f32.mrf.mxu1  ;;  %v6612_v44 = vpop.permute.xlu1 %541 }
 0x503   :  { %11301 = vst [vmem:[#allocation38_spill] sm:$0xff] %v6612_v44  ;;  %v544_v43 = vmul.f32 %v6612_v44, %v6478_v3 }
 0x505   :  { %546 = vrot.lane.b32.xlu2 %v544_v43, %s5840_s11  ;;  %1048 = vmatpush.xpose.msra.mxu0 %v6246_v10 }
 0x509   :  { %1049 = vmatpush.xpose.msra.mxu0 %v6258_v13 }
 0x50a   :  { %v6619_v42 = vpop.f32.mrf.mxu1 }
 0x50d   :  { %1050 = vmatpush.xpose.msra.mxu0 %v6270_v16 }
 0x511   :  { %1051 = vmatpush.xpose.msra.mxu0 %v6282_v19 }
 0x512   :  { %v6623_v40 = vpop.f32.mrf.mxu1 }
 0x515   :  { %1052 = vmatpush.xpose.msra.mxu0 %v6294_v22 }
 0x519   :  { %1053 = vmatpush.xpose.msra.mxu0 %v6306_v25 }
 0x51a   :  { %v6628_v41 = vpop.f32.mrf.mxu1 }
 0x51d   :  { %1054 = vmatpush.xpose.msra.mxu0 %v6365_v61 }
 0x521   :  { %1055 = vmatpush.xpose.msra.mxu0 %v6384_v53 }
 0x522   :  { %v6632_v38 = vpop.f32.mrf.mxu1 }
 0x52a   :  { %v848_v36 = vpop.f32.mrf.mxu1 }
 0x532   :  { %v851_v35 = vpop.f32.mrf.mxu1 }
 0x53a   :  { %v854_v37 = vpop.f32.mrf.mxu1 }
 0x542   :  { %v857_v39 = vpop.f32.mrf.mxu1 }
 0x54a   :  { %v860_v46 = vpop.f32.mrf.mxu1 }
 0x54b   :  { %v861_v43 = vadd.f32 %v6642_v60, %v860_v46 }
 0x54d   :  { %vm890_vm0 = vcmp.ge.f32.partialorder %v861_v43, 0.0 }
 0x552   :  { %v863_v47 = vpop.f32.mrf.mxu1 }
 0x553   :  { %v864_v33 = vadd.f32 %v6642_v60, %v863_v47 }
 0x555   :  { %vm891_vm15 = vcmp.ge.f32.partialorder %v864_v33, 0.0 }
 0x55a   :  { %v866_v48 = vpop.f32.mrf.mxu1 }
 0x55b   :  { %v867_v4 = vadd.f32 %v6642_v60, %v866_v48 }
 0x55d   :  { %v908_v5 = vmul.f32 0.01, %v867_v4  ;;  %vm892_vm14 = vcmp.ge.f32.partialorder %v867_v4, 0.0 }
 0x55f   :  { %v547_v49 = vpop.permute.xlu2 %546  ;;  %v6667_v48 = vsel %vm892_vm14, %v867_v4, %v908_v5 }
 0x560   :  { %v550_v50 = vsel %vm549_vm9, %v547_v49, 0.0  ;;  %v907_v49 = vmul.f32 0.01, %v864_v33  ;;  %11306 = vst [vmem:[#allocation43_spill] sm:$0xff] %v6667_v48 }
 0x561   :  { %551 = vadd.xlane.f32.xlu2 %v550_v50  ;;  %v858_v50 = vadd.f32 %v6642_v60, %v857_v39 }
 0x562   :  { %v869_v59 = vpop.f32.mrf.mxu1  ;;  %v6672_v47 = vsel %vm891_vm15, %v864_v33, %v907_v49 }
 0x563   :  { %v870_v63 = vadd.f32 %v6642_v60, %v869_v59  ;;  %v906_v59 = vmul.f32 0.01, %v861_v43  ;;  %11307 = vst [vmem:[#allocation44_spill] sm:$0xff] %v6672_v47  ;;  %vm889_vm1 = vcmp.ge.f32.partialorder %v858_v50, 0.0 }
 0x565   :  { %v909_v18 = vmul.f32 0.01, %v870_v63  ;;  %vm893_vm13 = vcmp.ge.f32.partialorder %v870_v63, 0.0  ;;  %v6677_v46 = vsel %vm890_vm0, %v861_v43, %v906_v59 }
 0x566   :  { %11308 = vst [vmem:[#allocation45_spill] sm:$0xff] %v6677_v46 }
 0x567   :  { %v6662_v55 = vsel %vm893_vm13, %v870_v63, %v909_v18 }
 0x568   :  { %11305 = vst [vmem:[#allocation42_spill] sm:$0xff] %v6662_v55 }
 0x56a   :  { %v872_v24 = vpop.f32.mrf.mxu1 }
 0x56b   :  { %v873_v21 = vadd.f32 %v6642_v60, %v872_v24  ;;  %v855_v24 = vadd.f32 %v6642_v60, %v854_v37 }
 0x56d   :  { %v910_v30 = vmul.f32 0.01, %v873_v21  ;;  %vm894_vm12 = vcmp.ge.f32.partialorder %v873_v21, 0.0  ;;  %vm888_vm2 = vcmp.ge.f32.partialorder %v855_v24, 0.0 }
 0x56f   :  { %v6657_v27 = vsel %vm894_vm12, %v873_v21, %v910_v30  ;;  %v846_v21 = vadd.f32 %v6642_v60, %v6632_v38  ;;  %v840_v38 = vadd.f32 %v6642_v60, %v6623_v40  ;;  %v834_v40 = vadd.f32 %v6642_v60, %v6610_v45  ;;  %v6737_v45 = vld [vmem:[#allocation3] sm:$0x1] }
 0x570   :  { %11304 = vst [vmem:[#allocation41_spill] sm:$0xff] %v6657_v27 }
 0x571   :  { %v901_v63 = vmul.f32 0.01, %v846_v21  ;;  %vm885_vm6 = vcmp.ge.f32.partialorder %v846_v21, 0.0  ;;  %v899_v33 = vmul.f32 0.01, %v840_v38  ;;  %vm883_vm8 = vcmp.ge.f32.partialorder %v840_v38, 0.0 }
 0x572   :  { %v875_v62 = vpop.f32.mrf.mxu1 }
 0x573   :  { %v876_v0 = vadd.f32 %v6642_v60, %v875_v62  ;;  %v905_v62 = vmul.f32 0.01, %v858_v50  ;;  %v6705_v18 = vsel %vm885_vm6, %v846_v21, %v901_v63  ;;  %v6717_v49 = vsel %vm883_vm8, %v840_v38, %v899_v33  ;;  %v6772_v21 = vld [vmem:[%s11272_s21 + $0x68] sm:$0xff]  ;;  %v6790_v63 = vld [vmem:[%s11272_s21 + $0x50] sm:$0xff] }
 0x574   :  { %v6796_v38 = vld [vmem:[%s11272_s21 + $0x48] sm:$0xff]  ;;  %v6814_v33 = vld [vmem:[%s11272_s21 + $0x30] sm:$0xff] }
 0x575   :  { %v911_v12 = vmul.f32 0.01, %v876_v0  ;;  %vm895_vm11 = vcmp.ge.f32.partialorder %v876_v0, 0.0  ;;  %v6682_v39 = vsel %vm889_vm1, %v858_v50, %v905_v62  ;;  %v897_v50 = vmul.f32 0.01, %v834_v40 }
 0x576   :  { %11309 = vst [vmem:[#allocation46_spill] sm:$0xff] %v6682_v39 }
 0x577   :  { %v6652_v58 = vsel %vm895_vm11, %v876_v0, %v911_v12  ;;  %v904_v0 = vmul.f32 0.01, %v855_v24  ;;  %vm881_vm11 = vcmp.ge.f32.partialorder %v834_v40, 0.0 }
 0x578   :  { %11303 = vst [vmem:[#allocation40_spill] sm:$0xff] %v6652_v58 }
 0x579   :  { %v6687_v37 = vsel %vm888_vm2, %v855_v24, %v904_v0 }
 0x57a   :  { %v878_v9 = vpop.f32.mrf.mxu1 }
 0x57b   :  { %v879_v1 = vadd.f32 %v6642_v60, %v878_v9  ;;  %v852_v9 = vadd.f32 %v6642_v60, %v851_v35 }
 0x57d   :  { %vm896_vm10 = vcmp.ge.f32.partialorder %v879_v1, 0.0  ;;  %v912_v2 = vmul.f32 0.01, %v879_v1  ;;  %vm887_vm4 = vcmp.ge.f32.partialorder %v852_v9, 0.0 }
 0x57f   :  { %v6647_v52 = vsel %vm896_vm10, %v879_v1, %v912_v2  ;;  %v849_v1 = vadd.f32 %v6642_v60, %v848_v36  ;;  %v903_v2 = vmul.f32 0.01, %v852_v9  ;;  %v843_v36 = vadd.f32 %v6642_v60, %v6628_v41 }
 0x580   :  { %11302 = vst [vmem:[#allocation39_spill] sm:$0xff] %v6647_v52  ;;  %5163 = vmatpush.xpose.msk.msra.mxu3 %vm331_vm3, %v6647_v52  ;;  %v837_v41 = vadd.f32 %v6642_v60, %v6619_v42  ;;  %v6725_v42 = vsel %vm881_vm11, %v834_v40, %v897_v50  ;;  %v6820_v40 = vld [vmem:[%s11272_s21 + $0x28] sm:$0xff]  ;;  %v6832_v50 = vld [vmem:[%s11272_s21 + $0x18] sm:$0xff] }
 0x581   :  { %v902_v35 = vmul.f32 0.01, %v849_v1  ;;  %v6693_v12 = vsel %vm887_vm4, %v852_v9, %v903_v2  ;;  %vm886_vm5 = vcmp.ge.f32.partialorder %v849_v1, 0.0  ;;  %v900_v4 = vmul.f32 0.01, %v843_v36  ;;  %v6760_v2 = vld [vmem:[%s11272_s21 + $0x78] sm:$0xff] }
 0x582   :  { %vm884_vm7 = vcmp.ge.f32.partialorder %v843_v36, 0.0  ;;  %v898_v43 = vmul.f32 0.01, %v837_v41  ;;  %vm882_vm10 = vcmp.ge.f32.partialorder %v837_v41, 0.0 }
 0x583   :  { %v6699_v30 = vsel %vm886_vm5, %v849_v1, %v902_v35  ;;  %v6711_v5 = vsel %vm884_vm7, %v843_v36, %v900_v4  ;;  %v11312_v1 = vld [vmem:[#allocation27_spill] sm:$0xff]  ;;  %v6778_v35 = vld [vmem:[%s11272_s21 + $0x60] sm:$0xff]  ;;  %v6784_v36 = vld [vmem:[%s11272_s21 + $0x58] sm:$0xff] }
 0x584   :  { %5164 = vmatpush.xpose.msk.msra.mxu3 %vm331_vm3, %v6652_v58  ;;  %v6721_v59 = vsel %vm882_vm10, %v837_v41, %v898_v43  ;;  %v6802_v4 = vld [vmem:[%s11272_s21 + $0x40] sm:$0xff]  ;;  %v6808_v41 = vld [vmem:[%s11272_s21 + $0x38] sm:$0xff] }
 0x585   :  { %v6826_v43 = vld [vmem:[%s11272_s21 + $0x20] sm:$0xff] }
 0x588   :  { %5165 = vmatpush.xpose.msk.msra.mxu3 %vm331_vm3, %v6657_v27 }
 0x58c   :  { %5166 = vmatpush.xpose.msk.msra.mxu3 %vm331_vm3, %v6662_v55 }
 0x590   :  { %5167 = vmatpush.xpose.msk.msra.mxu3 %vm331_vm3, %v6667_v48 }
 0x594   :  { %5168 = vmatpush.xpose.msk.msra.mxu3 %vm331_vm3, %v6672_v47 }
 0x598   :  { %5169 = vmatpush.xpose.msk.msra.mxu3 %vm331_vm3, %v6677_v46 }
 0x59c   :  { %5170 = vmatpush.xpose.msk.msra.mxu3 %vm331_vm3, %v6682_v39 }
 0x5a0   :  { %5171 = vmatpush.xpose.msk.msra.mxu3 %vm331_vm3, %v6687_v37 }
 0x5a4   :  { %5172 = vmatpush.xpose.msk.msra.mxu3 %vm331_vm3, %v6693_v12 }
 0x5a8   :  { %5173 = vmatpush.xpose.msk.msra.mxu3 %vm331_vm3, %v6699_v30 }
 0x5ac   :  { %5174 = vmatpush.xpose.msk.msra.mxu3 %vm331_vm3, %v6705_v18 }
 0x5b0   :  { %5175 = vmatpush.xpose.msk.msra.mxu3 %vm331_vm3, %v6711_v5 }
 0x5b4   :  { %5176 = vmatpush.xpose.msk.msra.mxu3 %vm331_vm3, %v6717_v49 }
 0x5b8   :  { %5177 = vmatpush.xpose.msk.msra.mxu3 %vm331_vm3, %v6721_v59 }
 0x5bc   :  { %5178 = vmatpush.xpose.msk.msra.mxu3 %vm331_vm3, %v6725_v42 }
 0x5bf   :  { %5179 = vmatmul.msk.f32.vlgmr.msra.gmra.mxu3 %vm331_vm3, %v6227_v51 }
 0x5c0   :  { %1020 = vmatpush.xpose.msrb.mxu3 %v6234_v6 }
 0x5c4   :  { %1021 = vmatpush.xpose.msrb.mxu3 %v6240_v8 }
 0x5c8   :  { %1022 = vmatpush.xpose.msrb.mxu3 %v6251_v11 }
 0x5cc   :  { %1023 = vmatpush.xpose.msrb.mxu3 %v6263_v14 }
 0x5d0   :  { %1024 = vmatpush.xpose.msrb.mxu3 %v6275_v17 }
 0x5d4   :  { %1025 = vmatpush.xpose.msrb.mxu3 %v6287_v20  ;;  %v552_v24 = vpop.xlane.xlu2 %551 }
 0x5d5   :  { %v554_v62 = vadd.f32 %v6737_v45, %v552_v24  ;;  %v6838_v24 = vld [vmem:[%s11272_s21 + $0x10] sm:$0xff] }
 0x5d7   :  { %v5120_v6 = vmul.f32 -1.442695, %v554_v62  ;;  %v6844_v62 = vld [vmem:[%s11272_s21 + $0x8] sm:$0xff] }
 0x5d8   :  { %1026 = vmatpush.xpose.msrb.mxu3 %v6299_v23 }
 0x5d9   :  { %5500 = vpow2.f32 %v5120_v6  ;;  %v6850_v6 = vld [vmem:[%s11272_s21] sm:$0xff] }
 0x5dc   :  { %1027 = vmatpush.xpose.msrb.mxu3 %v6311_v26 }
 0x5df   :  { %v5501_v51 = vpop.eup %5500 }
 0x5e0   :  { %1028 = vmatpush.xpose.msrb.mxu3 %v6318_v28  ;;  %v558_v8 = vadd.f32 1.0, %v5501_v51  ;;  %v6853_v51 = vpop.f32.mrf.mxu3 }
 0x5e2   :  { %5502 = vrcp.f32 %v558_v8  ;;  %v570_v20 = vand.u32 2147483648, %v558_v8  ;;  %v568_v9 = vand.u32 2147483647, %v558_v8  ;;  %vm564_vm13 = vweird.f32 %v558_v8 }
 0x5e4   :  { %1029 = vmatpush.xpose.msrb.mxu3 %v6324_v31  ;;  %v571_v28 = vor.u32 1.1754944e-38, %v570_v20  ;;  %vm569_vm15 = vcmp.eq.f32.partialorder %v568_v9, 8.507059e+37  ;;  %v11317_v20 = vld [vmem:[#allocation31_spill] sm:$0xff]  ;;  %v11319_v9 = vld [vmem:[#allocation33_spill] sm:$0xff] }
 0x5e8   :  { %1030 = vmatpush.xpose.msrb.mxu3 %v6330_v32  ;;  %v5503_v11 = vpop.eup %5502  ;;  %v5841_v32 = vmov 0.0  }
 0x5e9   :  { %v560_v14 = vmul.f32 %v5503_v11, %v558_v8  ;;  %vm565_vm12 = vweird.f32 %v5503_v11 }
 0x5ea   :  { %vm566_vm14 = vmor %vm564_vm13, %vm565_vm12 }
 0x5eb   :  { %v561_v17 = vsub.f32 1.0, %v560_v14  ;;  %v11315_v14 = vld [vmem:[#allocation29_spill] sm:$0xff] }
 0x5ec   :  { %1031 = vmatpush.xpose.msrb.mxu3 %v6336_v34 }
 0x5ed   :  { %v562_v23 = vmul.f32 %v5503_v11, %v561_v17  ;;  %v11316_v17 = vld [vmem:[#allocation30_spill] sm:$0xff] }
 0x5ef   :  { %v563_v26 = vadd.f32 %v5503_v11, %v562_v23  ;;  %v11318_v23 = vld [vmem:[#allocation32_spill] sm:$0xff] }
 0x5f0   :  { %1032 = vmatpush.xpose.msrb.mxu3 %v6342_v57  ;;  %v11311_v57 = vld [vmem:[#allocation26_spill] sm:$0xff] }
 0x5f1   :  { %v567_v0 = vsel %vm566_vm14, %v5503_v11, %v563_v26  ;;  %11313 = vst [vmem:[#allocation26_spill] sm:$0xff] %v6850_v6  ;;  %v11314_v11 = vld [vmem:[#allocation28_spill] sm:$0xff]  ;;  %v6863_v26 = vpop.f32.mrf.mxu0 }
 0x5f2   :  { %v6748_v31 = vsel %vm569_vm15, %v571_v28, %v567_v0  ;;  %v11320_v0 = vld [vmem:[#allocation34_spill] sm:$0xff] }
 0x5f3   :  { %5443 = vpush %v6748_v31  ;;  %vm737_vm0 = vcmp.lt.f32.partialorder %v6748_v31, 0.999 }
 0x5f4   :  { %1033 = vmatpush.xpose.msrb.mxu3 %v6348_v56  ;;  %v6752_v34 = vsel %vm737_vm0, 1.0, %v5841_v32  ;;  %v6766_v56 = vld [vmem:[%s11272_s21 + $0x70] sm:$0xff] }
 0x5f5   :  { %11310 = vst [vmem:[#allocation47_spill] sm:$0xff] %v6752_v34 }
 0x5f6   :  { %5445 = vpush %v6752_v34 }
 0x5f8   :  { %1034 = vmatpush.xpose.msrb.mxu3 %v11311_v57 }
 0x5fc   :  { %1035 = vmatpush.xpose.msrb.mxu3 %v11312_v1 }
 0x600   :  { %1509 = vmatpush.xpose.msra.mxu3 %v6760_v2 }
 0x604   :  { %1510 = vmatpush.xpose.msra.mxu3 %v6766_v56 }
 0x608   :  { %1511 = vmatpush.xpose.msra.mxu3 %v6772_v21 }
 0x60c   :  { %1512 = vmatpush.xpose.msra.mxu3 %v6778_v35 }
 0x610   :  { %1513 = vmatpush.xpose.msra.mxu3 %v6784_v36 }
 0x614   :  { %1514 = vmatpush.xpose.msra.mxu3 %v6790_v63 }
 0x618   :  { %1515 = vmatpush.xpose.msra.mxu3 %v6796_v38 }
 0x61c   :  { %1516 = vmatpush.xpose.msra.mxu3 %v6802_v4 }
 0x620   :  { %1517 = vmatpush.xpose.msra.mxu3 %v6808_v41 }
 0x624   :  { %1518 = vmatpush.xpose.msra.mxu3 %v6814_v33  ;;  %s6865_s14 = spop %5443 }
 0x627   :  { %s5446_s26 = spop %5445 }
 0x628   :  { %1519 = vmatpush.xpose.msra.mxu3 %v6820_v40  ;;  %v6868_v1 = vstv %s5446_s26 }
 0x62c   :  { %1520 = vmatpush.xpose.msra.mxu3 %v6826_v43 }
 0x630   :  { %1521 = vmatpush.xpose.msra.mxu3 %v6832_v50 }
 0x634   :  { %1522 = vmatpush.xpose.msra.mxu3 %v6838_v24 }
 0x638   :  { %1523 = vmatpush.xpose.msra.mxu3 %v6844_v62 }
 0x63c   :  { %1524 = vmatpush.xpose.msra.mxu3 %v6850_v6 }
 0x642   :  { %v994_v8 = vpop.f32.mrf.mxu3 }
 0x643   :  { %1013 = vmatmul.f32.vlgmr.msrb.gmra.mxu0 %v994_v8 }
 0x644   :  { %1271 = vmatpush.msrb.mxu0 %v11314_v11  ;;  %v11321_v11 = vld [vmem:[#allocation25_spill] sm:$0xff] }
 0x646   :  { %1272 = vmatpush.msrb.mxu0 %v11315_v14 }
 0x648   :  { %1273 = vmatpush.msrb.mxu0 %v11316_v17  ;;  %v11323_v17 = vld [vmem:[#allocation24_spill] sm:$0xff] }
 0x64a   :  { %1274 = vmatpush.msrb.mxu0 %v11317_v20  ;;  %v1120_v20 = vsub.f32 %v6721_v59, %v11323_v17 }
 0x64c   :  { %1275 = vmatpush.msrb.mxu0 %v11318_v23  ;;  %v1140_v23 = vmul.f32 %v6868_v1, %v1120_v20  ;;  %v11331_v20 = vld [vmem:[#allocation20_spill] sm:$0xff] }
 0x64e   :  { %1276 = vmatpush.msrb.mxu0 %v6407_v7  ;;  %v1119_v7 = vsub.f32 %v6725_v42, %v11321_v11 }
 0x650   :  { %1277 = vmatpush.msrb.mxu0 %v6413_v29  ;;  %v1139_v29 = vmul.f32 %v6868_v1, %v1119_v7 }
 0x652   :  { %1278 = vmatpush.msrb.mxu0 %v11319_v9  ;;  %v6876_v14 = vadd.f32 %v1139_v29, %v11321_v11  ;;  %v11325_v9 = vld [vmem:[#allocation23_spill] sm:$0xff] }
 0x654   :  { %11322 = vst [vmem:[#allocation27_spill] sm:$0xff] %v6876_v14 }
 0x6c0   :  { %v1014_v28 = vpop.f32.mrf.mxu0 }
 0x6c1   :  { %v1015_v32 = vadd.f32 %v1014_v28, %v11320_v0 }
 0x6c3   :  { %v1018_v57 = vmul.f32 0.01, %v1015_v32  ;;  %vm1017_vm1 = vcmp.ge.f32.partialorder %v1015_v32, 0.0 }
 0x6c5   :  { %v1019_v8 = vsel %vm1017_vm1, %v1015_v32, %v1018_v57  ;;  %v11327_v32 = vld [vmem:[#allocation22_spill] sm:$0xff] }
 0x6c6   :  { %1036 = vmatmul.f32.vlgmr.msrb.gmra.mxu3 %v1019_v8  ;;  %1056 = vmatmul.f32.vlgmr.msra.gmra.mxu0 %v1019_v8  ;;  %v11329_v8 = vld [vmem:[#allocation21_spill] sm:$0xff] }
 0x6c7   :  { %1560 = vmatpush.xpose.msrb.mxu3 %v6246_v10  ;;  %v6886_v10 = vadd.f32 %v1140_v23, %v11323_v17 }
 0x6c9   :  { %11324 = vst [vmem:[#allocation28_spill] sm:$0xff] %v6886_v10 }
 0x6cb   :  { %1561 = vmatpush.xpose.msrb.mxu3 %v6258_v13  ;;  %v1121_v13 = vsub.f32 %v6717_v49, %v11325_v9 }
 0x6cd   :  { %v1141_v28 = vmul.f32 %v6868_v1, %v1121_v13  ;;  %v11333_v13 = vld [vmem:[#allocation19_spill] sm:$0xff] }
 0x6ce   :  { %5182 = vmatmul.msk.f32.vlgmr.msrb.gmra.mxu0 %vm331_vm3, %v6876_v14 }
 0x6cf   :  { %1562 = vmatpush.xpose.msrb.mxu3 %v6270_v16  ;;  %v6896_v16 = vadd.f32 %v1141_v28, %v11325_v9  ;;  %v1125_v28 = vsub.f32 %v6693_v12, %v11333_v13 }
 0x6d1   :  { %11326 = vst [vmem:[#allocation29_spill] sm:$0xff] %v6896_v16 }
 0x6d3   :  { %1563 = vmatpush.xpose.msrb.mxu3 %v6282_v19  ;;  %v1122_v19 = vsub.f32 %v6711_v5, %v11327_v32 }
 0x6d5   :  { %v1142_v57 = vmul.f32 %v6868_v1, %v1122_v19  ;;  %v1145_v19 = vmul.f32 %v6868_v1, %v1125_v28 }
 0x6d6   :  { %5183 = vmatmul.msk.f32.gmra.mxu0 %vm331_vm3, %v6886_v10 }
 0x6d7   :  { %1564 = vmatpush.xpose.msrb.mxu3 %v6294_v22  ;;  %v6906_v22 = vadd.f32 %v1142_v57, %v11327_v32  ;;  %v6930_v57 = vadd.f32 %v1145_v19, %v11333_v13 }
 0x6d9   :  { %11328 = vst [vmem:[#allocation30_spill] sm:$0xff] %v6906_v22 }
 0x6da   :  { %11334 = vst [vmem:[#allocation33_spill] sm:$0xff] %v6930_v57 }
 0x6db   :  { %1565 = vmatpush.xpose.msrb.mxu3 %v6306_v25  ;;  %v1123_v25 = vsub.f32 %v6705_v18, %v11329_v8 }
 0x6dd   :  { %v1143_v7 = vmul.f32 %v6868_v1, %v1123_v25  ;;  %v11335_v25 = vld [vmem:[#allocation18_spill] sm:$0xff] }
 0x6de   :  { %5184 = vmatmul.msk.f32.gmra.mxu0 %vm331_vm3, %v6896_v16 }
 0x6df   :  { %1566 = vmatpush.xpose.msrb.mxu3 %v6365_v61  ;;  %v6914_v29 = vadd.f32 %v1143_v7, %v11329_v8  ;;  %v1124_v61 = vsub.f32 %v6699_v30, %v11331_v20  ;;  %v1126_v7 = vsub.f32 %v6687_v37, %v11335_v25 }
 0x6e1   :  { %11330 = vst [vmem:[#allocation31_spill] sm:$0xff] %v6914_v29 }
 0x6e3   :  { %1567 = vmatpush.xpose.msrb.mxu3 %v6384_v53  ;;  %v1144_v53 = vmul.f32 %v6868_v1, %v1124_v61  ;;  %v1146_v61 = vmul.f32 %v6868_v1, %v1126_v7 }
 0x6e5   :  { %v6922_v23 = vadd.f32 %v1144_v53, %v11331_v20  ;;  %v6938_v53 = vadd.f32 %v1146_v61, %v11335_v25 }
 0x6e6   :  { %5185 = vmatmul.msk.f32.gmra.mxu0 %vm331_vm3, %v6906_v22 }
 0x6e7   :  { %11332 = vst [vmem:[#allocation32_spill] sm:$0xff] %v6922_v23 }
 0x6e8   :  { %11336 = vst [vmem:[#allocation25_spill] sm:$0xff] %v6938_v53 }
 0x6ee   :  { %5186 = vmatmul.msk.f32.gmra.mxu0 %vm331_vm3, %v6914_v29  ;;  %v1127_v29 = vsub.f32 %v6682_v39, %v11337_v15 }
 0x6f0   :  { %v1147_v28 = vmul.f32 %v6868_v1, %v1127_v29 }
 0x6f2   :  { %v6946_v19 = vadd.f32 %v1147_v28, %v11337_v15 }
 0x6f4   :  { %11338 = vst [vmem:[#allocation24_spill] sm:$0xff] %v6946_v19 }
 0x6f6   :  { %5187 = vmatmul.msk.f32.gmra.mxu0 %vm331_vm3, %v6922_v23  ;;  %v11339_v23 = vld [vmem:[#allocation16_spill] sm:$0xff] }
 0x6f7   :  { %v1128_v22 = vsub.f32 %v6677_v46, %v11339_v23 }
 0x6f9   :  { %v1148_v7 = vmul.f32 %v6868_v1, %v1128_v22 }
 0x6fb   :  { %v6954_v61 = vadd.f32 %v1148_v7, %v11339_v23 }
 0x6fd   :  { %11340 = vst [vmem:[#allocation23_spill] sm:$0xff] %v6954_v61 }
 0x6fe   :  { %5188 = vmatmul.msk.f32.gmra.mxu0 %vm331_vm3, %v6930_v57  ;;  %v11341_v57 = vld [vmem:[#allocation15_spill] sm:$0xff] }
 0x6ff   :  { %v1129_v16 = vsub.f32 %v6672_v47, %v11341_v57 }
 0x701   :  { %v1149_v29 = vmul.f32 %v6868_v1, %v1129_v16 }
 0x703   :  { %v6962_v28 = vadd.f32 %v1149_v29, %v11341_v57 }
 0x705   :  { %11342 = vst [vmem:[#allocation22_spill] sm:$0xff] %v6962_v28 }
 0x706   :  { %5189 = vmatmul.msk.f32.gmra.mxu0 %vm331_vm3, %v6938_v53  ;;  %v11343_v53 = vld [vmem:[#allocation14_spill] sm:$0xff] }
 0x707   :  { %v1130_v10 = vsub.f32 %v6667_v48, %v11343_v53 }
 0x709   :  { %v1150_v22 = vmul.f32 %v6868_v1, %v1130_v10 }
 0x70b   :  { %v6970_v7 = vadd.f32 %v1150_v22, %v11343_v53 }
 0x70d   :  { %11344 = vst [vmem:[#allocation21_spill] sm:$0xff] %v6970_v7 }
 0x70e   :  { %5190 = vmatmul.msk.f32.gmra.mxu0 %vm331_vm3, %v6946_v19  ;;  %v11345_v19 = vld [vmem:[#allocation13_spill] sm:$0xff] }
 0x70f   :  { %v1131_v14 = vsub.f32 %v6662_v55, %v11345_v19 }
 0x711   :  { %v1151_v16 = vmul.f32 %v6868_v1, %v1131_v14 }
 0x713   :  { %v6978_v29 = vadd.f32 %v1151_v16, %v11345_v19 }
 0x715   :  { %11346 = vst [vmem:[#allocation20_spill] sm:$0xff] %v6978_v29 }
 0x716   :  { %5191 = vmatmul.msk.f32.gmra.mxu0 %vm331_vm3, %v6954_v61  ;;  %v11347_v61 = vld [vmem:[#allocation12_spill] sm:$0xff] }
 0x717   :  { %v1132_v0 = vsub.f32 %v6657_v27, %v11347_v61 }
 0x719   :  { %v1152_v10 = vmul.f32 %v6868_v1, %v1132_v0 }
 0x71b   :  { %v6986_v22 = vadd.f32 %v1152_v10, %v11347_v61 }
 0x71d   :  { %11348 = vst [vmem:[#allocation19_spill] sm:$0xff] %v6986_v22 }
 0x71e   :  { %5192 = vmatmul.msk.f32.gmra.mxu0 %vm331_vm3, %v6962_v28  ;;  %v11349_v28 = vld [vmem:[#allocation11_spill] sm:$0xff] }
 0x71f   :  { %v1133_v55 = vsub.f32 %v6652_v58, %v11349_v28  ;;  %v601_v58 = vperm.slane %v6466_v54, 0 }
 0x721   :  { %v1153_v14 = vmul.f32 %v6868_v1, %v1133_v55 }
 0x723   :  { %v6994_v16 = vadd.f32 %v1153_v14, %v11349_v28  ;;  %v7008_v14 = vadd.f32 %v6863_v26, %v601_v58 }
 0x725   :  { %11350 = vst [vmem:[#allocation18_spill] sm:$0xff] %v6994_v16 }
 0x726   :  { %5193 = vmatmul.msk.f32.gmra.mxu0 %vm331_vm3, %v6970_v7  ;;  %v11351_v7 = vld [vmem:[#allocation10_spill] sm:$0xff]  ;;  %11353 = vst [vmem:[#allocation48_spill] sm:$0xff] %v7008_v14 }
 0x727   :  { %v1134_v27 = vsub.f32 %v6647_v52, %v11351_v7 }
 0x729   :  { %v1154_v0 = vmul.f32 %v6868_v1, %v1134_v27 }
 0x72e   :  { %5194 = vmatmul.msk.f32.gmra.mxu0 %vm331_vm3, %v6978_v29  ;;  %v7002_v29 = vadd.f32 %v1154_v0, %v11351_v7 }
 0x730   :  { %11352 = vst [vmem:[#allocation17_spill] sm:$0xff] %v7002_v29 }
 0x736   :  { %5195 = vmatmul.msk.f32.gmra.mxu0 %vm331_vm3, %v6986_v22  ;;  %v11354_v22 = vld [vmem:[#allocation35_spill] sm:$0xff] }
 0x73e   :  { %5196 = vmatmul.msk.f32.gmra.mxu0 %vm331_vm3, %v6994_v16 }
 0x743   :  { %v1057_v10 = vpop.f32.mrf.mxu0 }
 0x746   :  { %5197 = vmatmul.msk.f32.gmra.mxu0 %vm331_vm3, %v7002_v29 }
 0x749   :  { %v1037_v55 = vpop.f32.mrf.mxu3 }
 0x74a   :  { %v1038_v52 = vadd.f32 %v1037_v55, %v11354_v22 }
 0x74b   :  { %v1280_v48 = vpop.f32.mrf.mxu0 }
 0x74c   :  { %v1060_v16 = vadd.f32 %v1038_v52, %v7008_v14  ;;  %v11355_v52 = vperm.slane %v6466_v54, 1  ;;  %v11357_v14 = vld [vmem:[#allocation36_spill] sm:$0xff] }
 0x74d   :  { %v1058_v22 = vadd.f32 %v1057_v10, %v11357_v14 }
 0x74e   :  { %v5180_v47 = vmul.f32 -1.442695, %v1060_v16 }
 0x750   :  { %5504 = vpow2.f32 %v5180_v47  ;;  %v7015_v47 = vadd.f32 %v6853_v51, %v11355_v52 }
 0x752   :  { %11356 = vst [vmem:[#allocation49_spill] sm:$0xff] %v7015_v47 }
 0x753   :  { %v1283_v27 = vpop.f32.mrf.mxu0 }
 0x756   :  { %v5505_v1 = vpop.eup %5504 }
 0x757   :  { %v1064_v0 = vadd.f32 1.0, %v5505_v1 }
 0x759   :  { %5506 = vrcp.f32 %v1064_v0  ;;  %v1076_v29 = vand.u32 2147483648, %v1064_v0  ;;  %v1074_v58 = vand.u32 2147483647, %v1064_v0  ;;  %vm1070_vm4 = vweird.f32 %v1064_v0 }
 0x75b   :  { %v1286_v46 = vpop.f32.mrf.mxu0  ;;  %v1077_v55 = vor.u32 1.1754944e-38, %v1076_v29  ;;  %vm1075_vm6 = vcmp.eq.f32.partialorder %v1074_v58, 8.507059e+37 }
 0x75f   :  { %v5507_v39 = vpop.eup %5506 }
 0x760   :  { %v1066_v7 = vmul.f32 %v5507_v39, %v1064_v0  ;;  %vm1071_vm2 = vweird.f32 %v5507_v39 }
 0x761   :  { %vm1072_vm5 = vmor %vm1070_vm4, %vm1071_vm2 }
 0x762   :  { %v1067_v28 = vsub.f32 1.0, %v1066_v7 }
 0x763   :  { %v1289_v61 = vpop.f32.mrf.mxu0 }
 0x764   :  { %v1068_v19 = vmul.f32 %v5507_v39, %v1067_v28 }
 0x766   :  { %v1069_v26 = vadd.f32 %v5507_v39, %v1068_v19 }
 0x768   :  { %v1073_v16 = vsel %vm1072_vm5, %v5507_v39, %v1069_v26 }
 0x769   :  { %v1078_v1 = vsel %vm1075_vm6, %v1077_v55, %v1073_v16 }
 0x76a   :  { %v1080_v7 = vmul.f32 %v1078_v1, %v7015_v47  ;;  %v1089_v16 = vmul.f32 %v1078_v1, %v6478_v3 }
 0x76b   :  { %v1292_v53 = vpop.f32.mrf.mxu0 }
 0x76c   :  { %v1081_v28 = vadd.f32 %v1080_v7, %v1058_v22  ;;  %v1083_v22 = vsub.f32 1.0, %v1078_v1 }
 0x76e   :  { %5508 = vtanh.f32 %v1081_v28 }
 0x773   :  { %v1295_v57 = vpop.f32.mrf.mxu0 }
 0x774   :  { %v5509_v19 = vpop.eup %5508 }
 0x775   :  { %1085 = vrot.lane.b32.xlu0 %v5509_v19, %s5840_s11 }
 0x77b   :  { %v1298_v29 = vpop.f32.mrf.mxu0 }
 0x783   :  { %v1301_v0 = vpop.f32.mrf.mxu0 }
 0x78b   :  { %v1304_v54 = vpop.f32.mrf.mxu0 }
 0x793   :  { %v1307_v23 = vpop.f32.mrf.mxu0 }
 0x79b   :  { %v1310_v51 = vpop.f32.mrf.mxu0 }
 0x7a3   :  { %v1313_v52 = vpop.f32.mrf.mxu0 }
 0x7ab   :  { %v1316_v58 = vpop.f32.mrf.mxu0 }
 0x7b3   :  { %v1319_v39 = vpop.f32.mrf.mxu0 }
 0x7bb   :  { %v1322_v26 = vpop.f32.mrf.mxu0 }
 0x7c3   :  { %v1325_v55 = vpop.f32.mrf.mxu0 }
 0x7c4   :  { %1328 = vmatpush.msrb.mxu2 %v1325_v55 }
 0x7c6   :  { %1329 = vmatpush.msrb.mxu2 %v1322_v26 }
 0x7c8   :  { %1330 = vmatpush.msrb.mxu2 %v1319_v39 }
 0x7ca   :  { %1331 = vmatpush.msrb.mxu2 %v1316_v58 }
 0x7cc   :  { %1332 = vmatpush.msrb.mxu2 %v1313_v52 }
 0x7ce   :  { %1333 = vmatpush.msrb.mxu2 %v1310_v51 }
 0x7d0   :  { %1334 = vmatpush.msrb.mxu2 %v1307_v23 }
 0x7d2   :  { %1335 = vmatpush.msrb.mxu2 %v1304_v54 }
 0x7d4   :  { %1336 = vmatpush.msrb.mxu2 %v1301_v0 }
 0x7d6   :  { %1337 = vmatpush.msrb.mxu2 %v1298_v29 }
 0x7d8   :  { %1338 = vmatpush.msrb.mxu2 %v1295_v57 }
 0x7da   :  { %1339 = vmatpush.msrb.mxu2 %v1292_v53 }
 0x7dc   :  { %1340 = vmatpush.msrb.mxu2 %v1289_v61 }
 0x7de   :  { %1341 = vmatpush.msrb.mxu2 %v1286_v46 }
 0x7e0   :  { %1342 = vmatpush.msrb.mxu2 %v1283_v27 }
 0x7e2   :  { %1343 = vmatpush.msrb.mxu2 %v1280_v48 }
 0x7e3   :  { %1344 = vmatmul.f32.vlgmr.msrb.gmra.mxu2 %v6850_v6 }
 0x7e7   :  { %v1086_v10 = vpop.permute.xlu0 %1085 }
 0x7e8   :  { %v1088_v7 = vmul.f32 %v1086_v10, %v1083_v22 }
 0x7ea   :  { %v1090_v28 = vadd.f32 %v1089_v16, %v1088_v7 }
 0x7eb   :  { %1347 = vmatmul.f32.gmra.mxu2 %v6844_v62 }
 0x7ec   :  { %v1091_v23 = vmul.f32 %v1090_v28, %v6612_v44 }
 0x7ee   :  { %1093 = vrot.lane.b32.xlu1 %v1091_v23, %s5840_s11 }
 0x7f3   :  { %1350 = vmatmul.f32.gmra.mxu2 %v6838_v24 }
 0x7fb   :  { %1353 = vmatmul.f32.gmra.mxu2 %v6832_v50 }
 0x803   :  { %1356 = vmatmul.f32.gmra.mxu2 %v6826_v43 }
 0x80b   :  { %1359 = vmatmul.f32.gmra.mxu2 %v6820_v40 }
 0x813   :  { %1362 = vmatmul.f32.gmra.mxu2 %v6814_v33 }
 0x81b   :  { %1365 = vmatmul.f32.gmra.mxu2 %v6808_v41 }
 0x823   :  { %1368 = vmatmul.f32.gmra.mxu2 %v6802_v4 }
 0x82b   :  { %1371 = vmatmul.f32.gmra.mxu2 %v6796_v38 }
 0x833   :  { %1374 = vmatmul.f32.gmra.mxu2 %v6790_v63 }
 0x83b   :  { %1377 = vmatmul.f32.gmra.mxu2 %v6784_v36 }
 0x843   :  { %1380 = vmatmul.f32.gmra.mxu2 %v6778_v35 }
 0x84b   :  { %1383 = vmatmul.f32.gmra.mxu2 %v6772_v21 }
 0x853   :  { %1386 = vmatmul.f32.gmra.mxu2 %v6766_v56 }
 0x85b   :  { %1389 = vmatmul.f32.gmra.mxu2 %v6760_v2 }
 0x860   :  { %v1094_v48 = vpop.permute.xlu1 %1093 }
 0x861   :  { %v1096_v46 = vsel %vm549_vm9, %v1094_v48, 0.0 }
 0x862   :  { %1097 = vadd.xlane.f32.xlu0 %v1096_v46 }
 0x866   :  { %v7040_v57 = vpop.f32.mrf.mxu2 }
 0x86e   :  { %v7042_v53 = vpop.f32.mrf.mxu2 }
 0x876   :  { %v7044_v61 = vpop.f32.mrf.mxu2 }
 0x87e   :  { %v7046_v27 = vpop.f32.mrf.mxu2 }
 0x886   :  { %v7048_v1 = vpop.f32.mrf.mxu2 }
 0x88e   :  { %v7050_v19 = vpop.f32.mrf.mxu2 }
 0x896   :  { %v7052_v29 = vpop.f32.mrf.mxu2 }
 0x89e   :  { %v7054_v0 = vpop.f32.mrf.mxu2 }
 0x8a6   :  { %v1369_v54 = vpop.f32.mrf.mxu2 }
 0x8ae   :  { %v1372_v51 = vpop.f32.mrf.mxu2 }
 0x8b6   :  { %v1375_v52 = vpop.f32.mrf.mxu2 }
 0x8be   :  { %v1378_v58 = vpop.f32.mrf.mxu2 }
 0x8c6   :  { %v1381_v39 = vpop.f32.mrf.mxu2 }
 0x8ce   :  { %v1384_v26 = vpop.f32.mrf.mxu2 }
 0x8cf   :  { %v1385_v3 = vadd.f32 %v6642_v60, %v1384_v26  ;;  %v1379_v26 = vadd.f32 %v6642_v60, %v1378_v58 }
 0x8d1   :  { %vm1406_vm10 = vcmp.ge.f32.partialorder %v1385_v3, 0.0  ;;  %vm1404_vm13 = vcmp.ge.f32.partialorder %v1379_v26, 0.0 }
 0x8d5   :  { %v1098_v55 = vpop.xlane.xlu0 %1097 }
 0x8d6   :  { %v1099_v22 = vadd.f32 %v1098_v55, %v6737_v45  ;;  %v1387_v10 = vpop.f32.mrf.mxu2  ;;  %v1382_v45 = vadd.f32 %v6642_v60, %v1381_v39  ;;  %v1422_v55 = vmul.f32 0.01, %v1385_v3 }
 0x8d7   :  { %v1388_v28 = vadd.f32 %v6642_v60, %v1387_v10 }
 0x8d8   :  { %v5181_v16 = vmul.f32 -1.442695, %v1099_v22  ;;  %vm1405_vm11 = vcmp.ge.f32.partialorder %v1382_v45, 0.0 }
 0x8d9   :  { %v1423_v47 = vmul.f32 0.01, %v1388_v28  ;;  %vm1407_vm8 = vcmp.ge.f32.partialorder %v1388_v28, 0.0 }
 0x8da   :  { %5510 = vpow2.f32 %v5181_v16 }
 0x8db   :  { %v7065_v22 = vsel %vm1407_vm8, %v1388_v28, %v1423_v47  ;;  %v1376_v28 = vadd.f32 %v6642_v60, %v1375_v52 }
 0x8dc   :  { %11359 = vst [vmem:[#allocation51_spill] sm:$0xff] %v7065_v22 }
 0x8dd   :  { %vm1403_vm1 = vcmp.ge.f32.partialorder %v1376_v28, 0.0 }
 0x8de   :  { %v1390_v7 = vpop.f32.mrf.mxu2 }
 0x8df   :  { %v1391_v23 = vadd.f32 %v6642_v60, %v1390_v7  ;;  %v1421_v7 = vmul.f32 0.01, %v1382_v45 }
 0x8e0   :  { %v5511_v48 = vpop.eup %5510 }
 0x8e1   :  { %v1103_v46 = vadd.f32 1.0, %v5511_v48  ;;  %vm1408_vm7 = vcmp.ge.f32.partialorder %v1391_v23, 0.0  ;;  %v1424_v44 = vmul.f32 0.01, %v1391_v23 }
 0x8e3   :  { %5512 = vrcp.f32 %v1103_v46  ;;  %v7060_v14 = vsel %vm1408_vm7, %v1391_v23, %v1424_v44  ;;  %v7070_v44 = vsel %vm1406_vm10, %v1385_v3, %v1422_v55  ;;  %v1115_v39 = vand.u32 2147483648, %v1103_v46 }
 0x8e4   :  { %11358 = vst [vmem:[#allocation50_spill] sm:$0xff] %v7060_v14  ;;  %5198 = vmatpush.xpose.msk.msra.mxu1 %vm331_vm3, %v7060_v14  ;;  %v1113_v47 = vand.u32 2147483647, %v1103_v46  ;;  %v1420_v14 = vmul.f32 0.01, %v1379_v26  ;;  %vm1109_vm14 = vweird.f32 %v1103_v46 }
 0x8e5   :  { %11360 = vst [vmem:[#allocation52_spill] sm:$0xff] %v7070_v44  ;;  %v1116_v58 = vor.u32 1.1754944e-38, %v1115_v39 }
 0x8e6   :  { %vm1114_vm0 = vcmp.eq.f32.partialorder %v1113_v47, 8.507059e+37 }
 0x8e8   :  { %5199 = vmatpush.xpose.msk.msra.mxu1 %vm331_vm3, %v7065_v22  ;;  %v7075_v22 = vsel %vm1405_vm11, %v1382_v45, %v1421_v7  ;;  %v1370_v45 = vadd.f32 %v6642_v60, %v1369_v54  ;;  %v1364_v54 = vadd.f32 %v6642_v60, %v7052_v29  ;;  %v1358_v29 = vadd.f32 %v6642_v60, %v7048_v1 }
 0x8e9   :  { %v5513_v10 = vpop.eup %5512  ;;  %v1352_v1 = vadd.f32 %v6642_v60, %v7044_v61  ;;  %v1346_v61 = vadd.f32 %v6642_v60, %v7040_v57  ;;  %v7166_v57 = vld [vmem:[%s10750_s6] sm:$0x1] }
 0x8ea   :  { %v1105_v16 = vmul.f32 %v5513_v10, %v1103_v46  ;;  %vm1110_vm12 = vweird.f32 %v5513_v10  ;;  %v1417_v7 = vmul.f32 0.01, %v1370_v45  ;;  %vm1401_vm5 = vcmp.ge.f32.partialorder %v1370_v45, 0.0  ;;  %11362 = vst [vmem:[#allocation54_spill] sm:$0xff] %v7166_v57 }
 0x8eb   :  { %vm1111_vm15 = vmor %vm1109_vm14, %vm1110_vm12  ;;  %vm1399_vm7 = vcmp.ge.f32.partialorder %v1364_v54, 0.0  ;;  %vm1397_vm10 = vcmp.ge.f32.partialorder %v1358_v29, 0.0  ;;  %vm1395_vm12 = vcmp.ge.f32.partialorder %v1352_v1, 0.0  ;;  %vm1393_vm14 = vcmp.ge.f32.partialorder %v1346_v61, 0.0 }
 0x8ec   :  { %5200 = vmatpush.xpose.msk.msra.mxu1 %vm331_vm3, %v7070_v44  ;;  %v1106_v23 = vsub.f32 1.0, %v1105_v16  ;;  %v1373_v16 = vadd.f32 %v6642_v60, %v1372_v51  ;;  %v7080_v44 = vsel %vm1404_vm13, %v1379_v26, %v1420_v14  ;;  %v1367_v26 = vadd.f32 %v6642_v60, %v7054_v0 }
 0x8ed   :  { %v7109_v47 = vsel %vm1401_vm5, %v1370_v45, %v1417_v7  ;;  %v1361_v0 = vadd.f32 %v6642_v60, %v7050_v19  ;;  %v1355_v19 = vadd.f32 %v6642_v60, %v7046_v27  ;;  %v1349_v27 = vadd.f32 %v6642_v60, %v7042_v53  ;;  %v7160_v60 = vld [vmem:[%s10754_s10 + $0x78] sm:$0xff] }
 0x8ee   :  { %v1107_v48 = vmul.f32 %v5513_v10, %v1106_v23  ;;  %v1419_v23 = vmul.f32 0.01, %v1376_v28  ;;  %vm1402_vm4 = vcmp.ge.f32.partialorder %v1373_v16, 0.0  ;;  %vm1400_vm6 = vcmp.ge.f32.partialorder %v1367_v26, 0.0 }
 0x8ef   :  { %vm1398_vm8 = vcmp.ge.f32.partialorder %v1361_v0, 0.0  ;;  %vm1396_vm11 = vcmp.ge.f32.partialorder %v1355_v19, 0.0  ;;  %v1410_v7 = vmul.f32 0.01, %v1349_v27  ;;  %vm1394_vm13 = vcmp.ge.f32.partialorder %v1349_v27, 0.0 }
 0x8f0   :  { %5201 = vmatpush.xpose.msk.msra.mxu1 %vm331_vm3, %v7075_v22  ;;  %v1108_v3 = vadd.f32 %v5513_v10, %v1107_v48  ;;  %v7092_v51 = vsel %vm1403_vm1, %v1376_v28, %v1419_v23  ;;  %v1416_v48 = vmul.f32 0.01, %v1367_v26  ;;  %v1415_v28 = vmul.f32 0.01, %v1364_v54 }
 0x8f1   :  { %v7149_v53 = vsel %vm1394_vm13, %v1349_v27, %v1410_v7 }
 0x8f2   :  { %v1112_v55 = vsel %vm1111_vm15, %v5513_v10, %v1108_v3  ;;  %v1418_v10 = vmul.f32 0.01, %v1373_v16  ;;  %v7115_v3 = vsel %vm1400_vm6, %v1367_v26, %v1416_v48  ;;  %v1409_v48 = vmul.f32 0.01, %v1346_v61 }
 0x8f3   :  { %v7082_v6 = vsel %vm1114_vm0, %v1116_v58, %v1112_v55  ;;  %v1414_v58 = vmul.f32 0.01, %v1361_v0  ;;  %v7121_v55 = vsel %vm1399_vm7, %v1364_v54, %v1415_v28  ;;  %v719_v28 = vstv %s6865_s14 }
 0x8f4   :  { %5202 = vmatpush.xpose.msk.msra.mxu1 %vm331_vm3, %v7080_v44  ;;  %v1171_v52 = vmul.f32 %v7082_v6, %v6752_v34  ;;  %v7103_v39 = vsel %vm1402_vm4, %v1373_v16, %v1418_v10  ;;  %v1413_v16 = vmul.f32 0.01, %v1358_v29  ;;  %v1411_v10 = vmul.f32 0.01, %v1352_v1 }
 0x8f5   :  { %v7127_v23 = vsel %vm1398_vm8, %v1361_v0, %v1414_v58  ;;  %v7153_v0 = vsel %vm1393_vm14, %v1346_v61, %v1409_v48  ;;  %v721_v58 = vmul.f32 %v719_v28, %v11321_v11  ;;  %v725_v27 = vmul.f32 %v719_v28, %v11329_v8  ;;  %v7186_v61 = vld [vmem:[%s10754_s10 + $0x68] sm:$0xff] }
 0x8f6   :  { %5447 = vpush %v1171_v52  ;;  %v7089_v46 = vadd.f32 %v1171_v52, %v6748_v31  ;;  %v1412_v52 = vmul.f32 0.01, %v1355_v19  ;;  %v7133_v45 = vsel %vm1397_vm10, %v1358_v29, %v1413_v16  ;;  %v7145_v54 = vsel %vm1395_vm12, %v1352_v1, %v1411_v10  ;;  %v7174_v29 = vld [vmem:[%s10754_s10 + $0x70] sm:$0xff] }
 0x8f7   :  { %11363 = vst [vmem:[#allocation55_spill] sm:$0xff] %v7174_v29  ;;  %v723_v16 = vmul.f32 %v719_v28, %v11325_v9  ;;  %v726_v10 = vmul.f32 %v719_v28, %v11331_v20  ;;  %v727_v20 = vmul.f32 %v719_v28, %v11333_v13  ;;  %v728_v13 = vmul.f32 %v719_v28, %v11335_v25  ;;  %v11381_v25 = vld [vmem:[#allocation46_spill] sm:$0xff] }
 0x8f8   :  { %vm1213_vm2 = vcmp.lt.f32.partialorder %v7089_v46, 0.999  ;;  %5203 = vmatpush.xpose.msk.msra.mxu1 %vm331_vm3, %v7092_v51  ;;  %v7139_v26 = vsel %vm1396_vm11, %v1355_v19, %v1412_v52  ;;  %v722_v19 = vmul.f32 %v719_v28, %v11323_v17  ;;  %v724_v52 = vmul.f32 %v719_v28, %v11327_v32  ;;  %11364 = vst [vmem:[#allocation56_spill] sm:$0xff] %v7186_v61 }
 0x8f9   :  { %v7098_v14 = vsel %vm1213_vm2, %v6752_v34, 0.0 }
 0x8fa   :  { %11361 = vst [vmem:[#allocation53_spill] sm:$0xff] %v7098_v14 }
 0x8fb   :  { %5449 = vpush %v7098_v14 }
 0x8fc   :  { %5204 = vmatpush.xpose.msk.msra.mxu1 %vm331_vm3, %v7103_v39 }
 0x900   :  { %5205 = vmatpush.xpose.msk.msra.mxu1 %vm331_vm3, %v7109_v47 }
 0x904   :  { %5206 = vmatpush.xpose.msk.msra.mxu1 %vm331_vm3, %v7115_v3 }
 0x908   :  { %5207 = vmatpush.xpose.msk.msra.mxu1 %vm331_vm3, %v7121_v55 }
 0x90c   :  { %5208 = vmatpush.xpose.msk.msra.mxu1 %vm331_vm3, %v7127_v23 }
 0x910   :  { %5209 = vmatpush.xpose.msk.msra.mxu1 %vm331_vm3, %v7133_v45 }
 0x914   :  { %5210 = vmatpush.xpose.msk.msra.mxu1 %vm331_vm3, %v7139_v26 }
 0x918   :  { %5211 = vmatpush.xpose.msk.msra.mxu1 %vm331_vm3, %v7145_v54 }
 0x91c   :  { %5212 = vmatpush.xpose.msk.msra.mxu1 %vm331_vm3, %v7149_v53 }
 0x920   :  { %5213 = vmatpush.xpose.msk.msra.mxu1 %vm331_vm3, %v7153_v0 }
 0x923   :  { %5214 = vmatmul.msk.f32.vlgmr.msra.gmra.mxu1 %vm331_vm3, %v7166_v57 }
 0x924   :  { %1532 = vmatpush.xpose.msrb.mxu1 %v7160_v60 }
 0x927   :  { %s5448_s19 = spop %5447 }
 0x928   :  { %1533 = vmatpush.xpose.msrb.mxu1 %v7174_v29  ;;  %v1174_v1 = vstv %s5448_s19 }
 0x929   :  { %v1176_v11 = vmul.f32 %v1174_v1, %v6725_v42  ;;  %v1177_v17 = vmul.f32 %v1174_v1, %v6721_v59  ;;  %v1178_v9 = vmul.f32 %v1174_v1, %v6717_v49  ;;  %v1179_v7 = vmul.f32 %v1174_v1, %v6711_v5 }
 0x92a   :  { %v1180_v32 = vmul.f32 %v1174_v1, %v6705_v18  ;;  %v1181_v8 = vmul.f32 %v1174_v1, %v6699_v30  ;;  %v1182_v48 = vmul.f32 %v1174_v1, %v6693_v12  ;;  %v7214_v30 = vld [vmem:[%s10754_s10 + $0x60] sm:$0xff]  ;;  %v7220_v12 = vld [vmem:[%s10754_s10 + $0x58] sm:$0xff]  ;;  %v1183_v18 = vmul.f32 %v1174_v1, %v6687_v37  ;;  %v7236_v37 = vld [vmem:[%s10754_s10 + $0x50] sm:$0xff] }
 0x92b   :  { %v7197_v29 = vadd.f32 %v1176_v11, %v721_v58  ;;  %v7199_v57 = vadd.f32 %v1177_v17, %v722_v19  ;;  %v7203_v42 = vadd.f32 %v1179_v7, %v724_v52  ;;  %11371 = vst [vmem:[#allocation63_spill] sm:$0xff] %v7214_v30  ;;  %v729_v58 = vmul.f32 %v719_v28, %v11337_v15  ;;  %v11373_v19 = vld [vmem:[#allocation16_spill] sm:$0xff]  ;;  %v11374_v52 = vld [vmem:[#allocation15_spill] sm:$0xff]  ;;  %v11376_v17 = vld [vmem:[#allocation13_spill] sm:$0xff] }
 0x92c   :  { %1534 = vmatpush.xpose.msrb.mxu1 %v7186_v61  ;;  %v7201_v61 = vadd.f32 %v1178_v9, %v723_v16  ;;  %v7205_v59 = vadd.f32 %v1180_v32, %v725_v27  ;;  %v7207_v49 = vadd.f32 %v1181_v8, %v726_v10  ;;  %v7209_v5 = vadd.f32 %v1182_v48, %v727_v20  ;;  %v11375_v10 = vld [vmem:[#allocation14_spill] sm:$0xff]  ;;  %v11377_v7 = vld [vmem:[#allocation12_spill] sm:$0xff]  ;;  %v11378_v8 = vld [vmem:[#allocation11_spill] sm:$0xff]  ;;  %s5450_s7 = spop %5449 }
 0x92d   :  { %11365 = vst [vmem:[#allocation57_spill] sm:$0xff] %v7199_v57  ;;  %v730_v16 = vmul.f32 %v719_v28, %v11373_v19  ;;  %v731_v27 = vmul.f32 %v719_v28, %v11374_v52  ;;  %v732_v11 = vmul.f32 %v719_v28, %v11375_v10  ;;  %v733_v9 = vmul.f32 %v719_v28, %v11376_v17  ;;  %v11379_v48 = vld [vmem:[#allocation10_spill] sm:$0xff]  ;;  %v11382_v52 = vld [vmem:[#allocation45_spill] sm:$0xff]  ;;  %v11383_v17 = vld [vmem:[#allocation44_spill] sm:$0xff] }
 0x92e   :  { %11366 = vst [vmem:[#allocation58_spill] sm:$0xff] %v7201_v61  ;;  %v734_v32 = vmul.f32 %v719_v28, %v11377_v7  ;;  %v735_v20 = vmul.f32 %v719_v28, %v11378_v8  ;;  %v7239_v15 = vadd.f32 %v1183_v18, %v728_v13  ;;  %v1184_v19 = vmul.f32 %v1174_v1, %v11381_v25  ;;  %v11384_v7 = vld [vmem:[#allocation43_spill] sm:$0xff]  ;;  %v11385_v8 = vld [vmem:[#allocation42_spill] sm:$0xff] }
 0x92f   :  { %11367 = vst [vmem:[#allocation59_spill] sm:$0xff] %v7203_v42  ;;  %v1185_v10 = vmul.f32 %v1174_v1, %v11382_v52  ;;  %v11388_v13 = vld [vmem:[#allocation39_spill] sm:$0xff] }
 0x930   :  { %11368 = vst [vmem:[#allocation60_spill] sm:$0xff] %v7205_v59  ;;  %1535 = vmatpush.xpose.msrb.mxu1 %v7214_v30  ;;  %v1186_v30 = vmul.f32 %v1174_v1, %v11383_v17  ;;  %v11387_v59 = vld [vmem:[#allocation40_spill] sm:$0xff]  ;;  %v7248_v61 = vadd.f32 %v1184_v19, %v729_v58  ;;  %v1191_v25 = vmul.f32 %v1174_v1, %v11388_v13  ;;  %v7346_v19 = vld [vmem:[%s10748_s4 + $0x20] sm:$0xff] }
 0x931   :  { %11369 = vst [vmem:[#allocation61_spill] sm:$0xff] %v7207_v49  ;;  %v1188_v49 = vmul.f32 %v1174_v1, %v11385_v8  ;;  %v1190_v42 = vmul.f32 %v1174_v1, %v11387_v59  ;;  %v7250_v57 = vadd.f32 %v1185_v10, %v730_v16  ;;  %v7266_v59 = vld [vmem:[%s10754_s10 + $0x48] sm:$0xff]  ;;  %v7310_v16 = vld [vmem:[%s10754_s10 + $0x10] sm:$0xff]  ;;  %v7352_v10 = vld [vmem:[%s10748_s4 + $0x18] sm:$0xff] }
 0x932   :  { %11370 = vst [vmem:[#allocation62_spill] sm:$0xff] %v7209_v5  ;;  %v1187_v5 = vmul.f32 %v1174_v1, %v11384_v7  ;;  %v7252_v18 = vadd.f32 %v1186_v30, %v731_v27  ;;  %v7298_v30 = vld [vmem:[%s10754_s10 + $0x20] sm:$0xff]  ;;  %v7316_v27 = vld [vmem:[%s10754_s10 + $0x8] sm:$0xff]  ;;  %v7358_v8 = vld [vmem:[%s10748_s4 + $0x10] sm:$0xff] }
 0x933   :  { %11372 = vst [vmem:[#allocation64_spill] sm:$0xff] %v7220_v12  ;;  %v7257_v52 = vadd.f32 %v1188_v49, %v733_v9  ;;  %v7261_v7 = vadd.f32 %v1190_v42, %v735_v20  ;;  %v7280_v42 = vld [vmem:[%s10754_s10 + $0x38] sm:$0xff]  ;;  %v7286_v49 = vld [vmem:[%s10754_s10 + $0x30] sm:$0xff]  ;;  %v7340_v20 = vld [vmem:[%s10748_s4 + $0x28] sm:$0xff] }
 0x934   :  { %1536 = vmatpush.xpose.msrb.mxu1 %v7220_v12  ;;  %v736_v12 = vmul.f32 %v719_v28, %v11379_v48  ;;  %11380 = vst [vmem:[#allocation16_spill] sm:$0xff] %v7239_v15  ;;  %v11386_v28 = vld [vmem:[#allocation41_spill] sm:$0xff]  ;;  %v7255_v15 = vadd.f32 %v1187_v5, %v732_v11  ;;  %v7292_v5 = vld [vmem:[%s10754_s10 + $0x28] sm:$0xff] }
 0x935   :  { %v1189_v48 = vmul.f32 %v1174_v1, %v11386_v28  ;;  %v7274_v1 = vld [vmem:[%s10754_s10 + $0x40] sm:$0xff]  ;;  %11389 = vst [vmem:[#allocation15_spill] sm:$0xff] %v7280_v42  ;;  %v7328_v9 = vld [vmem:[%s10748_s4 + $0x38] sm:$0xff]  ;;  %v7364_v28 = vld [vmem:[%s10748_s4 + $0x8] sm:$0xff] }
 0x936   :  { %v7269_v58 = vadd.f32 %v1191_v25, %v736_v12  ;;  %11390 = vst [vmem:[#allocation14_spill] sm:$0xff] %v7286_v49  ;;  %v7304_v12 = vld [vmem:[%s10754_s10 + $0x18] sm:$0xff]  ;;  %v7322_v11 = vld [vmem:[%s10754_s10] sm:$0xff]  ;;  %v7417_v25 = vld [vmem:[%s10754_s10 + $0xa8] sm:$0xff] }
 0x937   :  { %v7259_v17 = vadd.f32 %v1189_v48, %v734_v32  ;;  %11391 = vst [vmem:[#allocation13_spill] sm:$0xff] %v7292_v5  ;;  %v7334_v32 = vld [vmem:[%s10748_s4 + $0x30] sm:$0xff]  ;;  %v7370_v48 = vld [vmem:[%s10748_s4] sm:$0xff] }
 0x938   :  { %1537 = vmatpush.xpose.msrb.mxu1 %v7236_v37  ;;  %11392 = vst [vmem:[#allocation12_spill] sm:$0xff] %v7298_v30 }
 0x939   :  { %11393 = vst [vmem:[#allocation11_spill] sm:$0xff] %v7304_v12 }
 0x93a   :  { %11394 = vst [vmem:[#allocation10_spill] sm:$0xff] %v7310_v16 }
 0x93b   :  { %11395 = vst [vmem:[#allocation46_spill] sm:$0xff] %v7316_v27 }
 0x93c   :  { %1538 = vmatpush.xpose.msrb.mxu1 %v7266_v59  ;;  %11396 = vst [vmem:[#allocation45_spill] sm:$0xff] %v7322_v11 }
 0x93d   :  { %11397 = vst [vmem:[#allocation44_spill] sm:$0xff] %v7328_v9 }
 0x93e   :  { %11398 = vst [vmem:[#allocation43_spill] sm:$0xff] %v7334_v32 }
 0x93f   :  { %11399 = vst [vmem:[#allocation42_spill] sm:$0xff] %v7340_v20 }
 0x940   :  { %1539 = vmatpush.xpose.msrb.mxu1 %v7274_v1  ;;  %11400 = vst [vmem:[#allocation41_spill] sm:$0xff] %v7346_v19 }
 0x941   :  { %11401 = vst [vmem:[#allocation40_spill] sm:$0xff] %v7352_v10 }
 0x942   :  { %11402 = vst [vmem:[#allocation39_spill] sm:$0xff] %v7358_v8 }
 0x943   :  { %11403 = vst [vmem:[#allocation65_spill] sm:$0xff] %v7364_v28 }
 0x944   :  { %1540 = vmatpush.xpose.msrb.mxu1 %v7280_v42  ;;  %11404 = vst [vmem:[#allocation66_spill] sm:$0xff] %v7370_v48 }
 0x948   :  { %1541 = vmatpush.xpose.msrb.mxu1 %v7286_v49 }
 0x94c   :  { %1542 = vmatpush.xpose.msrb.mxu1 %v7292_v5 }
 0x950   :  { %1543 = vmatpush.xpose.msrb.mxu1 %v7298_v30 }
 0x954   :  { %1544 = vmatpush.xpose.msrb.mxu1 %v7304_v12 }
 0x958   :  { %1545 = vmatpush.xpose.msrb.mxu1 %v7310_v16 }
 0x95c   :  { %1546 = vmatpush.xpose.msrb.mxu1 %v7316_v27 }
 0x960   :  { %1547 = vmatpush.xpose.msrb.mxu1 %v7322_v11 }
 0x964   :  { %1783 = vmatpush.msra.mxu1 %v7328_v9 }
 0x966   :  { %1784 = vmatpush.msra.mxu1 %v7334_v32 }
 0x968   :  { %1785 = vmatpush.msra.mxu1 %v7340_v20 }
 0x96a   :  { %1786 = vmatpush.msra.mxu1 %v7346_v19  ;;  %v11453_v19 = vld [vmem:[#allocation49_spill] sm:$0xff] }
 0x96c   :  { %1787 = vmatpush.msra.mxu1 %v7352_v10 }
 0x96e   :  { %1788 = vmatpush.msra.mxu1 %v7358_v8 }
 0x970   :  { %1789 = vmatpush.msra.mxu1 %v7364_v28 }
 0x972   :  { %1790 = vmatpush.msra.mxu1 %v7370_v48 }
 0x9a0   :  { %v1506_v13 = vpop.f32.mrf.mxu1 }
 0x9a1   :  { %1525 = vmatmul.f32.vlgmr.msra.gmra.mxu3 %v1506_v13 }
 0x9a2   :  { %2021 = vmatpush.xpose.msra.mxu3 %v6760_v2  ;;  %v11405_v2 = vld [vmem:[#allocation26_spill] sm:$0xff] }
 0x9a6   :  { %2022 = vmatpush.xpose.msra.mxu3 %v6766_v56 }
 0x9aa   :  { %2023 = vmatpush.xpose.msra.mxu3 %v6772_v21  ;;  %v11406_v21 = vld [vmem:[#allocation34_spill] sm:$0xff] }
 0x9ae   :  { %2024 = vmatpush.xpose.msra.mxu3 %v6778_v35 }
 0x9b2   :  { %2025 = vmatpush.xpose.msra.mxu3 %v6784_v36 }
 0x9b6   :  { %2026 = vmatpush.xpose.msra.mxu3 %v6790_v63  ;;  %v7390_v63 = vstv %s5450_s7 }
 0x9ba   :  { %2027 = vmatpush.xpose.msra.mxu3 %v6796_v38 }
 0x9be   :  { %2028 = vmatpush.xpose.msra.mxu3 %v6802_v4  ;;  %v11407_v4 = vld [vmem:[#allocation27_spill] sm:$0xff] }
 0x9c2   :  { %2029 = vmatpush.xpose.msra.mxu3 %v6808_v41  ;;  %v1631_v41 = vsub.f32 %v7153_v0, %v11407_v4 }
 0x9c6   :  { %2030 = vmatpush.xpose.msra.mxu3 %v6814_v33  ;;  %v7397_v33 = vld [vmem:[%s10754_s10 + $0xb8] sm:$0xff] }
 0x9c7   :  { %11408 = vst [vmem:[#allocation26_spill] sm:$0xff] %v7397_v33 }
 0x9ca   :  { %2031 = vmatpush.xpose.msra.mxu3 %v6820_v40  ;;  %v1651_v40 = vmul.f32 %v7390_v63, %v1631_v41  ;;  %v7444_v41 = vld [vmem:[%s10754_s10 + $0x90] sm:$0xff] }
 0x9cb   :  { %11417 = vst [vmem:[#allocation70_spill] sm:$0xff] %v7444_v41 }
 0x9ce   :  { %2032 = vmatpush.xpose.msra.mxu3 %v6826_v43  ;;  %v7404_v43 = vld [vmem:[%s10754_s10 + $0xb0] sm:$0xff] }
 0x9cf   :  { %11409 = vst [vmem:[#allocation27_spill] sm:$0xff] %v7404_v43 }
 0x9d2   :  { %2033 = vmatpush.xpose.msra.mxu3 %v6832_v50  ;;  %v7408_v50 = vadd.f32 %v1651_v40, %v11407_v4 }
 0x9d4   :  { %11410 = vst [vmem:[#allocation67_spill] sm:$0xff] %v7408_v50 }
 0x9d6   :  { %2034 = vmatpush.xpose.msra.mxu3 %v6838_v24  ;;  %v11411_v24 = vld [vmem:[#allocation28_spill] sm:$0xff] }
 0x9d7   :  { %11412 = vst [vmem:[#allocation28_spill] sm:$0xff] %v7417_v25 }
 0x9da   :  { %2035 = vmatpush.xpose.msra.mxu3 %v6844_v62  ;;  %v1632_v62 = vsub.f32 %v7149_v53, %v11411_v24 }
 0x9dc   :  { %v1652_v13 = vmul.f32 %v7390_v63, %v1632_v62 }
 0x9de   :  { %2036 = vmatpush.xpose.msra.mxu3 %v11405_v2  ;;  %v7424_v2 = vld [vmem:[%s10754_s10 + $0xa0] sm:$0xff] }
 0x9df   :  { %11413 = vst [vmem:[#allocation68_spill] sm:$0xff] %v7424_v2 }
 0xa24   :  { %v1526_v56 = vpop.f32.mrf.mxu3 }
 0xa25   :  { %v1527_v35 = vadd.f32 %v1526_v56, %v11406_v21  ;;  %v7428_v56 = vadd.f32 %v1652_v13, %v11411_v24  ;;  %v11419_v24 = vld [vmem:[#allocation30_spill] sm:$0xff] }
 0xa26   :  { %v1634_v62 = vsub.f32 %v7139_v26, %v11419_v24  ;;  %v7457_v13 = vld [vmem:[%s10754_s10 + $0x88] sm:$0xff] }
 0xa27   :  { %vm1529_vm15 = vcmp.ge.f32.partialorder %v1527_v35, 0.0  ;;  %v1530_v36 = vmul.f32 0.01, %v1527_v35  ;;  %11414 = vst [vmem:[#allocation69_spill] sm:$0xff] %v7428_v56 }
 0xa28   :  { %11420 = vst [vmem:[#allocation30_spill] sm:$0xff] %v7457_v13 }
 0xa29   :  { %v1531_v38 = vsel %vm1529_vm15, %v1527_v35, %v1530_v36  ;;  %v11415_v35 = vld [vmem:[#allocation29_spill] sm:$0xff] }
 0xa2a   :  { %1548 = vmatmul.f32.vlgmr.msrb.gmra.mxu1 %v1531_v38  ;;  %1568 = vmatmul.f32.vlgmr.msrb.gmra.mxu3 %v1531_v38  ;;  %v1633_v36 = vsub.f32 %v7145_v54, %v11415_v35  ;;  %v7437_v38 = vld [vmem:[%s10754_s10 + $0x98] sm:$0xff] }
 0xa2b   :  { %2072 = vmatpush.xpose.msrb.mxu3 %v7397_v33  ;;  %11416 = vst [vmem:[#allocation29_spill] sm:$0xff] %v7437_v38 }
 0xa2c   :  { %v1653_v4 = vmul.f32 %v7390_v63, %v1633_v36  ;;  %v1654_v36 = vmul.f32 %v7390_v63, %v1634_v62 }
 0xa2e   :  { %v7448_v40 = vadd.f32 %v1653_v4, %v11415_v35  ;;  %v7464_v35 = vld [vmem:[%s10754_s10 + $0x80] sm:$0xff]  ;;  %v7468_v4 = vadd.f32 %v1654_v36, %v11419_v24 }
 0xa2f   :  { %2073 = vmatpush.xpose.msrb.mxu3 %v7404_v43  ;;  %11421 = vst [vmem:[#allocation72_spill] sm:$0xff] %v7464_v35 }
 0xa30   :  { %11418 = vst [vmem:[#allocation71_spill] sm:$0xff] %v7448_v40 }
 0xa31   :  { %11422 = vst [vmem:[#allocation73_spill] sm:$0xff] %v7468_v4 }
 0xa32   :  { %5217 = vmatmul.msk.f32.vlgmr.msra.gmra.mxu1 %vm331_vm3, %v7408_v50 }
 0xa33   :  { %2074 = vmatpush.xpose.msrb.mxu3 %v7417_v25 }
 0xa37   :  { %2075 = vmatpush.xpose.msrb.mxu3 %v7424_v2 }
 0xa3a   :  { %5218 = vmatmul.msk.f32.gmra.mxu1 %vm331_vm3, %v7428_v56 }
 0xa3b   :  { %2076 = vmatpush.xpose.msrb.mxu3 %v7437_v38 }
 0xa3f   :  { %2077 = vmatpush.xpose.msrb.mxu3 %v7444_v41  ;;  %v11423_v41 = vld [vmem:[#allocation31_spill] sm:$0xff] }
 0xa40   :  { %v1635_v38 = vsub.f32 %v7133_v45, %v11423_v41 }
 0xa42   :  { %5219 = vmatmul.msk.f32.gmra.mxu1 %vm331_vm3, %v7448_v40  ;;  %v11425_v40 = vld [vmem:[#allocation32_spill] sm:$0xff] }
 0xa43   :  { %2078 = vmatpush.xpose.msrb.mxu3 %v7457_v13  ;;  %v1655_v13 = vmul.f32 %v7390_v63, %v1635_v38  ;;  %v1636_v2 = vsub.f32 %v7127_v23, %v11425_v40 }
 0xa45   :  { %v7476_v62 = vadd.f32 %v1655_v13, %v11423_v41  ;;  %v1656_v24 = vmul.f32 %v7390_v63, %v1636_v2  ;;  %v11429_v13 = vld [vmem:[#allocation25_spill] sm:$0xff] }
 0xa47   :  { %2079 = vmatpush.xpose.msrb.mxu3 %v7464_v35  ;;  %11424 = vst [vmem:[#allocation31_spill] sm:$0xff] %v7476_v62  ;;  %v7484_v36 = vadd.f32 %v1656_v24, %v11425_v40  ;;  %v11427_v35 = vld [vmem:[#allocation33_spill] sm:$0xff]  ;;  %v11431_v24 = vld [vmem:[#allocation24_spill] sm:$0xff] }
 0xa48   :  { %v1637_v25 = vsub.f32 %v7121_v55, %v11427_v35 }
 0xa49   :  { %11426 = vst [vmem:[#allocation32_spill] sm:$0xff] %v7484_v36 }
 0xa4a   :  { %5220 = vmatmul.msk.f32.gmra.mxu1 %vm331_vm3, %v7468_v4  ;;  %v1657_v38 = vmul.f32 %v7390_v63, %v1637_v25  ;;  %v1638_v4 = vsub.f32 %v7115_v3, %v11429_v13 }
 0xa4c   :  { %v7492_v41 = vadd.f32 %v1657_v38, %v11427_v35  ;;  %v1658_v2 = vmul.f32 %v7390_v63, %v1638_v4  ;;  %v11433_v38 = vld [vmem:[#allocation23_spill] sm:$0xff] }
 0xa4e   :  { %11428 = vst [vmem:[#allocation33_spill] sm:$0xff] %v7492_v41  ;;  %v7500_v40 = vadd.f32 %v1658_v2, %v11429_v13  ;;  %v11435_v2 = vld [vmem:[#allocation22_spill] sm:$0xff] }
 0xa50   :  { %11430 = vst [vmem:[#allocation25_spill] sm:$0xff] %v7500_v40 }
 0xa52   :  { %5221 = vmatmul.msk.f32.gmra.mxu1 %vm331_vm3, %v7476_v62  ;;  %v1639_v62 = vsub.f32 %v7109_v47, %v11431_v24 }
 0xa54   :  { %v1659_v25 = vmul.f32 %v7390_v63, %v1639_v62 }
 0xa56   :  { %v7508_v35 = vadd.f32 %v1659_v25, %v11431_v24  ;;  %v11437_v25 = vld [vmem:[#allocation21_spill] sm:$0xff] }
 0xa58   :  { %11432 = vst [vmem:[#allocation24_spill] sm:$0xff] %v7508_v35 }
 0xa5a   :  { %5222 = vmatmul.msk.f32.gmra.mxu1 %vm331_vm3, %v7484_v36  ;;  %v1640_v36 = vsub.f32 %v7103_v39, %v11433_v38 }
 0xa5c   :  { %v1660_v4 = vmul.f32 %v7390_v63, %v1640_v36 }
 0xa5e   :  { %v7516_v13 = vadd.f32 %v1660_v4, %v11433_v38  ;;  %v11439_v4 = vld [vmem:[#allocation20_spill] sm:$0xff] }
 0xa60   :  { %11434 = vst [vmem:[#allocation23_spill] sm:$0xff] %v7516_v13 }
 0xa62   :  { %5223 = vmatmul.msk.f32.gmra.mxu1 %vm331_vm3, %v7492_v41  ;;  %v1641_v41 = vsub.f32 %v7092_v51, %v11435_v2 }
 0xa64   :  { %v1661_v62 = vmul.f32 %v7390_v63, %v1641_v41 }
 0xa66   :  { %v7524_v24 = vadd.f32 %v1661_v62, %v11435_v2  ;;  %v11441_v62 = vld [vmem:[#allocation19_spill] sm:$0xff] }
 0xa68   :  { %11436 = vst [vmem:[#allocation22_spill] sm:$0xff] %v7524_v24 }
 0xa6a   :  { %5224 = vmatmul.msk.f32.gmra.mxu1 %vm331_vm3, %v7500_v40  ;;  %v1642_v40 = vsub.f32 %v7080_v44, %v11437_v25 }
 0xa6c   :  { %v1662_v36 = vmul.f32 %v7390_v63, %v1642_v40 }
 0xa6e   :  { %v7532_v38 = vadd.f32 %v1662_v36, %v11437_v25  ;;  %v11444_v36 = vld [vmem:[#allocation18_spill] sm:$0xff] }
 0xa70   :  { %11438 = vst [vmem:[#allocation21_spill] sm:$0xff] %v7532_v38 }
 0xa72   :  { %5225 = vmatmul.msk.f32.gmra.mxu1 %vm331_vm3, %v7508_v35  ;;  %v1643_v35 = vsub.f32 %v7075_v22, %v11439_v4 }
 0xa74   :  { %v1663_v41 = vmul.f32 %v7390_v63, %v1643_v35 }
 0xa76   :  { %v7540_v2 = vadd.f32 %v1663_v41, %v11439_v4  ;;  %v11447_v41 = vld [vmem:[#allocation17_spill] sm:$0xff] }
 0xa78   :  { %11440 = vst [vmem:[#allocation20_spill] sm:$0xff] %v7540_v2 }
 0xa7a   :  { %5226 = vmatmul.msk.f32.gmra.mxu1 %vm331_vm3, %v7516_v13  ;;  %v11442_v13 = vld [vmem:[#allocation52_spill] sm:$0xff] }
 0xa7b   :  { %v1644_v56 = vsub.f32 %v11442_v13, %v11441_v62 }
 0xa7d   :  { %v1664_v40 = vmul.f32 %v7390_v63, %v1644_v56 }
 0xa7f   :  { %v7548_v25 = vadd.f32 %v1664_v40, %v11441_v62  ;;  %v11449_v40 = vld [vmem:[#allocation35_spill] sm:$0xff] }
 0xa81   :  { %11443 = vst [vmem:[#allocation19_spill] sm:$0xff] %v7548_v25 }
 0xa82   :  { %5227 = vmatmul.msk.f32.gmra.mxu1 %vm331_vm3, %v7524_v24  ;;  %v11445_v24 = vld [vmem:[#allocation51_spill] sm:$0xff] }
 0xa83   :  { %v1645_v43 = vsub.f32 %v11445_v24, %v11444_v36 }
 0xa85   :  { %v1665_v35 = vmul.f32 %v7390_v63, %v1645_v43 }
 0xa87   :  { %v7556_v4 = vadd.f32 %v1665_v35, %v11444_v36 }
 0xa89   :  { %11446 = vst [vmem:[#allocation52_spill] sm:$0xff] %v7556_v4 }
 0xa8a   :  { %5228 = vmatmul.msk.f32.gmra.mxu1 %vm331_vm3, %v7532_v38  ;;  %v11448_v38 = vld [vmem:[#allocation50_spill] sm:$0xff] }
 0xa8b   :  { %v1646_v33 = vsub.f32 %v11448_v38, %v11447_v41 }
 0xa8d   :  { %v1666_v56 = vmul.f32 %v7390_v63, %v1646_v33 }
 0xa8f   :  { %v7565_v50 = vadd.f32 %v1666_v56, %v11447_v41 }
 0xa91   :  { %11450 = vst [vmem:[#allocation18_spill] sm:$0xff] %v7565_v50 }
 0xa92   :  { %5229 = vmatmul.msk.f32.gmra.mxu1 %vm331_vm3, %v7540_v2 }
 0xa9a   :  { %5230 = vmatmul.msk.f32.gmra.mxu1 %vm331_vm3, %v7548_v25  ;;  %v11451_v25 = vld [vmem:[#allocation48_spill] sm:$0xff] }
 0xaa2   :  { %5231 = vmatmul.msk.f32.gmra.mxu1 %vm331_vm3, %v7556_v4 }
 0xaa7   :  { %v1549_v62 = vpop.f32.mrf.mxu1 }
 0xaa8   :  { %v1550_v2 = vadd.f32 %v1549_v62, %v11449_v40 }
 0xaaa   :  { %v1572_v21 = vadd.f32 %v1550_v2, %v11451_v25  ;;  %5232 = vmatmul.msk.f32.gmra.mxu1 %vm331_vm3, %v7565_v50 }
 0xaac   :  { %v5215_v43 = vmul.f32 -1.442695, %v1572_v21 }
 0xaad   :  { %v1569_v2 = vpop.f32.mrf.mxu3 }
 0xaae   :  { %5514 = vpow2.f32 %v5215_v43 }
 0xaaf   :  { %v1792_v36 = vpop.f32.mrf.mxu1 }
 0xab4   :  { %v5515_v35 = vpop.eup %5514 }
 0xab5   :  { %v1576_v48 = vadd.f32 1.0, %v5515_v35  ;;  %v11452_v35 = vld [vmem:[#allocation36_spill] sm:$0xff] }
 0xab6   :  { %v1570_v10 = vadd.f32 %v1569_v2, %v11452_v35 }
 0xab7   :  { %5516 = vrcp.f32 %v1576_v48  ;;  %v1795_v4 = vpop.f32.mrf.mxu1  ;;  %v1588_v62 = vand.u32 2147483648, %v1576_v48  ;;  %v1586_v41 = vand.u32 2147483647, %v1576_v48  ;;  %vm1582_vm1 = vweird.f32 %v1576_v48 }
 0xab9   :  { %v1589_v25 = vor.u32 1.1754944e-38, %v1588_v62  ;;  %vm1587_vm4 = vcmp.eq.f32.partialorder %v1586_v41, 8.507059e+37 }
 0xabd   :  { %v5517_v28 = vpop.eup %5516 }
 0xabe   :  { %v1578_v63 = vmul.f32 %v5517_v28, %v1576_v48  ;;  %vm1583_vm0 = vweird.f32 %v5517_v28 }
 0xabf   :  { %v1798_v33 = vpop.f32.mrf.mxu1  ;;  %vm1584_vm2 = vmor %vm1582_vm1, %vm1583_vm0 }
 0xac0   :  { %v1579_v8 = vsub.f32 1.0, %v1578_v63 }
 0xac2   :  { %v1580_v40 = vmul.f32 %v5517_v28, %v1579_v8 }
 0xac4   :  { %v1581_v56 = vadd.f32 %v5517_v28, %v1580_v40 }
 0xac6   :  { %v1585_v21 = vsel %vm1584_vm2, %v5517_v28, %v1581_v56 }
 0xac7   :  { %v1590_v43 = vsel %vm1587_vm4, %v1589_v25, %v1585_v21  ;;  %v1801_v50 = vpop.f32.mrf.mxu1 }
 0xac8   :  { %v1592_v20 = vmul.f32 %v1590_v43, %v11453_v19 }
 0xaca   :  { %v1593_v32 = vadd.f32 %v1592_v20, %v1570_v10  ;;  %v11454_v20 = vld [vmem:[#allocation37_spill] sm:$0xff] }
 0xacb   :  { %v1601_v10 = vmul.f32 %v1590_v43, %v11454_v20 }
 0xacc   :  { %5518 = vtanh.f32 %v1593_v32 }
 0xacf   :  { %v1804_v63 = vpop.f32.mrf.mxu1 }
 0xad2   :  { %v5519_v9 = vpop.eup %5518 }
 0xad3   :  { %1597 = vrot.lane.b32.xlu1 %v5519_v9, %s5840_s11  ;;  %v1595_v9 = vsub.f32 1.0, %v1590_v43  ;;  %v7609_v43 = vld [vmem:[%s11272_s21 + $0x28] sm:$0xff] }
 0xad4   :  { %11461 = vst [vmem:[#allocation76_spill] sm:$0xff] %v7609_v43 }
 0xad7   :  { %v1807_v8 = vpop.f32.mrf.mxu1 }
 0xadf   :  { %v1810_v40 = vpop.f32.mrf.mxu1 }
 0xae7   :  { %v1813_v48 = vpop.f32.mrf.mxu1 }
 0xaef   :  { %v1816_v11 = vpop.f32.mrf.mxu1 }
 0xaf7   :  { %v1819_v27 = vpop.f32.mrf.mxu1 }
 0xaff   :  { %v1822_v62 = vpop.f32.mrf.mxu1 }
 0xb07   :  { %v1825_v28 = vpop.f32.mrf.mxu1 }
 0xb0f   :  { %v1828_v41 = vpop.f32.mrf.mxu1 }
 0xb17   :  { %v1831_v25 = vpop.f32.mrf.mxu1 }
 0xb1f   :  { %v1834_v56 = vpop.f32.mrf.mxu1 }
 0xb27   :  { %v1837_v21 = vpop.f32.mrf.mxu1 }
 0xb28   :  { %1840 = vmatpush.msra.mxu0 %v1837_v21  ;;  %v7657_v21 = vld [vmem:[%s11272_s21 + $0x68] sm:$0xff] }
 0xb29   :  { %11469 = vst [vmem:[#allocation84_spill] sm:$0xff] %v7657_v21 }
 0xb2a   :  { %1841 = vmatpush.msra.mxu0 %v1834_v56  ;;  %v7651_v56 = vld [vmem:[%s11272_s21 + $0x60] sm:$0xff] }
 0xb2b   :  { %11468 = vst [vmem:[#allocation83_spill] sm:$0xff] %v7651_v56 }
 0xb2c   :  { %1842 = vmatpush.msra.mxu0 %v1831_v25  ;;  %v7645_v25 = vld [vmem:[%s11272_s21 + $0x58] sm:$0xff] }
 0xb2d   :  { %11467 = vst [vmem:[#allocation82_spill] sm:$0xff] %v7645_v25 }
 0xb2e   :  { %1843 = vmatpush.msra.mxu0 %v1828_v41  ;;  %v7639_v41 = vld [vmem:[%s11272_s21 + $0x50] sm:$0xff] }
 0xb2f   :  { %11466 = vst [vmem:[#allocation81_spill] sm:$0xff] %v7639_v41 }
 0xb30   :  { %1844 = vmatpush.msra.mxu0 %v1825_v28  ;;  %v7577_v28 = vld [vmem:[%s11272_s21] sm:$0xff] }
 0xb31   :  { %11455 = vst [vmem:[#allocation51_spill] sm:$0xff] %v7577_v28 }
 0xb32   :  { %1845 = vmatpush.msra.mxu0 %v1822_v62  ;;  %v7633_v62 = vld [vmem:[%s11272_s21 + $0x48] sm:$0xff] }
 0xb33   :  { %11465 = vst [vmem:[#allocation80_spill] sm:$0xff] %v7633_v62 }
 0xb34   :  { %1846 = vmatpush.msra.mxu0 %v1819_v27 }
 0xb36   :  { %1847 = vmatpush.msra.mxu0 %v1816_v11  ;;  %v11456_v11 = vld [vmem:[#allocation38_spill] sm:$0xff] }
 0xb38   :  { %1848 = vmatpush.msra.mxu0 %v1813_v48  ;;  %v7627_v48 = vld [vmem:[%s11272_s21 + $0x40] sm:$0xff] }
 0xb39   :  { %11464 = vst [vmem:[#allocation79_spill] sm:$0xff] %v7627_v48 }
 0xb3a   :  { %1849 = vmatpush.msra.mxu0 %v1810_v40  ;;  %v7621_v40 = vld [vmem:[%s11272_s21 + $0x38] sm:$0xff] }
 0xb3b   :  { %11463 = vst [vmem:[#allocation78_spill] sm:$0xff] %v7621_v40 }
 0xb3c   :  { %1850 = vmatpush.msra.mxu0 %v1807_v8 }
 0xb3e   :  { %1851 = vmatpush.msra.mxu0 %v1804_v63  ;;  %v7615_v63 = vld [vmem:[%s11272_s21 + $0x30] sm:$0xff] }
 0xb3f   :  { %11462 = vst [vmem:[#allocation77_spill] sm:$0xff] %v7615_v63 }
 0xb40   :  { %1852 = vmatpush.msra.mxu0 %v1801_v50  ;;  %v7585_v50 = vld [vmem:[%s11272_s21 + $0x8] sm:$0xff] }
 0xb41   :  { %11457 = vst [vmem:[#allocation17_spill] sm:$0xff] %v7585_v50 }
 0xb42   :  { %1853 = vmatpush.msra.mxu0 %v1798_v33  ;;  %v7603_v33 = vld [vmem:[%s11272_s21 + $0x20] sm:$0xff] }
 0xb43   :  { %11460 = vst [vmem:[#allocation75_spill] sm:$0xff] %v7603_v33 }
 0xb44   :  { %1854 = vmatpush.msra.mxu0 %v1795_v4  ;;  %v7591_v4 = vld [vmem:[%s11272_s21 + $0x10] sm:$0xff] }
 0xb45   :  { %v1598_v32 = vpop.permute.xlu1 %1597  ;;  %11458 = vst [vmem:[#allocation50_spill] sm:$0xff] %v7591_v4 }
 0xb46   :  { %v1600_v2 = vmul.f32 %v1598_v32, %v1595_v9  ;;  %1855 = vmatpush.msra.mxu0 %v1792_v36  ;;  %v7597_v36 = vld [vmem:[%s11272_s21 + $0x18] sm:$0xff]  ;;  %v7663_v9 = vld [vmem:[%s11272_s21 + $0x70] sm:$0xff] }
 0xb47   :  { %1856 = vmatmul.f32.vlgmr.msra.gmra.mxu0 %v7577_v28  ;;  %11459 = vst [vmem:[#allocation74_spill] sm:$0xff] %v7597_v36 }
 0xb48   :  { %v1602_v27 = vadd.f32 %v1601_v10, %v1600_v2  ;;  %11470 = vst [vmem:[#allocation85_spill] sm:$0xff] %v7663_v9  ;;  %v7669_v10 = vld [vmem:[%s11272_s21 + $0x78] sm:$0xff] }
 0xb49   :  { %11471 = vst [vmem:[#allocation86_spill] sm:$0xff] %v7669_v10 }
 0xb4a   :  { %v1603_v8 = vmul.f32 %v1602_v27, %v11456_v11 }
 0xb4c   :  { %1605 = vrot.lane.b32.xlu1 %v1603_v8, %s5840_s11 }
 0xb4f   :  { %1859 = vmatmul.f32.gmra.mxu0 %v7585_v50 }
 0xb57   :  { %1862 = vmatmul.f32.gmra.mxu0 %v7591_v4 }
 0xb5f   :  { %1865 = vmatmul.f32.gmra.mxu0 %v7597_v36 }
 0xb67   :  { %1868 = vmatmul.f32.gmra.mxu0 %v7603_v33 }
 0xb6f   :  { %1871 = vmatmul.f32.gmra.mxu0 %v7609_v43 }
 0xb77   :  { %1874 = vmatmul.f32.gmra.mxu0 %v7615_v63 }
 0xb7f   :  { %1877 = vmatmul.f32.gmra.mxu0 %v7621_v40  ;;  %v7691_v40 = vld [vmem:[#allocation3] sm:$0x1] }
 0xb80   :  { %11472 = vst [vmem:[#allocation87_spill] sm:$0xff] %v7691_v40 }
 0xb87   :  { %1880 = vmatmul.f32.gmra.mxu0 %v7627_v48 }
 0xb8f   :  { %1883 = vmatmul.f32.gmra.mxu0 %v7633_v62 }
 0xb97   :  { %1886 = vmatmul.f32.gmra.mxu0 %v7639_v41 }
 0xb9f   :  { %1889 = vmatmul.f32.gmra.mxu0 %v7645_v25 }
 0xba7   :  { %1892 = vmatmul.f32.gmra.mxu0 %v7651_v56  ;;  %v7697_v56 = vld [vmem:[%s10749_s5] ss:$0 sm:$0xff] }
 0xbaf   :  { %1895 = vmatmul.f32.gmra.mxu0 %v7657_v21 }
 0xbb7   :  { %1898 = vmatmul.f32.gmra.mxu0 %v7663_v9 }
 0xbbe   :  { %v1606_v32 = vpop.permute.xlu1 %1605 }
 0xbbf   :  { %1901 = vmatmul.f32.gmra.mxu0 %v7669_v10  ;;  %v1608_v2 = vsel %vm549_vm9, %v1606_v32, 0.0 }
 0xbc0   :  { %1609 = vadd.xlane.f32.xlu1 %v1608_v2 }
 0xbc4   :  { %v7673_v27 = vpop.f32.mrf.mxu0 }
 0xbcc   :  { %v7675_v8 = vpop.f32.mrf.mxu0 }
 0xbd4   :  { %v7677_v11 = vpop.f32.mrf.mxu0 }
 0xbdc   :  { %v7679_v20 = vpop.f32.mrf.mxu0 }
 0xbe4   :  { %v7681_v19 = vpop.f32.mrf.mxu0 }
 0xbec   :  { %v7683_v35 = vpop.f32.mrf.mxu0 }
 0xbf4   :  { %v7685_v28 = vpop.f32.mrf.mxu0 }
 0xbfc   :  { %v7687_v50 = vpop.f32.mrf.mxu0 }
 0xc04   :  { %v7689_v4 = vpop.f32.mrf.mxu0 }
 0xc0c   :  { %v1884_v32 = vpop.f32.mrf.mxu0 }
 0xc14   :  { %v1887_v2 = vpop.f32.mrf.mxu0 }
 0xc15   :  { %v1888_v49 = vadd.f32 %v7697_v56, %v1887_v2 }
 0xc17   :  { %vm1915_vm15 = vcmp.ge.f32.partialorder %v1888_v49, 0.0 }
 0xc1c   :  { %v1890_v36 = vpop.f32.mrf.mxu0 }
 0xc24   :  { %v1893_v33 = vpop.f32.mrf.mxu0 }
 0xc2c   :  { %v1896_v43 = vpop.f32.mrf.mxu0 }
 0xc2d   :  { %v1897_v30 = vadd.f32 %v7697_v56, %v1896_v43  ;;  %v1209_v43 = vsub.f32 %v7082_v6, %v6748_v31 }
 0xc2f   :  { %vm1918_vm7 = vcmp.ge.f32.partialorder %v1897_v30, 0.0 }
 0xc33   :  { %v1610_v63 = vpop.xlane.xlu1 %1609 }
 0xc34   :  { %v1611_v48 = vadd.f32 %v7691_v40, %v1610_v63  ;;  %v1899_v62 = vpop.f32.mrf.mxu0  ;;  %v1934_v40 = vmul.f32 0.01, %v1897_v30 }
 0xc35   :  { %v1900_v21 = vadd.f32 %v7697_v56, %v1899_v62 }
 0xc36   :  { %v5216_v41 = vmul.f32 -1.442695, %v1611_v48  ;;  %v7714_v5 = vsel %vm1918_vm7, %v1897_v30, %v1934_v40 }
 0xc37   :  { %v1935_v63 = vmul.f32 0.01, %v1900_v21  ;;  %vm1919_vm6 = vcmp.ge.f32.partialorder %v1900_v21, 0.0  ;;  %11475 = vst [vmem:[#allocation90_spill] sm:$0xff] %v7714_v5 }
 0xc38   :  { %5520 = vpow2.f32 %v5216_v41  ;;  %v1894_v41 = vadd.f32 %v7697_v56, %v1893_v33 }
 0xc39   :  { %v7707_v62 = vsel %vm1919_vm6, %v1900_v21, %v1935_v63  ;;  %v1210_v63 = vmul.f32 %v1209_v43, %v6752_v34  ;;  %v1885_v43 = vadd.f32 %v7697_v56, %v1884_v32  ;;  %v1882_v32 = vadd.f32 %v7697_v56, %v7689_v4 }
 0xc3a   :  { %11474 = vst [vmem:[#allocation89_spill] sm:$0xff] %v7707_v62  ;;  %vm1917_vm8 = vcmp.ge.f32.partialorder %v1894_v41, 0.0 }
 0xc3b   :  { %v1211_v40 = vadd.f32 %v1210_v63, %v6748_v31  ;;  %vm1914_vm1 = vcmp.ge.f32.partialorder %v1885_v43, 0.0  ;;  %v1929_v4 = vmul.f32 0.01, %v1882_v32  ;;  %vm1913_vm2 = vcmp.ge.f32.partialorder %v1882_v32, 0.0 }
 0xc3c   :  { %v1902_v25 = vpop.f32.mrf.mxu0 }
 0xc3d   :  { %v1903_v9 = vadd.f32 %v7697_v56, %v1902_v25 }
 0xc3e   :  { %v5521_v10 = vpop.eup %5520 }
 0xc3f   :  { %v1615_v16 = vadd.f32 1.0, %v5521_v10  ;;  %vm1920_vm5 = vcmp.ge.f32.partialorder %v1903_v9, 0.0  ;;  %v1936_v12 = vmul.f32 0.01, %v1903_v9 }
 0xc41   :  { %5522 = vrcp.f32 %v1615_v16  ;;  %v7702_v48 = vsel %vm1920_vm5, %v1903_v9, %v1936_v12  ;;  %v1891_v12 = vadd.f32 %v7697_v56, %v1890_v36  ;;  %v1933_v9 = vmul.f32 0.01, %v1894_v41 }
 0xc42   :  { %11473 = vst [vmem:[#allocation88_spill] sm:$0xff] %v7702_v48  ;;  %5233 = vmatpush.xpose.msk.msra.mxu2 %vm331_vm3, %v7702_v48  ;;  %v1627_v21 = vand.u32 2147483648, %v1615_v16  ;;  %vm1621_vm12 = vweird.f32 %v1615_v16 }
 0xc43   :  { %v1932_v6 = vmul.f32 0.01, %v1891_v12  ;;  %v7720_v42 = vsel %vm1917_vm8, %v1894_v41, %v1933_v9  ;;  %vm1916_vm11 = vcmp.ge.f32.partialorder %v1891_v12, 0.0 }
 0xc44   :  { %11476 = vst [vmem:[#allocation91_spill] sm:$0xff] %v7720_v42  ;;  %v1628_v36 = vor.u32 1.1754944e-38, %v1627_v21 }
 0xc45   :  { %v7726_v34 = vsel %vm1916_vm11, %v1891_v12, %v1932_v6  ;;  %v7756_v6 = vsel %vm1913_vm2, %v1882_v32, %v1929_v4 }
 0xc46   :  { %5234 = vmatpush.xpose.msk.msra.mxu2 %vm331_vm3, %v7707_v62  ;;  %v1625_v62 = vand.u32 2147483647, %v1615_v16  ;;  %11477 = vst [vmem:[#allocation92_spill] sm:$0xff] %v7726_v34 }
 0xc47   :  { %v5523_v25 = vpop.eup %5522 }
 0xc48   :  { %v1617_v10 = vmul.f32 %v5523_v25, %v1615_v16  ;;  %vm1622_vm10 = vweird.f32 %v5523_v25  ;;  %vm1626_vm14 = vcmp.eq.f32.partialorder %v1625_v62, 8.507059e+37 }
 0xc49   :  { %vm1623_vm13 = vmor %vm1621_vm12, %vm1622_vm10 }
 0xc4a   :  { %5235 = vmatpush.xpose.msk.msra.mxu2 %vm331_vm3, %v7714_v5  ;;  %v1618_v33 = vsub.f32 1.0, %v1617_v10 }
 0xc4c   :  { %v1619_v48 = vmul.f32 %v5523_v25, %v1618_v33  ;;  %v1931_v33 = vmul.f32 0.01, %v1888_v49 }
 0xc4e   :  { %5236 = vmatpush.xpose.msk.msra.mxu2 %vm331_vm3, %v7720_v42  ;;  %v1620_v30 = vadd.f32 %v5523_v25, %v1619_v48  ;;  %v1930_v48 = vmul.f32 0.01, %v1885_v43  ;;  %v7737_v62 = vsel %vm1915_vm15, %v1888_v49, %v1931_v33  ;;  %v1876_v49 = vadd.f32 %v7697_v56, %v7685_v28 }
 0xc4f   :  { %v1870_v28 = vadd.f32 %v7697_v56, %v7681_v19  ;;  %v1864_v19 = vadd.f32 %v7697_v56, %v7677_v11  ;;  %v1858_v11 = vadd.f32 %v7697_v56, %v7673_v27  ;;  %v11479_v27 = vld [vmem:[#allocation54_spill] sm:$0xff] }
 0xc50   :  { %v1624_v10 = vsel %vm1623_vm13, %v5523_v25, %v1620_v30  ;;  %v7750_v21 = vsel %vm1914_vm1, %v1885_v43, %v1930_v48  ;;  %v1927_v30 = vmul.f32 0.01, %v1876_v49  ;;  %vm1911_vm5 = vcmp.ge.f32.partialorder %v1876_v49, 0.0 }
 0xc51   :  { %v1629_v2 = vsel %vm1626_vm14, %v1628_v36, %v1624_v10  ;;  %v1925_v43 = vmul.f32 0.01, %v1870_v28  ;;  %vm1909_vm7 = vcmp.ge.f32.partialorder %v1870_v28, 0.0  ;;  %vm1907_vm10 = vcmp.ge.f32.partialorder %v1864_v19, 0.0 }
 0xc52   :  { %5237 = vmatpush.xpose.msk.msra.mxu2 %vm331_vm3, %v7726_v34  ;;  %v1683_v41 = vmul.f32 %v1629_v2, %v7098_v14  ;;  %v1721_v9 = vsub.f32 %v1629_v2, %v1211_v40  ;;  %v7768_v10 = vsel %vm1911_vm5, %v1876_v49, %v1927_v30  ;;  %vm1905_vm12 = vcmp.ge.f32.partialorder %v1858_v11, 0.0  ;;  %v11480_v49 = vld [vmem:[#allocation55_spill] sm:$0xff] }
 0xc54   :  { %5451 = vpush %v1683_v41  ;;  %v7732_v16 = vadd.f32 %v1683_v41, %v7089_v46  ;;  %v1722_v31 = vmul.f32 %v1721_v9, %v7098_v14  ;;  %v1879_v46 = vadd.f32 %v7697_v56, %v7687_v50  ;;  %v1873_v50 = vadd.f32 %v7697_v56, %v7683_v35 }
 0xc55   :  { %v1867_v35 = vadd.f32 %v7697_v56, %v7679_v20  ;;  %v7780_v41 = vsel %vm1909_vm7, %v1870_v28, %v1925_v43  ;;  %v1861_v20 = vadd.f32 %v7697_v56, %v7675_v8  ;;  %v1923_v9 = vmul.f32 0.01, %v1864_v19 }
 0xc56   :  { %vm1725_vm0 = vcmp.lt.f32.partialorder %v7732_v16, 0.999  ;;  %5238 = vmatpush.xpose.msk.msra.mxu2 %vm331_vm3, %v7737_v62  ;;  %v7742_v25 = vadd.f32 %v1722_v31, %v1211_v40  ;;  %v1928_v63 = vmul.f32 0.01, %v1879_v46  ;;  %vm1912_vm4 = vcmp.ge.f32.partialorder %v1879_v46, 0.0 }
 0xc57   :  { %v7745_v12 = vsel %vm1725_vm0, %v7098_v14, 0.0  ;;  %v1926_v40 = vmul.f32 0.01, %v1873_v50  ;;  %vm1910_vm6 = vcmp.ge.f32.partialorder %v1873_v50, 0.0  ;;  %v1924_v2 = vmul.f32 0.01, %v1867_v35 }
 0xc58   :  { %11478 = vst [vmem:[#allocation93_spill] sm:$0xff] %v7745_v12  ;;  %v7762_v36 = vsel %vm1912_vm4, %v1879_v46, %v1928_v63  ;;  %vm1908_vm8 = vcmp.ge.f32.partialorder %v1867_v35, 0.0  ;;  %v1922_v32 = vmul.f32 0.01, %v1861_v20  ;;  %v7792_v48 = vsel %vm1907_vm10, %v1864_v19, %v1923_v9  ;;  %v11542_v14 = vld [vmem:[#allocation70_spill] sm:$0xff] }
 0xc59   :  { %5453 = vpush %v7745_v12  ;;  %v7774_v33 = vsel %vm1910_vm6, %v1873_v50, %v1926_v40  ;;  %v7786_v31 = vsel %vm1908_vm8, %v1867_v35, %v1924_v2  ;;  %vm1906_vm11 = vcmp.ge.f32.partialorder %v1861_v20, 0.0  ;;  %v1921_v46 = vmul.f32 0.01, %v1858_v11  ;;  %v11481_v50 = vld [vmem:[#allocation56_spill] sm:$0xff] }
 0xc5a   :  { %5239 = vmatpush.xpose.msk.msra.mxu2 %vm331_vm3, %v7750_v21  ;;  %v7796_v4 = vsel %vm1906_vm11, %v1861_v20, %v1922_v32  ;;  %v11482_v20 = vld [vmem:[#allocation57_spill] sm:$0xff] }
 0xc5b   :  { %v7800_v8 = vsel %vm1905_vm12, %v1858_v11, %v1921_v46  ;;  %v11483_v11 = vld [vmem:[#allocation58_spill] sm:$0xff] }
 0xc5e   :  { %5240 = vmatpush.xpose.msk.msra.mxu2 %vm331_vm3, %v7756_v6 }
 0xc62   :  { %5241 = vmatpush.xpose.msk.msra.mxu2 %vm331_vm3, %v7762_v36 }
 0xc66   :  { %5242 = vmatpush.xpose.msk.msra.mxu2 %vm331_vm3, %v7768_v10 }
 0xc6a   :  { %5243 = vmatpush.xpose.msk.msra.mxu2 %vm331_vm3, %v7774_v33 }
 0xc6e   :  { %5244 = vmatpush.xpose.msk.msra.mxu2 %vm331_vm3, %v7780_v41 }
 0xc72   :  { %5245 = vmatpush.xpose.msk.msra.mxu2 %vm331_vm3, %v7786_v31 }
 0xc76   :  { %5246 = vmatpush.xpose.msk.msra.mxu2 %vm331_vm3, %v7792_v48 }
 0xc7a   :  { %5247 = vmatpush.xpose.msk.msra.mxu2 %vm331_vm3, %v7796_v4 }
 0xc7e   :  { %5248 = vmatpush.xpose.msk.msra.mxu2 %vm331_vm3, %v7800_v8 }
 0xc81   :  { %5249 = vmatmul.msk.f32.vlgmr.msra.gmra.mxu2 %vm331_vm3, %v11479_v27  ;;  %v11489_v27 = vld [vmem:[#allocation64_spill] sm:$0xff] }
 0xc82   :  { %2044 = vmatpush.xpose.msrb.mxu2 %v7160_v60 }
 0xc85   :  { %s5452_s29 = spop %5451 }
 0xc86   :  { %2045 = vmatpush.xpose.msrb.mxu2 %v11480_v49  ;;  %v1686_v63 = vstv %s5452_s29 }
 0xc87   :  { %v1688_v30 = vmul.f32 %v1686_v63, %v7153_v0  ;;  %v1689_v28 = vmul.f32 %v1686_v63, %v7149_v53  ;;  %v1690_v40 = vmul.f32 %v1686_v63, %v7145_v54  ;;  %v1691_v35 = vmul.f32 %v1686_v63, %v7139_v26  ;;  %v11484_v53 = vld [vmem:[#allocation59_spill] sm:$0xff]  ;;  %v11485_v54 = vld [vmem:[#allocation60_spill] sm:$0xff] }
 0xc88   :  { %v1692_v43 = vmul.f32 %v1686_v63, %v7133_v45  ;;  %v1693_v60 = vmul.f32 %v1686_v63, %v7127_v23  ;;  %v1694_v19 = vmul.f32 %v1686_v63, %v7121_v55  ;;  %v11486_v45 = vld [vmem:[#allocation61_spill] sm:$0xff]  ;;  %v11487_v23 = vld [vmem:[#allocation62_spill] sm:$0xff]  ;;  %v1695_v49 = vmul.f32 %v1686_v63, %v7115_v3 }
 0xc89   :  { %v7817_v2 = vadd.f32 %v1688_v30, %v7197_v29  ;;  %v7820_v9 = vadd.f32 %v1689_v28, %v11482_v20  ;;  %v7823_v0 = vadd.f32 %v1690_v40, %v11483_v11  ;;  %v7826_v32 = vadd.f32 %v1691_v35, %v11484_v53  ;;  %v11488_v29 = vld [vmem:[#allocation63_spill] sm:$0xff]  ;;  %v11511_v11 = vld [vmem:[#allocation82_spill] sm:$0xff]  ;;  %v11512_v53 = vld [vmem:[#allocation81_spill] sm:$0xff] }
 0xc8a   :  { %2046 = vmatpush.xpose.msrb.mxu2 %v11481_v50  ;;  %v7829_v26 = vadd.f32 %v1692_v43, %v11485_v54  ;;  %v7832_v46 = vadd.f32 %v1693_v60, %v11486_v45  ;;  %v7835_v55 = vadd.f32 %v1694_v19, %v11487_v23  ;;  %v11490_v50 = vld [vmem:[#allocation16_spill] sm:$0xff]  ;;  %v1696_v28 = vmul.f32 %v1686_v63, %v7109_v47  ;;  %v11514_v45 = vld [vmem:[#allocation79_spill] sm:$0xff]  ;;  %v11515_v23 = vld [vmem:[#allocation78_spill] sm:$0xff]  ;;  %s5454_s30 = spop %5453 }
 0xc8b   :  { %v7842_v30 = vadd.f32 %v1695_v49, %v11490_v50  ;;  %v1697_v40 = vmul.f32 %v1686_v63, %v7103_v39  ;;  %v1698_v35 = vmul.f32 %v1686_v63, %v7092_v51  ;;  %v1699_v43 = vmul.f32 %v1686_v63, %v7080_v44  ;;  %v11513_v54 = vld [vmem:[#allocation80_spill] sm:$0xff]  ;;  %v11518_v49 = vld [vmem:[#allocation75_spill] sm:$0xff]  ;;  %v11519_v50 = vld [vmem:[#allocation74_spill] sm:$0xff] }
 0xc8c   :  { %v1700_v60 = vmul.f32 %v1686_v63, %v7075_v22  ;;  %v1701_v19 = vmul.f32 %v1686_v63, %v11442_v13  ;;  %v1702_v20 = vmul.f32 %v1686_v63, %v11445_v24  ;;  %v7852_v3 = vadd.f32 %v1696_v28, %v7248_v61  ;;  %v11501_v13 = vld [vmem:[#allocation13_spill] sm:$0xff]  ;;  %v11504_v24 = vld [vmem:[#allocation10_spill] sm:$0xff] }
 0xc8d   :  { %v7858_v47 = vadd.f32 %v1698_v35, %v7252_v18  ;;  %v1703_v39 = vmul.f32 %v1686_v63, %v11448_v38  ;;  %v7862_v51 = vadd.f32 %v1699_v43, %v7255_v15  ;;  %v11499_v18 = vld [vmem:[#allocation15_spill] sm:$0xff]  ;;  %v11500_v15 = vld [vmem:[#allocation14_spill] sm:$0xff]  ;;  %v11508_v38 = vld [vmem:[#allocation85_spill] sm:$0xff] }
 0xc8e   :  { %2047 = vmatpush.xpose.msrb.mxu2 %v11488_v29  ;;  %11491 = vst [vmem:[#allocation54_spill] sm:$0xff] %v7852_v3  ;;  %v7865_v22 = vadd.f32 %v1700_v60, %v7257_v52  ;;  %v7868_v44 = vadd.f32 %v1701_v19, %v7259_v17  ;;  %v7871_v61 = vadd.f32 %v1702_v20, %v7261_v7  ;;  %v11502_v52 = vld [vmem:[#allocation12_spill] sm:$0xff]  ;;  %v11503_v17 = vld [vmem:[#allocation11_spill] sm:$0xff]  ;;  %v11505_v7 = vld [vmem:[#allocation46_spill] sm:$0xff] }
 0xc8f   :  { %11493 = vst [vmem:[#allocation56_spill] sm:$0xff] %v7858_v47  ;;  %v11510_v63 = vld [vmem:[#allocation83_spill] sm:$0xff]  ;;  %v11516_v29 = vld [vmem:[#allocation77_spill] sm:$0xff]  ;;  %v11520_v28 = vld [vmem:[#allocation50_spill] sm:$0xff] }
 0xc90   :  { %11494 = vst [vmem:[#allocation57_spill] sm:$0xff] %v7862_v51  ;;  %v11522_v35 = vld [vmem:[#allocation51_spill] sm:$0xff]  ;;  %v11523_v60 = vld [vmem:[#allocation44_spill] sm:$0xff]  ;;  %v11525_v20 = vld [vmem:[#allocation42_spill] sm:$0xff] }
 0xc91   :  { %11495 = vst [vmem:[#allocation58_spill] sm:$0xff] %v7865_v22  ;;  %v11524_v19 = vld [vmem:[#allocation43_spill] sm:$0xff] }
 0xc92   :  { %2048 = vmatpush.xpose.msrb.mxu2 %v11489_v27  ;;  %11496 = vst [vmem:[#allocation59_spill] sm:$0xff] %v7868_v44  ;;  %v11517_v27 = vld [vmem:[#allocation76_spill] sm:$0xff] }
 0xc93   :  { %11497 = vst [vmem:[#allocation60_spill] sm:$0xff] %v7871_v61 }
 0xc96   :  { %2049 = vmatpush.xpose.msrb.mxu2 %v7236_v37  ;;  %v7855_v37 = vadd.f32 %v1697_v40, %v7250_v57  ;;  %v7875_v57 = vadd.f32 %v1703_v39, %v7269_v58  ;;  %v11507_v58 = vld [vmem:[#allocation86_spill] sm:$0xff]  ;;  %v11521_v40 = vld [vmem:[#allocation17_spill] sm:$0xff] }
 0xc97   :  { %v11526_v39 = vld [vmem:[#allocation41_spill] sm:$0xff] }
 0xc98   :  { %11492 = vst [vmem:[#allocation55_spill] sm:$0xff] %v7855_v37 }
 0xc99   :  { %11498 = vst [vmem:[#allocation61_spill] sm:$0xff] %v7875_v57 }
 0xc9a   :  { %2050 = vmatpush.xpose.msrb.mxu2 %v7266_v59  ;;  %v11506_v59 = vld [vmem:[#allocation45_spill] sm:$0xff] }
 0xc9e   :  { %2051 = vmatpush.xpose.msrb.mxu2 %v7274_v1  ;;  %v11509_v1 = vld [vmem:[#allocation84_spill] sm:$0xff] }
 0xca2   :  { %2052 = vmatpush.xpose.msrb.mxu2 %v11499_v18  ;;  %v11527_v18 = vld [vmem:[#allocation40_spill] sm:$0xff] }
 0xca6   :  { %2053 = vmatpush.xpose.msrb.mxu2 %v11500_v15  ;;  %v11528_v15 = vld [vmem:[#allocation39_spill] sm:$0xff] }
 0xcaa   :  { %2054 = vmatpush.xpose.msrb.mxu2 %v11501_v13  ;;  %v11529_v13 = vld [vmem:[#allocation65_spill] sm:$0xff] }
 0xcae   :  { %2055 = vmatpush.xpose.msrb.mxu2 %v11502_v52  ;;  %v11530_v52 = vld [vmem:[#allocation66_spill] sm:$0xff] }
 0xcb2   :  { %2056 = vmatpush.xpose.msrb.mxu2 %v11503_v17 }
 0xcb6   :  { %2057 = vmatpush.xpose.msrb.mxu2 %v11504_v24  ;;  %v11531_v24 = vld [vmem:[#allocation34_spill] sm:$0xff] }
 0xcba   :  { %2058 = vmatpush.xpose.msrb.mxu2 %v11505_v7 }
 0xcbe   :  { %2059 = vmatpush.xpose.msrb.mxu2 %v11506_v59 }
 0xcc2   :  { %2533 = vmatpush.xpose.msra.mxu2 %v11507_v58 }
 0xcc6   :  { %2534 = vmatpush.xpose.msra.mxu2 %v11508_v38 }
 0xcca   :  { %2535 = vmatpush.xpose.msra.mxu2 %v11509_v1 }
 0xcce   :  { %2536 = vmatpush.xpose.msra.mxu2 %v11510_v63 }
 0xcd2   :  { %2537 = vmatpush.xpose.msra.mxu2 %v11511_v11 }
 0xcd6   :  { %2538 = vmatpush.xpose.msra.mxu2 %v11512_v53 }
 0xcda   :  { %2539 = vmatpush.xpose.msra.mxu2 %v11513_v54 }
 0xcde   :  { %2540 = vmatpush.xpose.msra.mxu2 %v11514_v45 }
 0xce2   :  { %2541 = vmatpush.xpose.msra.mxu2 %v11515_v23 }
 0xce6   :  { %2542 = vmatpush.xpose.msra.mxu2 %v11516_v29 }
 0xcea   :  { %2543 = vmatpush.xpose.msra.mxu2 %v11517_v27 }
 0xcee   :  { %2544 = vmatpush.xpose.msra.mxu2 %v11518_v49 }
 0xcf2   :  { %2545 = vmatpush.xpose.msra.mxu2 %v11519_v50 }
 0xcf6   :  { %2546 = vmatpush.xpose.msra.mxu2 %v11520_v28 }
 0xcfa   :  { %2547 = vmatpush.xpose.msra.mxu2 %v11521_v40 }
 0xcfe   :  { %2548 = vmatpush.xpose.msra.mxu2 %v11522_v35 }
 0xd04   :  { %v2018_v43 = vpop.f32.mrf.mxu2 }
 0xd05   :  { %2037 = vmatmul.f32.vlgmr.msra.gmra.mxu3 %v2018_v43  ;;  %v7911_v43 = vstv %s5454_s30  ;;  %s5058_s30 = sshll.u32 %s10760_s17, 4  ;;  %s5059_s30 = int_to_ptr.hbm [resolvable:$true] %s5058_s30 }
 0xd06   :  { %2295 = vmatpush.msra.mxu3 %v11523_v60 }
 0xd08   :  { %2296 = vmatpush.msra.mxu3 %v11524_v19  ;;  %v11532_v19 = vld [vmem:[#allocation67_spill] sm:$0xff] }
 0xd0a   :  { %2297 = vmatpush.msra.mxu3 %v11525_v20  ;;  %v2143_v20 = vsub.f32 %v7800_v8, %v11532_v19 }
 0xd0c   :  { %2298 = vmatpush.msra.mxu3 %v11526_v39  ;;  %v11533_v39 = vld [vmem:[#allocation26_spill] sm:$0xff] }
 0xd0e   :  { %2299 = vmatpush.msra.mxu3 %v11527_v18  ;;  %v2163_v18 = vmul.f32 %v7911_v43, %v2143_v20  ;;  %v11540_v20 = vld [vmem:[#allocation71_spill] sm:$0xff] }
 0xd10   :  { %2300 = vmatpush.msra.mxu3 %v11528_v15  ;;  %v11534_v15 = vld [vmem:[#allocation27_spill] sm:$0xff] }
 0xd12   :  { %2301 = vmatpush.msra.mxu3 %v11529_v13  ;;  %v7919_v13 = vadd.f32 %v2163_v18, %v11532_v19  ;;  %v11541_v19 = vld [vmem:[#allocation29_spill] sm:$0xff] }
 0xd14   :  { %2302 = vmatpush.msra.mxu3 %v11530_v52  ;;  %11535 = vst [vmem:[#allocation62_spill] sm:$0xff] %v7919_v13  ;;  %v11536_v52 = vld [vmem:[#allocation69_spill] sm:$0xff] }
 0xd88   :  { %v2038_v17 = vpop.f32.mrf.mxu3 }
 0xd89   :  { %v2039_v7 = vadd.f32 %v2038_v17, %v11531_v24  ;;  %v2144_v17 = vsub.f32 %v7796_v4, %v11536_v52 }
 0xd8b   :  { %vm2041_vm13 = vcmp.ge.f32.partialorder %v2039_v7, 0.0  ;;  %v2042_v59 = vmul.f32 0.01, %v2039_v7 }
 0xd8d   :  { %v2043_v60 = vsel %vm2041_vm13, %v2039_v7, %v2042_v59  ;;  %v11537_v7 = vld [vmem:[#allocation28_spill] sm:$0xff]  ;;  %v2164_v59 = vmul.f32 %v7911_v43, %v2144_v17  ;;  %v11544_v17 = vld [vmem:[#allocation73_spill] sm:$0xff] }
 0xd8e   :  { %2060 = vmatmul.f32.vlgmr.msrb.gmra.mxu2 %v2043_v60  ;;  %2080 = vmatmul.f32.vlgmr.msrb.gmra.mxu3 %v2043_v60  ;;  %v11538_v60 = vld [vmem:[#allocation68_spill] sm:$0xff] }
 0xd8f   :  { %2584 = vmatpush.xpose.msrb.mxu2 %v11533_v39  ;;  %v7929_v39 = vadd.f32 %v2164_v59, %v11536_v52  ;;  %v11545_v52 = vld [vmem:[#allocation30_spill] sm:$0xff] }
 0xd91   :  { %11539 = vst [vmem:[#allocation63_spill] sm:$0xff] %v7929_v39 }
 0xd93   :  { %2585 = vmatpush.xpose.msrb.mxu2 %v11534_v15  ;;  %v2145_v15 = vsub.f32 %v7792_v48, %v11540_v20 }
 0xd95   :  { %v2165_v18 = vmul.f32 %v7911_v43, %v2145_v15  ;;  %v11548_v15 = vld [vmem:[#allocation31_spill] sm:$0xff] }
 0xd96   :  { %5252 = vmatmul.msk.f32.vlgmr.msra.gmra.mxu3 %vm331_vm3, %v7919_v13 }
 0xd97   :  { %2586 = vmatpush.xpose.msrb.mxu2 %v11537_v7  ;;  %v7939_v7 = vadd.f32 %v2165_v18, %v11540_v20 }
 0xd99   :  { %11543 = vst [vmem:[#allocation64_spill] sm:$0xff] %v7939_v7 }
 0xd9b   :  { %2587 = vmatpush.xpose.msrb.mxu2 %v11538_v60  ;;  %v2146_v60 = vsub.f32 %v7786_v31, %v11544_v17 }
 0xd9d   :  { %v2166_v59 = vmul.f32 %v7911_v43, %v2146_v60  ;;  %v11552_v60 = vld [vmem:[#allocation33_spill] sm:$0xff] }
 0xd9e   :  { %5253 = vmatmul.msk.f32.gmra.mxu3 %vm331_vm3, %v7929_v39  ;;  %v11546_v39 = vld [vmem:[#allocation72_spill] sm:$0xff] }
 0xd9f   :  { %2588 = vmatpush.xpose.msrb.mxu2 %v11541_v19  ;;  %v7949_v19 = vadd.f32 %v2166_v59, %v11544_v17  ;;  %v2149_v59 = vsub.f32 %v7768_v10, %v11552_v60 }
 0xda1   :  { %11547 = vst [vmem:[#allocation16_spill] sm:$0xff] %v7949_v19 }
 0xda3   :  { %2589 = vmatpush.xpose.msrb.mxu2 %v11542_v14  ;;  %v2147_v14 = vsub.f32 %v7780_v41, %v11548_v15 }
 0xda5   :  { %v2167_v20 = vmul.f32 %v7911_v43, %v2147_v14 }
 0xda6   :  { %5254 = vmatmul.msk.f32.gmra.mxu3 %vm331_vm3, %v7939_v7  ;;  %v11550_v7 = vld [vmem:[#allocation32_spill] sm:$0xff] }
 0xda7   :  { %2590 = vmatpush.xpose.msrb.mxu2 %v11545_v52  ;;  %v7957_v18 = vadd.f32 %v2167_v20, %v11548_v15  ;;  %v2148_v52 = vsub.f32 %v7774_v33, %v11550_v7  ;;  %v2169_v15 = vmul.f32 %v7911_v43, %v2149_v59  ;;  %v11554_v20 = vld [vmem:[#allocation25_spill] sm:$0xff] }
 0xda9   :  { %11549 = vst [vmem:[#allocation15_spill] sm:$0xff] %v7957_v18  ;;  %v7973_v14 = vadd.f32 %v2169_v15, %v11552_v60  ;;  %v11558_v15 = vld [vmem:[#allocation23_spill] sm:$0xff] }
 0xdab   :  { %2591 = vmatpush.xpose.msrb.mxu2 %v11546_v39  ;;  %v2168_v39 = vmul.f32 %v7911_v43, %v2148_v52  ;;  %11553 = vst [vmem:[#allocation13_spill] sm:$0xff] %v7973_v14 }
 0xdad   :  { %v7965_v17 = vadd.f32 %v2168_v39, %v11550_v7  ;;  %v11556_v39 = vld [vmem:[#allocation24_spill] sm:$0xff] }
 0xdae   :  { %5255 = vmatmul.msk.f32.gmra.mxu3 %vm331_vm3, %v7949_v19  ;;  %v2150_v19 = vsub.f32 %v7762_v36, %v11554_v20 }
 0xdaf   :  { %11551 = vst [vmem:[#allocation14_spill] sm:$0xff] %v7965_v17 }
 0xdb0   :  { %v2170_v7 = vmul.f32 %v7911_v43, %v2150_v19 }
 0xdb2   :  { %v7981_v52 = vadd.f32 %v2170_v7, %v11554_v20  ;;  %v11560_v7 = vld [vmem:[#allocation22_spill] sm:$0xff] }
 0xdb4   :  { %11555 = vst [vmem:[#allocation12_spill] sm:$0xff] %v7981_v52 }
 0xdb6   :  { %5256 = vmatmul.msk.f32.gmra.mxu3 %vm331_vm3, %v7957_v18  ;;  %v2151_v18 = vsub.f32 %v7756_v6, %v11556_v39 }
 0xdb8   :  { %v2171_v60 = vmul.f32 %v7911_v43, %v2151_v18 }
 0xdba   :  { %v7989_v59 = vadd.f32 %v2171_v60, %v11556_v39  ;;  %v11562_v60 = vld [vmem:[#allocation21_spill] sm:$0xff] }
 0xdbc   :  { %11557 = vst [vmem:[#allocation11_spill] sm:$0xff] %v7989_v59 }
 0xdbe   :  { %5257 = vmatmul.msk.f32.gmra.mxu3 %vm331_vm3, %v7965_v17  ;;  %v2152_v17 = vsub.f32 %v7750_v21, %v11558_v15 }
 0xdc0   :  { %v2172_v19 = vmul.f32 %v7911_v43, %v2152_v17 }
 0xdc2   :  { %v7997_v20 = vadd.f32 %v2172_v19, %v11558_v15  ;;  %v11564_v19 = vld [vmem:[#allocation20_spill] sm:$0xff] }
 0xdc4   :  { %11559 = vst [vmem:[#allocation10_spill] sm:$0xff] %v7997_v20 }
 0xdc6   :  { %5258 = vmatmul.msk.f32.gmra.mxu3 %vm331_vm3, %v7973_v14  ;;  %v2153_v14 = vsub.f32 %v7737_v62, %v11560_v7 }
 0xdc8   :  { %v2173_v18 = vmul.f32 %v7911_v43, %v2153_v14 }
 0xdca   :  { %v8005_v39 = vadd.f32 %v2173_v18, %v11560_v7  ;;  %v11566_v18 = vld [vmem:[#allocation19_spill] sm:$0xff] }
 0xdcc   :  { %11561 = vst [vmem:[#allocation46_spill] sm:$0xff] %v8005_v39 }
 0xdce   :  { %5259 = vmatmul.msk.f32.gmra.mxu3 %vm331_vm3, %v7981_v52  ;;  %v2154_v52 = vsub.f32 %v7726_v34, %v11562_v60 }
 0xdd0   :  { %v2174_v17 = vmul.f32 %v7911_v43, %v2154_v52 }
 0xdd2   :  { %v8013_v15 = vadd.f32 %v2174_v17, %v11562_v60  ;;  %v11568_v17 = vld [vmem:[#allocation52_spill] sm:$0xff] }
 0xdd4   :  { %11563 = vst [vmem:[#allocation45_spill] sm:$0xff] %v8013_v15 }
 0xdd6   :  { %5260 = vmatmul.msk.f32.gmra.mxu3 %vm331_vm3, %v7989_v59  ;;  %v2155_v59 = vsub.f32 %v7720_v42, %v11564_v19 }
 0xdd8   :  { %v2175_v14 = vmul.f32 %v7911_v43, %v2155_v59 }
 0xdda   :  { %v8021_v7 = vadd.f32 %v2175_v14, %v11564_v19  ;;  %v11571_v14 = vld [vmem:[#allocation18_spill] sm:$0xff] }
 0xddc   :  { %11565 = vst [vmem:[#allocation86_spill] sm:$0xff] %v8021_v7 }
 0xdde   :  { %5261 = vmatmul.msk.f32.gmra.mxu3 %vm331_vm3, %v7997_v20  ;;  %v2156_v20 = vsub.f32 %v7714_v5, %v11566_v18 }
 0xde0   :  { %v2176_v52 = vmul.f32 %v7911_v43, %v2156_v20 }
 0xde2   :  { %v8029_v60 = vadd.f32 %v2176_v52, %v11566_v18 }
 0xde4   :  { %11567 = vst [vmem:[#allocation85_spill] sm:$0xff] %v8029_v60 }
 0xde6   :  { %5262 = vmatmul.msk.f32.gmra.mxu3 %vm331_vm3, %v8005_v39  ;;  %v11569_v39 = vld [vmem:[#allocation89_spill] sm:$0xff] }
 0xde7   :  { %v2157_v13 = vsub.f32 %v11569_v39, %v11568_v17 }
 0xde9   :  { %v2177_v59 = vmul.f32 %v7911_v43, %v2157_v13  ;;  %v11574_v13 = vld [vmem:[#allocation35_spill] sm:$0xff] }
 0xdeb   :  { %v8037_v19 = vadd.f32 %v2177_v59, %v11568_v17  ;;  %v11575_v17 = vld [vmem:[#allocation48_spill] sm:$0xff] }
 0xded   :  { %11570 = vst [vmem:[#allocation84_spill] sm:$0xff] %v8037_v19 }
 0xdee   :  { %5263 = vmatmul.msk.f32.gmra.mxu3 %vm331_vm3, %v8013_v15 }
 0xdf6   :  { %5264 = vmatmul.msk.f32.gmra.mxu3 %vm331_vm3, %v8021_v7  ;;  %v11572_v7 = vld [vmem:[#allocation88_spill] sm:$0xff] }
 0xdf7   :  { %v2158_v20 = vsub.f32 %v11572_v7, %v11571_v14 }
 0xdf9   :  { %v2178_v18 = vmul.f32 %v7911_v43, %v2158_v20 }
 0xdfb   :  { %v8045_v52 = vadd.f32 %v2178_v18, %v11571_v14 }
 0xdfd   :  { %11573 = vst [vmem:[#allocation83_spill] sm:$0xff] %v8045_v52 }
 0xdfe   :  { %5265 = vmatmul.msk.f32.gmra.mxu3 %vm331_vm3, %v8029_v60 }
 0xe06   :  { %5266 = vmatmul.msk.f32.gmra.mxu3 %vm331_vm3, %v8037_v19 }
 0xe0e   :  { %5267 = vmatmul.msk.f32.gmra.mxu3 %vm331_vm3, %v8045_v52 }
 0xe11   :  { %v2061_v60 = vpop.f32.mrf.mxu2  ;;  %v2081_v15 = vpop.f32.mrf.mxu3 }
 0xe12   :  { %v2062_v24 = vadd.f32 %v2061_v60, %v11574_v13  ;;  %v11577_v13 = vld [vmem:[#allocation49_spill] sm:$0xff] }
 0xe14   :  { %v2084_v59 = vadd.f32 %v2062_v24, %v11575_v17  ;;  %v11576_v17 = vld [vmem:[#allocation36_spill] sm:$0xff] }
 0xe16   :  { %v5250_v57 = vmul.f32 -1.442695, %v2084_v59 }
 0xe18   :  { %5524 = vpow2.f32 %v5250_v57 }
 0xe19   :  { %v2304_v19 = vpop.f32.mrf.mxu3 }
 0xe1e   :  { %v5525_v61 = vpop.eup %5524 }
 0xe1f   :  { %v2088_v44 = vadd.f32 1.0, %v5525_v61  ;;  %v2082_v61 = vadd.f32 %v2081_v15, %v11576_v17  ;;  %v11578_v15 = vld [vmem:[#allocation37_spill] sm:$0xff]  ;;  %v11579_v17 = vld [vmem:[#allocation38_spill] sm:$0xff] }
 0xe21   :  { %5526 = vrcp.f32 %v2088_v44  ;;  %v2307_v22 = vpop.f32.mrf.mxu3  ;;  %v2100_v51 = vand.u32 2147483648, %v2088_v44  ;;  %v2098_v52 = vand.u32 2147483647, %v2088_v44  ;;  %vm2094_vm15 = vweird.f32 %v2088_v44 }
 0xe23   :  { %v2101_v60 = vor.u32 1.1754944e-38, %v2100_v51  ;;  %vm2099_vm1 = vcmp.eq.f32.partialorder %v2098_v52, 8.507059e+37 }
 0xe27   :  { %v5527_v43 = vpop.eup %5526 }
 0xe28   :  { %v2090_v20 = vmul.f32 %v5527_v43, %v2088_v44  ;;  %vm2095_vm14 = vweird.f32 %v5527_v43 }
 0xe29   :  { %v2310_v14 = vpop.f32.mrf.mxu3  ;;  %vm2096_vm0 = vmor %vm2094_vm15, %vm2095_vm14 }
 0xe2a   :  { %v2091_v18 = vsub.f32 1.0, %v2090_v20 }
 0xe2c   :  { %v2092_v7 = vmul.f32 %v5527_v43, %v2091_v18 }
 0xe2e   :  { %v2093_v47 = vadd.f32 %v5527_v43, %v2092_v7 }
 0xe30   :  { %v2097_v24 = vsel %vm2096_vm0, %v5527_v43, %v2093_v47 }
 0xe31   :  { %v2102_v57 = vsel %vm2099_vm1, %v2101_v60, %v2097_v24  ;;  %v2313_v59 = vpop.f32.mrf.mxu3 }
 0xe32   :  { %v2104_v37 = vmul.f32 %v2102_v57, %v11577_v13 }
 0xe34   :  { %v2105_v3 = vadd.f32 %v2104_v37, %v2082_v61  ;;  %v2107_v37 = vsub.f32 1.0, %v2102_v57  ;;  %v2113_v61 = vmul.f32 %v2102_v57, %v11578_v15 }
 0xe36   :  { %5528 = vtanh.f32 %v2105_v3 }
 0xe39   :  { %v2316_v39 = vpop.f32.mrf.mxu3 }
 0xe3c   :  { %v5529_v20 = vpop.eup %5528 }
 0xe3d   :  { %2109 = vrot.lane.b32.xlu2 %v5529_v20, %s5840_s11 }
 0xe41   :  { %v2319_v18 = vpop.f32.mrf.mxu3 }
 0xe49   :  { %v2322_v5 = vpop.f32.mrf.mxu3 }
 0xe51   :  { %v2325_v7 = vpop.f32.mrf.mxu3 }
 0xe59   :  { %v2328_v44 = vpop.f32.mrf.mxu3 }
 0xe61   :  { %v2331_v42 = vpop.f32.mrf.mxu3 }
 0xe69   :  { %v2334_v51 = vpop.f32.mrf.mxu3 }
 0xe71   :  { %v2337_v47 = vpop.f32.mrf.mxu3 }
 0xe79   :  { %v2340_v52 = vpop.f32.mrf.mxu3 }
 0xe81   :  { %v2343_v43 = vpop.f32.mrf.mxu3 }
 0xe89   :  { %v2346_v60 = vpop.f32.mrf.mxu3 }
 0xe91   :  { %v2349_v24 = vpop.f32.mrf.mxu3 }
 0xe92   :  { %2352 = vmatpush.msrb.mxu1 %v2349_v24 }
 0xe94   :  { %2353 = vmatpush.msrb.mxu1 %v2346_v60 }
 0xe96   :  { %2354 = vmatpush.msrb.mxu1 %v2343_v43 }
 0xe97   :  { %v2110_v3 = vpop.permute.xlu2 %2109 }
 0xe98   :  { %v2112_v13 = vmul.f32 %v2110_v3, %v2107_v37  ;;  %2355 = vmatpush.msrb.mxu1 %v2340_v52 }
 0xe9a   :  { %v2114_v20 = vadd.f32 %v2113_v61, %v2112_v13  ;;  %2356 = vmatpush.msrb.mxu1 %v2337_v47 }
 0xe9c   :  { %2357 = vmatpush.msrb.mxu1 %v2334_v51  ;;  %v2115_v34 = vmul.f32 %v2114_v20, %v11579_v17 }
 0xe9e   :  { %2117 = vrot.lane.b32.xlu0 %v2115_v34, %s5840_s11  ;;  %2358 = vmatpush.msrb.mxu1 %v2331_v42 }
 0xea0   :  { %2359 = vmatpush.msrb.mxu1 %v2328_v44 }
 0xea2   :  { %2360 = vmatpush.msrb.mxu1 %v2325_v7 }
 0xea4   :  { %2361 = vmatpush.msrb.mxu1 %v2322_v5 }
 0xea6   :  { %2362 = vmatpush.msrb.mxu1 %v2319_v18 }
 0xea8   :  { %2363 = vmatpush.msrb.mxu1 %v2316_v39 }
 0xeaa   :  { %2364 = vmatpush.msrb.mxu1 %v2313_v59 }
 0xeac   :  { %2365 = vmatpush.msrb.mxu1 %v2310_v14 }
 0xeae   :  { %2366 = vmatpush.msrb.mxu1 %v2307_v22 }
 0xeb0   :  { %2367 = vmatpush.msrb.mxu1 %v2304_v19 }
 0xeb1   :  { %2368 = vmatmul.f32.vlgmr.msrb.gmra.mxu1 %v11522_v35 }
 0xeb9   :  { %2371 = vmatmul.f32.gmra.mxu1 %v11521_v40 }
 0xec1   :  { %2374 = vmatmul.f32.gmra.mxu1 %v11520_v28 }
 0xec9   :  { %2377 = vmatmul.f32.gmra.mxu1 %v11519_v50 }
 0xed1   :  { %2380 = vmatmul.f32.gmra.mxu1 %v11518_v49 }
 0xed9   :  { %2383 = vmatmul.f32.gmra.mxu1 %v11517_v27  ;;  %v11580_v27 = vld [vmem:[#allocation87_spill] sm:$0xff] }
 0xee1   :  { %2386 = vmatmul.f32.gmra.mxu1 %v11516_v29 }
 0xee9   :  { %2389 = vmatmul.f32.gmra.mxu1 %v11515_v23 }
 0xef1   :  { %2392 = vmatmul.f32.gmra.mxu1 %v11514_v45 }
 0xef9   :  { %2395 = vmatmul.f32.gmra.mxu1 %v11513_v54 }
 0xf01   :  { %2398 = vmatmul.f32.gmra.mxu1 %v11512_v53 }
 0xf09   :  { %2401 = vmatmul.f32.gmra.mxu1 %v11511_v11 }
 0xf10   :  { %v2118_v34 = vpop.permute.xlu0 %2117 }
 0xf11   :  { %2404 = vmatmul.f32.gmra.mxu1 %v11510_v63  ;;  %v2120_v42 = vsel %vm549_vm9, %v2118_v34, 0.0 }
 0xf12   :  { %2121 = vadd.xlane.f32.xlu2 %v2120_v42 }
 0xf19   :  { %2407 = vmatmul.f32.gmra.mxu1 %v11509_v1 }
 0xf21   :  { %2410 = vmatmul.f32.gmra.mxu1 %v11508_v38 }
 0xf29   :  { %2413 = vmatmul.f32.gmra.mxu1 %v11507_v58 }
 0xf2e   :  { %v8074_v5 = vpop.f32.mrf.mxu1 }
 0xf36   :  { %v8076_v22 = vpop.f32.mrf.mxu1 }
 0xf3e   :  { %v8078_v54 = vpop.f32.mrf.mxu1 }
 0xf46   :  { %v8080_v53 = vpop.f32.mrf.mxu1 }
 0xf4e   :  { %v8082_v11 = vpop.f32.mrf.mxu1 }
 0xf56   :  { %v8084_v63 = vpop.f32.mrf.mxu1 }
 0xf5e   :  { %v8086_v45 = vpop.f32.mrf.mxu1 }
 0xf66   :  { %v8088_v23 = vpop.f32.mrf.mxu1 }
 0xf6e   :  { %v8090_v1 = vpop.f32.mrf.mxu1 }
 0xf76   :  { %v2396_v38 = vpop.f32.mrf.mxu1 }
 0xf7e   :  { %v2399_v58 = vpop.f32.mrf.mxu1 }
 0xf85   :  { %v2122_v29 = vpop.xlane.xlu2 %2121 }
 0xf86   :  { %v2123_v49 = vadd.f32 %v11580_v27, %v2122_v29  ;;  %v2402_v50 = vpop.f32.mrf.mxu1 }
 0xf88   :  { %v5251_v28 = vmul.f32 -1.442695, %v2123_v49 }
 0xf8a   :  { %5530 = vpow2.f32 %v5251_v28 }
 0xf8e   :  { %v2405_v40 = vpop.f32.mrf.mxu1 }
 0xf90   :  { %v5531_v35 = vpop.eup %5530 }
 0xf91   :  { %v2127_v39 = vadd.f32 1.0, %v5531_v35  ;;  %v2406_v35 = vadd.f32 %v7697_v56, %v2405_v40 }
 0xf93   :  { %5532 = vrcp.f32 %v2127_v39  ;;  %v2139_v59 = vand.u32 2147483648, %v2127_v39  ;;  %v2137_v44 = vand.u32 2147483647, %v2127_v39  ;;  %vm2133_vm4 = vweird.f32 %v2127_v39 }
 0xf94   :  { %vm2429_vm12 = vcmp.ge.f32.partialorder %v2406_v35, 0.0 }
 0xf95   :  { %v2140_v47 = vor.u32 1.1754944e-38, %v2139_v59  ;;  %vm2138_vm6 = vcmp.eq.f32.partialorder %v2137_v44, 8.507059e+37  ;;  %v2394_v44 = vadd.f32 %v7697_v56, %v8090_v1  ;;  %v2388_v1 = vadd.f32 %v7697_v56, %v8086_v45 }
 0xf96   :  { %v2408_v19 = vpop.f32.mrf.mxu1  ;;  %v2382_v45 = vadd.f32 %v7697_v56, %v8082_v11 }
 0xf97   :  { %vm2425_vm0 = vcmp.ge.f32.partialorder %v2394_v44, 0.0 }
 0xf99   :  { %v5533_v13 = vpop.eup %5532 }
 0xf9a   :  { %v2129_v14 = vmul.f32 %v5533_v13, %v2127_v39  ;;  %vm2134_vm2 = vweird.f32 %v5533_v13 }
 0xf9b   :  { %vm2135_vm5 = vmor %vm2133_vm4, %vm2134_vm2  ;;  %vm2423_vm2 = vcmp.ge.f32.partialorder %v2388_v1, 0.0 }
 0xf9c   :  { %v2130_v57 = vsub.f32 1.0, %v2129_v14  ;;  %v2445_v14 = vmul.f32 0.01, %v2406_v35 }
 0xf9e   :  { %v2411_v18 = vpop.f32.mrf.mxu1  ;;  %v2131_v7 = vmul.f32 %v5533_v13, %v2130_v57  ;;  %v2400_v57 = vadd.f32 %v7697_v56, %v2399_v58  ;;  %v8125_v40 = vsel %vm2429_vm12, %v2406_v35, %v2445_v14  ;;  %v2370_v35 = vadd.f32 %v7697_v56, %v8074_v5 }
 0xf9f   :  { %v2412_v20 = vadd.f32 %v7697_v56, %v2411_v18  ;;  %11585 = vst [vmem:[#allocation78_spill] sm:$0xff] %v8125_v40  ;;  %v2397_v18 = vadd.f32 %v7697_v56, %v2396_v38  ;;  %v2391_v38 = vadd.f32 %v7697_v56, %v8088_v23  ;;  %v2385_v23 = vadd.f32 %v7697_v56, %v8084_v63 }
 0xfa0   :  { %v2132_v51 = vadd.f32 %v5533_v13, %v2131_v7  ;;  %v2443_v7 = vmul.f32 0.01, %v2400_v57  ;;  %vm2427_vm14 = vcmp.ge.f32.partialorder %v2400_v57, 0.0  ;;  %v2379_v63 = vadd.f32 %v7697_v56, %v8080_v53 }
 0xfa1   :  { %v2447_v49 = vmul.f32 0.01, %v2412_v20  ;;  %vm2431_vm10 = vcmp.ge.f32.partialorder %v2412_v20, 0.0  ;;  %v2442_v58 = vmul.f32 0.01, %v2397_v18  ;;  %vm2426_vm15 = vcmp.ge.f32.partialorder %v2397_v18, 0.0 }
 0xfa2   :  { %v2136_v52 = vsel %vm2135_vm5, %v5533_v13, %v2132_v51  ;;  %v2403_v13 = vadd.f32 %v7697_v56, %v2402_v50  ;;  %v8136_v51 = vsel %vm2427_vm14, %v2400_v57, %v2443_v7  ;;  %vm2424_vm1 = vcmp.ge.f32.partialorder %v2391_v38, 0.0 }
 0xfa3   :  { %v2141_v43 = vsel %vm2138_vm6, %v2140_v47, %v2136_v52  ;;  %v8115_v39 = vsel %vm2431_vm10, %v2412_v20, %v2447_v49  ;;  %11587 = vst [vmem:[#allocation76_spill] sm:$0xff] %v8136_v51  ;;  %v2441_v47 = vmul.f32 0.01, %v2394_v44  ;;  %v8142_v52 = vsel %vm2426_vm15, %v2397_v18, %v2442_v58 }
 0xfa4   :  { %v2195_v60 = vmul.f32 %v2141_v43, %v7745_v12  ;;  %v2233_v24 = vsub.f32 %v2141_v43, %v7742_v25  ;;  %11583 = vst [vmem:[#allocation80_spill] sm:$0xff] %v8115_v39  ;;  %v2444_v59 = vmul.f32 0.01, %v2403_v13  ;;  %vm2428_vm13 = vcmp.ge.f32.partialorder %v2403_v13, 0.0 }
 0xfa5   :  { %11588 = vst [vmem:[#allocation75_spill] sm:$0xff] %v8142_v52  ;;  %v2440_v43 = vmul.f32 0.01, %v2391_v38  ;;  %vm2422_vm4 = vcmp.ge.f32.partialorder %v2385_v23, 0.0  ;;  %vm2421_vm5 = vcmp.ge.f32.partialorder %v2382_v45, 0.0  ;;  %vm2420_vm6 = vcmp.ge.f32.partialorder %v2379_v63, 0.0 }
 0xfa6   :  { %5455 = vpush %v2195_v60  ;;  %v8096_v37 = vadd.f32 %v2195_v60, %v7732_v16  ;;  %v2234_v3 = vmul.f32 %v2233_v24, %v7745_v12  ;;  %v2414_v61 = vpop.f32.mrf.mxu1  ;;  %v2409_v16 = vadd.f32 %v7697_v56, %v2408_v19  ;;  %v8130_v50 = vsel %vm2428_vm13, %v2403_v13, %v2444_v59 }
 0xfa7   :  { %v2415_v34 = vadd.f32 %v7697_v56, %v2414_v61  ;;  %11586 = vst [vmem:[#allocation77_spill] sm:$0xff] %v8130_v50  ;;  %v8148_v60 = vsel %vm2425_vm0, %v2394_v44, %v2441_v47  ;;  %v2439_v24 = vmul.f32 0.01, %v2388_v1  ;;  %v2438_v61 = vmul.f32 0.01, %v2385_v23 }
 0xfa8   :  { %vm2237_vm7 = vcmp.lt.f32.partialorder %v8096_v37, 0.999  ;;  %v8103_v42 = vadd.f32 %v2234_v3, %v7742_v25  ;;  %v2446_v25 = vmul.f32 0.01, %v2409_v16  ;;  %vm2430_vm11 = vcmp.ge.f32.partialorder %v2409_v16, 0.0  ;;  %11589 = vst [vmem:[#allocation74_spill] sm:$0xff] %v8148_v60 }
 0xfa9   :  { %vm2432_vm8 = vcmp.ge.f32.partialorder %v2415_v34, 0.0  ;;  %v2448_v29 = vmul.f32 0.01, %v2415_v34  ;;  %v8106_v27 = vsel %vm2237_vm7, %v7745_v12, 0.0  ;;  %v8154_v3 = vsel %vm2424_vm1, %v2391_v38, %v2440_v43  ;;  %v11591_v38 = vld [vmem:[#allocation92_spill] sm:$0xff]  ;;  %v11593_v43 = vld [vmem:[#allocation90_spill] sm:$0xff] }
 0xfaa   :  { %11581 = vst [vmem:[#allocation82_spill] sm:$0xff] %v8106_v27  ;;  %v8120_v19 = vsel %vm2430_vm11, %v2409_v16, %v2446_v25  ;;  %v8160_v20 = vsel %vm2423_vm2, %v2388_v1, %v2439_v24  ;;  %v2376_v16 = vadd.f32 %v7697_v56, %v8078_v54  ;;  %v2436_v11 = vmul.f32 0.01, %v2379_v63  ;;  %v11592_v1 = vld [vmem:[#allocation91_spill] sm:$0xff]  ;;  %v11594_v24 = vld [vmem:[#allocation89_spill] sm:$0xff] }
 0xfab   :  { %5457 = vpush %v8106_v27  ;;  %v8110_v28 = vsel %vm2432_vm8, %v2415_v34, %v2448_v29  ;;  %v2437_v34 = vmul.f32 0.01, %v2382_v45  ;;  %v8166_v29 = vsel %vm2422_vm4, %v2385_v23, %v2438_v61  ;;  %v2373_v53 = vadd.f32 %v7697_v56, %v8076_v22  ;;  %v11595_v61 = vld [vmem:[#allocation54_spill] sm:$0xff]  ;;  %v8420_v12 = vld [vmem:[%s11272_s21 + $0x30] sm:$0xff] }
 0xfac   :  { %11582 = vst [vmem:[#allocation81_spill] sm:$0xff] %v8110_v28  ;;  %5268 = vmatpush.xpose.msk.msrb.mxu0 %vm331_vm3, %v8110_v28  ;;  %v2435_v25 = vmul.f32 0.01, %v2376_v16  ;;  %v8184_v18 = vsel %vm2420_vm6, %v2379_v63, %v2436_v11  ;;  %vm2419_vm7 = vcmp.ge.f32.partialorder %v2376_v16, 0.0  ;;  %vm2417_vm10 = vcmp.ge.f32.partialorder %v2370_v35, 0.0 }
 0xfad   :  { %11584 = vst [vmem:[#allocation79_spill] sm:$0xff] %v8120_v19  ;;  %v8172_v49 = vsel %vm2421_vm5, %v2382_v45, %v2437_v34  ;;  %vm2418_vm8 = vcmp.ge.f32.partialorder %v2373_v53, 0.0  ;;  %v11597_v34 = vld [vmem:[#allocation55_spill] sm:$0xff] }
 0xfae   :  { %11625 = vst [vmem:[#allocation72_spill] sm:$0xff] %v8420_v12 }
 0xfb0   :  { %5269 = vmatpush.xpose.msk.msrb.mxu0 %vm331_vm3, %v8115_v39 }
 0xfb4   :  { %5270 = vmatpush.xpose.msk.msrb.mxu0 %vm331_vm3, %v8120_v19 }
 0xfb8   :  { %5271 = vmatpush.xpose.msk.msrb.mxu0 %vm331_vm3, %v8125_v40 }
 0xfbc   :  { %5272 = vmatpush.xpose.msk.msrb.mxu0 %vm331_vm3, %v8130_v50 }
 0xfc0   :  { %5273 = vmatpush.xpose.msk.msrb.mxu0 %vm331_vm3, %v8136_v51 }
 0xfc4   :  { %5274 = vmatpush.xpose.msk.msrb.mxu0 %vm331_vm3, %v8142_v52 }
 0xfc8   :  { %5275 = vmatpush.xpose.msk.msrb.mxu0 %vm331_vm3, %v8148_v60 }
 0xfcc   :  { %5276 = vmatpush.xpose.msk.msrb.mxu0 %vm331_vm3, %v8154_v3 }
 0xfd0   :  { %5277 = vmatpush.xpose.msk.msrb.mxu0 %vm331_vm3, %v8160_v20 }
 0xfd4   :  { %5278 = vmatpush.xpose.msk.msrb.mxu0 %vm331_vm3, %v8166_v29 }
 0xfd7   :  { %s5456_s12 = spop %5455 }
 0xfd8   :  { %v2198_v13 = vstv %s5456_s12  ;;  %5279 = vmatpush.xpose.msk.msrb.mxu0 %vm331_vm3, %v8172_v49  ;;  %s5842_s12 = smov [#allocation4]  }
 0xfd9   :  { %v2200_v54 = vmul.f32 %v2198_v13, %v7800_v8  ;;  %v2201_v14 = vmul.f32 %v2198_v13, %v7796_v4  ;;  %v2202_v57 = vmul.f32 %v2198_v13, %v7792_v48  ;;  %v2203_v59 = vmul.f32 %v2198_v13, %v7786_v31  ;;  %s5056_s0 = sshll.u32 %s5842_s12, 4  ;;  %s5057_s0 = int_to_ptr.vmem [resolvable:$true] %s5056_s0 }
 0xfda   :  { %v2204_v5 = vmul.f32 %v2198_v13, %v7780_v41  ;;  %v2205_v7 = vmul.f32 %v2198_v13, %v7774_v33  ;;  %v2206_v56 = vmul.f32 %v2198_v13, %v7768_v10  ;;  %v2434_v31 = vmul.f32 0.01, %v2373_v53 }
 0xfdb   :  { %v8190_v22 = vadd.f32 %v2200_v54, %v7817_v2  ;;  %v8193_v44 = vadd.f32 %v2201_v14, %v7820_v9  ;;  %v8196_v4 = vadd.f32 %v2202_v57, %v7823_v0  ;;  %v8199_v48 = vadd.f32 %v2203_v59, %v7826_v32  ;;  %v11606_v54 = vld [vmem:[#allocation59_spill] sm:$0xff]  ;;  %v11608_v57 = vld [vmem:[#allocation60_spill] sm:$0xff] }
 0xfdc   :  { %5280 = vmatpush.xpose.msk.msrb.mxu0 %vm331_vm3, %v8184_v18  ;;  %v8204_v33 = vadd.f32 %v2204_v5, %v7829_v26  ;;  %v8207_v10 = vadd.f32 %v2205_v7, %v7832_v46  ;;  %v8210_v41 = vadd.f32 %v2206_v56, %v7835_v55  ;;  %v8212_v8 = vsel %vm2419_vm7, %v2376_v16, %v2435_v25  ;;  %v11599_v16 = vld [vmem:[#allocation56_spill] sm:$0xff]  ;;  %v8269_v56 = vld [vmem:[%s10750_s6] sm:$0x1]  ;;  %s5458_s1 = spop %5457 }
 0xfdd   :  { %v2433_v2 = vmul.f32 0.01, %v2370_v35  ;;  %v2207_v9 = vmul.f32 %v2198_v13, %v7762_v36  ;;  %v8217_v0 = vsel %vm2418_vm8, %v2373_v53, %v2434_v31  ;;  %v2208_v46 = vmul.f32 %v2198_v13, %v7756_v6  ;;  %v11604_v53 = vld [vmem:[#allocation58_spill] sm:$0xff]  ;;  %v8260_v5 = vld [vmem:[%s10754_s10 + $0x78] sm:$0xff]  ;;  %v8276_v31 = vld [vmem:[%s10754_s10 + $0x70] sm:$0xff] }
 0xfde   :  { %v2209_v55 = vmul.f32 %v2198_v13, %v7750_v21  ;;  %v2210_v58 = vmul.f32 %v2198_v13, %v7737_v62  ;;  %v2211_v47 = vmul.f32 %v2198_v13, %v11591_v38  ;;  %v2212_v36 = vmul.f32 %v2198_v13, %v11592_v1  ;;  %v11601_v21 = vld [vmem:[#allocation88_spill] sm:$0xff]  ;;  %v11602_v62 = vld [vmem:[#allocation57_spill] sm:$0xff] }
 0xfdf   :  { %v8221_v32 = vsel %vm2417_vm10, %v2370_v35, %v2433_v2  ;;  %v8224_v26 = vadd.f32 %v2207_v9, %v7842_v30  ;;  %v2213_v23 = vmul.f32 %v2198_v13, %v11593_v43  ;;  %v2214_v45 = vmul.f32 %v2198_v13, %v11594_v24  ;;  %v8282_v2 = vld [vmem:[%s10754_s10 + $0x68] sm:$0xff]  ;;  %v8288_v9 = vld [vmem:[%s10754_s10 + $0x60] sm:$0xff]  ;;  %v8324_v1 = vld [vmem:[%s10754_s10 + $0x30] sm:$0xff] }
 0xfe0   :  { %5281 = vmatpush.xpose.msk.msrb.mxu0 %vm331_vm3, %v8212_v8  ;;  %v8234_v63 = vadd.f32 %v2208_v46, %v11595_v61  ;;  %v8237_v30 = vadd.f32 %v2209_v55, %v11597_v34  ;;  %v8240_v6 = vadd.f32 %v2210_v58, %v11599_v16  ;;  %v2215_v11 = vmul.f32 %v2198_v13, %v11601_v21  ;;  %v11610_v13 = vld [vmem:[#allocation61_spill] sm:$0xff]  ;;  %v8300_v55 = vld [vmem:[%s10754_s10 + $0x50] sm:$0xff]  ;;  %v8306_v58 = vld [vmem:[%s10754_s10 + $0x48] sm:$0xff] }
 0xfe1   :  { %11590 = vst [vmem:[#allocation50_spill] sm:$0xff] %v8224_v26  ;;  %v8246_v35 = vadd.f32 %v2211_v47, %v11602_v62  ;;  %v8249_v25 = vadd.f32 %v2212_v36, %v11604_v53  ;;  %v8252_v14 = vadd.f32 %v2213_v23, %v11606_v54  ;;  %v8255_v59 = vadd.f32 %v2214_v45, %v11608_v57  ;;  %v8294_v46 = vld [vmem:[%s10754_s10 + $0x58] sm:$0xff]  ;;  %v8312_v38 = vld [vmem:[%s10754_s10 + $0x40] sm:$0xff]  ;;  %v8330_v36 = vld [vmem:[%s10754_s10 + $0x28] sm:$0xff] }
 0xfe2   :  { %11596 = vst [vmem:[#allocation17_spill] sm:$0xff] %v8234_v63  ;;  %v8264_v7 = vadd.f32 %v2215_v11, %v11610_v13  ;;  %v8318_v47 = vld [vmem:[%s10754_s10 + $0x38] sm:$0xff]  ;;  %v8336_v43 = vld [vmem:[%s10754_s10 + $0x20] sm:$0xff]  ;;  %v8348_v24 = vld [vmem:[%s10754_s10 + $0x10] sm:$0xff] }
 0xfe3   :  { %11598 = vst [vmem:[#allocation51_spill] sm:$0xff] %v8237_v30  ;;  %v8342_v23 = vld [vmem:[%s10754_s10 + $0x18] sm:$0xff]  ;;  %v8354_v45 = vld [vmem:[%s10754_s10 + $0x8] sm:$0xff]  ;;  %v8360_v61 = vld [vmem:[%s10754_s10] sm:$0xff] }
 0xfe4   :  { %5282 = vmatpush.xpose.msk.msrb.mxu0 %vm331_vm3, %v8217_v0  ;;  %11600 = vst [vmem:[#allocation44_spill] sm:$0xff] %v8240_v6  ;;  %v8366_v34 = vld [vmem:[%s11272_s21 + $0x78] sm:$0xff]  ;;  %v8372_v16 = vld [vmem:[%s11272_s21 + $0x70] sm:$0xff]  ;;  %v8378_v21 = vld [vmem:[%s11272_s21 + $0x68] sm:$0xff] }
 0xfe5   :  { %11603 = vst [vmem:[#allocation43_spill] sm:$0xff] %v8246_v35  ;;  %v8384_v11 = vld [vmem:[%s11272_s21 + $0x60] sm:$0xff]  ;;  %v8390_v62 = vld [vmem:[%s11272_s21 + $0x58] sm:$0xff]  ;;  %v8396_v53 = vld [vmem:[%s11272_s21 + $0x50] sm:$0xff] }
 0xfe6   :  { %11605 = vst [vmem:[#allocation42_spill] sm:$0xff] %v8249_v25  ;;  %v8402_v54 = vld [vmem:[%s11272_s21 + $0x48] sm:$0xff]  ;;  %v8408_v57 = vld [vmem:[%s11272_s21 + $0x40] sm:$0xff]  ;;  %v8414_v13 = vld [vmem:[%s11272_s21 + $0x38] sm:$0xff] }
 0xfe7   :  { %11607 = vst [vmem:[#allocation41_spill] sm:$0xff] %v8252_v14 }
 0xfe8   :  { %5283 = vmatpush.xpose.msk.msrb.mxu0 %vm331_vm3, %v8221_v32  ;;  %11609 = vst [vmem:[#allocation40_spill] sm:$0xff] %v8255_v59  ;;  %v11641_v59 = vld [vmem:[#allocation62_spill] sm:$0xff] }
 0xfe9   :  { %11611 = vst [vmem:[#allocation39_spill] sm:$0xff] %v8264_v7  ;;  %v8508_v7 = vstv %s5458_s1  ;;  %v2655_v14 = vsub.f32 %v8221_v32, %v11641_v59 }
 0xfea   :  { %11612 = vst [vmem:[#allocation65_spill] sm:$0xff] %v8288_v9 }
 0xfeb   :  { %5284 = vmatmul.msk.f32.vlgmr.msrb.gmra.mxu0 %vm331_vm3, %v8269_v56  ;;  %11613 = vst [vmem:[#allocation66_spill] sm:$0xff] %v8294_v46 }
 0xfec   :  { %2556 = vmatpush.xpose.msra.mxu0 %v8260_v5  ;;  %11614 = vst [vmem:[#allocation67_spill] sm:$0xff] %v8300_v55 }
 0xfed   :  { %11615 = vst [vmem:[#allocation26_spill] sm:$0xff] %v8306_v58 }
 0xfee   :  { %11616 = vst [vmem:[#allocation27_spill] sm:$0xff] %v8312_v38 }
 0xfef   :  { %11617 = vst [vmem:[#allocation69_spill] sm:$0xff] %v8318_v47 }
 0xff0   :  { %2557 = vmatpush.xpose.msra.mxu0 %v8276_v31  ;;  %11618 = vst [vmem:[#allocation28_spill] sm:$0xff] %v8324_v1 }
 0xff1   :  { %11619 = vst [vmem:[#allocation68_spill] sm:$0xff] %v8330_v36 }
 0xff2   :  { %11620 = vst [vmem:[#allocation71_spill] sm:$0xff] %v8336_v43 }
 0xff3   :  { %11621 = vst [vmem:[#allocation29_spill] sm:$0xff] %v8342_v23 }
 0xff4   :  { %2558 = vmatpush.xpose.msra.mxu0 %v8282_v2  ;;  %11622 = vst [vmem:[#allocation70_spill] sm:$0xff] %v8348_v24 }
 0xff5   :  { %11623 = vst [vmem:[#allocation73_spill] sm:$0xff] %v8354_v45 }
 0xff6   :  { %11624 = vst [vmem:[#allocation30_spill] sm:$0xff] %v8360_v61 }
 0xff8   :  { %2559 = vmatpush.xpose.msra.mxu0 %v8288_v9 }
 0xffc   :  { %2560 = vmatpush.xpose.msra.mxu0 %v8294_v46 }
0x1000   :  { %2561 = vmatpush.xpose.msra.mxu0 %v8300_v55  ;;  %v11640_v55 = vld [vmem:[#allocation34_spill] sm:$0xff] }
0x1004   :  { %2562 = vmatpush.xpose.msra.mxu0 %v8306_v58  ;;  %v8474_v58 = vld [vmem:[%s10748_s4 + $0x28] sm:$0xff] }
0x1005   :  { %11634 = vst [vmem:[#allocation20_spill] sm:$0xff] %v8474_v58 }
0x1008   :  { %2563 = vmatpush.xpose.msra.mxu0 %v8312_v38  ;;  %v8468_v38 = vld [vmem:[%s10748_s4 + $0x30] sm:$0xff] }
0x1009   :  { %11633 = vst [vmem:[#allocation21_spill] sm:$0xff] %v8468_v38 }
0x100c   :  { %2564 = vmatpush.xpose.msra.mxu0 %v8318_v47  ;;  %v8462_v47 = vld [vmem:[%s10748_s4 + $0x38] sm:$0xff] }
0x100d   :  { %11632 = vst [vmem:[#allocation22_spill] sm:$0xff] %v8462_v47 }
0x1010   :  { %2565 = vmatpush.xpose.msra.mxu0 %v8324_v1 }
0x1014   :  { %2566 = vmatpush.xpose.msra.mxu0 %v8330_v36  ;;  %v8456_v36 = vld [vmem:[%s11272_s21] sm:$0xff] }
0x1015   :  { %11631 = vst [vmem:[#allocation23_spill] sm:$0xff] %v8456_v36 }
0x1018   :  { %2567 = vmatpush.xpose.msra.mxu0 %v8336_v43  ;;  %v8450_v43 = vld [vmem:[%s11272_s21 + $0x8] sm:$0xff] }
0x1019   :  { %11630 = vst [vmem:[#allocation24_spill] sm:$0xff] %v8450_v43 }
0x101c   :  { %2568 = vmatpush.xpose.msra.mxu0 %v8342_v23  ;;  %v8444_v23 = vld [vmem:[%s11272_s21 + $0x10] sm:$0xff] }
0x101d   :  { %11629 = vst [vmem:[#allocation25_spill] sm:$0xff] %v8444_v23 }
0x1020   :  { %2569 = vmatpush.xpose.msra.mxu0 %v8348_v24  ;;  %v8438_v24 = vld [vmem:[%s11272_s21 + $0x18] sm:$0xff] }
0x1021   :  { %11628 = vst [vmem:[#allocation33_spill] sm:$0xff] %v8438_v24 }
0x1024   :  { %2570 = vmatpush.xpose.msra.mxu0 %v8354_v45  ;;  %v8432_v45 = vld [vmem:[%s11272_s21 + $0x20] sm:$0xff] }
0x1025   :  { %11627 = vst [vmem:[#allocation32_spill] sm:$0xff] %v8432_v45 }
0x1028   :  { %2571 = vmatpush.xpose.msra.mxu0 %v8360_v61  ;;  %v8426_v61 = vld [vmem:[%s11272_s21 + $0x28] sm:$0xff] }
0x1029   :  { %11626 = vst [vmem:[#allocation31_spill] sm:$0xff] %v8426_v61 }
0x102c   :  { %3045 = vmatpush.xpose.msrb.mxu0 %v8366_v34 }
0x1030   :  { %3046 = vmatpush.xpose.msrb.mxu0 %v8372_v16 }
0x1034   :  { %3047 = vmatpush.xpose.msrb.mxu0 %v8378_v21 }
0x1038   :  { %3048 = vmatpush.xpose.msrb.mxu0 %v8384_v11 }
0x103c   :  { %3049 = vmatpush.xpose.msrb.mxu0 %v8390_v62 }
0x1040   :  { %3050 = vmatpush.xpose.msrb.mxu0 %v8396_v53 }
0x1044   :  { %3051 = vmatpush.xpose.msrb.mxu0 %v8402_v54 }
0x1048   :  { %3052 = vmatpush.xpose.msrb.mxu0 %v8408_v57 }
0x104c   :  { %3053 = vmatpush.xpose.msrb.mxu0 %v8414_v13 }
0x1050   :  { %3054 = vmatpush.xpose.msrb.mxu0 %v8420_v12 }
0x1054   :  { %3055 = vmatpush.xpose.msrb.mxu0 %v8426_v61 }
0x1058   :  { %3056 = vmatpush.xpose.msrb.mxu0 %v8432_v45 }
0x105c   :  { %3057 = vmatpush.xpose.msrb.mxu0 %v8438_v24 }
0x1060   :  { %3058 = vmatpush.xpose.msrb.mxu0 %v8444_v23 }
0x1064   :  { %3059 = vmatpush.xpose.msrb.mxu0 %v8450_v43 }
0x1068   :  { %3060 = vmatpush.xpose.msrb.mxu0 %v8456_v36  ;;  %v2530_v1 = vpop.f32.mrf.mxu0 }
0x1069   :  { %2549 = vmatmul.f32.vlgmr.msra.gmra.mxu2 %v2530_v1  ;;  %v8480_v1 = vld [vmem:[%s10748_s4 + $0x20] sm:$0xff] }
0x106a   :  { %2807 = vmatpush.msra.mxu2 %v8462_v47  ;;  %11635 = vst [vmem:[#allocation19_spill] sm:$0xff] %v8480_v1  ;;  %v8486_v47 = vld [vmem:[%s10748_s4 + $0x18] sm:$0xff] }
0x106b   :  { %11636 = vst [vmem:[#allocation52_spill] sm:$0xff] %v8486_v47 }
0x106c   :  { %2808 = vmatpush.msra.mxu2 %v8468_v38  ;;  %v8492_v38 = vld [vmem:[%s10748_s4 + $0x10] sm:$0xff] }
0x106d   :  { %11637 = vst [vmem:[#allocation18_spill] sm:$0xff] %v8492_v38 }
0x106e   :  { %2809 = vmatpush.msra.mxu2 %v8474_v58  ;;  %v8498_v58 = vld [vmem:[%s10748_s4 + $0x8] sm:$0xff] }
0x106f   :  { %11638 = vst [vmem:[#allocation87_spill] sm:$0xff] %v8498_v58 }
0x1070   :  { %2810 = vmatpush.msra.mxu2 %v8480_v1  ;;  %v8504_v1 = vld [vmem:[%s10748_s4] sm:$0xff] }
0x1071   :  { %11639 = vst [vmem:[#allocation92_spill] sm:$0xff] %v8504_v1 }
0x1072   :  { %2811 = vmatpush.msra.mxu2 %v8486_v47 }
0x1074   :  { %2812 = vmatpush.msra.mxu2 %v8492_v38 }
0x1076   :  { %2813 = vmatpush.msra.mxu2 %v8498_v58  ;;  %v8515_v58 = vld [vmem:[%s10754_s10 + $0xb8] sm:$0xff] }
0x1077   :  { %11642 = vst [vmem:[#allocation91_spill] sm:$0xff] %v8515_v58 }
0x1078   :  { %2814 = vmatpush.msra.mxu2 %v8504_v1  ;;  %v11659_v1 = vld [vmem:[#allocation14_spill] sm:$0xff] }
0x1079   :  { %v2660_v25 = vsub.f32 %v8166_v29, %v11659_v1 }
0x10ec   :  { %v2550_v47 = vpop.f32.mrf.mxu2 }
0x10ed   :  { %v2551_v46 = vadd.f32 %v2550_v47, %v11640_v55  ;;  %v2675_v47 = vmul.f32 %v8508_v7, %v2655_v14  ;;  %v8522_v55 = vld [vmem:[%s10754_s10 + $0xb0] sm:$0xff]  ;;  %v8535_v14 = vld [vmem:[%s10754_s10 + $0xa8] sm:$0xff] }
0x10ee   :  { %11643 = vst [vmem:[#allocation90_spill] sm:$0xff] %v8522_v55 }
0x10ef   :  { %vm2553_vm11 = vcmp.ge.f32.partialorder %v2551_v46, 0.0  ;;  %v2554_v38 = vmul.f32 0.01, %v2551_v46  ;;  %11646 = vst [vmem:[#allocation54_spill] sm:$0xff] %v8535_v14 }
0x10f1   :  { %v2555_v9 = vsel %vm2553_vm11, %v2551_v46, %v2554_v38  ;;  %v8526_v46 = vadd.f32 %v2675_v47, %v11641_v59  ;;  %v8542_v59 = vld [vmem:[%s10754_s10 + $0xa0] sm:$0xff] }
0x10f2   :  { %2572 = vmatmul.f32.vlgmr.msra.gmra.mxu0 %v2555_v9  ;;  %2592 = vmatmul.f32.vlgmr.msrb.gmra.mxu2 %v2555_v9  ;;  %v11645_v9 = vld [vmem:[#allocation63_spill] sm:$0xff]  ;;  %11647 = vst [vmem:[#allocation55_spill] sm:$0xff] %v8542_v59 }
0x10f3   :  { %3096 = vmatpush.xpose.msra.mxu0 %v8515_v58  ;;  %11644 = vst [vmem:[#allocation89_spill] sm:$0xff] %v8526_v46  ;;  %v2656_v38 = vsub.f32 %v8217_v0, %v11645_v9 }
0x10f5   :  { %v2676_v58 = vmul.f32 %v8508_v7, %v2656_v38  ;;  %v8555_v38 = vld [vmem:[%s10754_s10 + $0x98] sm:$0xff] }
0x10f6   :  { %11650 = vst [vmem:[#allocation88_spill] sm:$0xff] %v8555_v38 }
0x10f7   :  { %3097 = vmatpush.xpose.msra.mxu0 %v8522_v55  ;;  %v8546_v47 = vadd.f32 %v2676_v58, %v11645_v9  ;;  %v11649_v55 = vld [vmem:[#allocation64_spill] sm:$0xff] }
0x10f8   :  { %v8562_v58 = vld [vmem:[%s10754_s10 + $0x90] sm:$0xff] }
0x10f9   :  { %11648 = vst [vmem:[#allocation56_spill] sm:$0xff] %v8546_v47 }
0x10fa   :  { %5287 = vmatmul.msk.f32.vlgmr.msra.gmra.mxu2 %vm331_vm3, %v8526_v46  ;;  %v2657_v46 = vsub.f32 %v8212_v8, %v11649_v55  ;;  %11651 = vst [vmem:[#allocation57_spill] sm:$0xff] %v8562_v58 }
0x10fb   :  { %3098 = vmatpush.xpose.msra.mxu0 %v8535_v14 }
0x10fc   :  { %v2677_v14 = vmul.f32 %v8508_v7, %v2657_v46  ;;  %v8575_v46 = vld [vmem:[%s10754_s10 + $0x88] sm:$0xff] }
0x10fd   :  { %11654 = vst [vmem:[#allocation59_spill] sm:$0xff] %v8575_v46 }
0x10fe   :  { %v8566_v9 = vadd.f32 %v2677_v14, %v11649_v55  ;;  %v8582_v55 = vld [vmem:[%s10754_s10 + $0x80] sm:$0xff] }
0x10ff   :  { %3099 = vmatpush.xpose.msra.mxu0 %v8542_v59  ;;  %v11653_v59 = vld [vmem:[#allocation16_spill] sm:$0xff]  ;;  %11655 = vst [vmem:[#allocation60_spill] sm:$0xff] %v8582_v55 }
0x1100   :  { %11652 = vst [vmem:[#allocation58_spill] sm:$0xff] %v8566_v9 }
0x1102   :  { %5288 = vmatmul.msk.f32.gmra.mxu2 %vm331_vm3, %v8546_v47  ;;  %v2658_v47 = vsub.f32 %v8184_v18, %v11653_v59 }
0x1103   :  { %3100 = vmatpush.xpose.msra.mxu0 %v8555_v38 }
0x1104   :  { %v2678_v38 = vmul.f32 %v8508_v7, %v2658_v47 }
0x1106   :  { %v8586_v14 = vadd.f32 %v2678_v38, %v11653_v59  ;;  %v2680_v59 = vmul.f32 %v8508_v7, %v2660_v25 }
0x1107   :  { %3101 = vmatpush.xpose.msra.mxu0 %v8562_v58  ;;  %v11657_v58 = vld [vmem:[#allocation15_spill] sm:$0xff] }
0x1108   :  { %11656 = vst [vmem:[#allocation61_spill] sm:$0xff] %v8586_v14  ;;  %v8602_v38 = vadd.f32 %v2680_v59, %v11659_v1  ;;  %v11665_v59 = vld [vmem:[#allocation11_spill] sm:$0xff] }
0x110a   :  { %5289 = vmatmul.msk.f32.gmra.mxu2 %vm331_vm3, %v8566_v9  ;;  %v2659_v9 = vsub.f32 %v8172_v49, %v11657_v58  ;;  %11660 = vst [vmem:[#allocation63_spill] sm:$0xff] %v8602_v38 }
0x110b   :  { %3102 = vmatpush.xpose.msra.mxu0 %v8575_v46 }
0x110c   :  { %v2679_v46 = vmul.f32 %v8508_v7, %v2659_v9 }
0x110e   :  { %v8594_v47 = vadd.f32 %v2679_v46, %v11657_v58  ;;  %v11663_v46 = vld [vmem:[#allocation12_spill] sm:$0xff] }
0x110f   :  { %3103 = vmatpush.xpose.msra.mxu0 %v8582_v55  ;;  %v11661_v55 = vld [vmem:[#allocation13_spill] sm:$0xff] }
0x1110   :  { %11658 = vst [vmem:[#allocation62_spill] sm:$0xff] %v8594_v47  ;;  %v2661_v35 = vsub.f32 %v8160_v20, %v11661_v55 }
0x1112   :  { %5290 = vmatmul.msk.f32.gmra.mxu2 %vm331_vm3, %v8586_v14  ;;  %v2681_v58 = vmul.f32 %v8508_v7, %v2661_v35  ;;  %v2662_v14 = vsub.f32 %v8154_v3, %v11663_v46 }
0x1114   :  { %v8610_v9 = vadd.f32 %v2681_v58, %v11661_v55  ;;  %v2682_v25 = vmul.f32 %v8508_v7, %v2662_v14  ;;  %v11667_v58 = vld [vmem:[#allocation10_spill] sm:$0xff] }
0x1116   :  { %11662 = vst [vmem:[#allocation64_spill] sm:$0xff] %v8610_v9  ;;  %v8618_v1 = vadd.f32 %v2682_v25, %v11663_v46  ;;  %v11669_v25 = vld [vmem:[#allocation46_spill] sm:$0xff] }
0x1118   :  { %11664 = vst [vmem:[#allocation16_spill] sm:$0xff] %v8618_v1 }
0x111a   :  { %5291 = vmatmul.msk.f32.gmra.mxu2 %vm331_vm3, %v8594_v47  ;;  %v2663_v47 = vsub.f32 %v8148_v60, %v11665_v59 }
0x111c   :  { %v2683_v35 = vmul.f32 %v8508_v7, %v2663_v47 }
0x111e   :  { %v8626_v55 = vadd.f32 %v2683_v35, %v11665_v59  ;;  %v11671_v35 = vld [vmem:[#allocation45_spill] sm:$0xff] }
0x1120   :  { %11666 = vst [vmem:[#allocation15_spill] sm:$0xff] %v8626_v55 }
0x1122   :  { %5292 = vmatmul.msk.f32.gmra.mxu2 %vm331_vm3, %v8602_v38  ;;  %v2664_v38 = vsub.f32 %v8142_v52, %v11667_v58 }
0x1124   :  { %v2684_v14 = vmul.f32 %v8508_v7, %v2664_v38 }
0x1126   :  { %v8634_v46 = vadd.f32 %v2684_v14, %v11667_v58  ;;  %v11673_v14 = vld [vmem:[#allocation86_spill] sm:$0xff] }
0x1128   :  { %11668 = vst [vmem:[#allocation14_spill] sm:$0xff] %v8634_v46 }
0x112a   :  { %5293 = vmatmul.msk.f32.gmra.mxu2 %vm331_vm3, %v8610_v9  ;;  %v2665_v9 = vsub.f32 %v8136_v51, %v11669_v25 }
0x112c   :  { %v2685_v47 = vmul.f32 %v8508_v7, %v2665_v9 }
0x112e   :  { %v8642_v59 = vadd.f32 %v2685_v47, %v11669_v25  ;;  %v11675_v47 = vld [vmem:[#allocation85_spill] sm:$0xff] }
0x1130   :  { %11670 = vst [vmem:[#allocation13_spill] sm:$0xff] %v8642_v59 }
0x1132   :  { %5294 = vmatmul.msk.f32.gmra.mxu2 %vm331_vm3, %v8618_v1  ;;  %v2666_v1 = vsub.f32 %v8130_v50, %v11671_v35 }
0x1134   :  { %v2686_v38 = vmul.f32 %v8508_v7, %v2666_v1 }
0x1136   :  { %v8650_v58 = vadd.f32 %v2686_v38, %v11671_v35  ;;  %v11677_v38 = vld [vmem:[#allocation84_spill] sm:$0xff] }
0x1138   :  { %11672 = vst [vmem:[#allocation12_spill] sm:$0xff] %v8650_v58 }
0x113a   :  { %5295 = vmatmul.msk.f32.gmra.mxu2 %vm331_vm3, %v8626_v55  ;;  %v2667_v55 = vsub.f32 %v8125_v40, %v11673_v14 }
0x113c   :  { %v2687_v9 = vmul.f32 %v8508_v7, %v2667_v55 }
0x113e   :  { %v8658_v25 = vadd.f32 %v2687_v9, %v11673_v14  ;;  %v11679_v9 = vld [vmem:[#allocation83_spill] sm:$0xff] }
0x1140   :  { %11674 = vst [vmem:[#allocation11_spill] sm:$0xff] %v8658_v25 }
0x1142   :  { %5296 = vmatmul.msk.f32.gmra.mxu2 %vm331_vm3, %v8634_v46  ;;  %v2668_v46 = vsub.f32 %v8120_v19, %v11675_v47  ;;  %v11684_v19 = vld [vmem:[#allocation49_spill] sm:$0xff] }
0x1144   :  { %v2688_v1 = vmul.f32 %v8508_v7, %v2668_v46 }
0x1146   :  { %v8666_v35 = vadd.f32 %v2688_v1, %v11675_v47  ;;  %v11680_v1 = vld [vmem:[#allocation35_spill] sm:$0xff] }
0x1148   :  { %11676 = vst [vmem:[#allocation10_spill] sm:$0xff] %v8666_v35 }
0x114a   :  { %5297 = vmatmul.msk.f32.gmra.mxu2 %vm331_vm3, %v8642_v59  ;;  %v2669_v59 = vsub.f32 %v8115_v39, %v11677_v38 }
0x114c   :  { %v2689_v55 = vmul.f32 %v8508_v7, %v2669_v59 }
0x114e   :  { %v8674_v14 = vadd.f32 %v2689_v55, %v11677_v38 }
0x1150   :  { %11678 = vst [vmem:[#allocation46_spill] sm:$0xff] %v8674_v14 }
0x1152   :  { %5298 = vmatmul.msk.f32.gmra.mxu2 %vm331_vm3, %v8650_v58  ;;  %v2670_v58 = vsub.f32 %v8110_v28, %v11679_v9 }
0x1154   :  { %v2690_v46 = vmul.f32 %v8508_v7, %v2670_v58 }
0x1156   :  { %v8683_v6 = vadd.f32 %v2690_v46, %v11679_v9 }
0x1158   :  { %11681 = vst [vmem:[#allocation45_spill] sm:$0xff] %v8683_v6 }
0x115a   :  { %5299 = vmatmul.msk.f32.gmra.mxu2 %vm331_vm3, %v8658_v25 }
0x1162   :  { %5300 = vmatmul.msk.f32.gmra.mxu2 %vm331_vm3, %v8666_v35  ;;  %v11682_v35 = vld [vmem:[#allocation48_spill] sm:$0xff] }
0x116a   :  { %5301 = vmatmul.msk.f32.gmra.mxu2 %vm331_vm3, %v8674_v14 }
0x116f   :  { %v2573_v47 = vpop.f32.mrf.mxu0 }
0x1170   :  { %v2574_v25 = vadd.f32 %v2573_v47, %v11680_v1 }
0x1172   :  { %v2596_v30 = vadd.f32 %v2574_v25, %v11682_v35  ;;  %5302 = vmatmul.msk.f32.gmra.mxu2 %vm331_vm3, %v8683_v6  ;;  %v11683_v6 = vld [vmem:[#allocation36_spill] sm:$0xff] }
0x1174   :  { %v5285_v59 = vmul.f32 -1.442695, %v2596_v30 }
0x1175   :  { %v2593_v38 = vpop.f32.mrf.mxu2 }
0x1176   :  { %5534 = vpow2.f32 %v5285_v59 }
0x117c   :  { %v5535_v55 = vpop.eup %5534 }
0x117d   :  { %v2600_v28 = vadd.f32 1.0, %v5535_v55  ;;  %v2816_v63 = vpop.f32.mrf.mxu2  ;;  %v2594_v55 = vadd.f32 %v2593_v38, %v11683_v6 }
0x117f   :  { %5536 = vrcp.f32 %v2600_v28  ;;  %v2612_v47 = vand.u32 2147483648, %v2600_v28  ;;  %v2610_v9 = vand.u32 2147483647, %v2600_v28  ;;  %vm2606_vm13 = vweird.f32 %v2600_v28 }
0x1181   :  { %v2613_v25 = vor.u32 1.1754944e-38, %v2612_v47  ;;  %vm2611_vm15 = vcmp.eq.f32.partialorder %v2610_v9, 8.507059e+37 }
0x1185   :  { %v5537_v14 = vpop.eup %5536  ;;  %v2819_v7 = vpop.f32.mrf.mxu2 }
0x1186   :  { %v2602_v58 = vmul.f32 %v5537_v14, %v2600_v28  ;;  %vm2607_vm12 = vweird.f32 %v5537_v14 }
0x1187   :  { %vm2608_vm14 = vmor %vm2606_vm13, %vm2607_vm12 }
0x1188   :  { %v2603_v39 = vsub.f32 1.0, %v2602_v58 }
0x118a   :  { %v2604_v1 = vmul.f32 %v5537_v14, %v2603_v39 }
0x118c   :  { %v2605_v46 = vadd.f32 %v5537_v14, %v2604_v1 }
0x118d   :  { %v2822_v35 = vpop.f32.mrf.mxu2 }
0x118e   :  { %v2609_v30 = vsel %vm2608_vm14, %v5537_v14, %v2605_v46 }
0x118f   :  { %v2614_v59 = vsel %vm2611_vm15, %v2613_v25, %v2609_v30 }
0x1190   :  { %v2616_v40 = vmul.f32 %v2614_v59, %v11684_v19  ;;  %v2625_v30 = vmul.f32 %v2614_v59, %v11578_v15  ;;  %v8737_v19 = vld [vmem:[%s10749_s5] ss:$0 sm:$0xff] }
0x1192   :  { %v2617_v50 = vadd.f32 %v2616_v40, %v2594_v55  ;;  %v2619_v40 = vsub.f32 1.0, %v2614_v59 }
0x1194   :  { %5538 = vtanh.f32 %v2617_v50 }
0x1195   :  { %v2825_v51 = vpop.f32.mrf.mxu2 }
0x119a   :  { %v5539_v58 = vpop.eup %5538 }
0x119b   :  { %2621 = vrot.lane.b32.xlu1 %v5539_v58, %s5840_s11 }
0x119d   :  { %v2828_v39 = vpop.f32.mrf.mxu2 }
0x11a5   :  { %v2831_v52 = vpop.f32.mrf.mxu2 }
0x11ad   :  { %v2834_v1 = vpop.f32.mrf.mxu2 }
0x11b5   :  { %v2837_v28 = vpop.f32.mrf.mxu2 }
0x11bd   :  { %v2840_v60 = vpop.f32.mrf.mxu2 }
0x11c5   :  { %v2843_v47 = vpop.f32.mrf.mxu2 }
0x11cd   :  { %v2846_v26 = vpop.f32.mrf.mxu2 }
0x11d5   :  { %v2849_v14 = vpop.f32.mrf.mxu2 }
0x11dd   :  { %v2852_v9 = vpop.f32.mrf.mxu2 }
0x11e5   :  { %v2855_v46 = vpop.f32.mrf.mxu2 }
0x11ed   :  { %v2858_v25 = vpop.f32.mrf.mxu2 }
0x11f5   :  { %v2861_v38 = vpop.f32.mrf.mxu2 }
0x11f6   :  { %2864 = vmatpush.msrb.mxu3 %v2861_v38 }
0x11f8   :  { %2865 = vmatpush.msrb.mxu3 %v2858_v25 }
0x11fa   :  { %2866 = vmatpush.msrb.mxu3 %v2855_v46 }
0x11fc   :  { %2867 = vmatpush.msrb.mxu3 %v2852_v9 }
0x11fe   :  { %2868 = vmatpush.msrb.mxu3 %v2849_v14 }
0x1200   :  { %2869 = vmatpush.msrb.mxu3 %v2846_v26 }
0x1202   :  { %2870 = vmatpush.msrb.mxu3 %v2843_v47 }
0x1204   :  { %2871 = vmatpush.msrb.mxu3 %v2840_v60 }
0x1206   :  { %2872 = vmatpush.msrb.mxu3 %v2837_v28 }
0x1208   :  { %2873 = vmatpush.msrb.mxu3 %v2834_v1 }
0x120a   :  { %2874 = vmatpush.msrb.mxu3 %v2831_v52 }
0x120c   :  { %2875 = vmatpush.msrb.mxu3 %v2828_v39 }
0x120d   :  { %v2622_v50 = vpop.permute.xlu1 %2621 }
0x120e   :  { %v2624_v55 = vmul.f32 %v2622_v50, %v2619_v40  ;;  %2876 = vmatpush.msrb.mxu3 %v2825_v51  ;;  %v8731_v40 = vld [vmem:[#allocation3] sm:$0x1] }
0x120f   :  { %11685 = vst [vmem:[#allocation86_spill] sm:$0xff] %v8731_v40 }
0x1210   :  { %v2626_v58 = vadd.f32 %v2625_v30, %v2624_v55  ;;  %2877 = vmatpush.msrb.mxu3 %v2822_v35 }
0x1212   :  { %2878 = vmatpush.msrb.mxu3 %v2819_v7  ;;  %v2627_v46 = vmul.f32 %v2626_v58, %v11579_v17 }
0x1214   :  { %2879 = vmatpush.msrb.mxu3 %v2816_v63  ;;  %2629 = vrot.lane.b32.xlu0 %v2627_v46, %s5840_s11 }
0x1215   :  { %2880 = vmatmul.f32.vlgmr.msrb.gmra.mxu3 %v8456_v36 }
0x121d   :  { %2883 = vmatmul.f32.gmra.mxu3 %v8450_v43 }
0x1225   :  { %2886 = vmatmul.f32.gmra.mxu3 %v8444_v23 }
0x122d   :  { %2889 = vmatmul.f32.gmra.mxu3 %v8438_v24 }
0x1235   :  { %2892 = vmatmul.f32.gmra.mxu3 %v8432_v45 }
0x123d   :  { %2895 = vmatmul.f32.gmra.mxu3 %v8426_v61 }
0x1245   :  { %2898 = vmatmul.f32.gmra.mxu3 %v8420_v12 }
0x124d   :  { %2901 = vmatmul.f32.gmra.mxu3 %v8414_v13 }
0x1255   :  { %2904 = vmatmul.f32.gmra.mxu3 %v8408_v57 }
0x125d   :  { %2907 = vmatmul.f32.gmra.mxu3 %v8402_v54 }
0x1265   :  { %2910 = vmatmul.f32.gmra.mxu3 %v8396_v53 }
0x126d   :  { %2913 = vmatmul.f32.gmra.mxu3 %v8390_v62 }
0x1275   :  { %2916 = vmatmul.f32.gmra.mxu3 %v8384_v11 }
0x127d   :  { %2919 = vmatmul.f32.gmra.mxu3 %v8378_v21 }
0x1285   :  { %2922 = vmatmul.f32.gmra.mxu3 %v8372_v16 }
0x1286   :  { %v2630_v51 = vpop.permute.xlu0 %2629 }
0x1287   :  { %v2632_v52 = vsel %vm549_vm9, %v2630_v51, 0.0 }
0x1288   :  { %2633 = vadd.xlane.f32.xlu0 %v2632_v52 }
0x128d   :  { %2925 = vmatmul.f32.gmra.mxu3 %v8366_v34 }
0x1298   :  { %v8711_v60 = vpop.f32.mrf.mxu3 }
0x12a0   :  { %v8713_v26 = vpop.f32.mrf.mxu3 }
0x12a8   :  { %v8715_v63 = vpop.f32.mrf.mxu3 }
0x12b0   :  { %v8717_v35 = vpop.f32.mrf.mxu3 }
0x12b8   :  { %v8719_v7 = vpop.f32.mrf.mxu3 }
0x12c0   :  { %v8721_v59 = vpop.f32.mrf.mxu3 }
0x12c8   :  { %v8723_v39 = vpop.f32.mrf.mxu3 }
0x12d0   :  { %v8725_v1 = vpop.f32.mrf.mxu3 }
0x12d8   :  { %v8727_v28 = vpop.f32.mrf.mxu3 }
0x12e0   :  { %v8729_v47 = vpop.f32.mrf.mxu3 }
0x12e8   :  { %v2911_v14 = vpop.f32.mrf.mxu3 }
0x12f0   :  { %v2914_v9 = vpop.f32.mrf.mxu3 }
0x12f8   :  { %v2917_v25 = vpop.f32.mrf.mxu3 }
0x12fb   :  { %v2634_v38 = vpop.xlane.xlu0 %2633 }
0x12fc   :  { %v2635_v50 = vadd.f32 %v8731_v40, %v2634_v38 }
0x12fe   :  { %v5286_v30 = vmul.f32 -1.442695, %v2635_v50 }
0x1300   :  { %5540 = vpow2.f32 %v5286_v30  ;;  %v2920_v55 = vpop.f32.mrf.mxu3 }
0x1301   :  { %v2921_v43 = vadd.f32 %v8737_v19, %v2920_v55 }
0x1303   :  { %vm2942_vm7 = vcmp.ge.f32.partialorder %v2921_v43, 0.0 }
0x1306   :  { %v5541_v58 = vpop.eup %5540 }
0x1307   :  { %v2639_v46 = vadd.f32 1.0, %v5541_v58 }
0x1308   :  { %v2923_v51 = vpop.f32.mrf.mxu3 }
0x1309   :  { %5542 = vrcp.f32 %v2639_v46  ;;  %v2924_v6 = vadd.f32 %v8737_v19, %v2923_v51  ;;  %v2651_v30 = vand.u32 2147483648, %v2639_v46  ;;  %v2649_v58 = vand.u32 2147483647, %v2639_v46 }
0x130a   :  { %vm2645_vm4 = vweird.f32 %v2639_v46  ;;  %v2918_v51 = vadd.f32 %v8737_v19, %v2917_v25  ;;  %v2915_v25 = vadd.f32 %v8737_v19, %v2914_v9 }
0x130b   :  { %v2959_v23 = vmul.f32 0.01, %v2924_v6  ;;  %vm2943_vm2 = vcmp.ge.f32.partialorder %v2924_v6, 0.0  ;;  %vm2650_vm6 = vcmp.eq.f32.partialorder %v2649_v58, 8.507059e+37 }
0x130c   :  { %vm2941_vm10 = vcmp.ge.f32.partialorder %v2918_v51, 0.0  ;;  %v2956_v9 = vmul.f32 0.01, %v2915_v25  ;;  %vm2940_vm11 = vcmp.ge.f32.partialorder %v2915_v25, 0.0 }
0x130d   :  { %v8747_v61 = vsel %vm2943_vm2, %v2924_v6, %v2959_v23 }
0x130f   :  { %v5543_v52 = vpop.eup %5542 }
0x1310   :  { %v2926_v17 = vpop.f32.mrf.mxu3  ;;  %v2641_v15 = vmul.f32 %v5543_v52, %v2639_v46  ;;  %vm2646_vm1 = vweird.f32 %v5543_v52  ;;  %v2957_v46 = vmul.f32 0.01, %v2918_v51 }
0x1311   :  { %v2927_v36 = vadd.f32 %v8737_v19, %v2926_v17  ;;  %vm2647_vm5 = vmor %vm2645_vm4, %vm2646_vm1  ;;  %v2652_v17 = vor.u32 1.1754944e-38, %v2651_v30 }
0x1312   :  { %v2642_v38 = vsub.f32 1.0, %v2641_v15 }
0x1313   :  { %vm2944_vm0 = vcmp.ge.f32.partialorder %v2927_v36, 0.0  ;;  %v2960_v50 = vmul.f32 0.01, %v2927_v36 }
0x1314   :  { %v2643_v40 = vmul.f32 %v5543_v52, %v2642_v38  ;;  %v2958_v38 = vmul.f32 0.01, %v2921_v43 }
0x1315   :  { %v8742_v24 = vsel %vm2944_vm0, %v2927_v36, %v2960_v50 }
0x1316   :  { %5303 = vmatpush.xpose.msk.msra.mxu1 %vm331_vm3, %v8742_v24  ;;  %v2644_v45 = vadd.f32 %v5543_v52, %v2643_v40  ;;  %v8758_v6 = vsel %vm2942_vm7, %v2921_v43, %v2958_v38  ;;  %v2909_v43 = vadd.f32 %v8737_v19, %v8729_v47  ;;  %v2903_v47 = vadd.f32 %v8737_v19, %v8725_v1 }
0x1317   :  { %v2897_v1 = vadd.f32 %v8737_v19, %v8721_v59  ;;  %v2891_v59 = vadd.f32 %v8737_v19, %v8717_v35  ;;  %v2885_v35 = vadd.f32 %v8737_v19, %v8713_v26 }
0x1318   :  { %v2648_v15 = vsel %vm2647_vm5, %v5543_v52, %v2644_v45  ;;  %v8771_v52 = vsel %vm2941_vm10, %v2918_v51, %v2957_v46  ;;  %v2954_v30 = vmul.f32 0.01, %v2909_v43  ;;  %vm2938_vm13 = vcmp.ge.f32.partialorder %v2909_v43, 0.0 }
0x1319   :  { %v2653_v12 = vsel %vm2650_vm6, %v2652_v17, %v2648_v15  ;;  %v2952_v51 = vmul.f32 0.01, %v2903_v47  ;;  %vm2936_vm15 = vcmp.ge.f32.partialorder %v2903_v47, 0.0  ;;  %vm2934_vm1 = vcmp.ge.f32.partialorder %v2897_v1, 0.0 }
0x131a   :  { %5304 = vmatpush.xpose.msk.msra.mxu1 %vm331_vm3, %v8747_v61  ;;  %v2707_v36 = vmul.f32 %v2653_v12, %v8106_v27  ;;  %v2745_v55 = vsub.f32 %v2653_v12, %v8103_v42  ;;  %v8789_v15 = vsel %vm2938_vm13, %v2909_v43, %v2954_v30  ;;  %vm2932_vm4 = vcmp.ge.f32.partialorder %v2891_v59, 0.0 }
0x131b   :  { %v2946_v30 = vmul.f32 0.01, %v2885_v35  ;;  %vm2930_vm6 = vcmp.ge.f32.partialorder %v2885_v35, 0.0 }
0x131c   :  { %5459 = vpush %v2707_v36  ;;  %v8754_v40 = vadd.f32 %v2707_v36, %v8096_v37  ;;  %v2746_v45 = vmul.f32 %v2745_v55, %v8106_v27  ;;  %v2912_v37 = vadd.f32 %v8737_v19, %v2911_v14  ;;  %v2906_v14 = vadd.f32 %v8737_v19, %v8727_v28 }
0x131d   :  { %v2900_v28 = vadd.f32 %v8737_v19, %v8723_v39  ;;  %v8801_v55 = vsel %vm2936_vm15, %v2903_v47, %v2952_v51  ;;  %v2894_v39 = vadd.f32 %v8737_v19, %v8719_v7  ;;  %v2888_v7 = vadd.f32 %v8737_v19, %v8715_v63 }
0x131e   :  { %vm2749_vm8 = vcmp.lt.f32.partialorder %v8754_v40, 0.999  ;;  %5305 = vmatpush.xpose.msk.msra.mxu1 %vm331_vm3, %v8758_v6  ;;  %v8764_v12 = vadd.f32 %v2746_v45, %v8103_v42  ;;  %v2955_v50 = vmul.f32 0.01, %v2912_v37  ;;  %v8777_v42 = vsel %vm2940_vm11, %v2915_v25, %v2956_v9 }
0x131f   :  { %v8767_v23 = vsel %vm2749_vm8, %v8106_v27, 0.0  ;;  %vm2939_vm12 = vcmp.ge.f32.partialorder %v2912_v37, 0.0  ;;  %v2953_v17 = vmul.f32 0.01, %v2906_v14  ;;  %vm2937_vm14 = vcmp.ge.f32.partialorder %v2906_v14, 0.0 }
0x1320   :  { %11686 = vst [vmem:[#allocation85_spill] sm:$0xff] %v8767_v23  ;;  %v8783_v58 = vsel %vm2939_vm12, %v2912_v37, %v2955_v50  ;;  %v2951_v36 = vmul.f32 0.01, %v2900_v28  ;;  %vm2935_vm0 = vcmp.ge.f32.partialorder %v2900_v28, 0.0  ;;  %v2950_v45 = vmul.f32 0.01, %v2897_v1 }
0x1321   :  { %5461 = vpush %v8767_v23  ;;  %v8795_v38 = vsel %vm2937_vm14, %v2906_v14, %v2953_v17  ;;  %v2949_v46 = vmul.f32 0.01, %v2894_v39  ;;  %vm2933_vm2 = vcmp.ge.f32.partialorder %v2894_v39, 0.0  ;;  %v2948_v9 = vmul.f32 0.01, %v2891_v59 }
0x1322   :  { %5306 = vmatpush.xpose.msk.msra.mxu1 %vm331_vm3, %v8771_v52  ;;  %v8807_v25 = vsel %vm2935_vm0, %v2900_v28, %v2951_v36  ;;  %v8813_v37 = vsel %vm2934_vm1, %v2897_v1, %v2950_v45  ;;  %v2947_v50 = vmul.f32 0.01, %v2888_v7  ;;  %vm2931_vm5 = vcmp.ge.f32.partialorder %v2888_v7, 0.0 }
0x1323   :  { %v8819_v43 = vsel %vm2933_vm2, %v2894_v39, %v2949_v46  ;;  %v8825_v14 = vsel %vm2932_vm4, %v2891_v59, %v2948_v9  ;;  %v2882_v63 = vadd.f32 %v8737_v19, %v8711_v60  ;;  %v8835_v26 = vsel %vm2930_vm6, %v2885_v35, %v2946_v30  ;;  %v11691_v35 = vld [vmem:[#allocation77_spill] sm:$0xff] }
0x1324   :  { %v8831_v47 = vsel %vm2931_vm5, %v2888_v7, %v2947_v50  ;;  %v11692_v50 = vld [vmem:[#allocation78_spill] sm:$0xff] }
0x1325   :  { %v2945_v17 = vmul.f32 0.01, %v2882_v63  ;;  %vm2929_vm7 = vcmp.ge.f32.partialorder %v2882_v63, 0.0 }
0x1326   :  { %5307 = vmatpush.xpose.msk.msra.mxu1 %vm331_vm3, %v8777_v42 }
0x1327   :  { %v8843_v39 = vsel %vm2929_vm7, %v2882_v63, %v2945_v17 }
0x132a   :  { %5308 = vmatpush.xpose.msk.msra.mxu1 %vm331_vm3, %v8783_v58 }
0x132e   :  { %5309 = vmatpush.xpose.msk.msra.mxu1 %vm331_vm3, %v8789_v15 }
0x1332   :  { %5310 = vmatpush.xpose.msk.msra.mxu1 %vm331_vm3, %v8795_v38 }
0x1336   :  { %5311 = vmatpush.xpose.msk.msra.mxu1 %vm331_vm3, %v8801_v55 }
0x133a   :  { %5312 = vmatpush.xpose.msk.msra.mxu1 %vm331_vm3, %v8807_v25 }
0x133e   :  { %5313 = vmatpush.xpose.msk.msra.mxu1 %vm331_vm3, %v8813_v37 }
0x1342   :  { %5314 = vmatpush.xpose.msk.msra.mxu1 %vm331_vm3, %v8819_v43 }
0x1346   :  { %5315 = vmatpush.xpose.msk.msra.mxu1 %vm331_vm3, %v8825_v14 }
0x134a   :  { %5316 = vmatpush.xpose.msk.msra.mxu1 %vm331_vm3, %v8831_v47 }
0x134d   :  { %s5460_s19 = spop %5459 }
0x134e   :  { %v2710_v28 = vstv %s5460_s19  ;;  %5317 = vmatpush.xpose.msk.msra.mxu1 %vm331_vm3, %v8835_v26 }
0x134f   :  { %v2712_v51 = vmul.f32 %v2710_v28, %v8221_v32  ;;  %v2713_v60 = vmul.f32 %v2710_v28, %v8217_v0  ;;  %v2714_v1 = vmul.f32 %v2710_v28, %v8212_v8  ;;  %v2715_v36 = vmul.f32 %v2710_v28, %v8184_v18 }
0x1350   :  { %v2716_v45 = vmul.f32 %v2710_v28, %v8172_v49  ;;  %v2717_v59 = vmul.f32 %v2710_v28, %v8166_v29  ;;  %v2718_v46 = vmul.f32 %v2710_v28, %v8160_v20  ;;  %v2719_v18 = vmul.f32 %v2710_v28, %v8154_v3  ;;  %v11695_v3 = vld [vmem:[#allocation17_spill] sm:$0xff] }
0x1351   :  { %v8849_v7 = vadd.f32 %v2712_v51, %v8190_v22  ;;  %v8852_v9 = vadd.f32 %v2713_v60, %v8193_v44  ;;  %v8855_v0 = vadd.f32 %v2714_v1, %v8196_v4  ;;  %v8858_v8 = vadd.f32 %v2715_v36, %v8199_v48  ;;  %v11687_v22 = vld [vmem:[#allocation50_spill] sm:$0xff]  ;;  %v11697_v1 = vld [vmem:[#allocation44_spill] sm:$0xff] }
0x1352   :  { %5318 = vmatpush.xpose.msk.msra.mxu1 %vm331_vm3, %v8843_v39  ;;  %v8863_v49 = vadd.f32 %v2716_v45, %v8204_v33  ;;  %v8866_v20 = vadd.f32 %v2717_v59, %v8207_v10  ;;  %v8869_v29 = vadd.f32 %v2718_v46, %v8210_v41  ;;  %v8878_v44 = vadd.f32 %v2719_v18, %v11687_v22  ;;  %v11688_v4 = vld [vmem:[#allocation74_spill] sm:$0xff]  ;;  %v11689_v33 = vld [vmem:[#allocation75_spill] sm:$0xff]  ;;  %v11690_v41 = vld [vmem:[#allocation76_spill] sm:$0xff]  ;;  %s5462_s1 = spop %5461 }
0x1353   :  { %v2720_v48 = vmul.f32 %v2710_v28, %v11688_v4  ;;  %v2721_v10 = vmul.f32 %v2710_v28, %v11689_v33  ;;  %v2722_v32 = vmul.f32 %v2710_v28, %v11690_v41  ;;  %v2724_v63 = vmul.f32 %v2710_v28, %v11692_v50  ;;  %v11698_v45 = vld [vmem:[#allocation81_spill] sm:$0xff]  ;;  %v11699_v46 = vld [vmem:[#allocation43_spill] sm:$0xff]  ;;  %v11700_v22 = vld [vmem:[#allocation42_spill] sm:$0xff] }
0x1354   :  { %v2727_v59 = vmul.f32 %v2710_v28, %v11698_v45  ;;  %v11701_v33 = vld [vmem:[#allocation41_spill] sm:$0xff] }
0x1355   :  { %5319 = vmatmul.msk.f32.vlgmr.msra.gmra.mxu1 %vm331_vm3, %v8269_v56  ;;  %v11693_v56 = vld [vmem:[#allocation79_spill] sm:$0xff]  ;;  %v8888_v51 = vadd.f32 %v2720_v48, %v11695_v3  ;;  %v8894_v36 = vadd.f32 %v2722_v32, %v11697_v1  ;;  %v8901_v4 = vadd.f32 %v2724_v63, %v11700_v22  ;;  %v11703_v50 = vld [vmem:[#allocation65_spill] sm:$0xff]  ;;  %v11706_v32 = vld [vmem:[#allocation66_spill] sm:$0xff] }
0x1356   :  { %3068 = vmatpush.xpose.msrb.mxu1 %v8260_v5  ;;  %v2723_v5 = vmul.f32 %v2710_v28, %v11691_v35  ;;  %v2725_v30 = vmul.f32 %v2710_v28, %v11693_v56  ;;  %v11702_v35 = vld [vmem:[#allocation40_spill] sm:$0xff]  ;;  %v11710_v63 = vld [vmem:[#allocation69_spill] sm:$0xff]  ;;  %v11715_v1 = vld [vmem:[#allocation70_spill] sm:$0xff] }
0x1357   :  { %v11712_v3 = vld [vmem:[#allocation68_spill] sm:$0xff]  ;;  %v11716_v45 = vld [vmem:[#allocation73_spill] sm:$0xff]  ;;  %v11719_v22 = vld [vmem:[#allocation31_spill] sm:$0xff] }
0x1358   :  { %v8898_v18 = vadd.f32 %v2723_v5, %v11699_v46  ;;  %v8904_v41 = vadd.f32 %v2725_v30, %v11701_v33  ;;  %v11708_v5 = vld [vmem:[#allocation26_spill] sm:$0xff]  ;;  %v11711_v30 = vld [vmem:[#allocation28_spill] sm:$0xff]  ;;  %v11728_v33 = vld [vmem:[#allocation19_spill] sm:$0xff] }
0x1359   :  { %v11718_v46 = vld [vmem:[#allocation72_spill] sm:$0xff] }
0x135a   :  { %3069 = vmatpush.xpose.msrb.mxu1 %v8276_v31  ;;  %v11694_v31 = vld [vmem:[#allocation80_spill] sm:$0xff] }
0x135b   :  { %v2726_v17 = vmul.f32 %v2710_v28, %v11694_v31  ;;  %v11707_v28 = vld [vmem:[#allocation67_spill] sm:$0xff] }
0x135c   :  { %v11709_v31 = vld [vmem:[#allocation27_spill] sm:$0xff] }
0x135d   :  { %v8907_v48 = vadd.f32 %v2726_v17, %v11702_v35  ;;  %v11713_v17 = vld [vmem:[#allocation71_spill] sm:$0xff]  ;;  %v11729_v35 = vld [vmem:[#allocation52_spill] sm:$0xff] }
0x135e   :  { %3070 = vmatpush.xpose.msrb.mxu1 %v8282_v2  ;;  %v11696_v2 = vld [vmem:[#allocation51_spill] sm:$0xff] }
0x135f   :  { %v8891_v60 = vadd.f32 %v2721_v10, %v11696_v2  ;;  %v11704_v10 = vld [vmem:[#allocation39_spill] sm:$0xff]  ;;  %v11714_v2 = vld [vmem:[#allocation29_spill] sm:$0xff] }
0x1360   :  { %v8911_v56 = vadd.f32 %v2727_v59, %v11704_v10  ;;  %v11717_v59 = vld [vmem:[#allocation30_spill] sm:$0xff]  ;;  %v11731_v10 = vld [vmem:[#allocation87_spill] sm:$0xff] }
0x1362   :  { %3071 = vmatpush.xpose.msrb.mxu1 %v11703_v50  ;;  %11705 = vst [vmem:[#allocation84_spill] sm:$0xff] %v8911_v56  ;;  %v11730_v50 = vld [vmem:[#allocation18_spill] sm:$0xff] }
0x1366   :  { %3072 = vmatpush.xpose.msrb.mxu1 %v11706_v32  ;;  %v11732_v32 = vld [vmem:[#allocation92_spill] sm:$0xff] }
0x136a   :  { %3073 = vmatpush.xpose.msrb.mxu1 %v11707_v28 }
0x136e   :  { %3074 = vmatpush.xpose.msrb.mxu1 %v11708_v5  ;;  %v11733_v5 = vld [vmem:[#allocation34_spill] sm:$0xff] }
0x1372   :  { %3075 = vmatpush.xpose.msrb.mxu1 %v11709_v31 }
0x1376   :  { %3076 = vmatpush.xpose.msrb.mxu1 %v11710_v63 }
0x137a   :  { %3077 = vmatpush.xpose.msrb.mxu1 %v11711_v30  ;;  %v8950_v30 = vstv %s5462_s1 }
0x137e   :  { %3078 = vmatpush.xpose.msrb.mxu1 %v11712_v3 }
0x1382   :  { %3079 = vmatpush.xpose.msrb.mxu1 %v11713_v17  ;;  %v11734_v17 = vld [vmem:[#allocation89_spill] sm:$0xff] }
0x1386   :  { %3080 = vmatpush.xpose.msrb.mxu1 %v11714_v2  ;;  %v3167_v2 = vsub.f32 %v8843_v39, %v11734_v17 }
0x138a   :  { %3081 = vmatpush.xpose.msrb.mxu1 %v11715_v1  ;;  %v11735_v1 = vld [vmem:[#allocation91_spill] sm:$0xff] }
0x138e   :  { %3082 = vmatpush.xpose.msrb.mxu1 %v11716_v45  ;;  %v3187_v45 = vmul.f32 %v8950_v30, %v3167_v2 }
0x1392   :  { %3083 = vmatpush.xpose.msrb.mxu1 %v11717_v59  ;;  %v11736_v59 = vld [vmem:[#allocation90_spill] sm:$0xff] }
0x1396   :  { %3557 = vmatpush.xpose.msra.mxu1 %v8366_v34  ;;  %v11720_v34 = vld [vmem:[#allocation32_spill] sm:$0xff] }
0x139a   :  { %3558 = vmatpush.xpose.msra.mxu1 %v8372_v16  ;;  %v11721_v16 = vld [vmem:[#allocation33_spill] sm:$0xff] }
0x139e   :  { %3559 = vmatpush.xpose.msra.mxu1 %v8378_v21  ;;  %v11722_v21 = vld [vmem:[#allocation25_spill] sm:$0xff] }
0x13a2   :  { %3560 = vmatpush.xpose.msra.mxu1 %v8384_v11  ;;  %v11723_v11 = vld [vmem:[#allocation24_spill] sm:$0xff] }
0x13a6   :  { %3561 = vmatpush.xpose.msra.mxu1 %v8390_v62  ;;  %v11724_v62 = vld [vmem:[#allocation23_spill] sm:$0xff] }
0x13aa   :  { %3562 = vmatpush.xpose.msra.mxu1 %v8396_v53 }
0x13ae   :  { %3563 = vmatpush.xpose.msra.mxu1 %v8402_v54  ;;  %v11725_v54 = vld [vmem:[#allocation22_spill] sm:$0xff] }
0x13b2   :  { %3564 = vmatpush.xpose.msra.mxu1 %v8408_v57  ;;  %v11726_v57 = vld [vmem:[#allocation21_spill] sm:$0xff] }
0x13b6   :  { %3565 = vmatpush.xpose.msra.mxu1 %v8414_v13  ;;  %v11727_v13 = vld [vmem:[#allocation20_spill] sm:$0xff] }
0x13ba   :  { %3566 = vmatpush.xpose.msra.mxu1 %v11718_v46  ;;  %v8958_v46 = vadd.f32 %v3187_v45, %v11734_v17  ;;  %v11752_v45 = vld [vmem:[#allocation63_spill] sm:$0xff] }
0x13bc   :  { %11737 = vst [vmem:[#allocation83_spill] sm:$0xff] %v8958_v46 }
0x13be   :  { %3567 = vmatpush.xpose.msra.mxu1 %v11719_v22  ;;  %v11738_v22 = vld [vmem:[#allocation56_spill] sm:$0xff] }
0x13c2   :  { %3568 = vmatpush.xpose.msra.mxu1 %v11720_v34  ;;  %v3168_v34 = vsub.f32 %v8835_v26, %v11738_v22 }
0x13c6   :  { %3569 = vmatpush.xpose.msra.mxu1 %v11721_v16  ;;  %v11739_v16 = vld [vmem:[#allocation54_spill] sm:$0xff] }
0x13ca   :  { %3570 = vmatpush.xpose.msra.mxu1 %v11722_v21  ;;  %v3188_v21 = vmul.f32 %v8950_v30, %v3168_v34 }
0x13ce   :  { %3571 = vmatpush.xpose.msra.mxu1 %v11723_v11  ;;  %v11740_v11 = vld [vmem:[#allocation55_spill] sm:$0xff] }
0x13d2   :  { %3572 = vmatpush.xpose.msra.mxu1 %v11724_v62  ;;  %v3042_v53 = vpop.f32.mrf.mxu1  ;;  %v8968_v62 = vadd.f32 %v3188_v21, %v11738_v22 }
0x13d3   :  { %3061 = vmatmul.f32.vlgmr.msrb.gmra.mxu0 %v3042_v53  ;;  %v11742_v53 = vld [vmem:[#allocation58_spill] sm:$0xff] }
0x13d4   :  { %3319 = vmatpush.msrb.mxu0 %v11725_v54  ;;  %11741 = vst [vmem:[#allocation50_spill] sm:$0xff] %v8968_v62  ;;  %v3169_v54 = vsub.f32 %v8831_v47, %v11742_v53 }
0x13d6   :  { %3320 = vmatpush.msrb.mxu0 %v11726_v57  ;;  %v11743_v57 = vld [vmem:[#allocation88_spill] sm:$0xff] }
0x13d8   :  { %3321 = vmatpush.msrb.mxu0 %v11727_v13  ;;  %v3189_v13 = vmul.f32 %v8950_v30, %v3169_v54  ;;  %v11756_v54 = vld [vmem:[#allocation16_spill] sm:$0xff] }
0x13da   :  { %3322 = vmatpush.msrb.mxu0 %v11728_v33  ;;  %v11744_v33 = vld [vmem:[#allocation57_spill] sm:$0xff] }
0x13dc   :  { %3323 = vmatpush.msrb.mxu0 %v11729_v35  ;;  %v8978_v35 = vadd.f32 %v3189_v13, %v11742_v53 }
0x13de   :  { %3324 = vmatpush.msrb.mxu0 %v11730_v50  ;;  %11745 = vst [vmem:[#allocation74_spill] sm:$0xff] %v8978_v35  ;;  %v11746_v50 = vld [vmem:[#allocation61_spill] sm:$0xff] }
0x13e0   :  { %3325 = vmatpush.msrb.mxu0 %v11731_v10  ;;  %v3170_v10 = vsub.f32 %v8825_v14, %v11746_v50 }
0x13e2   :  { %3326 = vmatpush.msrb.mxu0 %v11732_v32  ;;  %v11747_v32 = vld [vmem:[#allocation59_spill] sm:$0xff] }
0x1450   :  { %v3062_v28 = vpop.f32.mrf.mxu0 }
0x1451   :  { %v3063_v31 = vadd.f32 %v3062_v28, %v11733_v5  ;;  %v3190_v28 = vmul.f32 %v8950_v30, %v3170_v10 }
0x1453   :  { %vm3065_vm8 = vcmp.ge.f32.partialorder %v3063_v31, 0.0  ;;  %v3066_v63 = vmul.f32 0.01, %v3063_v31 }
0x1455   :  { %v3067_v3 = vsel %vm3065_vm8, %v3063_v31, %v3066_v63  ;;  %v11748_v31 = vld [vmem:[#allocation60_spill] sm:$0xff]  ;;  %v8988_v63 = vadd.f32 %v3190_v28, %v11746_v50  ;;  %v11758_v50 = vld [vmem:[#allocation15_spill] sm:$0xff] }
0x1456   :  { %3084 = vmatmul.f32.vlgmr.msrb.gmra.mxu1 %v3067_v3  ;;  %3104 = vmatmul.f32.vlgmr.msra.gmra.mxu0 %v3067_v3  ;;  %v11750_v3 = vld [vmem:[#allocation62_spill] sm:$0xff]  ;;  %v3175_v10 = vsub.f32 %v8795_v38, %v11758_v50 }
0x1457   :  { %3608 = vmatpush.xpose.msrb.mxu1 %v11735_v1  ;;  %11749 = vst [vmem:[#allocation75_spill] sm:$0xff] %v8988_v63  ;;  %v3171_v17 = vsub.f32 %v8819_v43, %v11750_v3 }
0x1459   :  { %v3191_v2 = vmul.f32 %v8950_v30, %v3171_v17 }
0x145b   :  { %3609 = vmatpush.xpose.msrb.mxu1 %v11736_v59  ;;  %v8996_v1 = vadd.f32 %v3191_v2, %v11750_v3  ;;  %v3172_v59 = vsub.f32 %v8813_v37, %v11752_v45 }
0x145d   :  { %11751 = vst [vmem:[#allocation76_spill] sm:$0xff] %v8996_v1  ;;  %v3192_v22 = vmul.f32 %v8950_v30, %v3172_v59 }
0x145e   :  { %5322 = vmatmul.msk.f32.vlgmr.msrb.gmra.mxu0 %vm331_vm3, %v8958_v46 }
0x145f   :  { %3610 = vmatpush.xpose.msrb.mxu1 %v11739_v16  ;;  %v9004_v34 = vadd.f32 %v3192_v22, %v11752_v45  ;;  %v11754_v16 = vld [vmem:[#allocation64_spill] sm:$0xff]  ;;  %v11762_v45 = vld [vmem:[#allocation13_spill] sm:$0xff] }
0x1460   :  { %v3173_v21 = vsub.f32 %v8807_v25, %v11754_v16  ;;  %v3177_v59 = vsub.f32 %v8783_v58, %v11762_v45 }
0x1461   :  { %11753 = vst [vmem:[#allocation77_spill] sm:$0xff] %v9004_v34 }
0x1462   :  { %v3197_v22 = vmul.f32 %v8950_v30, %v3177_v59  ;;  %v11770_v59 = vld [vmem:[#allocation46_spill] sm:$0xff] }
0x1463   :  { %3611 = vmatpush.xpose.msrb.mxu1 %v11740_v11  ;;  %v3193_v11 = vmul.f32 %v8950_v30, %v3173_v21  ;;  %v11764_v21 = vld [vmem:[#allocation12_spill] sm:$0xff] }
0x1465   :  { %v9012_v53 = vadd.f32 %v3193_v11, %v11754_v16  ;;  %v9044_v16 = vadd.f32 %v3197_v22, %v11762_v45  ;;  %v3178_v11 = vsub.f32 %v8777_v42, %v11764_v21  ;;  %v3181_v22 = vsub.f32 %v8747_v61, %v11770_v59 }
0x1466   :  { %5323 = vmatmul.msk.f32.gmra.mxu0 %vm331_vm3, %v8968_v62 }
0x1467   :  { %3612 = vmatpush.xpose.msrb.mxu1 %v11743_v57  ;;  %11755 = vst [vmem:[#allocation78_spill] sm:$0xff] %v9012_v53  ;;  %v3174_v57 = vsub.f32 %v8801_v55, %v11756_v54 }
0x1468   :  { %11763 = vst [vmem:[#allocation51_spill] sm:$0xff] %v9044_v16 }
0x1469   :  { %v3194_v13 = vmul.f32 %v8950_v30, %v3174_v57 }
0x146b   :  { %3613 = vmatpush.xpose.msrb.mxu1 %v11744_v33  ;;  %v9020_v33 = vadd.f32 %v3194_v13, %v11756_v54  ;;  %v3198_v54 = vmul.f32 %v8950_v30, %v3178_v11  ;;  %v11766_v13 = vld [vmem:[#allocation11_spill] sm:$0xff] }
0x146d   :  { %11757 = vst [vmem:[#allocation79_spill] sm:$0xff] %v9020_v33  ;;  %v9052_v57 = vadd.f32 %v3198_v54, %v11764_v21  ;;  %v3201_v21 = vmul.f32 %v8950_v30, %v3181_v22  ;;  %v11772_v54 = vld [vmem:[#allocation45_spill] sm:$0xff] }
0x146e   :  { %5324 = vmatmul.msk.f32.gmra.mxu0 %vm331_vm3, %v8978_v35 }
0x146f   :  { %3614 = vmatpush.xpose.msrb.mxu1 %v11747_v32  ;;  %v3195_v32 = vmul.f32 %v8950_v30, %v3175_v10  ;;  %11765 = vst [vmem:[#allocation44_spill] sm:$0xff] %v9052_v57  ;;  %v9076_v11 = vadd.f32 %v3201_v21, %v11770_v59 }
0x1471   :  { %v9028_v28 = vadd.f32 %v3195_v32, %v11758_v50  ;;  %v3179_v50 = vsub.f32 %v8771_v52, %v11766_v13  ;;  %11771 = vst [vmem:[#allocation42_spill] sm:$0xff] %v9076_v11 }
0x1473   :  { %3615 = vmatpush.xpose.msrb.mxu1 %v11748_v31  ;;  %11759 = vst [vmem:[#allocation80_spill] sm:$0xff] %v9028_v28  ;;  %v11760_v31 = vld [vmem:[#allocation14_spill] sm:$0xff]  ;;  %v3199_v10 = vmul.f32 %v8950_v30, %v3179_v50 }
0x1474   :  { %v3176_v3 = vsub.f32 %v8789_v15, %v11760_v31 }
0x1475   :  { %v9060_v32 = vadd.f32 %v3199_v10, %v11766_v13  ;;  %v3182_v13 = vsub.f32 %v8742_v24, %v11772_v54 }
0x1476   :  { %5325 = vmatmul.msk.f32.gmra.mxu0 %vm331_vm3, %v8988_v63  ;;  %v3196_v17 = vmul.f32 %v8950_v30, %v3176_v3 }
0x1477   :  { %11767 = vst [vmem:[#allocation81_spill] sm:$0xff] %v9060_v32  ;;  %v3202_v50 = vmul.f32 %v8950_v30, %v3182_v13 }
0x1478   :  { %v9036_v2 = vadd.f32 %v3196_v17, %v11760_v31  ;;  %v11768_v31 = vld [vmem:[#allocation10_spill] sm:$0xff] }
0x1479   :  { %v3180_v3 = vsub.f32 %v8758_v6, %v11768_v31  ;;  %v9085_v27 = vadd.f32 %v3202_v50, %v11772_v54 }
0x147a   :  { %11761 = vst [vmem:[#allocation17_spill] sm:$0xff] %v9036_v2 }
0x147b   :  { %v3200_v17 = vmul.f32 %v8950_v30, %v3180_v3  ;;  %v11773_v3 = vld [vmem:[#allocation35_spill] sm:$0xff]  ;;  %11774 = vst [vmem:[#allocation41_spill] sm:$0xff] %v9085_v27 }
0x147d   :  { %v9068_v45 = vadd.f32 %v3200_v17, %v11768_v31 }
0x147e   :  { %5326 = vmatmul.msk.f32.gmra.mxu0 %vm331_vm3, %v8996_v1 }
0x147f   :  { %11769 = vst [vmem:[#allocation43_spill] sm:$0xff] %v9068_v45 }
0x1486   :  { %5327 = vmatmul.msk.f32.gmra.mxu0 %vm331_vm3, %v9004_v34 }
0x148e   :  { %5328 = vmatmul.msk.f32.gmra.mxu0 %vm331_vm3, %v9012_v53 }
0x1496   :  { %5329 = vmatmul.msk.f32.gmra.mxu0 %vm331_vm3, %v9020_v33 }
0x149e   :  { %5330 = vmatmul.msk.f32.gmra.mxu0 %vm331_vm3, %v9028_v28  ;;  %v11777_v28 = vld [vmem:[#allocation49_spill] sm:$0xff] }
0x14a6   :  { %5331 = vmatmul.msk.f32.gmra.mxu0 %vm331_vm3, %v9036_v2 }
0x14ae   :  { %5332 = vmatmul.msk.f32.gmra.mxu0 %vm331_vm3, %v9044_v16 }
0x14b6   :  { %5333 = vmatmul.msk.f32.gmra.mxu0 %vm331_vm3, %v9052_v57 }
0x14be   :  { %5334 = vmatmul.msk.f32.gmra.mxu0 %vm331_vm3, %v9060_v32 }
0x14c6   :  { %5335 = vmatmul.msk.f32.gmra.mxu0 %vm331_vm3, %v9068_v45  ;;  %v11775_v45 = vld [vmem:[#allocation48_spill] sm:$0xff] }
0x14ce   :  { %5336 = vmatmul.msk.f32.gmra.mxu0 %vm331_vm3, %v9076_v11 }
0x14d3   :  { %v3085_v10 = vpop.f32.mrf.mxu1  ;;  %v3105_v31 = vpop.f32.mrf.mxu0 }
0x14d4   :  { %v3086_v17 = vadd.f32 %v3085_v10, %v11773_v3 }
0x14d6   :  { %v3108_v22 = vadd.f32 %v3086_v17, %v11775_v45  ;;  %5337 = vmatmul.msk.f32.gmra.mxu0 %vm331_vm3, %v9085_v27  ;;  %v11776_v27 = vld [vmem:[#allocation36_spill] sm:$0xff] }
0x14d8   :  { %v5320_v59 = vmul.f32 -1.442695, %v3108_v22 }
0x14da   :  { %5544 = vpow2.f32 %v5320_v59 }
0x14db   :  { %v3328_v21 = vpop.f32.mrf.mxu0 }
0x14e0   :  { %v5545_v32 = vpop.eup %5544 }
0x14e1   :  { %v3112_v57 = vadd.f32 1.0, %v5545_v32  ;;  %v3106_v32 = vadd.f32 %v3105_v31, %v11776_v27  ;;  %v11778_v31 = vld [vmem:[#allocation37_spill] sm:$0xff] }
0x14e3   :  { %5546 = vrcp.f32 %v3112_v57  ;;  %v3331_v11 = vpop.f32.mrf.mxu0  ;;  %v3124_v10 = vand.u32 2147483648, %v3112_v57  ;;  %v3122_v54 = vand.u32 2147483647, %v3112_v57  ;;  %vm3118_vm11 = vweird.f32 %v3112_v57 }
0x14e5   :  { %v3125_v17 = vor.u32 1.1754944e-38, %v3124_v10  ;;  %vm3123_vm13 = vcmp.eq.f32.partialorder %v3122_v54, 8.507059e+37 }
0x14e9   :  { %v5547_v30 = vpop.eup %5546 }
0x14ea   :  { %v3114_v13 = vmul.f32 %v5547_v30, %v3112_v57  ;;  %vm3119_vm10 = vweird.f32 %v5547_v30 }
0x14eb   :  { %v3334_v16 = vpop.f32.mrf.mxu0  ;;  %vm3120_vm12 = vmor %vm3118_vm11, %vm3119_vm10 }
0x14ec   :  { %v3115_v2 = vsub.f32 1.0, %v3114_v13 }
0x14ee   :  { %v3116_v3 = vmul.f32 %v5547_v30, %v3115_v2 }
0x14f0   :  { %v3117_v50 = vadd.f32 %v5547_v30, %v3116_v3 }
0x14f2   :  { %v3121_v45 = vsel %vm3120_vm12, %v5547_v30, %v3117_v50 }
0x14f3   :  { %v3126_v22 = vsel %vm3123_vm13, %v3125_v17, %v3121_v45  ;;  %v3337_v59 = vpop.f32.mrf.mxu0 }
0x14f4   :  { %v3128_v33 = vmul.f32 %v3126_v22, %v11777_v28 }
0x14f6   :  { %v3129_v53 = vadd.f32 %v3128_v33, %v3106_v32  ;;  %v3137_v32 = vmul.f32 %v3126_v22, %v11778_v31 }
0x14f8   :  { %5548 = vtanh.f32 %v3129_v53  ;;  %v3131_v53 = vsub.f32 1.0, %v3126_v22  ;;  %v9129_v22 = vld [vmem:[%s11272_s21 + $0x28] sm:$0xff] }
0x14f9   :  { %11785 = vst [vmem:[#allocation26_spill] sm:$0xff] %v9129_v22 }
0x14fb   :  { %v3340_v34 = vpop.f32.mrf.mxu0 }
0x14fe   :  { %v5549_v13 = vpop.eup %5548 }
0x14ff   :  { %3133 = vrot.lane.b32.xlu1 %v5549_v13, %s5840_s11 }
0x1503   :  { %v3343_v2 = vpop.f32.mrf.mxu0 }
0x150b   :  { %v3346_v1 = vpop.f32.mrf.mxu0 }
0x1513   :  { %v3349_v3 = vpop.f32.mrf.mxu0 }
0x151b   :  { %v3352_v57 = vpop.f32.mrf.mxu0 }
0x1523   :  { %v3355_v63 = vpop.f32.mrf.mxu0 }
0x152b   :  { %v3358_v10 = vpop.f32.mrf.mxu0 }
0x1533   :  { %v3361_v30 = vpop.f32.mrf.mxu0 }
0x153b   :  { %v3364_v54 = vpop.f32.mrf.mxu0 }
0x1543   :  { %v3367_v45 = vpop.f32.mrf.mxu0 }
0x154b   :  { %v3370_v50 = vpop.f32.mrf.mxu0 }
0x1553   :  { %v3373_v17 = vpop.f32.mrf.mxu0 }
0x1554   :  { %3376 = vmatpush.msrb.mxu2 %v3373_v17  ;;  %v9171_v17 = vld [vmem:[%s11272_s21 + $0x60] sm:$0xff] }
0x1555   :  { %11792 = vst [vmem:[#allocation70_spill] sm:$0xff] %v9171_v17 }
0x1556   :  { %3377 = vmatpush.msrb.mxu2 %v3370_v50 }
0x1558   :  { %3378 = vmatpush.msrb.mxu2 %v3367_v45  ;;  %v9165_v45 = vld [vmem:[%s11272_s21 + $0x58] sm:$0xff] }
0x1559   :  { %11791 = vst [vmem:[#allocation29_spill] sm:$0xff] %v9165_v45 }
0x155a   :  { %3379 = vmatpush.msrb.mxu2 %v3364_v54  ;;  %v9159_v54 = vld [vmem:[%s11272_s21 + $0x50] sm:$0xff] }
0x155b   :  { %11790 = vst [vmem:[#allocation71_spill] sm:$0xff] %v9159_v54 }
0x155c   :  { %3380 = vmatpush.msrb.mxu2 %v3361_v30  ;;  %v9097_v30 = vld [vmem:[%s11272_s21] sm:$0xff] }
0x155d   :  { %11779 = vst [vmem:[#allocation40_spill] sm:$0xff] %v9097_v30 }
0x155e   :  { %3381 = vmatpush.msrb.mxu2 %v3358_v10  ;;  %v9153_v10 = vld [vmem:[%s11272_s21 + $0x48] sm:$0xff] }
0x155f   :  { %11789 = vst [vmem:[#allocation68_spill] sm:$0xff] %v9153_v10 }
0x1560   :  { %3382 = vmatpush.msrb.mxu2 %v3355_v63 }
0x1562   :  { %3383 = vmatpush.msrb.mxu2 %v3352_v57  ;;  %v9147_v57 = vld [vmem:[%s11272_s21 + $0x40] sm:$0xff] }
0x1563   :  { %11788 = vst [vmem:[#allocation28_spill] sm:$0xff] %v9147_v57 }
0x1564   :  { %3384 = vmatpush.msrb.mxu2 %v3349_v3  ;;  %v9141_v3 = vld [vmem:[%s11272_s21 + $0x38] sm:$0xff] }
0x1565   :  { %11787 = vst [vmem:[#allocation69_spill] sm:$0xff] %v9141_v3 }
0x1566   :  { %3385 = vmatpush.msrb.mxu2 %v3346_v1  ;;  %v11780_v1 = vld [vmem:[#allocation38_spill] sm:$0xff] }
0x1568   :  { %3386 = vmatpush.msrb.mxu2 %v3343_v2 }
0x156a   :  { %3387 = vmatpush.msrb.mxu2 %v3340_v34  ;;  %v9105_v34 = vld [vmem:[%s11272_s21 + $0x8] sm:$0xff] }
0x156b   :  { %11781 = vst [vmem:[#allocation65_spill] sm:$0xff] %v9105_v34 }
0x156c   :  { %3388 = vmatpush.msrb.mxu2 %v3337_v59  ;;  %v9135_v59 = vld [vmem:[%s11272_s21 + $0x30] sm:$0xff] }
0x156d   :  { %11786 = vst [vmem:[#allocation27_spill] sm:$0xff] %v9135_v59 }
0x156e   :  { %3389 = vmatpush.msrb.mxu2 %v3334_v16  ;;  %v9111_v16 = vld [vmem:[%s11272_s21 + $0x10] sm:$0xff] }
0x156f   :  { %11782 = vst [vmem:[#allocation39_spill] sm:$0xff] %v9111_v16 }
0x1570   :  { %3390 = vmatpush.msrb.mxu2 %v3331_v11  ;;  %v9117_v11 = vld [vmem:[%s11272_s21 + $0x18] sm:$0xff] }
0x1571   :  { %v3134_v33 = vpop.permute.xlu1 %3133  ;;  %11783 = vst [vmem:[#allocation66_spill] sm:$0xff] %v9117_v11 }
0x1572   :  { %v3136_v13 = vmul.f32 %v3134_v33, %v3131_v53  ;;  %3391 = vmatpush.msrb.mxu2 %v3328_v21  ;;  %v9123_v21 = vld [vmem:[%s11272_s21 + $0x20] sm:$0xff]  ;;  %v9178_v33 = vld [vmem:[%s11272_s21 + $0x68] sm:$0xff] }
0x1573   :  { %3392 = vmatmul.f32.vlgmr.msrb.gmra.mxu2 %v9097_v30  ;;  %11784 = vst [vmem:[#allocation67_spill] sm:$0xff] %v9123_v21  ;;  %v11796_v30 = vld [vmem:[#allocation86_spill] sm:$0xff] }
0x1574   :  { %v3138_v63 = vadd.f32 %v3137_v32, %v3136_v13  ;;  %11793 = vst [vmem:[#allocation73_spill] sm:$0xff] %v9178_v33  ;;  %v9184_v32 = vld [vmem:[%s11272_s21 + $0x70] sm:$0xff]  ;;  %v9190_v13 = vld [vmem:[%s11272_s21 + $0x78] sm:$0xff] }
0x1575   :  { %11794 = vst [vmem:[#allocation30_spill] sm:$0xff] %v9184_v32 }
0x1576   :  { %v3139_v2 = vmul.f32 %v3138_v63, %v11780_v1  ;;  %11795 = vst [vmem:[#allocation72_spill] sm:$0xff] %v9190_v13 }
0x1578   :  { %3141 = vrot.lane.b32.xlu2 %v3139_v2, %s5840_s11 }
0x157b   :  { %3395 = vmatmul.f32.gmra.mxu2 %v9105_v34 }
0x1583   :  { %3398 = vmatmul.f32.gmra.mxu2 %v9111_v16 }
0x158b   :  { %3401 = vmatmul.f32.gmra.mxu2 %v9117_v11 }
0x1593   :  { %3404 = vmatmul.f32.gmra.mxu2 %v9123_v21 }
0x159b   :  { %3407 = vmatmul.f32.gmra.mxu2 %v9129_v22 }
0x15a3   :  { %3410 = vmatmul.f32.gmra.mxu2 %v9135_v59 }
0x15ab   :  { %3413 = vmatmul.f32.gmra.mxu2 %v9141_v3 }
0x15b3   :  { %3416 = vmatmul.f32.gmra.mxu2 %v9147_v57 }
0x15bb   :  { %3419 = vmatmul.f32.gmra.mxu2 %v9153_v10 }
0x15c3   :  { %3422 = vmatmul.f32.gmra.mxu2 %v9159_v54 }
0x15cb   :  { %3425 = vmatmul.f32.gmra.mxu2 %v9165_v45 }
0x15d2   :  { %v3142_v50 = vpop.permute.xlu2 %3141 }
0x15d3   :  { %3428 = vmatmul.f32.gmra.mxu2 %v9171_v17  ;;  %v3144_v53 = vsel %vm549_vm9, %v3142_v50, 0.0 }
0x15d4   :  { %3145 = vadd.xlane.f32.xlu1 %v3144_v53 }
0x15db   :  { %3431 = vmatmul.f32.gmra.mxu2 %v9178_v33 }
0x15e3   :  { %3434 = vmatmul.f32.gmra.mxu2 %v9184_v32 }
0x15eb   :  { %3437 = vmatmul.f32.gmra.mxu2 %v9190_v13 }
0x15f6   :  { %v9193_v63 = vpop.f32.mrf.mxu2 }
0x15fe   :  { %v9195_v2 = vpop.f32.mrf.mxu2 }
0x1606   :  { %v9197_v50 = vpop.f32.mrf.mxu2 }
0x160e   :  { %v9199_v53 = vpop.f32.mrf.mxu2 }
0x1616   :  { %v9201_v1 = vpop.f32.mrf.mxu2 }
0x161e   :  { %v9203_v31 = vpop.f32.mrf.mxu2 }
0x1626   :  { %v9205_v28 = vpop.f32.mrf.mxu2 }
0x162e   :  { %v9207_v27 = vpop.f32.mrf.mxu2 }
0x1636   :  { %v9209_v35 = vpop.f32.mrf.mxu2 }
0x163e   :  { %v3420_v62 = vpop.f32.mrf.mxu2 }
0x1646   :  { %v3423_v46 = vpop.f32.mrf.mxu2 }
0x1647   :  { %v3146_v5 = vpop.xlane.xlu1 %3145 }
0x1648   :  { %v3147_v34 = vadd.f32 %v11796_v30, %v3146_v5 }
0x164a   :  { %v5321_v16 = vmul.f32 -1.442695, %v3147_v34 }
0x164c   :  { %5550 = vpow2.f32 %v5321_v16 }
0x164e   :  { %v3426_v11 = vpop.f32.mrf.mxu2 }
0x1652   :  { %v5551_v21 = vpop.eup %5550 }
0x1653   :  { %v3151_v22 = vadd.f32 1.0, %v5551_v21 }
0x1655   :  { %5552 = vrcp.f32 %v3151_v22  ;;  %v3163_v45 = vand.u32 2147483648, %v3151_v22  ;;  %v3161_v33 = vand.u32 2147483647, %v3151_v22  ;;  %vm3157_vm15 = vweird.f32 %v3151_v22 }
0x1656   :  { %v3429_v59 = vpop.f32.mrf.mxu2 }
0x1657   :  { %v3164_v13 = vor.u32 1.1754944e-38, %v3163_v45  ;;  %vm3162_vm1 = vcmp.eq.f32.partialorder %v3161_v33, 8.507059e+37 }
0x165b   :  { %v5553_v3 = vpop.eup %5552 }
0x165c   :  { %v3153_v57 = vmul.f32 %v5553_v3, %v3151_v22  ;;  %vm3158_vm14 = vweird.f32 %v5553_v3 }
0x165d   :  { %vm3159_vm0 = vmor %vm3157_vm15, %vm3158_vm14 }
0x165e   :  { %v3432_v10 = vpop.f32.mrf.mxu2  ;;  %v3154_v54 = vsub.f32 1.0, %v3153_v57 }
0x165f   :  { %v3433_v33 = vadd.f32 %v8737_v19, %v3432_v10 }
0x1660   :  { %v3155_v17 = vmul.f32 %v5553_v3, %v3154_v54 }
0x1661   :  { %vm3454_vm6 = vcmp.ge.f32.partialorder %v3433_v33, 0.0 }
0x1662   :  { %v3156_v32 = vadd.f32 %v5553_v3, %v3155_v17 }
0x1664   :  { %v3160_v5 = vsel %vm3159_vm0, %v5553_v3, %v3156_v32 }
0x1665   :  { %v3165_v30 = vsel %vm3162_vm1, %v3164_v13, %v3160_v5  ;;  %v3470_v5 = vmul.f32 0.01, %v3433_v33 }
0x1666   :  { %v3435_v34 = vpop.f32.mrf.mxu2  ;;  %v3219_v16 = vmul.f32 %v3165_v30, %v8767_v23  ;;  %v3257_v21 = vsub.f32 %v3165_v30, %v8764_v12 }
0x1667   :  { %v3436_v45 = vadd.f32 %v8737_v19, %v3435_v34  ;;  %v3427_v34 = vadd.f32 %v8737_v19, %v3426_v11  ;;  %v9239_v10 = vsel %vm3454_vm6, %v3433_v33, %v3470_v5 }
0x1668   :  { %5463 = vpush %v3219_v16  ;;  %v9215_v56 = vadd.f32 %v3219_v16, %v8754_v40  ;;  %v3258_v57 = vmul.f32 %v3257_v21, %v8767_v23  ;;  %v3424_v21 = vadd.f32 %v8737_v19, %v3423_v46 }
0x1669   :  { %v3471_v32 = vmul.f32 0.01, %v3436_v45  ;;  %vm3455_vm5 = vcmp.ge.f32.partialorder %v3436_v45, 0.0  ;;  %11799 = vst [vmem:[#allocation33_spill] sm:$0xff] %v9239_v10  ;;  %vm3452_vm8 = vcmp.ge.f32.partialorder %v3427_v34, 0.0 }
0x166a   :  { %vm3261_vm2 = vcmp.lt.f32.partialorder %v9215_v56, 0.999  ;;  %v9220_v22 = vadd.f32 %v3258_v57, %v8764_v12  ;;  %v3430_v12 = vadd.f32 %v8737_v19, %v3429_v59  ;;  %v3468_v57 = vmul.f32 0.01, %v3427_v34 }
0x166b   :  { %v9223_v3 = vsel %vm3261_vm2, %v8767_v23, 0.0  ;;  %v9234_v30 = vsel %vm3455_vm5, %v3436_v45, %v3471_v32  ;;  %v3467_v45 = vmul.f32 0.01, %v3424_v21  ;;  %vm3451_vm10 = vcmp.ge.f32.partialorder %v3424_v21, 0.0  ;;  %v11838_v23 = vld [vmem:[#allocation67_spill] sm:$0xff] }
0x166c   :  { %5465 = vpush %v9223_v3  ;;  %v3469_v16 = vmul.f32 0.01, %v3430_v12  ;;  %vm3453_vm7 = vcmp.ge.f32.partialorder %v3430_v12, 0.0  ;;  %v9249_v11 = vsel %vm3452_vm8, %v3427_v34, %v3468_v57 }
0x166d   :  { %11798 = vst [vmem:[#allocation32_spill] sm:$0xff] %v9234_v30 }
0x166e   :  { %v3438_v54 = vpop.f32.mrf.mxu2  ;;  %v9244_v59 = vsel %vm3453_vm7, %v3430_v12, %v3469_v16  ;;  %11801 = vst [vmem:[#allocation24_spill] sm:$0xff] %v9249_v11 }
0x166f   :  { %v3439_v17 = vadd.f32 %v8737_v19, %v3438_v54  ;;  %11800 = vst [vmem:[#allocation25_spill] sm:$0xff] %v9244_v59  ;;  %v3421_v54 = vadd.f32 %v8737_v19, %v3420_v62  ;;  %v3415_v62 = vadd.f32 %v8737_v19, %v9207_v27  ;;  %v3409_v27 = vadd.f32 %v8737_v19, %v9203_v31 }
0x1670   :  { %v3403_v31 = vadd.f32 %v8737_v19, %v9199_v53 }
0x1671   :  { %vm3456_vm4 = vcmp.ge.f32.partialorder %v3439_v17, 0.0  ;;  %v3472_v40 = vmul.f32 0.01, %v3439_v17  ;;  %v3466_v46 = vmul.f32 0.01, %v3421_v54  ;;  %vm3450_vm11 = vcmp.ge.f32.partialorder %v3421_v54, 0.0 }
0x1672   :  { %v3464_v12 = vmul.f32 0.01, %v3415_v62  ;;  %vm3448_vm13 = vcmp.ge.f32.partialorder %v3415_v62, 0.0  ;;  %vm3446_vm15 = vcmp.ge.f32.partialorder %v3409_v27, 0.0  ;;  %vm3444_vm1 = vcmp.ge.f32.partialorder %v3403_v31, 0.0 }
0x1673   :  { %v9229_v13 = vsel %vm3456_vm4, %v3439_v17, %v3472_v40  ;;  %v3418_v17 = vadd.f32 %v8737_v19, %v9209_v35  ;;  %v9255_v40 = vsel %vm3451_vm10, %v3424_v21, %v3467_v45  ;;  %v9261_v32 = vsel %vm3450_vm11, %v3421_v54, %v3466_v46 }
0x1674   :  { %11797 = vst [vmem:[#allocation31_spill] sm:$0xff] %v9229_v13  ;;  %5338 = vmatpush.xpose.msk.msra.mxu3 %vm331_vm3, %v9229_v13  ;;  %v3412_v35 = vadd.f32 %v8737_v19, %v9205_v28  ;;  %v9273_v16 = vsel %vm3448_vm13, %v3415_v62, %v3464_v12  ;;  %v3406_v28 = vadd.f32 %v8737_v19, %v9201_v1  ;;  %v3462_v21 = vmul.f32 0.01, %v3409_v27 }
0x1675   :  { %11802 = vst [vmem:[#allocation23_spill] sm:$0xff] %v9255_v40  ;;  %v3465_v33 = vmul.f32 0.01, %v3418_v17  ;;  %vm3449_vm12 = vcmp.ge.f32.partialorder %v3418_v17, 0.0 }
0x1676   :  { %v3463_v34 = vmul.f32 0.01, %v3412_v35  ;;  %vm3447_vm14 = vcmp.ge.f32.partialorder %v3412_v35, 0.0  ;;  %v3461_v54 = vmul.f32 0.01, %v3406_v28  ;;  %vm3445_vm0 = vcmp.ge.f32.partialorder %v3406_v28, 0.0 }
0x1677   :  { %v9267_v5 = vsel %vm3449_vm12, %v3418_v17, %v3465_v33  ;;  %v9285_v17 = vsel %vm3446_vm15, %v3409_v27, %v3462_v21 }
0x1678   :  { %5339 = vmatpush.xpose.msk.msra.mxu3 %vm331_vm3, %v9234_v30  ;;  %v9279_v57 = vsel %vm3447_vm14, %v3412_v35, %v3463_v34 }
0x167c   :  { %5340 = vmatpush.xpose.msk.msra.mxu3 %vm331_vm3, %v9239_v10 }
0x1680   :  { %5341 = vmatpush.xpose.msk.msra.mxu3 %vm331_vm3, %v9244_v59 }
0x1684   :  { %5342 = vmatpush.xpose.msk.msra.mxu3 %vm331_vm3, %v9249_v11 }
0x1688   :  { %5343 = vmatpush.xpose.msk.msra.mxu3 %vm331_vm3, %v9255_v40 }
0x168c   :  { %5344 = vmatpush.xpose.msk.msra.mxu3 %vm331_vm3, %v9261_v32 }
0x1690   :  { %5345 = vmatpush.xpose.msk.msra.mxu3 %vm331_vm3, %v9267_v5 }
0x1694   :  { %5346 = vmatpush.xpose.msk.msra.mxu3 %vm331_vm3, %v9273_v16 }
0x1698   :  { %5347 = vmatpush.xpose.msk.msra.mxu3 %vm331_vm3, %v9279_v57 }
0x1699   :  { %s5464_s27 = spop %5463 }
0x169a   :  { %v3222_v45 = vstv %s5464_s27 }
0x169b   :  { %v3224_v46 = vmul.f32 %v3222_v45, %v8843_v39  ;;  %v3225_v62 = vmul.f32 %v3222_v45, %v8835_v26  ;;  %v3226_v1 = vmul.f32 %v3222_v45, %v8831_v47  ;;  %v3227_v33 = vmul.f32 %v3222_v45, %v8825_v14 }
0x169c   :  { %5348 = vmatpush.xpose.msk.msra.mxu3 %vm331_vm3, %v9285_v17  ;;  %v3228_v35 = vmul.f32 %v3222_v45, %v8819_v43  ;;  %v3229_v53 = vmul.f32 %v3222_v45, %v8813_v37  ;;  %v3230_v12 = vmul.f32 %v3222_v45, %v8807_v25  ;;  %v3400_v26 = vadd.f32 %v8737_v19, %v9197_v50 }
0x169d   :  { %v9297_v27 = vadd.f32 %v3224_v46, %v8849_v7  ;;  %v9300_v39 = vadd.f32 %v3225_v62, %v8852_v9  ;;  %v9303_v47 = vadd.f32 %v3226_v1, %v8855_v0  ;;  %v9306_v14 = vadd.f32 %v3227_v33, %v8858_v8  ;;  %v9414_v62 = vld [vmem:[%s10754_s10 + $0x58] sm:$0xff]  ;;  %v9420_v1 = vld [vmem:[%s10754_s10 + $0x50] sm:$0xff]  ;;  %v9426_v33 = vld [vmem:[%s10754_s10 + $0x48] sm:$0xff]  ;;  %s5466_s7 = spop %5465 }
0x169e   :  { %v9311_v43 = vadd.f32 %v3228_v35, %v8863_v49  ;;  %v9314_v25 = vadd.f32 %v3229_v53, %v8866_v20  ;;  %v9317_v37 = vadd.f32 %v3230_v12, %v8869_v29  ;;  %v3460_v7 = vmul.f32 0.01, %v3403_v31  ;;  %11815 = vst [vmem:[#allocation56_spill] sm:$0xff] %v9414_v62  ;;  %v9432_v35 = vld [vmem:[%s10754_s10 + $0x40] sm:$0xff]  ;;  %v9438_v53 = vld [vmem:[%s10754_s10 + $0x38] sm:$0xff]  ;;  %v9444_v12 = vld [vmem:[%s10754_s10 + $0x30] sm:$0xff] }
0x169f   :  { %v9319_v9 = vsel %vm3445_vm0, %v3406_v28, %v3461_v54  ;;  %v3397_v0 = vadd.f32 %v8737_v19, %v9195_v2  ;;  %v3459_v8 = vmul.f32 0.01, %v3400_v26  ;;  %vm3443_vm2 = vcmp.ge.f32.partialorder %v3400_v26, 0.0  ;;  %11816 = vst [vmem:[#allocation54_spill] sm:$0xff] %v9420_v1 }
0x16a0   :  { %5349 = vmatpush.xpose.msk.msra.mxu3 %vm331_vm3, %v9319_v9  ;;  %v9325_v50 = vsel %vm3444_vm1, %v3403_v31, %v3460_v7  ;;  %v3231_v49 = vmul.f32 %v3222_v45, %v8801_v55  ;;  %v3394_v20 = vadd.f32 %v8737_v19, %v9193_v63  ;;  %v3232_v2 = vmul.f32 %v3222_v45, %v8795_v38  ;;  %v9456_v7 = vld [vmem:[%s10754_s10 + $0x20] sm:$0xff] }
0x16a1   :  { %v3458_v29 = vmul.f32 0.01, %v3397_v0  ;;  %v9332_v34 = vsel %vm3443_vm2, %v3400_v26, %v3459_v8  ;;  %vm3442_vm4 = vcmp.ge.f32.partialorder %v3397_v0, 0.0  ;;  %v3233_v21 = vmul.f32 %v3222_v45, %v8789_v15  ;;  %11817 = vst [vmem:[#allocation55_spill] sm:$0xff] %v9426_v33  ;;  %v9450_v26 = vld [vmem:[%s10754_s10 + $0x28] sm:$0xff]  ;;  %v9468_v8 = vld [vmem:[%s10754_s10 + $0x10] sm:$0xff] }
0x16a2   :  { %v9335_v28 = vadd.f32 %v3231_v49, %v8878_v44  ;;  %v3234_v31 = vmul.f32 %v3222_v45, %v8783_v58  ;;  %v3235_v55 = vmul.f32 %v3222_v45, %v8777_v42  ;;  %v3236_v19 = vmul.f32 %v3222_v45, %v8771_v52  ;;  %11818 = vst [vmem:[#allocation58_spill] sm:$0xff] %v9432_v35  ;;  %v9474_v49 = vld [vmem:[%s10754_s10 + $0x8] sm:$0xff] }
0x16a3   :  { %v3237_v63 = vmul.f32 %v3222_v45, %v8758_v6  ;;  %v3238_v54 = vmul.f32 %v3222_v45, %v8747_v61  ;;  %v9347_v44 = vadd.f32 %v3232_v2, %v8888_v51  ;;  %v9350_v38 = vadd.f32 %v3233_v21, %v8891_v60  ;;  %v11810_v60 = vld [vmem:[#allocation84_spill] sm:$0xff]  ;;  %11819 = vst [vmem:[#allocation88_spill] sm:$0xff] %v9438_v53  ;;  %v11828_v2 = vld [vmem:[#allocation30_spill] sm:$0xff]  ;;  %v11829_v21 = vld [vmem:[#allocation73_spill] sm:$0xff] }
0x16a4   :  { %5350 = vmatpush.xpose.msk.msra.mxu3 %vm331_vm3, %v9325_v50  ;;  %v9353_v15 = vadd.f32 %v3234_v31, %v8894_v36  ;;  %v3239_v58 = vmul.f32 %v3222_v45, %v8742_v24  ;;  %v9357_v46 = vadd.f32 %v3235_v55, %v8898_v18  ;;  %v9360_v52 = vadd.f32 %v3236_v19, %v8901_v4  ;;  %v9383_v18 = vld [vmem:[%s10754_s10 + $0x78] sm:$0xff]  ;;  %v9389_v4 = vld [vmem:[%s10750_s6] sm:$0x1]  ;;  %v11830_v31 = vld [vmem:[#allocation70_spill] sm:$0xff] }
0x16a5   :  { %11803 = vst [vmem:[#allocation22_spill] sm:$0xff] %v9347_v44  ;;  %v9363_v6 = vadd.f32 %v3237_v63, %v8904_v41  ;;  %v9366_v61 = vadd.f32 %v3238_v54, %v8907_v48  ;;  %v3457_v42 = vmul.f32 0.01, %v3394_v20  ;;  %v9369_v51 = vsel %vm3442_vm4, %v3397_v0, %v3458_v29  ;;  %v9396_v41 = vld [vmem:[%s10754_s10 + $0x70] sm:$0xff]  ;;  %v9402_v48 = vld [vmem:[%s10754_s10 + $0x68] sm:$0xff]  ;;  %v9408_v45 = vld [vmem:[%s10754_s10 + $0x60] sm:$0xff] }
0x16a6   :  { %11804 = vst [vmem:[#allocation21_spill] sm:$0xff] %v9350_v38  ;;  %v9372_v36 = vadd.f32 %v3239_v58, %v11810_v60  ;;  %vm3441_vm5 = vcmp.ge.f32.partialorder %v3394_v20, 0.0  ;;  %v9462_v0 = vld [vmem:[%s10754_s10 + $0x18] sm:$0xff]  ;;  %v11832_v19 = vld [vmem:[#allocation71_spill] sm:$0xff]  ;;  %v11837_v60 = vld [vmem:[#allocation26_spill] sm:$0xff] }
0x16a7   :  { %11805 = vst [vmem:[#allocation20_spill] sm:$0xff] %v9353_v15  ;;  %v9376_v24 = vsel %vm3441_vm5, %v3394_v20, %v3457_v42  ;;  %v9480_v20 = vld [vmem:[%s10754_s10] sm:$0xff]  ;;  %v11827_v29 = vld [vmem:[#allocation72_spill] sm:$0xff]  ;;  %v11836_v42 = vld [vmem:[#allocation27_spill] sm:$0xff] }
0x16a8   :  { %5351 = vmatpush.xpose.msk.msra.mxu3 %vm331_vm3, %v9332_v34  ;;  %11806 = vst [vmem:[#allocation19_spill] sm:$0xff] %v9357_v46  ;;  %v11831_v55 = vld [vmem:[#allocation29_spill] sm:$0xff]  ;;  %v11833_v63 = vld [vmem:[#allocation68_spill] sm:$0xff] }
0x16a9   :  { %11807 = vst [vmem:[#allocation52_spill] sm:$0xff] %v9360_v52  ;;  %v11834_v54 = vld [vmem:[#allocation28_spill] sm:$0xff]  ;;  %v11835_v58 = vld [vmem:[#allocation69_spill] sm:$0xff] }
0x16aa   :  { %11808 = vst [vmem:[#allocation18_spill] sm:$0xff] %v9363_v6 }
0x16ab   :  { %11809 = vst [vmem:[#allocation87_spill] sm:$0xff] %v9366_v61 }
0x16ac   :  { %11811 = vst [vmem:[#allocation92_spill] sm:$0xff] %v9372_v36  ;;  %5352 = vmatpush.xpose.msk.msra.mxu3 %vm331_vm3, %v9369_v51 }
0x16ad   :  { %11812 = vst [vmem:[#allocation89_spill] sm:$0xff] %v9396_v41 }
0x16ae   :  { %11813 = vst [vmem:[#allocation91_spill] sm:$0xff] %v9402_v48 }
0x16af   :  { %11814 = vst [vmem:[#allocation90_spill] sm:$0xff] %v9408_v45 }
0x16b0   :  { %5353 = vmatpush.xpose.msk.msra.mxu3 %vm331_vm3, %v9376_v24  ;;  %11820 = vst [vmem:[#allocation57_spill] sm:$0xff] %v9444_v12 }
0x16b1   :  { %11821 = vst [vmem:[#allocation61_spill] sm:$0xff] %v9450_v26 }
0x16b2   :  { %11822 = vst [vmem:[#allocation59_spill] sm:$0xff] %v9456_v7 }
0x16b3   :  { %5354 = vmatmul.msk.f32.vlgmr.msra.gmra.mxu3 %vm331_vm3, %v9389_v4  ;;  %11823 = vst [vmem:[#allocation60_spill] sm:$0xff] %v9462_v0 }
0x16b4   :  { %3580 = vmatpush.xpose.msrb.mxu3 %v9383_v18  ;;  %11824 = vst [vmem:[#allocation62_spill] sm:$0xff] %v9468_v8 }
0x16b5   :  { %11825 = vst [vmem:[#allocation63_spill] sm:$0xff] %v9474_v49 }
0x16b6   :  { %11826 = vst [vmem:[#allocation64_spill] sm:$0xff] %v9480_v20 }
0x16b8   :  { %3581 = vmatpush.xpose.msrb.mxu3 %v9396_v41 }
0x16bc   :  { %3582 = vmatpush.xpose.msrb.mxu3 %v9402_v48 }
0x16c0   :  { %3583 = vmatpush.xpose.msrb.mxu3 %v9408_v45  ;;  %v11852_v45 = vld [vmem:[#allocation83_spill] sm:$0xff] }
0x16c1   :  { %v3679_v48 = vsub.f32 %v9376_v24, %v11852_v45 }
0x16c4   :  { %3584 = vmatpush.xpose.msrb.mxu3 %v9414_v62 }
0x16c8   :  { %3585 = vmatpush.xpose.msrb.mxu3 %v9420_v1  ;;  %v9548_v1 = vstv %s5466_s7 }
0x16cc   :  { %3586 = vmatpush.xpose.msrb.mxu3 %v9426_v33 }
0x16d0   :  { %3587 = vmatpush.xpose.msrb.mxu3 %v9432_v35  ;;  %v11851_v35 = vld [vmem:[#allocation34_spill] sm:$0xff] }
0x16d4   :  { %3588 = vmatpush.xpose.msrb.mxu3 %v9438_v53  ;;  %v9514_v53 = vld [vmem:[%s10748_s4 + $0x28] sm:$0xff] }
0x16d5   :  { %11845 = vst [vmem:[#allocation14_spill] sm:$0xff] %v9514_v53 }
0x16d8   :  { %3589 = vmatpush.xpose.msrb.mxu3 %v9444_v12  ;;  %v9508_v12 = vld [vmem:[%s10748_s4 + $0x30] sm:$0xff] }
0x16d9   :  { %11844 = vst [vmem:[#allocation15_spill] sm:$0xff] %v9508_v12 }
0x16dc   :  { %3590 = vmatpush.xpose.msrb.mxu3 %v9450_v26  ;;  %v9502_v26 = vld [vmem:[%s10748_s4 + $0x38] sm:$0xff] }
0x16dd   :  { %11843 = vst [vmem:[#allocation16_spill] sm:$0xff] %v9502_v26 }
0x16e0   :  { %3591 = vmatpush.xpose.msrb.mxu3 %v9456_v7 }
0x16e4   :  { %3592 = vmatpush.xpose.msrb.mxu3 %v9462_v0  ;;  %v11842_v0 = vld [vmem:[#allocation40_spill] sm:$0xff] }
0x16e8   :  { %3593 = vmatpush.xpose.msrb.mxu3 %v9468_v8  ;;  %v11841_v8 = vld [vmem:[#allocation65_spill] sm:$0xff] }
0x16ec   :  { %3594 = vmatpush.xpose.msrb.mxu3 %v9474_v49  ;;  %v11840_v49 = vld [vmem:[#allocation39_spill] sm:$0xff] }
0x16f0   :  { %3595 = vmatpush.xpose.msrb.mxu3 %v9480_v20  ;;  %v11839_v20 = vld [vmem:[#allocation66_spill] sm:$0xff] }
0x16f4   :  { %4069 = vmatpush.xpose.msra.mxu3 %v11827_v29 }
0x16f8   :  { %4070 = vmatpush.xpose.msra.mxu3 %v11828_v2 }
0x16fc   :  { %4071 = vmatpush.xpose.msra.mxu3 %v11829_v21 }
0x1700   :  { %4072 = vmatpush.xpose.msra.mxu3 %v11830_v31 }
0x1704   :  { %4073 = vmatpush.xpose.msra.mxu3 %v11831_v55 }
0x1708   :  { %4074 = vmatpush.xpose.msra.mxu3 %v11832_v19 }
0x170c   :  { %4075 = vmatpush.xpose.msra.mxu3 %v11833_v63 }
0x1710   :  { %4076 = vmatpush.xpose.msra.mxu3 %v11834_v54 }
0x1714   :  { %4077 = vmatpush.xpose.msra.mxu3 %v11835_v58 }
0x1718   :  { %4078 = vmatpush.xpose.msra.mxu3 %v11836_v42 }
0x171c   :  { %4079 = vmatpush.xpose.msra.mxu3 %v11837_v60 }
0x1720   :  { %4080 = vmatpush.xpose.msra.mxu3 %v11838_v23 }
0x1724   :  { %4081 = vmatpush.xpose.msra.mxu3 %v11839_v20 }
0x1728   :  { %4082 = vmatpush.xpose.msra.mxu3 %v11840_v49 }
0x172c   :  { %4083 = vmatpush.xpose.msra.mxu3 %v11841_v8 }
0x1730   :  { %4084 = vmatpush.xpose.msra.mxu3 %v11842_v0 }
0x1736   :  { %v3554_v7 = vpop.f32.mrf.mxu3 }
0x1737   :  { %3573 = vmatmul.f32.vlgmr.msra.gmra.mxu1 %v3554_v7  ;;  %v9520_v7 = vld [vmem:[%s10748_s4 + $0x20] sm:$0xff] }
0x1738   :  { %3831 = vmatpush.msra.mxu1 %v9502_v26  ;;  %11846 = vst [vmem:[#allocation13_spill] sm:$0xff] %v9520_v7  ;;  %v9526_v26 = vld [vmem:[%s10748_s4 + $0x18] sm:$0xff] }
0x1739   :  { %11847 = vst [vmem:[#allocation12_spill] sm:$0xff] %v9526_v26 }
0x173a   :  { %3832 = vmatpush.msra.mxu1 %v9508_v12  ;;  %v9532_v12 = vld [vmem:[%s10748_s4 + $0x10] sm:$0xff] }
0x173b   :  { %11848 = vst [vmem:[#allocation11_spill] sm:$0xff] %v9532_v12 }
0x173c   :  { %3833 = vmatpush.msra.mxu1 %v9514_v53  ;;  %v9538_v53 = vld [vmem:[%s10748_s4 + $0x8] sm:$0xff] }
0x173d   :  { %11849 = vst [vmem:[#allocation10_spill] sm:$0xff] %v9538_v53 }
0x173e   :  { %3834 = vmatpush.msra.mxu1 %v9520_v7  ;;  %v9544_v7 = vld [vmem:[%s10748_s4] sm:$0xff] }
0x173f   :  { %11850 = vst [vmem:[#allocation46_spill] sm:$0xff] %v9544_v7 }
0x1740   :  { %3835 = vmatpush.msra.mxu1 %v9526_v26 }
0x1742   :  { %3836 = vmatpush.msra.mxu1 %v9532_v12 }
0x1744   :  { %3837 = vmatpush.msra.mxu1 %v9538_v53  ;;  %v9555_v53 = vld [vmem:[%s10754_s10 + $0xb8] sm:$0xff] }
0x1745   :  { %11853 = vst [vmem:[#allocation45_spill] sm:$0xff] %v9555_v53 }
0x1746   :  { %3838 = vmatpush.msra.mxu1 %v9544_v7 }
0x17b4   :  { %v3574_v26 = vpop.f32.mrf.mxu1 }
0x17b5   :  { %v3575_v33 = vadd.f32 %v3574_v26, %v11851_v35  ;;  %v3699_v26 = vmul.f32 %v9548_v1, %v3679_v48  ;;  %v9562_v35 = vld [vmem:[%s10754_s10 + $0xb0] sm:$0xff]  ;;  %v9575_v48 = vld [vmem:[%s10754_s10 + $0xa8] sm:$0xff] }
0x17b6   :  { %11854 = vst [vmem:[#allocation86_spill] sm:$0xff] %v9562_v35 }
0x17b7   :  { %vm3577_vm6 = vcmp.ge.f32.partialorder %v3575_v33, 0.0  ;;  %v3578_v12 = vmul.f32 0.01, %v3575_v33  ;;  %11857 = vst [vmem:[#allocation72_spill] sm:$0xff] %v9575_v48 }
0x17b9   :  { %v3579_v62 = vsel %vm3577_vm6, %v3575_v33, %v3578_v12  ;;  %v9566_v33 = vadd.f32 %v3699_v26, %v11852_v45  ;;  %v9582_v45 = vld [vmem:[%s10754_s10 + $0xa0] sm:$0xff] }
0x17ba   :  { %3596 = vmatmul.f32.vlgmr.msrb.gmra.mxu3 %v3579_v62  ;;  %3616 = vmatmul.f32.vlgmr.msrb.gmra.mxu1 %v3579_v62  ;;  %v11856_v62 = vld [vmem:[#allocation50_spill] sm:$0xff]  ;;  %11858 = vst [vmem:[#allocation30_spill] sm:$0xff] %v9582_v45 }
0x17bb   :  { %4120 = vmatpush.xpose.msrb.mxu3 %v9555_v53  ;;  %11855 = vst [vmem:[#allocation84_spill] sm:$0xff] %v9566_v33  ;;  %v3680_v12 = vsub.f32 %v9369_v51, %v11856_v62  ;;  %v11870_v53 = vld [vmem:[#allocation77_spill] sm:$0xff] }
0x17bc   :  { %v3684_v36 = vsub.f32 %v9285_v17, %v11870_v53 }
0x17bd   :  { %v3700_v7 = vmul.f32 %v9548_v1, %v3680_v12  ;;  %v9595_v12 = vld [vmem:[%s10754_s10 + $0x98] sm:$0xff] }
0x17be   :  { %11861 = vst [vmem:[#allocation70_spill] sm:$0xff] %v9595_v12 }
0x17bf   :  { %4121 = vmatpush.xpose.msrb.mxu3 %v9562_v35  ;;  %v9586_v26 = vadd.f32 %v3700_v7, %v11856_v62  ;;  %v9602_v7 = vld [vmem:[%s10754_s10 + $0x90] sm:$0xff] }
0x17c0   :  { %11862 = vst [vmem:[#allocation29_spill] sm:$0xff] %v9602_v7 }
0x17c1   :  { %11859 = vst [vmem:[#allocation73_spill] sm:$0xff] %v9586_v26 }
0x17c2   :  { %5357 = vmatmul.msk.f32.vlgmr.msra.gmra.mxu1 %vm331_vm3, %v9566_v33  ;;  %v11860_v33 = vld [vmem:[#allocation74_spill] sm:$0xff] }
0x17c3   :  { %4122 = vmatpush.xpose.msrb.mxu3 %v9575_v48  ;;  %v3681_v35 = vsub.f32 %v9332_v34, %v11860_v33 }
0x17c5   :  { %v3701_v48 = vmul.f32 %v9548_v1, %v3681_v35  ;;  %v9615_v35 = vld [vmem:[%s10754_s10 + $0x88] sm:$0xff] }
0x17c6   :  { %11865 = vst [vmem:[#allocation68_spill] sm:$0xff] %v9615_v35 }
0x17c7   :  { %4123 = vmatpush.xpose.msrb.mxu3 %v9582_v45  ;;  %v9606_v62 = vadd.f32 %v3701_v48, %v11860_v33  ;;  %v9622_v33 = vld [vmem:[%s10754_s10 + $0x80] sm:$0xff] }
0x17c8   :  { %11866 = vst [vmem:[#allocation28_spill] sm:$0xff] %v9622_v33 }
0x17c9   :  { %11863 = vst [vmem:[#allocation71_spill] sm:$0xff] %v9606_v62 }
0x17ca   :  { %5358 = vmatmul.msk.f32.gmra.mxu1 %vm331_vm3, %v9586_v26  ;;  %v11864_v26 = vld [vmem:[#allocation75_spill] sm:$0xff] }
0x17cb   :  { %4124 = vmatpush.xpose.msrb.mxu3 %v9595_v12  ;;  %v3682_v45 = vsub.f32 %v9325_v50, %v11864_v26 }
0x17cd   :  { %v3702_v12 = vmul.f32 %v9548_v1, %v3682_v45 }
0x17cf   :  { %4125 = vmatpush.xpose.msrb.mxu3 %v9602_v7  ;;  %v9626_v48 = vadd.f32 %v3702_v12, %v11864_v26  ;;  %v3704_v26 = vmul.f32 %v9548_v1, %v3684_v36 }
0x17d1   :  { %11867 = vst [vmem:[#allocation69_spill] sm:$0xff] %v9626_v48  ;;  %v9642_v12 = vadd.f32 %v3704_v26, %v11870_v53  ;;  %v11876_v26 = vld [vmem:[#allocation80_spill] sm:$0xff] }
0x17d2   :  { %5359 = vmatmul.msk.f32.gmra.mxu1 %vm331_vm3, %v9606_v62  ;;  %v11868_v62 = vld [vmem:[#allocation76_spill] sm:$0xff] }
0x17d3   :  { %4126 = vmatpush.xpose.msrb.mxu3 %v9615_v35  ;;  %v3683_v7 = vsub.f32 %v9319_v9, %v11868_v62  ;;  %11871 = vst [vmem:[#allocation26_spill] sm:$0xff] %v9642_v12 }
0x17d5   :  { %v3703_v35 = vmul.f32 %v9548_v1, %v3683_v7 }
0x17d7   :  { %4127 = vmatpush.xpose.msrb.mxu3 %v9622_v33  ;;  %v9634_v45 = vadd.f32 %v3703_v35, %v11868_v62  ;;  %v11872_v33 = vld [vmem:[#allocation78_spill] sm:$0xff]  ;;  %v11874_v35 = vld [vmem:[#allocation79_spill] sm:$0xff] }
0x17d8   :  { %v3685_v61 = vsub.f32 %v9279_v57, %v11872_v33 }
0x17d9   :  { %11869 = vst [vmem:[#allocation27_spill] sm:$0xff] %v9634_v45 }
0x17da   :  { %5360 = vmatmul.msk.f32.gmra.mxu1 %vm331_vm3, %v9626_v48  ;;  %v3705_v7 = vmul.f32 %v9548_v1, %v3685_v61  ;;  %v3686_v48 = vsub.f32 %v9273_v16, %v11874_v35 }
0x17dc   :  { %v9650_v62 = vadd.f32 %v3705_v7, %v11872_v33  ;;  %v3706_v36 = vmul.f32 %v9548_v1, %v3686_v48  ;;  %v11878_v7 = vld [vmem:[#allocation17_spill] sm:$0xff] }
0x17de   :  { %11873 = vst [vmem:[#allocation67_spill] sm:$0xff] %v9650_v62  ;;  %v9658_v53 = vadd.f32 %v3706_v36, %v11874_v35  ;;  %v11880_v36 = vld [vmem:[#allocation51_spill] sm:$0xff] }
0x17e0   :  { %11875 = vst [vmem:[#allocation66_spill] sm:$0xff] %v9658_v53 }
0x17e2   :  { %5361 = vmatmul.msk.f32.gmra.mxu1 %vm331_vm3, %v9634_v45  ;;  %v3687_v45 = vsub.f32 %v9267_v5, %v11876_v26 }
0x17e4   :  { %v3707_v61 = vmul.f32 %v9548_v1, %v3687_v45 }
0x17e6   :  { %v9666_v33 = vadd.f32 %v3707_v61, %v11876_v26  ;;  %v11882_v61 = vld [vmem:[#allocation44_spill] sm:$0xff] }
0x17e8   :  { %11877 = vst [vmem:[#allocation39_spill] sm:$0xff] %v9666_v33 }
0x17ea   :  { %5362 = vmatmul.msk.f32.gmra.mxu1 %vm331_vm3, %v9642_v12  ;;  %v3688_v12 = vsub.f32 %v9261_v32, %v11878_v7 }
0x17ec   :  { %v3708_v48 = vmul.f32 %v9548_v1, %v3688_v12 }
0x17ee   :  { %v9674_v35 = vadd.f32 %v3708_v48, %v11878_v7  ;;  %v11884_v48 = vld [vmem:[#allocation81_spill] sm:$0xff] }
0x17f0   :  { %11879 = vst [vmem:[#allocation65_spill] sm:$0xff] %v9674_v35 }
0x17f2   :  { %5363 = vmatmul.msk.f32.gmra.mxu1 %vm331_vm3, %v9650_v62  ;;  %v3689_v62 = vsub.f32 %v9255_v40, %v11880_v36 }
0x17f4   :  { %v3709_v45 = vmul.f32 %v9548_v1, %v3689_v62 }
0x17f6   :  { %v9682_v26 = vadd.f32 %v3709_v45, %v11880_v36  ;;  %v11886_v45 = vld [vmem:[#allocation43_spill] sm:$0xff] }
0x17f8   :  { %11881 = vst [vmem:[#allocation40_spill] sm:$0xff] %v9682_v26 }
0x17fa   :  { %5364 = vmatmul.msk.f32.gmra.mxu1 %vm331_vm3, %v9658_v53  ;;  %v3690_v53 = vsub.f32 %v9249_v11, %v11882_v61 }
0x17fc   :  { %v3710_v12 = vmul.f32 %v9548_v1, %v3690_v53 }
0x17fe   :  { %v9690_v7 = vadd.f32 %v3710_v12, %v11882_v61  ;;  %v11888_v12 = vld [vmem:[#allocation42_spill] sm:$0xff] }
0x1800   :  { %11883 = vst [vmem:[#allocation83_spill] sm:$0xff] %v9690_v7 }
0x1802   :  { %5365 = vmatmul.msk.f32.gmra.mxu1 %vm331_vm3, %v9666_v33  ;;  %v3691_v33 = vsub.f32 %v9244_v59, %v11884_v48 }
0x1804   :  { %v3711_v62 = vmul.f32 %v9548_v1, %v3691_v33 }
0x1806   :  { %v9698_v36 = vadd.f32 %v3711_v62, %v11884_v48  ;;  %v11890_v62 = vld [vmem:[#allocation41_spill] sm:$0xff] }
0x1808   :  { %11885 = vst [vmem:[#allocation50_spill] sm:$0xff] %v9698_v36 }
0x180a   :  { %5366 = vmatmul.msk.f32.gmra.mxu1 %vm331_vm3, %v9674_v35  ;;  %v3692_v35 = vsub.f32 %v9239_v10, %v11886_v45 }
0x180c   :  { %v3712_v53 = vmul.f32 %v9548_v1, %v3692_v35 }
0x180e   :  { %v9706_v61 = vadd.f32 %v3712_v53, %v11886_v45 }
0x1810   :  { %11887 = vst [vmem:[#allocation74_spill] sm:$0xff] %v9706_v61 }
0x1812   :  { %5367 = vmatmul.msk.f32.gmra.mxu1 %vm331_vm3, %v9682_v26  ;;  %v3693_v26 = vsub.f32 %v9234_v30, %v11888_v12 }
0x1814   :  { %v3713_v33 = vmul.f32 %v9548_v1, %v3693_v26  ;;  %v11892_v26 = vld [vmem:[#allocation35_spill] sm:$0xff] }
0x1816   :  { %v9714_v48 = vadd.f32 %v3713_v33, %v11888_v12  ;;  %v11893_v33 = vld [vmem:[#allocation48_spill] sm:$0xff] }
0x1818   :  { %11889 = vst [vmem:[#allocation75_spill] sm:$0xff] %v9714_v48 }
0x181a   :  { %5368 = vmatmul.msk.f32.gmra.mxu1 %vm331_vm3, %v9690_v7  ;;  %v3694_v7 = vsub.f32 %v9229_v13, %v11890_v62 }
0x181c   :  { %v3714_v35 = vmul.f32 %v9548_v1, %v3694_v7 }
0x181e   :  { %v9722_v53 = vadd.f32 %v3714_v35, %v11890_v62 }
0x1820   :  { %11891 = vst [vmem:[#allocation76_spill] sm:$0xff] %v9722_v53 }
0x1822   :  { %5369 = vmatmul.msk.f32.gmra.mxu1 %vm331_vm3, %v9698_v36 }
0x182a   :  { %5370 = vmatmul.msk.f32.gmra.mxu1 %vm331_vm3, %v9706_v61 }
0x1832   :  { %5371 = vmatmul.msk.f32.gmra.mxu1 %vm331_vm3, %v9714_v48 }
0x1837   :  { %v3617_v45 = vpop.f32.mrf.mxu1 }
0x183a   :  { %5372 = vmatmul.msk.f32.gmra.mxu1 %vm331_vm3, %v9722_v53 }
0x183d   :  { %v3597_v61 = vpop.f32.mrf.mxu3 }
0x183e   :  { %v3598_v36 = vadd.f32 %v3597_v61, %v11892_v26 }
0x183f   :  { %v3840_v12 = vpop.f32.mrf.mxu1 }
0x1840   :  { %v3620_v6 = vadd.f32 %v3598_v36, %v11893_v33  ;;  %v11894_v36 = vld [vmem:[#allocation36_spill] sm:$0xff] }
0x1841   :  { %v3618_v33 = vadd.f32 %v3617_v45, %v11894_v36  ;;  %v11896_v45 = vld [vmem:[#allocation37_spill] sm:$0xff] }
0x1842   :  { %v5355_v52 = vmul.f32 -1.442695, %v3620_v6 }
0x1844   :  { %5554 = vpow2.f32 %v5355_v52 }
0x1847   :  { %v3843_v46 = vpop.f32.mrf.mxu1 }
0x184a   :  { %v5555_v13 = vpop.eup %5554 }
0x184b   :  { %v3624_v48 = vadd.f32 1.0, %v5555_v13  ;;  %v11895_v13 = vld [vmem:[#allocation49_spill] sm:$0xff] }
0x184d   :  { %5556 = vrcp.f32 %v3624_v48  ;;  %v3636_v35 = vand.u32 2147483648, %v3624_v48  ;;  %v3634_v53 = vand.u32 2147483647, %v3624_v48  ;;  %vm3630_vm8 = vweird.f32 %v3624_v48 }
0x184f   :  { %v3846_v1 = vpop.f32.mrf.mxu1  ;;  %v3637_v61 = vor.u32 1.1754944e-38, %v3636_v35  ;;  %vm3635_vm11 = vcmp.eq.f32.partialorder %v3634_v53, 8.507059e+37 }
0x1853   :  { %v5557_v7 = vpop.eup %5556 }
0x1854   :  { %v3626_v15 = vmul.f32 %v5557_v7, %v3624_v48  ;;  %vm3631_vm7 = vweird.f32 %v5557_v7 }
0x1855   :  { %vm3632_vm10 = vmor %vm3630_vm8, %vm3631_vm7 }
0x1856   :  { %v3627_v62 = vsub.f32 1.0, %v3626_v15 }
0x1857   :  { %v3849_v38 = vpop.f32.mrf.mxu1 }
0x1858   :  { %v3628_v44 = vmul.f32 %v5557_v7, %v3627_v62 }
0x185a   :  { %v3629_v41 = vadd.f32 %v5557_v7, %v3628_v44 }
0x185c   :  { %v3633_v6 = vsel %vm3632_vm10, %v5557_v7, %v3629_v41 }
0x185d   :  { %v3638_v52 = vsel %vm3635_vm11, %v3637_v61, %v3633_v6 }
0x185e   :  { %v3640_v26 = vmul.f32 %v3638_v52, %v11895_v13 }
0x185f   :  { %v3852_v30 = vpop.f32.mrf.mxu1 }
0x1860   :  { %v3641_v10 = vadd.f32 %v3640_v26, %v3618_v33  ;;  %v3649_v26 = vmul.f32 %v3638_v52, %v11896_v45 }
0x1862   :  { %5558 = vtanh.f32 %v3641_v10  ;;  %v3643_v10 = vsub.f32 1.0, %v3638_v52 }
0x1867   :  { %v3855_v15 = vpop.f32.mrf.mxu1 }
0x1868   :  { %v5559_v59 = vpop.eup %5558 }
0x1869   :  { %3645 = vrot.lane.b32.xlu0 %v5559_v59, %s5840_s11 }
0x186f   :  { %v3858_v62 = vpop.f32.mrf.mxu1 }
0x1877   :  { %v3861_v11 = vpop.f32.mrf.mxu1 }
0x187f   :  { %v3864_v44 = vpop.f32.mrf.mxu1 }
0x1887   :  { %v3867_v48 = vpop.f32.mrf.mxu1 }
0x188f   :  { %v3870_v40 = vpop.f32.mrf.mxu1 }
0x1897   :  { %v3873_v35 = vpop.f32.mrf.mxu1 }
0x189f   :  { %v3876_v53 = vpop.f32.mrf.mxu1 }
0x18a7   :  { %v3879_v41 = vpop.f32.mrf.mxu1 }
0x18af   :  { %v3882_v7 = vpop.f32.mrf.mxu1 }
0x18b7   :  { %v3885_v61 = vpop.f32.mrf.mxu1 }
0x18b8   :  { %3888 = vmatpush.msra.mxu0 %v3885_v61 }
0x18ba   :  { %3889 = vmatpush.msra.mxu0 %v3882_v7 }
0x18bc   :  { %3890 = vmatpush.msra.mxu0 %v3879_v41 }
0x18be   :  { %3891 = vmatpush.msra.mxu0 %v3876_v53 }
0x18c0   :  { %3892 = vmatpush.msra.mxu0 %v3873_v35 }
0x18c2   :  { %3893 = vmatpush.msra.mxu0 %v3870_v40  ;;  %v11897_v40 = vld [vmem:[#allocation38_spill] sm:$0xff] }
0x18c4   :  { %3894 = vmatpush.msra.mxu0 %v3867_v48 }
0x18c6   :  { %3895 = vmatpush.msra.mxu0 %v3864_v44 }
0x18c8   :  { %3896 = vmatpush.msra.mxu0 %v3861_v11 }
0x18ca   :  { %3897 = vmatpush.msra.mxu0 %v3858_v62 }
0x18cc   :  { %3898 = vmatpush.msra.mxu0 %v3855_v15 }
0x18ce   :  { %3899 = vmatpush.msra.mxu0 %v3852_v30 }
0x18d0   :  { %3900 = vmatpush.msra.mxu0 %v3849_v38 }
0x18d2   :  { %3901 = vmatpush.msra.mxu0 %v3846_v1 }
0x18d4   :  { %3902 = vmatpush.msra.mxu0 %v3843_v46 }
0x18d6   :  { %3903 = vmatpush.msra.mxu0 %v3840_v12 }
0x18d7   :  { %3904 = vmatmul.f32.vlgmr.msra.gmra.mxu0 %v11842_v0 }
0x18db   :  { %v3646_v59 = vpop.permute.xlu0 %3645 }
0x18dc   :  { %v3648_v33 = vmul.f32 %v3646_v59, %v3643_v10  ;;  %v9774_v10 = vld [vmem:[%s10749_s5] ss:$0 sm:$0xff] }
0x18de   :  { %v3650_v6 = vadd.f32 %v3649_v26, %v3648_v33 }
0x18df   :  { %3907 = vmatmul.f32.gmra.mxu0 %v11841_v8 }
0x18e0   :  { %v3651_v44 = vmul.f32 %v3650_v6, %v11897_v40 }
0x18e2   :  { %3653 = vrot.lane.b32.xlu2 %v3651_v44, %s5840_s11 }
0x18e7   :  { %3910 = vmatmul.f32.gmra.mxu0 %v11840_v49 }
0x18ef   :  { %3913 = vmatmul.f32.gmra.mxu0 %v11839_v20 }
0x18f7   :  { %3916 = vmatmul.f32.gmra.mxu0 %v11838_v23 }
0x18ff   :  { %3919 = vmatmul.f32.gmra.mxu0 %v11837_v60 }
0x1907   :  { %3922 = vmatmul.f32.gmra.mxu0 %v11836_v42 }
0x190f   :  { %3925 = vmatmul.f32.gmra.mxu0 %v11835_v58 }
0x1917   :  { %3928 = vmatmul.f32.gmra.mxu0 %v11834_v54 }
0x191f   :  { %3931 = vmatmul.f32.gmra.mxu0 %v11833_v63  ;;  %v5751_v63 = vld [vmem:[#allocation3] sm:$0x1] }
0x1927   :  { %3934 = vmatmul.f32.gmra.mxu0 %v11832_v19 }
0x192f   :  { %3937 = vmatmul.f32.gmra.mxu0 %v11831_v55 }
0x1937   :  { %3940 = vmatmul.f32.gmra.mxu0 %v11830_v31 }
0x193c   :  { %v3654_v30 = vpop.permute.xlu2 %3653 }
0x193d   :  { %v3656_v11 = vsel %vm549_vm9, %v3654_v30, 0.0 }
0x193e   :  { %3657 = vadd.xlane.f32.xlu2 %v3656_v11 }
0x193f   :  { %3943 = vmatmul.f32.gmra.mxu0 %v11829_v21 }
0x1947   :  { %3946 = vmatmul.f32.gmra.mxu0 %v11828_v2 }
0x194f   :  { %3949 = vmatmul.f32.gmra.mxu0 %v11827_v29 }
0x1954   :  { %v9751_v23 = vpop.f32.mrf.mxu0 }
0x195c   :  { %v9753_v38 = vpop.f32.mrf.mxu0 }
0x1964   :  { %v9755_v46 = vpop.f32.mrf.mxu0 }
0x196c   :  { %v9757_v0 = vpop.f32.mrf.mxu0 }
0x1974   :  { %v9759_v8 = vpop.f32.mrf.mxu0 }
0x197c   :  { %v9761_v49 = vpop.f32.mrf.mxu0 }
0x1984   :  { %v9763_v20 = vpop.f32.mrf.mxu0 }
0x198c   :  { %v9765_v31 = vpop.f32.mrf.mxu0 }
0x1994   :  { %v9767_v21 = vpop.f32.mrf.mxu0 }
0x199c   :  { %v9769_v2 = vpop.f32.mrf.mxu0 }
0x19a4   :  { %v3935_v29 = vpop.f32.mrf.mxu0 }
0x19ac   :  { %v3938_v55 = vpop.f32.mrf.mxu0 }
0x19b1   :  { %v3658_v19 = vpop.xlane.xlu2 %3657 }
0x19b2   :  { %v3659_v54 = vadd.f32 %v5751_v63, %v3658_v19 }
0x19b4   :  { %v5356_v58 = vmul.f32 -1.442695, %v3659_v54  ;;  %v3941_v42 = vpop.f32.mrf.mxu0 }
0x19b6   :  { %5560 = vpow2.f32 %v5356_v58 }
0x19bc   :  { %v5561_v60 = vpop.eup %5560  ;;  %v3944_v12 = vpop.f32.mrf.mxu0 }
0x19bd   :  { %v3663_v1 = vadd.f32 1.0, %v5561_v60  ;;  %v3945_v63 = vadd.f32 %v9774_v10, %v3944_v12  ;;  %v3942_v12 = vadd.f32 %v9774_v10, %v3941_v42 }
0x19bf   :  { %5562 = vrcp.f32 %v3663_v1  ;;  %v3675_v35 = vand.u32 2147483648, %v3663_v1  ;;  %v3673_v41 = vand.u32 2147483647, %v3663_v1  ;;  %vm3669_vm13 = vweird.f32 %v3663_v1 }
0x19c0   :  { %vm3966_vm4 = vcmp.ge.f32.partialorder %v3945_v63, 0.0  ;;  %vm3965_vm5 = vcmp.ge.f32.partialorder %v3942_v12, 0.0 }
0x19c1   :  { %v3676_v33 = vor.u32 1.1754944e-38, %v3675_v35  ;;  %vm3674_vm15 = vcmp.eq.f32.partialorder %v3673_v41, 8.507059e+37  ;;  %v3981_v35 = vmul.f32 0.01, %v3942_v12 }
0x19c3   :  { %v9808_v41 = vsel %vm3965_vm5, %v3942_v12, %v3981_v35 }
0x19c4   :  { %v3947_v52 = vpop.f32.mrf.mxu0 }
0x19c5   :  { %v5563_v15 = vpop.eup %5562  ;;  %v3948_v59 = vadd.f32 %v9774_v10, %v3947_v52 }
0x19c6   :  { %v3665_v62 = vmul.f32 %v5563_v15, %v3663_v1  ;;  %vm3670_vm12 = vweird.f32 %v5563_v15 }
0x19c7   :  { %vm3671_vm14 = vmor %vm3669_vm13, %vm3670_vm12  ;;  %v3983_v54 = vmul.f32 0.01, %v3948_v59  ;;  %vm3967_vm1 = vcmp.ge.f32.partialorder %v3948_v59, 0.0 }
0x19c8   :  { %v3666_v48 = vsub.f32 1.0, %v3665_v62 }
0x19c9   :  { %v9794_v62 = vsel %vm3967_vm1, %v3948_v59, %v3983_v54 }
0x19ca   :  { %v3667_v53 = vmul.f32 %v5563_v15, %v3666_v48 }
0x19cc   :  { %v3950_v7 = vpop.f32.mrf.mxu0  ;;  %v3668_v61 = vadd.f32 %v5563_v15, %v3667_v53 }
0x19cd   :  { %v3951_v26 = vadd.f32 %v9774_v10, %v3950_v7  ;;  %v3933_v7 = vadd.f32 %v9774_v10, %v9769_v2  ;;  %v3927_v2 = vadd.f32 %v9774_v10, %v9765_v31  ;;  %v3921_v31 = vadd.f32 %v9774_v10, %v9761_v49 }
0x19ce   :  { %v3672_v6 = vsel %vm3671_vm14, %v5563_v15, %v3668_v61  ;;  %v3982_v15 = vmul.f32 0.01, %v3945_v63  ;;  %v3915_v49 = vadd.f32 %v9774_v10, %v9757_v0  ;;  %v3909_v0 = vadd.f32 %v9774_v10, %v9753_v38 }
0x19cf   :  { %vm3968_vm0 = vcmp.ge.f32.partialorder %v3951_v26, 0.0  ;;  %v3984_v44 = vmul.f32 0.01, %v3951_v26  ;;  %v3677_v30 = vsel %vm3674_vm15, %v3676_v33, %v3672_v6  ;;  %v3978_v59 = vmul.f32 0.01, %v3933_v7 }
0x19d0   :  { %v3731_v11 = vmul.f32 %v3677_v30, %v9223_v3  ;;  %v3769_v19 = vsub.f32 %v3677_v30, %v9220_v22  ;;  %v9803_v53 = vsel %vm3966_vm4, %v3945_v63, %v3982_v15  ;;  %vm3962_vm8 = vcmp.ge.f32.partialorder %v3933_v7, 0.0 }
0x19d1   :  { %v9781_v58 = vsel %vm3968_vm0, %v3951_v26, %v3984_v44  ;;  %v9826_v6 = vsel %vm3962_vm8, %v3933_v7, %v3978_v59  ;;  %v3976_v44 = vmul.f32 0.01, %v3927_v2  ;;  %vm3960_vm11 = vcmp.ge.f32.partialorder %v3927_v2, 0.0 }
0x19d2   :  { %5467 = vpush %v3731_v11  ;;  %v9784_v60 = vadd.f32 %v3731_v11, %v9215_v56  ;;  %v3770_v1 = vmul.f32 %v3769_v19, %v9223_v3  ;;  %5373 = vmatpush.xpose.msk.msra.mxu2 %vm331_vm3, %v9781_v58  ;;  %v3939_v56 = vadd.f32 %v9774_v10, %v3938_v55  ;;  %v3974_v63 = vmul.f32 0.01, %v3921_v31 }
0x19d3   :  { %v9838_v19 = vsel %vm3960_vm11, %v3927_v2, %v3976_v44  ;;  %vm3958_vm13 = vcmp.ge.f32.partialorder %v3921_v31, 0.0  ;;  %v3972_v15 = vmul.f32 0.01, %v3915_v49  ;;  %vm3956_vm15 = vcmp.ge.f32.partialorder %v3915_v49, 0.0 }
0x19d4   :  { %vm3773_vm2 = vcmp.lt.f32.partialorder %v9784_v60, 0.999  ;;  %v9791_v52 = vadd.f32 %v3770_v1, %v9220_v22  ;;  %v3936_v22 = vadd.f32 %v9774_v10, %v3935_v29  ;;  %v3980_v42 = vmul.f32 0.01, %v3939_v56  ;;  %11898 = vst [vmem:[#allocation77_spill] sm:$0xff] %v9838_v19 }
0x19d5   :  { %v9797_v48 = vsel %vm3773_vm2, %v9223_v3, 0.0  ;;  %vm3964_vm6 = vcmp.ge.f32.partialorder %v3939_v56, 0.0  ;;  %v3930_v29 = vadd.f32 %v9774_v10, %v9767_v21  ;;  %v3924_v21 = vadd.f32 %v9774_v10, %v9763_v20 }
0x19d6   :  { %5374 = vmatpush.xpose.msk.msra.mxu2 %vm331_vm3, %v9794_v62  ;;  %5469 = vpush %v9797_v48  ;;  %v3979_v55 = vmul.f32 0.01, %v3936_v22  ;;  %v9814_v61 = vsel %vm3964_vm6, %v3939_v56, %v3980_v42  ;;  %vm3963_vm7 = vcmp.ge.f32.partialorder %v3936_v22, 0.0  ;;  %v3918_v20 = vadd.f32 %v9774_v10, %v9759_v8 }
0x19d7   :  { %v3977_v33 = vmul.f32 0.01, %v3930_v29  ;;  %vm3961_vm10 = vcmp.ge.f32.partialorder %v3930_v29, 0.0  ;;  %v3975_v11 = vmul.f32 0.01, %v3924_v21  ;;  %vm3959_vm12 = vcmp.ge.f32.partialorder %v3924_v21, 0.0 }
0x19d8   :  { %v9820_v26 = vsel %vm3963_vm7, %v3936_v22, %v3979_v55  ;;  %v3973_v1 = vmul.f32 0.01, %v3918_v20  ;;  %v9850_v12 = vsel %vm3958_vm13, %v3921_v31, %v3974_v63  ;;  %vm3957_vm14 = vcmp.ge.f32.partialorder %v3918_v20, 0.0 }
0x19d9   :  { %v9832_v30 = vsel %vm3961_vm10, %v3930_v29, %v3977_v33  ;;  %v9844_v54 = vsel %vm3959_vm12, %v3924_v21, %v3975_v11  ;;  %11900 = vst [vmem:[#allocation79_spill] sm:$0xff] %v9850_v12  ;;  %v3912_v8 = vadd.f32 %v9774_v10, %v9755_v46  ;;  %v9862_v22 = vsel %vm3956_vm15, %v3915_v49, %v3972_v15  ;;  %v11914_v11 = vld [vmem:[#allocation24_spill] sm:$0xff]  ;;  %v11916_v49 = vld [vmem:[#allocation33_spill] sm:$0xff] }
0x19da   :  { %5375 = vmatpush.xpose.msk.msra.mxu2 %vm331_vm3, %v9803_v53  ;;  %11899 = vst [vmem:[#allocation78_spill] sm:$0xff] %v9844_v54  ;;  %v9856_v56 = vsel %vm3957_vm14, %v3918_v20, %v3973_v1  ;;  %v3906_v46 = vadd.f32 %v9774_v10, %v9751_v23  ;;  %v3970_v42 = vmul.f32 0.01, %v3909_v0  ;;  %vm3954_vm1 = vcmp.ge.f32.partialorder %v3909_v0, 0.0  ;;  %v11918_v15 = vld [vmem:[#allocation89_spill] sm:$0xff] }
0x19db   :  { %11901 = vst [vmem:[#allocation80_spill] sm:$0xff] %v9856_v56  ;;  %v3971_v35 = vmul.f32 0.01, %v3912_v8  ;;  %vm3955_vm0 = vcmp.ge.f32.partialorder %v3912_v8, 0.0 }
0x19dc   :  { %11902 = vst [vmem:[#allocation17_spill] sm:$0xff] %v9862_v22  ;;  %vm3953_vm2 = vcmp.ge.f32.partialorder %v3906_v46, 0.0 }
0x19dd   :  { %v9868_v55 = vsel %vm3955_vm0, %v3912_v8, %v3971_v35  ;;  %v11917_v8 = vld [vmem:[#allocation32_spill] sm:$0xff] }
0x19de   :  { %5376 = vmatpush.xpose.msk.msra.mxu2 %vm331_vm3, %v9808_v41  ;;  %11903 = vst [vmem:[#allocation51_spill] sm:$0xff] %v9868_v55 }
0x19e2   :  { %5377 = vmatpush.xpose.msk.msra.mxu2 %vm331_vm3, %v9814_v61 }
0x19e6   :  { %5378 = vmatpush.xpose.msk.msra.mxu2 %vm331_vm3, %v9820_v26 }
0x19ea   :  { %5379 = vmatpush.xpose.msk.msra.mxu2 %vm331_vm3, %v9826_v6 }
0x19ee   :  { %5380 = vmatpush.xpose.msk.msra.mxu2 %vm331_vm3, %v9832_v30 }
0x19f2   :  { %5381 = vmatpush.xpose.msk.msra.mxu2 %vm331_vm3, %v9838_v19 }
0x19f6   :  { %5382 = vmatpush.xpose.msk.msra.mxu2 %vm331_vm3, %v9844_v54 }
0x19fa   :  { %5383 = vmatpush.xpose.msk.msra.mxu2 %vm331_vm3, %v9850_v12 }
0x19fe   :  { %5384 = vmatpush.xpose.msk.msra.mxu2 %vm331_vm3, %v9856_v56 }
0x1a02   :  { %5385 = vmatpush.xpose.msk.msra.mxu2 %vm331_vm3, %v9862_v22 }
0x1a03   :  { %s5468_s5 = spop %5467 }
0x1a04   :  { %v3734_v7 = vstv %s5468_s5 }
0x1a05   :  { %v3736_v29 = vmul.f32 %v3734_v7, %v9376_v24  ;;  %v3737_v59 = vmul.f32 %v3734_v7, %v9369_v51  ;;  %v3738_v38 = vmul.f32 %v3734_v7, %v9332_v34  ;;  %v3739_v2 = vmul.f32 %v3734_v7, %v9325_v50 }
0x1a06   :  { %5386 = vmatpush.xpose.msk.msra.mxu2 %vm331_vm3, %v9868_v55  ;;  %v3740_v33 = vmul.f32 %v3734_v7, %v9319_v9  ;;  %v3741_v23 = vmul.f32 %v3734_v7, %v9285_v17  ;;  %v3742_v21 = vmul.f32 %v3734_v7, %v9279_v57  ;;  %v3969_v17 = vmul.f32 0.01, %v3906_v46 }
0x1a07   :  { %v9880_v44 = vadd.f32 %v3736_v29, %v9297_v27  ;;  %v9883_v24 = vadd.f32 %v3737_v59, %v9300_v39  ;;  %v9886_v34 = vadd.f32 %v3738_v38, %v9303_v47  ;;  %v9889_v50 = vadd.f32 %v3739_v2, %v9306_v14  ;;  %v11923_v29 = vld [vmem:[#allocation19_spill] sm:$0xff]  ;;  %v11924_v38 = vld [vmem:[#allocation52_spill] sm:$0xff]  ;;  %s5470_s20 = spop %5469 }
0x1a08   :  { %v9892_v51 = vadd.f32 %v3740_v33, %v9311_v43  ;;  %v9895_v9 = vadd.f32 %v3741_v23, %v9314_v25  ;;  %v9898_v57 = vadd.f32 %v3742_v21, %v9317_v37  ;;  %v9900_v27 = vsel %vm3954_vm1, %v3909_v0, %v3970_v42  ;;  %v11913_v37 = vld [vmem:[#allocation23_spill] sm:$0xff]  ;;  %v11925_v33 = vld [vmem:[#allocation18_spill] sm:$0xff] }
0x1a09   :  { %11904 = vst [vmem:[#allocation44_spill] sm:$0xff] %v9880_v44  ;;  %v9904_v39 = vsel %vm3953_vm2, %v3906_v46, %v3969_v17  ;;  %v3743_v47 = vmul.f32 %v3734_v7, %v9273_v16  ;;  %v3744_v43 = vmul.f32 %v3734_v7, %v9267_v5  ;;  %v3745_v25 = vmul.f32 %v3734_v7, %v9261_v32  ;;  %v11915_v16 = vld [vmem:[#allocation25_spill] sm:$0xff]  ;;  %v11921_v5 = vld [vmem:[#allocation20_spill] sm:$0xff]  ;;  %v11922_v46 = vld [vmem:[#allocation31_spill] sm:$0xff] }
0x1a0a   :  { %11905 = vst [vmem:[#allocation81_spill] sm:$0xff] %v9883_v24  ;;  %5387 = vmatpush.xpose.msk.msra.mxu2 %vm331_vm3, %v9900_v27  ;;  %v3746_v31 = vmul.f32 %v3734_v7, %v11913_v37  ;;  %v3747_v20 = vmul.f32 %v3734_v7, %v11914_v11  ;;  %v3748_v63 = vmul.f32 %v3734_v7, %v11915_v16  ;;  %v11926_v21 = vld [vmem:[#allocation87_spill] sm:$0xff]  ;;  %v11929_v37 = vld [vmem:[#allocation90_spill] sm:$0xff]  ;;  %v11934_v16 = vld [vmem:[#allocation88_spill] sm:$0xff] }
0x1a0b   :  { %11906 = vst [vmem:[#allocation43_spill] sm:$0xff] %v9886_v34  ;;  %v9913_v14 = vadd.f32 %v3743_v47, %v9335_v28  ;;  %v3749_v1 = vmul.f32 %v3734_v7, %v11916_v49  ;;  %v11920_v28 = vld [vmem:[#allocation21_spill] sm:$0xff]  ;;  %v3751_v42 = vmul.f32 %v3734_v7, %v11922_v46  ;;  %v11927_v47 = vld [vmem:[#allocation92_spill] sm:$0xff]  ;;  %v11932_v11 = vld [vmem:[#allocation55_spill] sm:$0xff] }
0x1a0c   :  { %11907 = vst [vmem:[#allocation42_spill] sm:$0xff] %v9889_v50  ;;  %v9927_v35 = vadd.f32 %v3745_v25, %v11920_v28  ;;  %v9930_v32 = vadd.f32 %v3746_v31, %v11921_v5  ;;  %v9934_v59 = vadd.f32 %v3747_v20, %v11923_v29  ;;  %v9937_v2 = vadd.f32 %v3748_v63, %v11924_v38  ;;  %v11928_v25 = vld [vmem:[#allocation91_spill] sm:$0xff]  ;;  %v11931_v31 = vld [vmem:[#allocation54_spill] sm:$0xff]  ;;  %v11935_v63 = vld [vmem:[#allocation57_spill] sm:$0xff] }
0x1a0d   :  { %11908 = vst [vmem:[#allocation41_spill] sm:$0xff] %v9892_v51  ;;  %v9940_v23 = vadd.f32 %v3749_v1, %v11925_v33  ;;  %v11933_v20 = vld [vmem:[#allocation58_spill] sm:$0xff]  ;;  %v11936_v49 = vld [vmem:[#allocation61_spill] sm:$0xff]  ;;  %v11937_v1 = vld [vmem:[#allocation59_spill] sm:$0xff] }
0x1a0e   :  { %11909 = vst [vmem:[#allocation36_spill] sm:$0xff] %v9895_v9  ;;  %5388 = vmatpush.xpose.msk.msra.mxu2 %vm331_vm3, %v9904_v39  ;;  %v11942_v28 = vld [vmem:[#allocation45_spill] sm:$0xff]  ;;  %v11943_v5 = vld [vmem:[#allocation86_spill] sm:$0xff]  ;;  %v11944_v46 = vld [vmem:[#allocation72_spill] sm:$0xff] }
0x1a0f   :  { %11910 = vst [vmem:[#allocation49_spill] sm:$0xff] %v9898_v57  ;;  %v11946_v29 = vld [vmem:[#allocation70_spill] sm:$0xff]  ;;  %v11947_v38 = vld [vmem:[#allocation29_spill] sm:$0xff]  ;;  %v11948_v33 = vld [vmem:[#allocation68_spill] sm:$0xff] }
0x1a10   :  { %11911 = vst [vmem:[#allocation37_spill] sm:$0xff] %v9900_v27 }
0x1a11   :  { %5389 = vmatmul.msk.f32.vlgmr.msra.gmra.mxu2 %vm331_vm3, %v9389_v4  ;;  %11912 = vst [vmem:[#allocation38_spill] sm:$0xff] %v9913_v14  ;;  %v11919_v4 = vld [vmem:[#allocation22_spill] sm:$0xff] }
0x1a12   :  { %4092 = vmatpush.xpose.msrb.mxu2 %v9383_v18  ;;  %v3750_v18 = vmul.f32 %v3734_v7, %v11917_v8  ;;  %v9924_v0 = vadd.f32 %v3744_v43, %v11919_v4  ;;  %v9946_v43 = vadd.f32 %v3751_v42, %v11927_v47  ;;  %v11930_v7 = vld [vmem:[#allocation56_spill] sm:$0xff]  ;;  %v11945_v42 = vld [vmem:[#allocation30_spill] sm:$0xff] }
0x1a13   :  { %v11938_v8 = vld [vmem:[#allocation60_spill] sm:$0xff] }
0x1a14   :  { %v9943_v17 = vadd.f32 %v3750_v18, %v11926_v21  ;;  %v11939_v18 = vld [vmem:[#allocation62_spill] sm:$0xff]  ;;  %v11941_v4 = vld [vmem:[#allocation64_spill] sm:$0xff] }
0x1a15   :  { %v11949_v21 = vld [vmem:[#allocation28_spill] sm:$0xff] }
0x1a16   :  { %4093 = vmatpush.xpose.msrb.mxu2 %v11918_v15  ;;  %v11940_v15 = vld [vmem:[#allocation63_spill] sm:$0xff] }
0x1a1a   :  { %4094 = vmatpush.xpose.msrb.mxu2 %v11928_v25  ;;  %v11950_v25 = vld [vmem:[#allocation16_spill] sm:$0xff] }
0x1a1e   :  { %4095 = vmatpush.xpose.msrb.mxu2 %v11929_v37  ;;  %v11951_v37 = vld [vmem:[#allocation15_spill] sm:$0xff] }
0x1a22   :  { %4096 = vmatpush.xpose.msrb.mxu2 %v11930_v7  ;;  %v11952_v7 = vld [vmem:[#allocation14_spill] sm:$0xff] }
0x1a26   :  { %4097 = vmatpush.xpose.msrb.mxu2 %v11931_v31  ;;  %v11953_v31 = vld [vmem:[#allocation13_spill] sm:$0xff] }
0x1a2a   :  { %4098 = vmatpush.xpose.msrb.mxu2 %v11932_v11  ;;  %v11954_v11 = vld [vmem:[#allocation12_spill] sm:$0xff] }
0x1a2e   :  { %4099 = vmatpush.xpose.msrb.mxu2 %v11933_v20  ;;  %v11955_v20 = vld [vmem:[#allocation11_spill] sm:$0xff] }
0x1a32   :  { %4100 = vmatpush.xpose.msrb.mxu2 %v11934_v16  ;;  %v11956_v16 = vld [vmem:[#allocation10_spill] sm:$0xff] }
0x1a36   :  { %4101 = vmatpush.xpose.msrb.mxu2 %v11935_v63  ;;  %v11957_v63 = vld [vmem:[#allocation46_spill] sm:$0xff] }
0x1a3a   :  { %4102 = vmatpush.xpose.msrb.mxu2 %v11936_v49 }
0x1a3e   :  { %4103 = vmatpush.xpose.msrb.mxu2 %v11937_v1  ;;  %v11958_v1 = vld [vmem:[#allocation34_spill] sm:$0xff] }
0x1a42   :  { %4104 = vmatpush.xpose.msrb.mxu2 %v11938_v8 }
0x1a46   :  { %4105 = vmatpush.xpose.msrb.mxu2 %v11939_v18 }
0x1a4a   :  { %4106 = vmatpush.xpose.msrb.mxu2 %v11940_v15  ;;  %v9979_v15 = vstv %s5470_s20 }
0x1a4e   :  { %4107 = vmatpush.xpose.msrb.mxu2 %v11941_v4 }
0x1a52   :  { %4632 = vmatpush.xpose.msra.mxu2 %v11942_v28  ;;  %v11959_v28 = vld [vmem:[#allocation84_spill] sm:$0xff] }
0x1a56   :  { %4633 = vmatpush.xpose.msra.mxu2 %v11943_v5  ;;  %v4191_v5 = vsub.f32 %v9904_v39, %v11959_v28 }
0x1a5a   :  { %4634 = vmatpush.xpose.msra.mxu2 %v11944_v46  ;;  %v4211_v46 = vmul.f32 %v9979_v15, %v4191_v5 }
0x1a5e   :  { %4635 = vmatpush.xpose.msra.mxu2 %v11945_v42  ;;  %v9985_v42 = vadd.f32 %v4211_v46, %v11959_v28 }
0x1a62   :  { %4636 = vmatpush.xpose.msra.mxu2 %v11946_v29  ;;  %v11960_v29 = vld [vmem:[#allocation73_spill] sm:$0xff] }
0x1a66   :  { %4637 = vmatpush.xpose.msra.mxu2 %v11947_v38  ;;  %v4192_v38 = vsub.f32 %v9900_v27, %v11960_v29 }
0x1a6a   :  { %4638 = vmatpush.xpose.msra.mxu2 %v11948_v33  ;;  %v4212_v33 = vmul.f32 %v9979_v15, %v4192_v38 }
0x1a6e   :  { %4639 = vmatpush.xpose.msra.mxu2 %v11949_v21  ;;  %v9993_v21 = vadd.f32 %v4212_v33, %v11960_v29  ;;  %v11969_v29 = vld [vmem:[#allocation67_spill] sm:$0xff] }
0x1a6f   :  { %v4197_v38 = vsub.f32 %v9844_v54, %v11969_v29 }
0x1a71   :  { %v4217_v33 = vmul.f32 %v9979_v15, %v4197_v38  ;;  %v11975_v38 = vld [vmem:[#allocation40_spill] sm:$0xff] }
0x1a94   :  { %v4066_v47 = vpop.f32.mrf.mxu2 }
0x1a95   :  { %4085 = vmatmul.f32.vlgmr.msra.gmra.mxu3 %v4066_v47  ;;  %v11961_v47 = vld [vmem:[#allocation71_spill] sm:$0xff] }
0x1a96   :  { %4343 = vmatpush.msra.mxu3 %v11950_v25  ;;  %v4193_v25 = vsub.f32 %v9868_v55, %v11961_v47 }
0x1a98   :  { %4344 = vmatpush.msra.mxu3 %v11951_v37  ;;  %v4213_v37 = vmul.f32 %v9979_v15, %v4193_v25  ;;  %v11971_v25 = vld [vmem:[#allocation66_spill] sm:$0xff] }
0x1a9a   :  { %4345 = vmatpush.msra.mxu3 %v11952_v7  ;;  %v10001_v7 = vadd.f32 %v4213_v37, %v11961_v47  ;;  %v10033_v47 = vadd.f32 %v4217_v33, %v11969_v29  ;;  %v4198_v37 = vsub.f32 %v9838_v19, %v11971_v25  ;;  %v4201_v33 = vsub.f32 %v9820_v26, %v11975_v38 }
0x1a9c   :  { %4346 = vmatpush.msra.mxu3 %v11953_v31  ;;  %11962 = vst [vmem:[#allocation23_spill] sm:$0xff] %v10001_v7  ;;  %v11963_v31 = vld [vmem:[#allocation69_spill] sm:$0xff] }
0x1a9d   :  { %11970 = vst [vmem:[#allocation32_spill] sm:$0xff] %v10033_v47 }
0x1a9e   :  { %4347 = vmatpush.msra.mxu3 %v11954_v11  ;;  %v4194_v11 = vsub.f32 %v9862_v22, %v11963_v31 }
0x1aa0   :  { %4348 = vmatpush.msra.mxu3 %v11955_v20  ;;  %v4214_v20 = vmul.f32 %v9979_v15, %v4194_v11 }
0x1aa2   :  { %4349 = vmatpush.msra.mxu3 %v11956_v16  ;;  %v10009_v16 = vadd.f32 %v4214_v20, %v11963_v31  ;;  %v4218_v31 = vmul.f32 %v9979_v15, %v4198_v37  ;;  %v11973_v20 = vld [vmem:[#allocation39_spill] sm:$0xff] }
0x1aa4   :  { %4350 = vmatpush.msra.mxu3 %v11957_v63  ;;  %11964 = vst [vmem:[#allocation24_spill] sm:$0xff] %v10009_v16  ;;  %v11965_v63 = vld [vmem:[#allocation27_spill] sm:$0xff]  ;;  %v10041_v11 = vadd.f32 %v4218_v31, %v11971_v25  ;;  %v4221_v25 = vmul.f32 %v9979_v15, %v4201_v33  ;;  %v11978_v33 = vld [vmem:[#allocation74_spill] sm:$0xff] }
0x1aa5   :  { %v11976_v31 = vld [vmem:[#allocation83_spill] sm:$0xff] }
0x1aa6   :  { %11972 = vst [vmem:[#allocation89_spill] sm:$0xff] %v10041_v11  ;;  %v10065_v37 = vadd.f32 %v4221_v25, %v11975_v38  ;;  %v4204_v25 = vsub.f32 %v9803_v53, %v11978_v33 }
0x1b18   :  { %v4086_v49 = vpop.f32.mrf.mxu3 }
0x1b19   :  { %v4087_v8 = vadd.f32 %v4086_v49, %v11958_v1  ;;  %v4195_v49 = vsub.f32 %v9856_v56, %v11965_v63 }
0x1b1b   :  { %vm4089_vm4 = vcmp.ge.f32.partialorder %v4087_v8, 0.0  ;;  %v4090_v18 = vmul.f32 0.01, %v4087_v8 }
0x1b1d   :  { %v4091_v4 = vsel %vm4089_vm4, %v4087_v8, %v4090_v18  ;;  %v4215_v8 = vmul.f32 %v9979_v15, %v4195_v49 }
0x1b1e   :  { %4108 = vmatmul.f32.vlgmr.msrb.gmra.mxu2 %v4091_v4  ;;  %4128 = vmatmul.f32.vlgmr.msrb.gmra.mxu3 %v4091_v4  ;;  %v11967_v4 = vld [vmem:[#allocation26_spill] sm:$0xff] }
0x1b1f   :  { %v10017_v18 = vadd.f32 %v4215_v8, %v11965_v63  ;;  %v4196_v28 = vsub.f32 %v9850_v12, %v11967_v4  ;;  %v4199_v63 = vsub.f32 %v9832_v30, %v11973_v20 }
0x1b21   :  { %11966 = vst [vmem:[#allocation25_spill] sm:$0xff] %v10017_v18  ;;  %v4216_v5 = vmul.f32 %v9979_v15, %v4196_v28  ;;  %v4219_v49 = vmul.f32 %v9979_v15, %v4199_v63 }
0x1b23   :  { %v10025_v46 = vadd.f32 %v4216_v5, %v11967_v4  ;;  %v10049_v8 = vadd.f32 %v4219_v49, %v11973_v20  ;;  %v11974_v4 = vld [vmem:[#allocation65_spill] sm:$0xff]  ;;  %v4202_v20 = vsub.f32 %v9814_v61, %v11976_v31 }
0x1b24   :  { %v4200_v28 = vsub.f32 %v9826_v6, %v11974_v4 }
0x1b25   :  { %11968 = vst [vmem:[#allocation33_spill] sm:$0xff] %v10025_v46  ;;  %v4222_v63 = vmul.f32 %v9979_v15, %v4202_v20 }
0x1b26   :  { %5392 = vmatmul.msk.f32.vlgmr.msra.gmra.mxu3 %vm331_vm3, %v9985_v42  ;;  %v4220_v5 = vmul.f32 %v9979_v15, %v4200_v28 }
0x1b27   :  { %v10073_v49 = vadd.f32 %v4222_v63, %v11976_v31  ;;  %v4224_v31 = vmul.f32 %v9979_v15, %v4204_v25  ;;  %v11979_v63 = vld [vmem:[#allocation75_spill] sm:$0xff] }
0x1b28   :  { %v10057_v29 = vadd.f32 %v4220_v5, %v11974_v4  ;;  %v11977_v4 = vld [vmem:[#allocation50_spill] sm:$0xff]  ;;  %v4205_v14 = vsub.f32 %v9794_v62, %v11979_v63 }
0x1b29   :  { %v4203_v28 = vsub.f32 %v9808_v41, %v11977_v4  ;;  %v10089_v20 = vadd.f32 %v4224_v31, %v11978_v33 }
0x1b2b   :  { %v4223_v5 = vmul.f32 %v9979_v15, %v4203_v28 }
0x1b2d   :  { %v10081_v38 = vadd.f32 %v4223_v5, %v11977_v4  ;;  %v4225_v4 = vmul.f32 %v9979_v15, %v4205_v14  ;;  %v11980_v5 = vld [vmem:[#allocation76_spill] sm:$0xff]  ;;  %v11981_v14 = vld [vmem:[#allocation35_spill] sm:$0xff] }
0x1b2e   :  { %5393 = vmatmul.msk.f32.gmra.mxu3 %vm331_vm3, %v9993_v21  ;;  %v4206_v19 = vsub.f32 %v9781_v58, %v11980_v5 }
0x1b2f   :  { %v10097_v28 = vadd.f32 %v4225_v4, %v11979_v63  ;;  %v11982_v63 = vld [vmem:[#allocation48_spill] sm:$0xff] }
0x1b30   :  { %v4226_v33 = vmul.f32 %v9979_v15, %v4206_v19 }
0x1b32   :  { %v10105_v25 = vadd.f32 %v4226_v33, %v11980_v5 }
0x1b36   :  { %5394 = vmatmul.msk.f32.gmra.mxu3 %vm331_vm3, %v10001_v7 }
0x1b3e   :  { %5395 = vmatmul.msk.f32.gmra.mxu3 %vm331_vm3, %v10009_v16 }
0x1b46   :  { %5396 = vmatmul.msk.f32.gmra.mxu3 %vm331_vm3, %v10017_v18 }
0x1b4e   :  { %5397 = vmatmul.msk.f32.gmra.mxu3 %vm331_vm3, %v10025_v46 }
0x1b56   :  { %5398 = vmatmul.msk.f32.gmra.mxu3 %vm331_vm3, %v10033_v47 }
0x1b5e   :  { %5399 = vmatmul.msk.f32.gmra.mxu3 %vm331_vm3, %v10041_v11 }
0x1b66   :  { %5400 = vmatmul.msk.f32.gmra.mxu3 %vm331_vm3, %v10049_v8 }
0x1b6e   :  { %5401 = vmatmul.msk.f32.gmra.mxu3 %vm331_vm3, %v10057_v29 }
0x1b76   :  { %5402 = vmatmul.msk.f32.gmra.mxu3 %vm331_vm3, %v10065_v37 }
0x1b7e   :  { %5403 = vmatmul.msk.f32.gmra.mxu3 %vm331_vm3, %v10073_v49 }
0x1b86   :  { %5404 = vmatmul.msk.f32.gmra.mxu3 %vm331_vm3, %v10081_v38 }
0x1b8e   :  { %5405 = vmatmul.msk.f32.gmra.mxu3 %vm331_vm3, %v10089_v20 }
0x1b96   :  { %5406 = vmatmul.msk.f32.gmra.mxu3 %vm331_vm3, %v10097_v28 }
0x1b9e   :  { %5407 = vmatmul.msk.f32.gmra.mxu3 %vm331_vm3, %v10105_v25 }
0x1ba1   :  { %v4109_v31 = vpop.f32.mrf.mxu2  ;;  %v4129_v57 = vpop.f32.mrf.mxu3 }
0x1ba2   :  { %v4110_v11 = vadd.f32 %v4109_v31, %v11981_v14 }
0x1ba4   :  { %v4132_v4 = vadd.f32 %v4110_v11, %v11982_v63 }
0x1ba6   :  { %v5390_v54 = vmul.f32 -1.442695, %v4132_v4 }
0x1ba8   :  { %5564 = vpow2.f32 %v5390_v54 }
0x1ba9   :  { %v4352_v9 = vpop.f32.mrf.mxu3 }
0x1bae   :  { %v5565_v47 = vpop.eup %5564 }
0x1baf   :  { %v4136_v12 = vadd.f32 1.0, %v5565_v47  ;;  %v4130_v47 = vadd.f32 %v4129_v57, %v11894_v36 }
0x1bb1   :  { %5566 = vrcp.f32 %v4136_v12  ;;  %v4355_v51 = vpop.f32.mrf.mxu3  ;;  %v4148_v46 = vand.u32 2147483648, %v4136_v12  ;;  %v4146_v50 = vand.u32 2147483647, %v4136_v12  ;;  %vm4142_vm6 = vweird.f32 %v4136_v12 }
0x1bb3   :  { %v4149_v31 = vor.u32 1.1754944e-38, %v4148_v46  ;;  %vm4147_vm8 = vcmp.eq.f32.partialorder %v4146_v50, 8.507059e+37 }
0x1bb7   :  { %v5567_v19 = vpop.eup %5566 }
0x1bb8   :  { %v4138_v15 = vmul.f32 %v5567_v19, %v4136_v12  ;;  %vm4143_vm5 = vweird.f32 %v5567_v19 }
0x1bb9   :  { %v4358_v5 = vpop.f32.mrf.mxu3  ;;  %vm4144_vm7 = vmor %vm4142_vm6, %vm4143_vm5 }
0x1bba   :  { %v4139_v33 = vsub.f32 1.0, %v4138_v15 }
0x1bbc   :  { %v4140_v56 = vmul.f32 %v5567_v19, %v4139_v33 }
0x1bbe   :  { %v4141_v18 = vadd.f32 %v5567_v19, %v4140_v56 }
0x1bc0   :  { %v4145_v11 = vsel %vm4144_vm7, %v5567_v19, %v4141_v18 }
0x1bc1   :  { %v4150_v54 = vsel %vm4147_vm8, %v4149_v31, %v4145_v11  ;;  %v4361_v4 = vpop.f32.mrf.mxu3 }
0x1bc2   :  { %v4152_v22 = vmul.f32 %v4150_v54, %v11895_v13  ;;  %v4161_v57 = vmul.f32 %v4150_v54, %v11896_v45 }
0x1bc4   :  { %v4153_v34 = vadd.f32 %v4152_v22, %v4130_v47  ;;  %v4155_v22 = vsub.f32 1.0, %v4150_v54  ;;  %v10150_v54 = vld [vmem:[%s11272_s21 + $0x60] sm:$0xff] }
0x1bc5   :  { %11988 = vst [vmem:[#allocation52_spill] sm:$0xff] %v10150_v54 }
0x1bc6   :  { %5568 = vtanh.f32 %v4153_v34 }
0x1bc9   :  { %v4364_v16 = vpop.f32.mrf.mxu3 }
0x1bcc   :  { %v5569_v15 = vpop.eup %5568 }
0x1bcd   :  { %4157 = vrot.lane.b32.xlu0 %v5569_v15, %s5840_s11  ;;  %v10118_v15 = vld [vmem:[%s11272_s21] sm:$0xff] }
0x1bce   :  { %11983 = vst [vmem:[#allocation22_spill] sm:$0xff] %v10118_v15 }
0x1bd1   :  { %v4367_v33 = vpop.f32.mrf.mxu3 }
0x1bd9   :  { %v4370_v55 = vpop.f32.mrf.mxu3 }
0x1be1   :  { %v4373_v56 = vpop.f32.mrf.mxu3 }
0x1be9   :  { %v4376_v12 = vpop.f32.mrf.mxu3 }
0x1bf1   :  { %v4379_v24 = vpop.f32.mrf.mxu3 }
0x1bf9   :  { %v4382_v46 = vpop.f32.mrf.mxu3 }
0x1c01   :  { %v4385_v18 = vpop.f32.mrf.mxu3 }
0x1c09   :  { %v4388_v50 = vpop.f32.mrf.mxu3 }
0x1c11   :  { %v4391_v19 = vpop.f32.mrf.mxu3 }
0x1c19   :  { %v4394_v31 = vpop.f32.mrf.mxu3 }
0x1c21   :  { %v4397_v11 = vpop.f32.mrf.mxu3 }
0x1c22   :  { %4400 = vmatpush.msrb.mxu1 %v4397_v11  ;;  %v10210_v11 = vld [vmem:[%s11272_s21 + $0x28] sm:$0xff] }
0x1c23   :  { %11998 = vst [vmem:[#allocation88_spill] sm:$0xff] %v10210_v11 }
0x1c24   :  { %4401 = vmatpush.msrb.mxu1 %v4394_v31  ;;  %v10204_v31 = vld [vmem:[%s11272_s21 + $0x30] sm:$0xff] }
0x1c25   :  { %11997 = vst [vmem:[#allocation58_spill] sm:$0xff] %v10204_v31 }
0x1c26   :  { %4402 = vmatpush.msrb.mxu1 %v4391_v19  ;;  %v10198_v19 = vld [vmem:[%s11272_s21 + $0x38] sm:$0xff] }
0x1c27   :  { %11996 = vst [vmem:[#allocation55_spill] sm:$0xff] %v10198_v19 }
0x1c28   :  { %4403 = vmatpush.msrb.mxu1 %v4388_v50  ;;  %v10192_v50 = vld [vmem:[%s11272_s21 + $0x20] sm:$0xff] }
0x1c29   :  { %11995 = vst [vmem:[#allocation54_spill] sm:$0xff] %v10192_v50 }
0x1c2a   :  { %4404 = vmatpush.msrb.mxu1 %v4385_v18  ;;  %v10186_v18 = vld [vmem:[%s11272_s21 + $0x40] sm:$0xff] }
0x1c2b   :  { %11994 = vst [vmem:[#allocation56_spill] sm:$0xff] %v10186_v18 }
0x1c2c   :  { %4405 = vmatpush.msrb.mxu1 %v4382_v46  ;;  %v10180_v46 = vld [vmem:[%s11272_s21 + $0x48] sm:$0xff] }
0x1c2d   :  { %11993 = vst [vmem:[#allocation90_spill] sm:$0xff] %v10180_v46 }
0x1c2e   :  { %4406 = vmatpush.msrb.mxu1 %v4379_v24 }
0x1c30   :  { %4407 = vmatpush.msrb.mxu1 %v4376_v12  ;;  %v10174_v12 = vld [vmem:[%s11272_s21 + $0x18] sm:$0xff] }
0x1c31   :  { %11992 = vst [vmem:[#allocation91_spill] sm:$0xff] %v10174_v12 }
0x1c32   :  { %4408 = vmatpush.msrb.mxu1 %v4373_v56  ;;  %v10168_v56 = vld [vmem:[%s11272_s21 + $0x50] sm:$0xff] }
0x1c33   :  { %11991 = vst [vmem:[#allocation92_spill] sm:$0xff] %v10168_v56 }
0x1c34   :  { %4409 = vmatpush.msrb.mxu1 %v4370_v55  ;;  %v10124_v55 = vld [vmem:[%s11272_s21 + $0x78] sm:$0xff] }
0x1c35   :  { %11984 = vst [vmem:[#allocation21_spill] sm:$0xff] %v10124_v55 }
0x1c36   :  { %4410 = vmatpush.msrb.mxu1 %v4367_v33  ;;  %v10162_v33 = vld [vmem:[%s11272_s21 + $0x58] sm:$0xff] }
0x1c37   :  { %11990 = vst [vmem:[#allocation87_spill] sm:$0xff] %v10162_v33 }
0x1c38   :  { %4411 = vmatpush.msrb.mxu1 %v4364_v16  ;;  %v10138_v16 = vld [vmem:[%s11272_s21 + $0x8] sm:$0xff] }
0x1c39   :  { %11986 = vst [vmem:[#allocation31_spill] sm:$0xff] %v10138_v16 }
0x1c3a   :  { %4412 = vmatpush.msrb.mxu1 %v4361_v4  ;;  %v10156_v4 = vld [vmem:[%s11272_s21 + $0x10] sm:$0xff] }
0x1c3b   :  { %11989 = vst [vmem:[#allocation18_spill] sm:$0xff] %v10156_v4 }
0x1c3c   :  { %4413 = vmatpush.msrb.mxu1 %v4358_v5  ;;  %v10144_v5 = vld [vmem:[%s11272_s21 + $0x68] sm:$0xff] }
0x1c3d   :  { %11987 = vst [vmem:[#allocation19_spill] sm:$0xff] %v10144_v5 }
0x1c3e   :  { %4414 = vmatpush.msrb.mxu1 %v4355_v51 }
0x1c3f   :  { %v4158_v34 = vpop.permute.xlu0 %4157 }
0x1c40   :  { %v4160_v47 = vmul.f32 %v4158_v34, %v4155_v22  ;;  %4415 = vmatpush.msrb.mxu1 %v4352_v9  ;;  %v10132_v9 = vld [vmem:[%s11272_s21 + $0x70] sm:$0xff] }
0x1c41   :  { %4416 = vmatmul.f32.vlgmr.msrb.gmra.mxu1 %v10118_v15  ;;  %11985 = vst [vmem:[#allocation20_spill] sm:$0xff] %v10132_v9 }
0x1c42   :  { %v4162_v24 = vadd.f32 %v4161_v57, %v4160_v47  ;;  %4581 = vmatpush.xpose.msra.mxu1 %v10124_v55 }
0x1c44   :  { %v4163_v51 = vmul.f32 %v4162_v24, %v11897_v40 }
0x1c46   :  { %4165 = vrot.lane.b32.xlu0 %v4163_v51, %s5840_s11  ;;  %4582 = vmatpush.xpose.msra.mxu1 %v10132_v9 }
0x1c49   :  { %4419 = vmatmul.f32.gmra.mxu1 %v10138_v16 }
0x1c4a   :  { %4583 = vmatpush.xpose.msra.mxu1 %v10144_v5 }
0x1c4e   :  { %4584 = vmatpush.xpose.msra.mxu1 %v10150_v54 }
0x1c51   :  { %4422 = vmatmul.f32.gmra.mxu1 %v10156_v4 }
0x1c52   :  { %4585 = vmatpush.xpose.msra.mxu1 %v10162_v33 }
0x1c56   :  { %4586 = vmatpush.xpose.msra.mxu1 %v10168_v56 }
0x1c59   :  { %4425 = vmatmul.f32.gmra.mxu1 %v10174_v12 }
0x1c5a   :  { %4587 = vmatpush.xpose.msra.mxu1 %v10180_v46 }
0x1c5e   :  { %4588 = vmatpush.xpose.msra.mxu1 %v10186_v18 }
0x1c61   :  { %4428 = vmatmul.f32.gmra.mxu1 %v10192_v50 }
0x1c62   :  { %4589 = vmatpush.xpose.msra.mxu1 %v10198_v19 }
0x1c66   :  { %4590 = vmatpush.xpose.msra.mxu1 %v10204_v31 }
0x1c69   :  { %4431 = vmatmul.f32.gmra.mxu1 %v10210_v11 }
0x1c6a   :  { %4591 = vmatpush.xpose.msra.mxu1 %v10210_v11 }
0x1c6e   :  { %4592 = vmatpush.xpose.msra.mxu1 %v10192_v50 }
0x1c71   :  { %4434 = vmatmul.f32.gmra.mxu1 %v10204_v31 }
0x1c72   :  { %4593 = vmatpush.xpose.msra.mxu1 %v10174_v12 }
0x1c76   :  { %4594 = vmatpush.xpose.msra.mxu1 %v10156_v4 }
0x1c79   :  { %4437 = vmatmul.f32.gmra.mxu1 %v10198_v19 }
0x1c7a   :  { %4595 = vmatpush.xpose.msra.mxu1 %v10138_v16 }
0x1c7e   :  { %4596 = vmatpush.xpose.msra.mxu1 %v10118_v15 }
0x1c81   :  { %4440 = vmatmul.f32.gmra.mxu1 %v10186_v18 }
0x1c89   :  { %4443 = vmatmul.f32.gmra.mxu1 %v10180_v46 }
0x1c91   :  { %4446 = vmatmul.f32.gmra.mxu1 %v10168_v56 }
0x1c99   :  { %4449 = vmatmul.f32.gmra.mxu1 %v10162_v33 }
0x1ca1   :  { %4452 = vmatmul.f32.gmra.mxu1 %v10150_v54 }
0x1ca9   :  { %4455 = vmatmul.f32.gmra.mxu1 %v10144_v5 }
0x1cb1   :  { %4458 = vmatmul.f32.gmra.mxu1 %v10132_v9 }
0x1cb9   :  { %4461 = vmatmul.f32.gmra.mxu1 %v10124_v55 }
0x1cbe   :  { %v10229_v22 = vpop.f32.mrf.mxu1 }
0x1cc6   :  { %v10231_v34 = vpop.f32.mrf.mxu1 }
0x1cce   :  { %v10233_v57 = vpop.f32.mrf.mxu1 }
0x1cd6   :  { %v10235_v47 = vpop.f32.mrf.mxu1 }
0x1cde   :  { %v4429_v24 = vpop.f32.mrf.mxu1 }
0x1ce6   :  { %v4432_v51 = vpop.f32.mrf.mxu1 }
0x1cee   :  { %v4435_v56 = vpop.f32.mrf.mxu1 }
0x1cf6   :  { %v4438_v33 = vpop.f32.mrf.mxu1 }
0x1cfe   :  { %v4441_v46 = vpop.f32.mrf.mxu1 }
0x1d06   :  { %v4444_v54 = vpop.f32.mrf.mxu1 }
0x1d0e   :  { %v4447_v18 = vpop.f32.mrf.mxu1 }
0x1d16   :  { %v4450_v5 = vpop.f32.mrf.mxu1 }
0x1d1e   :  { %v4453_v19 = vpop.f32.mrf.mxu1 }
0x1d1f   :  { %v4454_v7 = vadd.f32 %v9774_v10, %v4453_v19 }
0x1d21   :  { %vm4477_vm13 = vcmp.ge.f32.partialorder %v4454_v7, 0.0 }
0x1d26   :  { %v4456_v9 = vpop.f32.mrf.mxu1 }
0x1d27   :  { %v4457_v4 = vadd.f32 %v9774_v10, %v4456_v9 }
0x1d29   :  { %v4494_v27 = vmul.f32 0.01, %v4457_v4  ;;  %vm4478_vm12 = vcmp.ge.f32.partialorder %v4457_v4, 0.0 }
0x1d2b   :  { %v10250_v9 = vsel %vm4478_vm12, %v4457_v4, %v4494_v27  ;;  %v4442_v27 = vadd.f32 %v9774_v10, %v4441_v46 }
0x1d2d   :  { %vm4473_vm1 = vcmp.ge.f32.partialorder %v4442_v27, 0.0 }
0x1d2e   :  { %v4459_v31 = vpop.f32.mrf.mxu1 }
0x1d2f   :  { %v4460_v11 = vadd.f32 %v9774_v10, %v4459_v31  ;;  %v4493_v31 = vmul.f32 0.01, %v4454_v7 }
0x1d31   :  { %v4495_v16 = vmul.f32 0.01, %v4460_v11  ;;  %vm4479_vm11 = vcmp.ge.f32.partialorder %v4460_v11, 0.0  ;;  %v10255_v19 = vsel %vm4477_vm13, %v4454_v7, %v4493_v31  ;;  %v4439_v7 = vadd.f32 %v9774_v10, %v4438_v33 }
0x1d32   :  { %v4489_v31 = vmul.f32 0.01, %v4442_v27 }
0x1d33   :  { %v10245_v44 = vsel %vm4479_vm11, %v4460_v11, %v4495_v16  ;;  %v4445_v16 = vadd.f32 %v9774_v10, %v4444_v54  ;;  %vm4472_vm2 = vcmp.ge.f32.partialorder %v4439_v7, 0.0 }
0x1d34   :  { %v10275_v46 = vsel %vm4473_vm1, %v4442_v27, %v4489_v31  ;;  %v4427_v27 = vadd.f32 %v9774_v10, %v10235_v47  ;;  %v4421_v47 = vadd.f32 %v9774_v10, %v10231_v34 }
0x1d35   :  { %v4490_v4 = vmul.f32 0.01, %v4445_v16  ;;  %vm4474_vm0 = vcmp.ge.f32.partialorder %v4445_v16, 0.0 }
0x1d36   :  { %v4462_v55 = vpop.f32.mrf.mxu1  ;;  %vm4468_vm7 = vcmp.ge.f32.partialorder %v4427_v27, 0.0 }
0x1d37   :  { %v4463_v50 = vadd.f32 %v9774_v10, %v4462_v55  ;;  %v4451_v55 = vadd.f32 %v9774_v10, %v4450_v5  ;;  %v10270_v54 = vsel %vm4474_vm0, %v4445_v16, %v4490_v4  ;;  %v4430_v16 = vadd.f32 %v9774_v10, %v4429_v24 }
0x1d38   :  { %v4424_v24 = vadd.f32 %v9774_v10, %v10233_v57  ;;  %v4418_v57 = vadd.f32 %v9774_v10, %v10229_v22  ;;  %v5770_v22 = vld [vmem:[%s10750_s6] sm:$0x1]  ;;  %s5069_s6 = sshll.u32 %s10761_s18, 4  ;;  %s5070_s6 = int_to_ptr.hbm [resolvable:$true] %s5069_s6 }
0x1d39   :  { %vm4480_vm10 = vcmp.ge.f32.partialorder %v4463_v50, 0.0  ;;  %v4496_v12 = vmul.f32 0.01, %v4463_v50  ;;  %vm4476_vm14 = vcmp.ge.f32.partialorder %v4451_v55, 0.0  ;;  %vm4469_vm6 = vcmp.ge.f32.partialorder %v4430_v16, 0.0 }
0x1d3a   :  { %vm4467_vm8 = vcmp.ge.f32.partialorder %v4424_v24, 0.0  ;;  %vm4465_vm11 = vcmp.ge.f32.partialorder %v4418_v57, 0.0 }
0x1d3b   :  { %v10240_v15 = vsel %vm4480_vm10, %v4463_v50, %v4496_v12  ;;  %v4448_v12 = vadd.f32 %v9774_v10, %v4447_v18  ;;  %v4492_v50 = vmul.f32 0.01, %v4451_v55  ;;  %vm4466_vm10 = vcmp.ge.f32.partialorder %v4421_v47, 0.0 }
0x1d3c   :  { %5408 = vmatpush.xpose.msk.msrb.mxu0 %vm331_vm3, %v10240_v15 }
0x1d3d   :  { %v4491_v11 = vmul.f32 0.01, %v4448_v12  ;;  %v10260_v5 = vsel %vm4476_vm14, %v4451_v55, %v4492_v50  ;;  %vm4475_vm15 = vcmp.ge.f32.partialorder %v4448_v12, 0.0  ;;  %v4436_v55 = vadd.f32 %v9774_v10, %v4435_v56 }
0x1d3e   :  { %v4488_v50 = vmul.f32 0.01, %v4439_v7 }
0x1d3f   :  { %v10265_v18 = vsel %vm4475_vm15, %v4448_v12, %v4491_v11  ;;  %v4433_v12 = vadd.f32 %v9774_v10, %v4432_v51  ;;  %v4487_v11 = vmul.f32 0.01, %v4436_v55  ;;  %vm4471_vm4 = vcmp.ge.f32.partialorder %v4436_v55, 0.0  ;;  %v5769_v10 = vld [vmem:[%s10754_s10 + $0x78] sm:$0xff] }
0x1d40   :  { %5409 = vmatpush.xpose.msk.msrb.mxu0 %vm331_vm3, %v10245_v44  ;;  %v10280_v33 = vsel %vm4472_vm2, %v4439_v7, %v4488_v50  ;;  %v4485_v51 = vmul.f32 0.01, %v4430_v16  ;;  %v4484_v7 = vmul.f32 0.01, %v4427_v27  ;;  %v4483_v50 = vmul.f32 0.01, %v4424_v24 }
0x1d41   :  { %11999 = vst [vmem:[#allocation57_spill] sm:$0xff] %v10280_v33  ;;  %v4486_v4 = vmul.f32 0.01, %v4433_v12  ;;  %v10285_v56 = vsel %vm4471_vm4, %v4436_v55, %v4487_v11  ;;  %vm4470_vm5 = vcmp.ge.f32.partialorder %v4433_v12, 0.0  ;;  %v4482_v11 = vmul.f32 0.01, %v4421_v47 }
0x1d42   :  { %12000 = vst [vmem:[#allocation61_spill] sm:$0xff] %v10285_v56  ;;  %v10297_v55 = vsel %vm4469_vm6, %v4430_v16, %v4485_v51  ;;  %v10309_v16 = vsel %vm4467_vm8, %v4424_v24, %v4483_v50  ;;  %v5772_v24 = vld [vmem:[%s10754_s10 + $0x68] sm:$0xff]  ;;  %v5775_v50 = vld [vmem:[%s10754_s10 + $0x50] sm:$0xff] }
0x1d43   :  { %v10291_v31 = vsel %vm4470_vm5, %v4433_v12, %v4486_v4  ;;  %12002 = vst [vmem:[#allocation60_spill] sm:$0xff] %v10297_v55  ;;  %v10303_v12 = vsel %vm4468_vm7, %v4427_v27, %v4484_v7  ;;  %v4481_v4 = vmul.f32 0.01, %v4418_v57  ;;  %v10313_v51 = vsel %vm4466_vm10, %v4421_v47, %v4482_v11  ;;  %v5771_v27 = vld [vmem:[%s10754_s10 + $0x70] sm:$0xff]  ;;  %v5773_v7 = vld [vmem:[%s10754_s10 + $0x60] sm:$0xff]  ;;  %v5774_v47 = vld [vmem:[%s10754_s10 + $0x58] sm:$0xff] }
0x1d44   :  { %5410 = vmatpush.xpose.msk.msrb.mxu0 %vm331_vm3, %v10250_v9  ;;  %12001 = vst [vmem:[#allocation59_spill] sm:$0xff] %v10291_v31  ;;  %v5777_v11 = vld [vmem:[%s10754_s10 + $0x40] sm:$0xff]  ;;  %vm5046_vm7 = vcmask 0  }
0x1d45   :  { %v10317_v34 = vsel %vm4465_vm11, %v4418_v57, %v4481_v4  ;;  %v5776_v57 = vld [vmem:[%s10754_s10 + $0x48] sm:$0xff]  ;;  %v5778_v4 = vld [vmem:[%s10754_s10 + $0x38] sm:$0xff] }
0x1d48   :  { %5411 = vmatpush.xpose.msk.msrb.mxu0 %vm331_vm3, %v10255_v19 }
0x1d4c   :  { %5412 = vmatpush.xpose.msk.msrb.mxu0 %vm331_vm3, %v10260_v5 }
0x1d50   :  { %5413 = vmatpush.xpose.msk.msrb.mxu0 %vm331_vm3, %v10265_v18 }
0x1d54   :  { %5414 = vmatpush.xpose.msk.msrb.mxu0 %vm331_vm3, %v10270_v54 }
0x1d58   :  { %5415 = vmatpush.xpose.msk.msrb.mxu0 %vm331_vm3, %v10275_v46 }
0x1d5c   :  { %5416 = vmatpush.xpose.msk.msrb.mxu0 %vm331_vm3, %v10280_v33 }
0x1d60   :  { %5417 = vmatpush.xpose.msk.msrb.mxu0 %vm331_vm3, %v10285_v56 }
0x1d64   :  { %5418 = vmatpush.xpose.msk.msrb.mxu0 %vm331_vm3, %v10291_v31 }
0x1d68   :  { %5419 = vmatpush.xpose.msk.msrb.mxu0 %vm331_vm3, %v10297_v55 }
0x1d6c   :  { %5420 = vmatpush.xpose.msk.msrb.mxu0 %vm331_vm3, %v10303_v12 }
0x1d70   :  { %5421 = vmatpush.xpose.msk.msrb.mxu0 %vm331_vm3, %v10309_v16 }
0x1d74   :  { %5422 = vmatpush.xpose.msk.msrb.mxu0 %vm331_vm3, %v10313_v51 }
0x1d78   :  { %5423 = vmatpush.xpose.msk.msrb.mxu0 %vm331_vm3, %v10317_v34 }
0x1d7b   :  { %5424 = vmatmul.msk.f32.vlgmr.msrb.gmra.mxu0 %vm331_vm3, %v5770_v22  ;;  %v5780_v22 = vld [vmem:[%s10754_s10 + $0x28] sm:$0xff] }
0x1d7c   :  { %4604 = vmatpush.xpose.msra.mxu0 %v5769_v10  ;;  %v5779_v10 = vld [vmem:[%s10754_s10 + $0x30] sm:$0xff] }
0x1d80   :  { %4605 = vmatpush.xpose.msra.mxu0 %v5771_v27  ;;  %v5781_v27 = vld [vmem:[%s10754_s10 + $0x20] sm:$0xff] }
0x1d84   :  { %4606 = vmatpush.xpose.msra.mxu0 %v5772_v24  ;;  %v5782_v24 = vld [vmem:[%s10754_s10 + $0x18] sm:$0xff] }
0x1d88   :  { %4607 = vmatpush.xpose.msra.mxu0 %v5773_v7  ;;  %v5783_v7 = vld [vmem:[%s10754_s10 + $0x10] sm:$0xff] }
0x1d8c   :  { %4608 = vmatpush.xpose.msra.mxu0 %v5774_v47  ;;  %v5784_v47 = vld [vmem:[%s10754_s10 + $0x8] sm:$0xff] }
0x1d90   :  { %4609 = vmatpush.xpose.msra.mxu0 %v5775_v50  ;;  %v5785_v50 = vld [vmem:[%s10754_s10] sm:$0xff] }
0x1d94   :  { %4610 = vmatpush.xpose.msra.mxu0 %v5776_v57 }
0x1d98   :  { %4611 = vmatpush.xpose.msra.mxu0 %v5777_v11 }
0x1d9c   :  { %4612 = vmatpush.xpose.msra.mxu0 %v5778_v4 }
0x1da0   :  { %4613 = vmatpush.xpose.msra.mxu0 %v5779_v10 }
0x1da4   :  { %4614 = vmatpush.xpose.msra.mxu0 %v5780_v22 }
0x1da8   :  { %4615 = vmatpush.xpose.msra.mxu0 %v5781_v27 }
0x1dac   :  { %4616 = vmatpush.xpose.msra.mxu0 %v5782_v24 }
0x1db0   :  { %4617 = vmatpush.xpose.msra.mxu0 %v5783_v7 }
0x1db4   :  { %4618 = vmatpush.xpose.msra.mxu0 %v5784_v47 }
0x1db8   :  { %4619 = vmatpush.xpose.msra.mxu0 %v5785_v50 }
0x1df8   :  { %v4578_v57 = vpop.f32.mrf.mxu0 }
0x1df9   :  { %4597 = vmatmul.f32.vlgmr.msra.gmra.mxu1 %v4578_v57 }
0x1e76   :  { %v4598_v11 = vpop.f32.mrf.mxu1 }
0x1e77   :  { %v4599_v4 = vadd.f32 %v4598_v11, %v11958_v1 }
0x1e79   :  { %vm4601_vm12 = vcmp.ge.f32.partialorder %v4599_v4, 0.0  ;;  %v4602_v10 = vmul.f32 0.01, %v4599_v4 }
0x1e7b   :  { %v4603_v22 = vsel %vm4601_vm12, %v4599_v4, %v4602_v10 }
0x1e7c   :  { %4620 = vmatmul.f32.vlgmr.msra.gmra.mxu0 %v4603_v22  ;;  %4640 = vmatmul.f32.vlgmr.msra.gmra.mxu2 %v4603_v22 }
0x1ef9   :  { %v4621_v27 = vpop.f32.mrf.mxu0 }
0x1efa   :  { %v4622_v24 = vadd.f32 %v4621_v27, %v11981_v14 }
0x1efc   :  { %v4644_v7 = vadd.f32 %v4622_v24, %v11982_v63 }
0x1efe   :  { %v5425_v47 = vmul.f32 -1.442695, %v4644_v7 }
0x1eff   :  { %v4641_v10 = vpop.f32.mrf.mxu2 }
0x1f00   :  { %5570 = vpow2.f32 %v5425_v47  ;;  %v4642_v27 = vadd.f32 %v4641_v10, %v11894_v36  ;;  %v5786_v10 = vld [vmem:[#allocation3] sm:$0x1] }
0x1f06   :  { %v5571_v33 = vpop.eup %5570 }
0x1f07   :  { %v4648_v56 = vadd.f32 1.0, %v5571_v33 }
0x1f09   :  { %5572 = vrcp.f32 %v4648_v56  ;;  %v4660_v55 = vand.u32 2147483648, %v4648_v56  ;;  %v4658_v11 = vand.u32 2147483647, %v4648_v56  ;;  %vm4654_vm14 = vweird.f32 %v4648_v56 }
0x1f0b   :  { %v4661_v22 = vor.u32 1.1754944e-38, %v4660_v55  ;;  %vm4659_vm0 = vcmp.eq.f32.partialorder %v4658_v11, 8.507059e+37 }
0x1f0f   :  { %v5573_v50 = vpop.eup %5572 }
0x1f10   :  { %v4650_v57 = vmul.f32 %v5573_v50, %v4648_v56  ;;  %vm4655_vm13 = vweird.f32 %v5573_v50 }
0x1f11   :  { %vm4656_vm15 = vmor %vm4654_vm14, %vm4655_vm13 }
0x1f12   :  { %v4651_v31 = vsub.f32 1.0, %v4650_v57 }
0x1f14   :  { %v4652_v1 = vmul.f32 %v5573_v50, %v4651_v31 }
0x1f16   :  { %v4653_v4 = vadd.f32 %v5573_v50, %v4652_v1 }
0x1f18   :  { %v4657_v14 = vsel %vm4656_vm15, %v5573_v50, %v4653_v4  ;;  %v4166_v50 = vpop.permute.xlu0 %4165 }
0x1f19   :  { %v4662_v63 = vsel %vm4659_vm0, %v4661_v22, %v4657_v14  ;;  %v4168_v36 = vsel %vm549_vm9, %v4166_v50, 0.0 }
0x1f1a   :  { %v4664_v33 = vmul.f32 %v4662_v63, %v11895_v13  ;;  %v4667_v31 = vsub.f32 1.0, %v4662_v63  ;;  %v4673_v57 = vmul.f32 %v4662_v63, %v11896_v45 }
0x1f1c   :  { %v4665_v24 = vadd.f32 %v4664_v33, %v4642_v27 }
0x1f1e   :  { %5574 = vtanh.f32 %v4665_v24 }
0x1f24   :  { %v5575_v7 = vpop.eup %5574 }
0x1f25   :  { %4669 = vrot.lane.b32.xlu1 %v5575_v7, %s5840_s11  ;;  %v12003_v7 = vld [vmem:[#allocation47_spill] sm:$0xff] }
0x1f97   :  { %v4670_v47 = vpop.permute.xlu1 %4669 }
0x1f98   :  { %v4672_v56 = vmul.f32 %v4670_v47, %v4667_v31  ;;  %v12004_v31 = vld [vmem:[#allocation53_spill] sm:$0xff] }
0x1f99   :  { %v1724_v47 = vadd.f32 %v12004_v31, %v12003_v7 }
0x1f9a   :  { %v4674_v1 = vadd.f32 %v4673_v57, %v4672_v56 }
0x1f9c   :  { %v4675_v55 = vmul.f32 %v4674_v1, %v11897_v40  ;;  %v12005_v1 = vld [vmem:[#allocation93_spill] sm:$0xff] }
0x1f9e   :  { %4677 = vrot.lane.b32.xlu0 %v4675_v55, %s5840_s11  ;;  %v2236_v55 = vadd.f32 %v12005_v1, %v1724_v47 }
0x1fc8   :  { %4169 = vadd.xlane.f32.xlu0 %v4168_v36 }
0x2010   :  { %v4678_v13 = vpop.permute.xlu0 %4677 }
0x2011   :  { %v4680_v11 = vsel %vm549_vm9, %v4678_v13, 0.0  ;;  %v12006_v13 = vld [vmem:[#allocation82_spill] sm:$0xff] }
0x2012   :  { %4681 = vadd.xlane.f32.xlu1 %v4680_v11  ;;  %v2748_v11 = vadd.f32 %v12006_v13, %v2236_v55 }
0x203b   :  { %v4170_v4 = vpop.xlane.xlu0 %4169 }
0x203c   :  { %v4171_v22 = vadd.f32 %v5786_v10, %v4170_v4 }
0x203e   :  { %v5391_v14 = vmul.f32 -1.442695, %v4171_v22 }
0x2040   :  { %5576 = vpow2.f32 %v5391_v14  ;;  %v12007_v14 = vld [vmem:[#allocation85_spill] sm:$0xff] }
0x2046   :  { %v5577_v45 = vpop.eup %5576 }
0x2047   :  { %v4175_v63 = vadd.f32 1.0, %v5577_v45  ;;  %v3260_v45 = vadd.f32 %v12007_v14, %v2748_v11 }
0x2049   :  { %5578 = vrcp.f32 %v4175_v63  ;;  %v4187_v24 = vand.u32 2147483648, %v4175_v63  ;;  %v4185_v56 = vand.u32 2147483647, %v4175_v63  ;;  %vm4181_vm9 = vweird.f32 %v4175_v63 }
0x204b   :  { %v4188_v36 = vor.u32 1.1754944e-38, %v4187_v24  ;;  %vm4186_vm4 = vcmp.eq.f32.partialorder %v4185_v56, 8.507059e+37 }
0x204f   :  { %v5579_v27 = vpop.eup %5578 }
0x2050   :  { %v4177_v40 = vmul.f32 %v5579_v27, %v4175_v63  ;;  %vm4182_vm1 = vweird.f32 %v5579_v27  ;;  %v3772_v63 = vadd.f32 %v9223_v3, %v3260_v45 }
0x2051   :  { %vm4183_vm2 = vmor %vm4181_vm9, %vm4182_vm1 }
0x2052   :  { %v4178_v33 = vsub.f32 1.0, %v4177_v40  ;;  %v4284_v24 = vadd.f32 %v9797_v48, %v3772_v63 }
0x2054   :  { %v4179_v57 = vmul.f32 %v5579_v27, %v4178_v33 }
0x2056   :  { %v4180_v50 = vadd.f32 %v5579_v27, %v4179_v57 }
0x2058   :  { %v4184_v4 = vsel %vm4183_vm2, %v5579_v27, %v4180_v50 }
0x2059   :  { %v4189_v22 = vsel %vm4186_vm4, %v4188_v36, %v4184_v4 }
0x205a   :  { %v4243_v40 = vmul.f32 %v4189_v22, %v9797_v48  ;;  %v4281_v7 = vsub.f32 %v4189_v22, %v9791_v52 }
0x205c   :  { %5471 = vpush %v4243_v40  ;;  %v4280_v33 = vadd.f32 %v4243_v40, %v9784_v60  ;;  %v4282_v31 = vmul.f32 %v4281_v7, %v9797_v48 }
0x205e   :  { %vm4285_vm5 = vcmp.lt.f32.partialorder %v4280_v33, 0.999  ;;  %v4283_v27 = vadd.f32 %v4282_v31, %v9791_v52 }
0x205f   :  { %v4286_v47 = vsel %vm4285_vm5, %v9797_v48, 0.0 }
0x2060   :  { %5473 = vpush %v4286_v47  ;;  %v4796_v57 = vadd.f32 %v4286_v47, %v4284_v24 }
0x2062   :  { %vm5479_vm6 = vcmp.lt.s32.totalorder %v4796_v57, 0  ;;  %v5480_v56 = vceil.f32 %v4796_v57  ;;  %v5481_v1 = vfloor.f32 %v4796_v57 }
0x2064   :  { %v5482_v55 = vsel %vm5479_vm6, %v5480_v56, %v5481_v1 }
0x2065   :  { %v5483_v50 = vcvt.f32.s32 %v5482_v55 }
0x2067   :  { %5047 = vst.msk [vmem:[#allocation4] sm:$0x1] %vm5046_vm7, %v5483_v50 }
0x2068   :  { %5061 = dma.vmem_to_hbm [thread:$0]  %s5057_s0, 16, %s5059_s30, [#allocation5]  }
0x2085   :  { %v4682_v60 = vpop.xlane.xlu1 %4681 }
0x2086   :  { %v4683_v36 = vadd.f32 %v5786_v10, %v4682_v60 }
0x2088   :  { %v5426_v3 = vmul.f32 -1.442695, %v4683_v36 }
0x208a   :  { %5580 = vpow2.f32 %v5426_v3 }
0x208d   :  { %s5472_s10 = spop %5471 }
0x208e   :  { %v10398_v52 = vstv %s5472_s10  ;;  %s5843_s10 = smov [#allocation6]  }
0x208f   :  { %v4256_v48 = vmul.f32 %v10398_v52, %v9832_v30  ;;  %v4257_v22 = vmul.f32 %v10398_v52, %v9826_v6  ;;  %v4258_v14 = vmul.f32 %v10398_v52, %v9820_v26  ;;  %v4259_v30 = vmul.f32 %v10398_v52, %v9814_v61  ;;  %s5067_s11 = sshll.u32 %s5843_s10, 4  ;;  %s5068_s11 = int_to_ptr.vmem [resolvable:$true] %s5067_s11 }
0x2090   :  { %v5581_v13 = vpop.eup %5580  ;;  %v4260_v6 = vmul.f32 %v10398_v52, %v9808_v41  ;;  %v4261_v26 = vmul.f32 %v10398_v52, %v9803_v53  ;;  %v4262_v41 = vmul.f32 %v10398_v52, %v9794_v62  ;;  %v4263_v53 = vmul.f32 %v10398_v52, %v9781_v58 }
0x2091   :  { %v4687_v11 = vadd.f32 1.0, %v5581_v13  ;;  %v10407_v10 = vadd.f32 %v4256_v48, %v9924_v0  ;;  %v10410_v40 = vadd.f32 %v4257_v22, %v9927_v35  ;;  %v10413_v7 = vadd.f32 %v4258_v14, %v9930_v32  ;;  %v4840_v48 = vld [vmem:[%s10752_s8 + $0x10] sm:$0xff]  ;;  %v4838_v22 = vld [vmem:[%s10752_s8] sm:$0xff]  ;;  %s5474_s26 = spop %5473 }
0x2092   :  { %v10422_v35 = vadd.f32 %v4259_v30, %v9934_v59  ;;  %v10425_v32 = vadd.f32 %v4260_v6, %v9937_v2  ;;  %v10428_v57 = vadd.f32 %v4261_v26, %v9940_v23  ;;  %v10435_v59 = vadd.f32 %v4262_v41, %v9943_v17  ;;  %v4845_v17 = vld [vmem:[%s10752_s8 + $0x38] sm:$0xff] }
0x2093   :  { %5582 = vrcp.f32 %v4687_v11  ;;  %v4699_v63 = vand.u32 2147483648, %v4687_v11  ;;  %v4697_v0 = vand.u32 2147483647, %v4687_v11  ;;  %vm4693_vm10 = vweird.f32 %v4687_v11  ;;  %4902 = vmatpush.msrb.mxu2 %v4845_v17 }
0x2094   :  { %v10438_v2 = vadd.f32 %v4263_v53, %v9946_v43  ;;  %v4844_v43 = vld [vmem:[%s10752_s8 + $0x30] sm:$0xff]  ;;  %v4248_v14 = vmul.f32 %v10398_v52, %v9904_v39  ;;  %v10471_v30 = vstv %s5474_s26  ;;  %v4714_v6 = vsub.f32 %v10260_v5, %v10073_v49 }
0x2095   :  { %v4700_v56 = vor.u32 1.1754944e-38, %v4699_v63  ;;  %vm4698_vm12 = vcmp.eq.f32.partialorder %v4697_v0, 8.507059e+37  ;;  %4903 = vmatpush.msrb.mxu2 %v4844_v43  ;;  %v4713_v26 = vsub.f32 %v10265_v18, %v10065_v37  ;;  %v4711_v39 = vsub.f32 %v10275_v46, %v10049_v8 }
0x2096   :  { %v4718_v0 = vsub.f32 %v10240_v15, %v10105_v25  ;;  %v4716_v41 = vsub.f32 %v10250_v9, %v10089_v20  ;;  %v4715_v53 = vsub.f32 %v10255_v19, %v10081_v38 }
0x2099   :  { %v5583_v4 = vpop.eup %5582 }
0x209a   :  { %v4689_v45 = vmul.f32 %v5583_v4, %v4687_v11  ;;  %vm4694_vm8 = vweird.f32 %v5583_v4 }
0x209b   :  { %vm4695_vm11 = vmor %vm4693_vm10, %vm4694_vm8 }
0x209c   :  { %v4690_v31 = vsub.f32 1.0, %v4689_v45  ;;  %v4704_v45 = vsub.f32 %v10313_v51, %v9993_v21 }
0x209e   :  { %v4691_v24 = vmul.f32 %v5583_v4, %v4690_v31  ;;  %v4703_v31 = vsub.f32 %v10317_v34, %v9985_v42 }
0x20a0   :  { %v4692_v61 = vadd.f32 %v5583_v4, %v4691_v24  ;;  %v4712_v24 = vsub.f32 %v10270_v54, %v10057_v29 }
0x20a2   :  { %v4696_v1 = vsel %vm4695_vm11, %v5583_v4, %v4692_v61  ;;  %v4839_v4 = vld [vmem:[%s10752_s8 + $0x8] sm:$0xff]  ;;  %v4717_v61 = vsub.f32 %v10245_v44, %v10097_v28 }
0x20a3   :  { %v4701_v23 = vsel %vm4698_vm12, %v4700_v56, %v4696_v1  ;;  %v12008_v56 = vld [vmem:[#allocation44_spill] sm:$0xff] }
0x20a4   :  { %v4755_v55 = vmul.f32 %v4701_v23, %v4286_v47  ;;  %v4793_v50 = vsub.f32 %v4701_v23, %v4283_v27  ;;  %v4264_v1 = vadd.f32 %v4248_v14, %v12008_v56  ;;  %v4723_v23 = vmul.f32 %v10471_v30, %v4703_v31  ;;  %v12011_v14 = vld [vmem:[#allocation81_spill] sm:$0xff] }
0x20a6   :  { %5475 = vpush %v4755_v55  ;;  %v4794_v60 = vmul.f32 %v4793_v50, %v4286_v47  ;;  %v4792_v36 = vadd.f32 %v4755_v55, %v4280_v33  ;;  %v4843_v33 = vld [vmem:[%s10752_s8 + $0x28] sm:$0xff]  ;;  %v4841_v47 = vld [vmem:[%s10752_s8 + $0x18] sm:$0xff] }
0x20a7   :  { %4904 = vmatpush.msrb.mxu2 %v4843_v33  ;;  %v12009_v50 = vld [vmem:[#allocation37_spill] sm:$0xff] }
0x20a8   :  { %v4795_v62 = vadd.f32 %v4794_v60, %v4283_v27  ;;  %vm4798_vm13 = vcmp.gt.f32.partialorder %v4792_v36, 1.0  ;;  %v4842_v27 = vld [vmem:[%s10752_s8 + $0x20] sm:$0xff]  ;;  %v4249_v60 = vmul.f32 %v10398_v52, %v12009_v50 }
0x20a9   :  { %4905 = vmatpush.msrb.mxu2 %v4842_v27  ;;  %v4738_v27 = vmul.f32 %v10471_v30, %v4718_v0 }
0x20aa   :  { %v4797_v3 = vsub.f32 %v4792_v36, %v4795_v62  ;;  %5048 = vst.msk [vmem:[#allocation6] sm:$0x1] %vm5046_vm7, %v4795_v62 }
0x20ab   :  { %4906 = vmatpush.msrb.mxu2 %v4841_v47  ;;  %v12010_v47 = vld [vmem:[#allocation23_spill] sm:$0xff]  ;;  %5072 = dma.vmem_to_hbm [thread:$0]  %s5068_s11, 16, %s5070_s6, [#allocation7]  }
0x20ac   :  { %v4799_v58 = vsub.f32 1.0, %v4797_v3 }
0x20ad   :  { %4907 = vmatpush.msrb.mxu2 %v4840_v48  ;;  %v4705_v48 = vsub.f32 %v10309_v16, %v12010_v47 }
0x20ae   :  { %v4800_v13 = vsub.f32 %v4799_v58, %v4795_v62 }
0x20af   :  { %4908 = vmatpush.msrb.mxu2 %v4839_v4 }
0x20b0   :  { %v4801_v11 = vsel %vm4798_vm13, %v4800_v13, 0.0 }
0x20b1   :  { %5477 = vpush %v4801_v11  ;;  %4909 = vmatpush.msrb.mxu2 %v4838_v22 }
0x20d7   :  { %s5476_s27 = spop %5475 }
0x20d8   :  { %v10473_v63 = vstv %s5476_s27 }
0x20d9   :  { %v4760_v55 = vmul.f32 %v10473_v63, %v10317_v34  ;;  %v4768_v36 = vmul.f32 %v10473_v63, %v10275_v46  ;;  %v4769_v62 = vmul.f32 %v10473_v63, %v10270_v54  ;;  %v4770_v3 = vmul.f32 %v10473_v63, %v10265_v18 }
0x20da   :  { %v4771_v58 = vmul.f32 %v10473_v63, %v10260_v5  ;;  %v4772_v13 = vmul.f32 %v10473_v63, %v10255_v19  ;;  %v4773_v34 = vmul.f32 %v10473_v63, %v10250_v9  ;;  %v4774_v11 = vmul.f32 %v10473_v63, %v10245_v44 }
0x20db   :  { %v4775_v46 = vmul.f32 %v10473_v63, %v10240_v15  ;;  %v4784_v54 = vadd.f32 %v4768_v36, %v10407_v10  ;;  %v4785_v17 = vadd.f32 %v4769_v62, %v10410_v40  ;;  %v4786_v18 = vadd.f32 %v4770_v3, %v10413_v7 }
0x20dc   :  { %v4787_v5 = vadd.f32 %v4771_v58, %v10422_v35  ;;  %v4788_v43 = vadd.f32 %v4772_v13, %v10425_v32  ;;  %v4789_v19 = vadd.f32 %v4773_v34, %v10428_v57  ;;  %v4790_v9 = vadd.f32 %v4774_v11, %v10435_v59  ;;  %v12012_v34 = vld [vmem:[#allocation51_spill] sm:$0xff] }
0x20dd   :  { %v4791_v33 = vadd.f32 %v4775_v46, %v10438_v2  ;;  %v4724_v44 = vmul.f32 %v10471_v30, %v4704_v45  ;;  %v4731_v15 = vmul.f32 %v10471_v30, %v4711_v39  ;;  %v4732_v10 = vmul.f32 %v10471_v30, %v4712_v24 }
0x20de   :  { %v4733_v40 = vmul.f32 %v10471_v30, %v4713_v26  ;;  %v4739_v7 = vadd.f32 %v4723_v23, %v9985_v42  ;;  %v4734_v35 = vmul.f32 %v10471_v30, %v4714_v6  ;;  %v4735_v32 = vmul.f32 %v10471_v30, %v4715_v53 }
0x20df   :  { %v4736_v57 = vmul.f32 %v10471_v30, %v4716_v41  ;;  %v4737_v2 = vmul.f32 %v10471_v30, %v4717_v61  ;;  %v4776_v4 = vadd.f32 %v4760_v55, %v4264_v1  ;;  %v4265_v42 = vadd.f32 %v4249_v60, %v12011_v14 }
0x20e0   :  { %v4740_v45 = vadd.f32 %v4724_v44, %v9993_v21  ;;  %v4747_v31 = vadd.f32 %v4731_v15, %v10049_v8  ;;  %v4748_v6 = vadd.f32 %v4732_v10, %v10057_v29  ;;  %v4749_v26 = vadd.f32 %v4733_v40, %v10065_v37  ;;  %v12015_v15 = vld [vmem:[#allocation17_spill] sm:$0xff] }
0x20e1   :  { %v4750_v39 = vadd.f32 %v4734_v35, %v10073_v49  ;;  %v4751_v0 = vadd.f32 %v4735_v32, %v10081_v38  ;;  %v4752_v61 = vadd.f32 %v4736_v57, %v10089_v20  ;;  %v4761_v41 = vmul.f32 %v10473_v63, %v10313_v51  ;;  %v12017_v35 = vld [vmem:[#allocation60_spill] sm:$0xff]  ;;  %v12018_v57 = vld [vmem:[#allocation42_spill] sm:$0xff] }
0x20e2   :  { %s5478_s8 = spop %5477  ;;  %v4753_v21 = vadd.f32 %v4737_v2, %v10097_v28  ;;  %v4754_v8 = vadd.f32 %v4738_v27, %v10105_v25  ;;  %v4725_v58 = vmul.f32 %v10471_v30, %v4705_v48  ;;  %v4250_v11 = vmul.f32 %v10398_v52, %v12012_v34 }
0x20e3   :  { %v10529_v59 = vstv %s5478_s8  ;;  %v4777_v3 = vadd.f32 %v4761_v41, %v4265_v42  ;;  %v4251_v10 = vmul.f32 %v10398_v52, %v12015_v15  ;;  %v12031_v15 = vld [vmem:[#allocation77_spill] sm:$0xff] }
0x20e4   :  { %v4806_v22 = vmul.f32 %v10529_v59, %v4739_v7  ;;  %v4807_v53 = vmul.f32 %v10529_v59, %v4740_v45  ;;  %v4814_v29 = vmul.f32 %v10529_v59, %v4747_v31  ;;  %v4815_v37 = vmul.f32 %v10529_v59, %v4748_v6  ;;  %v12016_v7 = vld [vmem:[#allocation25_spill] sm:$0xff]  ;;  %v12021_v31 = vld [vmem:[#allocation59_spill] sm:$0xff] }
0x20e5   :  { %v4816_v49 = vmul.f32 %v10529_v59, %v4749_v26  ;;  %v4817_v38 = vmul.f32 %v10529_v59, %v4750_v39  ;;  %v4818_v20 = vmul.f32 %v10529_v59, %v4751_v0  ;;  %v4819_v51 = vmul.f32 %v10529_v59, %v4752_v61  ;;  %v12020_v45 = vld [vmem:[#allocation33_spill] sm:$0xff] }
0x20e6   :  { %v4822_v24 = vadd.f32 %v4806_v22, %v4776_v4  ;;  %v4820_v56 = vmul.f32 %v10529_v59, %v4753_v21  ;;  %v4821_v28 = vmul.f32 %v10529_v59, %v4754_v8  ;;  %v10558_v1 = vadd.f32 %v4814_v29, %v4784_v54  ;;  %v12019_v22 = vld [vmem:[#allocation80_spill] sm:$0xff]  ;;  %v12022_v26 = vld [vmem:[#allocation41_spill] sm:$0xff] }
0x20e7   :  { %v10560_v25 = vadd.f32 %v4815_v37, %v4785_v17  ;;  %v10562_v23 = vadd.f32 %v4816_v49, %v4786_v18  ;;  %v10564_v55 = vadd.f32 %v4817_v38, %v4787_v5  ;;  %v10566_v50 = vadd.f32 %v4818_v20, %v4788_v43  ;;  %v12013_v17 = vld [vmem:[#allocation24_spill] sm:$0xff]  ;;  %v12014_v5 = vld [vmem:[#allocation43_spill] sm:$0xff]  ;;  %v12025_v49 = vld [vmem:[#allocation61_spill] sm:$0xff] }
0x20e8   :  { %5427 = vmatmul.msk.f32.vlgmr.msrb.gmra.mxu2 %vm331_vm3, %v4822_v24  ;;  %v10568_v60 = vadd.f32 %v4819_v51, %v4789_v19  ;;  %v10570_v36 = vadd.f32 %v4820_v56, %v4790_v9  ;;  %v10572_v62 = vadd.f32 %v4821_v28, %v4791_v33  ;;  %v4823_v13 = vadd.f32 %v4807_v53, %v4777_v3  ;;  %v12023_v53 = vld [vmem:[#allocation79_spill] sm:$0xff]  ;;  %v12024_v37 = vld [vmem:[#allocation32_spill] sm:$0xff] }
0x20e9   :  { %v4741_v46 = vadd.f32 %v4725_v58, %v12010_v47  ;;  %v4762_v54 = vmul.f32 %v10473_v63, %v10309_v16  ;;  %v4706_v18 = vsub.f32 %v10303_v12, %v12013_v17  ;;  %v4266_v43 = vadd.f32 %v4250_v11, %v12014_v5  ;;  %v12026_v20 = vld [vmem:[#allocation36_spill] sm:$0xff]  ;;  %v12030_v5 = vld [vmem:[#allocation49_spill] sm:$0xff] }
0x20ea   :  { %v4763_v16 = vmul.f32 %v10473_v63, %v10303_v12  ;;  %v4707_v32 = vsub.f32 %v12017_v35, %v12016_v7  ;;  %v4267_v2 = vadd.f32 %v4251_v10, %v12018_v57  ;;  %v4252_v14 = vmul.f32 %v10398_v52, %v12019_v22 }
0x20eb   :  { %v4808_v19 = vmul.f32 %v10529_v59, %v4741_v46  ;;  %v4778_v9 = vadd.f32 %v4762_v54, %v4266_v43  ;;  %v4726_v33 = vmul.f32 %v10471_v30, %v4706_v18  ;;  %v4764_v12 = vmul.f32 %v10473_v63, %v12017_v35  ;;  %v12028_v54 = vld [vmem:[#allocation89_spill] sm:$0xff] }
0x20ec   :  { %v4779_v47 = vadd.f32 %v4763_v16, %v4267_v2  ;;  %v4727_v48 = vmul.f32 %v10471_v30, %v4707_v32  ;;  %v4708_v6 = vsub.f32 %v12021_v31, %v12020_v45  ;;  %v4268_v24 = vadd.f32 %v4252_v14, %v12022_v26  ;;  %v12040_v26 = vld [vmem:[#allocation55_spill] sm:$0xff] }
0x20ed   :  { %v4824_v44 = vadd.f32 %v4808_v19, %v4778_v9  ;;  %v4742_v40 = vadd.f32 %v4726_v33, %v12013_v17  ;;  %v4253_v21 = vmul.f32 %v10398_v52, %v12023_v53  ;;  %v4765_v29 = vmul.f32 %v10473_v63, %v12021_v31  ;;  %v12029_v17 = vld [vmem:[#allocation57_spill] sm:$0xff]  ;;  %v12038_v31 = vld [vmem:[#allocation88_spill] sm:$0xff]  ;;  %v12046_v53 = vld [vmem:[#allocation19_spill] sm:$0xff] }
0x20ee   :  { %v4743_v42 = vadd.f32 %v4727_v48, %v12016_v7  ;;  %v4780_v0 = vadd.f32 %v4764_v12, %v4268_v24  ;;  %v4728_v61 = vmul.f32 %v10471_v30, %v4708_v6  ;;  %v4709_v38 = vsub.f32 %v12025_v49, %v12024_v37  ;;  %v12032_v7 = vld [vmem:[#allocation38_spill] sm:$0xff]  ;;  %v12036_v12 = vld [vmem:[#allocation91_spill] sm:$0xff]  ;;  %v12041_v24 = vld [vmem:[#allocation56_spill] sm:$0xff] }
0x20ef   :  { %v4809_v27 = vmul.f32 %v10529_v59, %v4742_v40  ;;  %v4269_v51 = vadd.f32 %v4253_v21, %v12026_v20  ;;  %v4766_v46 = vmul.f32 %v10473_v63, %v12025_v49  ;;  %v4710_v18 = vsub.f32 %v12029_v17, %v12028_v54  ;;  %v12039_v6 = vld [vmem:[#allocation58_spill] sm:$0xff]  ;;  %v12047_v21 = vld [vmem:[#allocation20_spill] sm:$0xff] }
0x20f0   :  { %5428 = vmatmul.msk.f32.gmra.mxu2 %vm331_vm3, %v4823_v13  ;;  %v4810_v39 = vmul.f32 %v10529_v59, %v4743_v42  ;;  %v4744_v8 = vadd.f32 %v4728_v61, %v12020_v45  ;;  %v4729_v3 = vmul.f32 %v10471_v30, %v4709_v38  ;;  %v12027_v13 = vld [vmem:[#allocation78_spill] sm:$0xff]  ;;  %v4255_v10 = vmul.f32 %v10398_v52, %v12031_v15  ;;  %v12044_v61 = vld [vmem:[#allocation87_spill] sm:$0xff] }
0x20f1   :  { %v4825_v4 = vadd.f32 %v4809_v27, %v4779_v47  ;;  %v4781_v28 = vadd.f32 %v4765_v29, %v4269_v51  ;;  %v4254_v34 = vmul.f32 %v10398_v52, %v12027_v13  ;;  %v4730_v33 = vmul.f32 %v10471_v30, %v4710_v18  ;;  %v12035_v42 = vld [vmem:[#allocation18_spill] sm:$0xff]  ;;  %v5493_v29 = vld [vmem:[%s10753_s9] ss:$0 sm:$0xff] }
0x20f2   :  { %v4826_v41 = vadd.f32 %v4810_v39, %v4780_v0  ;;  %v4811_v56 = vmul.f32 %v10529_v59, %v4744_v8  ;;  %v4745_v11 = vadd.f32 %v4729_v3, %v12024_v37  ;;  %v4767_v16 = vmul.f32 %v10473_v63, %v12029_v17  ;;  %v12037_v45 = vld [vmem:[#allocation54_spill] sm:$0xff]  ;;  %v12043_v0 = vld [vmem:[#allocation92_spill] sm:$0xff]  ;;  %v12048_v8 = vld [vmem:[#allocation21_spill] sm:$0xff] }
0x20f3   :  { %v4270_v43 = vadd.f32 %v4254_v34, %v12030_v5  ;;  %v4746_v40 = vadd.f32 %v4730_v33, %v12028_v54  ;;  %v4271_v35 = vadd.f32 %v4255_v10, %v12032_v7  ;;  %v12042_v39 = vld [vmem:[#allocation90_spill] sm:$0xff] }
0x20f4   :  { %v4827_v58 = vadd.f32 %v4811_v56, %v4781_v28  ;;  %v4812_v19 = vmul.f32 %v10529_v59, %v4745_v11 }
0x20f5   :  { %v4782_v9 = vadd.f32 %v4766_v46, %v4270_v43  ;;  %v4813_v32 = vmul.f32 %v10529_v59, %v4746_v40  ;;  %v4783_v57 = vadd.f32 %v4767_v16, %v4271_v35 }
0x20f7   :  { %v4829_v2 = vadd.f32 %v4813_v32, %v4783_v57 }
0x20f8   :  { %5429 = vmatmul.msk.f32.gmra.mxu2 %vm331_vm3, %v4824_v44  ;;  %v4828_v44 = vadd.f32 %v4812_v19, %v4782_v9 }
0x2100   :  { %5430 = vmatmul.msk.f32.gmra.mxu2 %vm331_vm3, %v4825_v4 }
0x2108   :  { %5431 = vmatmul.msk.f32.gmra.mxu2 %vm331_vm3, %v4826_v41  ;;  %v12045_v41 = vld [vmem:[#allocation52_spill] sm:$0xff] }
0x2110   :  { %5432 = vmatmul.msk.f32.gmra.mxu2 %vm331_vm3, %v4827_v58 }
0x2118   :  { %5433 = vmatmul.msk.f32.gmra.mxu2 %vm331_vm3, %v4828_v44 }
0x2120   :  { %5434 = vmatmul.msk.f32.gmra.mxu2 %vm331_vm3, %v4829_v2 }
0x2128   :  { %5435 = vmatmul.msk.f32.gmra.mxu2 %vm331_vm3, %v10558_v1 }
0x2130   :  { %5436 = vmatmul.msk.f32.gmra.mxu2 %vm331_vm3, %v10560_v25 }
0x2138   :  { %5437 = vmatmul.msk.f32.gmra.mxu2 %vm331_vm3, %v10562_v23 }
0x2140   :  { %5438 = vmatmul.msk.f32.gmra.mxu2 %vm331_vm3, %v10564_v55 }
0x2148   :  { %5439 = vmatmul.msk.f32.gmra.mxu2 %vm331_vm3, %v10566_v50 }
0x2150   :  { %5440 = vmatmul.msk.f32.gmra.mxu2 %vm331_vm3, %v10568_v60 }
0x2158   :  { %5441 = vmatmul.msk.f32.gmra.mxu2 %vm331_vm3, %v10570_v36  ;;  %v12033_v36 = vld [vmem:[#allocation22_spill] sm:$0xff] }
0x2160   :  { %5442 = vmatmul.msk.f32.gmra.mxu2 %vm331_vm3, %v10572_v62  ;;  %v12034_v62 = vld [vmem:[#allocation31_spill] sm:$0xff]  ;;  %vm5028_vm3 = vcmask 23552  }
0x216b   :  { %v4911_v52 = vpop.f32.mrf.mxu2 }
0x2173   :  { %v4914_v30 = vpop.f32.mrf.mxu2 }
0x217b   :  { %v4917_v63 = vpop.f32.mrf.mxu2 }
0x2183   :  { %v4920_v59 = vpop.f32.mrf.mxu2 }
0x218b   :  { %v4923_v1 = vpop.f32.mrf.mxu2 }
0x2193   :  { %v4926_v25 = vpop.f32.mrf.mxu2 }
0x219b   :  { %v4929_v23 = vpop.f32.mrf.mxu2 }
0x21a3   :  { %v4932_v55 = vpop.f32.mrf.mxu2 }
0x21ab   :  { %v4935_v27 = vpop.f32.mrf.mxu2 }
0x21b3   :  { %v4938_v47 = vpop.f32.mrf.mxu2 }
0x21bb   :  { %v4941_v50 = vpop.f32.mrf.mxu2 }
0x21c3   :  { %v4944_v48 = vpop.f32.mrf.mxu2 }
0x21cb   :  { %v4947_v4 = vpop.f32.mrf.mxu2 }
0x21d3   :  { %v4950_v60 = vpop.f32.mrf.mxu2 }
0x21db   :  { %v4953_v22 = vpop.f32.mrf.mxu2 }
0x21e3   :  { %v4956_v14 = vpop.f32.mrf.mxu2 }
0x21e4   :  { %4963 = vmatpush.msrb.mxu3 %v4956_v14 }
0x21e6   :  { %4964 = vmatpush.msrb.mxu3 %v4953_v22 }
0x21e8   :  { %4965 = vmatpush.msrb.mxu3 %v4950_v60 }
0x21ea   :  { %4966 = vmatpush.msrb.mxu3 %v4947_v4 }
0x21ec   :  { %4967 = vmatpush.msrb.mxu3 %v4944_v48 }
0x21ee   :  { %4968 = vmatpush.msrb.mxu3 %v4941_v50 }
0x21f0   :  { %4969 = vmatpush.msrb.mxu3 %v4938_v47 }
0x21f2   :  { %4970 = vmatpush.msrb.mxu3 %v4935_v27 }
0x21f4   :  { %4971 = vmatpush.msrb.mxu3 %v4932_v55 }
0x21f6   :  { %4972 = vmatpush.msrb.mxu3 %v4929_v23 }
0x21f8   :  { %4973 = vmatpush.msrb.mxu3 %v4926_v25 }
0x21fa   :  { %4974 = vmatpush.msrb.mxu3 %v4923_v1 }
0x21fc   :  { %4975 = vmatpush.msrb.mxu3 %v4920_v59 }
0x21fe   :  { %4976 = vmatpush.msrb.mxu3 %v4917_v63 }
0x2200   :  { %4977 = vmatpush.msrb.mxu3 %v4914_v30 }
0x2202   :  { %4978 = vmatpush.msrb.mxu3 %v4911_v52 }
0x2203   :  { %4979 = vmatmul.f32.vlgmr.msrb.gmra.mxu3 %v12033_v36 }
0x220b   :  { %4982 = vmatmul.f32.gmra.mxu3 %v12034_v62 }
0x2213   :  { %4985 = vmatmul.f32.gmra.mxu3 %v12035_v42 }
0x221b   :  { %4988 = vmatmul.f32.gmra.mxu3 %v12036_v12 }
0x2223   :  { %4991 = vmatmul.f32.gmra.mxu3 %v12037_v45 }
0x222b   :  { %4994 = vmatmul.f32.gmra.mxu3 %v12038_v31 }
0x2233   :  { %4997 = vmatmul.f32.gmra.mxu3 %v12039_v6 }
0x223b   :  { %5000 = vmatmul.f32.gmra.mxu3 %v12040_v26 }
0x2243   :  { %5003 = vmatmul.f32.gmra.mxu3 %v12041_v24 }
0x224b   :  { %5006 = vmatmul.f32.gmra.mxu3 %v12042_v39 }
0x2253   :  { %5009 = vmatmul.f32.gmra.mxu3 %v12043_v0 }
0x225b   :  { %5012 = vmatmul.f32.gmra.mxu3 %v12044_v61 }
0x2263   :  { %5015 = vmatmul.f32.gmra.mxu3 %v12045_v41 }
0x226b   :  { %5018 = vmatmul.f32.gmra.mxu3 %v12046_v53 }
0x2273   :  { %5021 = vmatmul.f32.gmra.mxu3 %v12047_v21 }
0x227b   :  { %5024 = vmatmul.f32.gmra.mxu3 %v12048_v8 }
0x2286   :  { %v4980_v37 = vpop.f32.mrf.mxu3 }
0x2287   :  { %v4981_v49 = vadd.f32 %v5493_v29, %v4980_v37 }
0x2289   :  { %5029 = vst.msk [vmem:[%s10759_s16] sm:$0xff] %vm5028_vm3, %v4981_v49 }
0x228e   :  { %v4983_v38 = vpop.f32.mrf.mxu3 }
0x228f   :  { %v4984_v20 = vadd.f32 %v5493_v29, %v4983_v38 }
0x2291   :  { %5030 = vst.msk [vmem:[%s10759_s16 + $0x8] sm:$0xff] %vm5028_vm3, %v4984_v20 }
0x2296   :  { %v4986_v51 = vpop.f32.mrf.mxu3 }
0x2297   :  { %v4987_v56 = vadd.f32 %v5493_v29, %v4986_v51 }
0x2299   :  { %5031 = vst.msk [vmem:[%s10759_s16 + $0x10] sm:$0xff] %vm5028_vm3, %v4987_v56 }
0x229e   :  { %v4989_v28 = vpop.f32.mrf.mxu3 }
0x229f   :  { %v4990_v3 = vadd.f32 %v5493_v29, %v4989_v28 }
0x22a1   :  { %5032 = vst.msk [vmem:[%s10759_s16 + $0x18] sm:$0xff] %vm5028_vm3, %v4990_v3 }
0x22a6   :  { %v4992_v58 = vpop.f32.mrf.mxu3 }
0x22a7   :  { %v4993_v13 = vadd.f32 %v5493_v29, %v4992_v58 }
0x22a9   :  { %5033 = vst.msk [vmem:[%s10759_s16 + $0x20] sm:$0xff] %vm5028_vm3, %v4993_v13 }
0x22ae   :  { %v4995_v34 = vpop.f32.mrf.mxu3 }
0x22af   :  { %v4996_v11 = vadd.f32 %v5493_v29, %v4995_v34 }
0x22b1   :  { %5034 = vst.msk [vmem:[%s10759_s16 + $0x28] sm:$0xff] %vm5028_vm3, %v4996_v11 }
0x22b6   :  { %v4998_v46 = vpop.f32.mrf.mxu3 }
0x22b7   :  { %v4999_v54 = vadd.f32 %v5493_v29, %v4998_v46 }
0x22b9   :  { %5035 = vst.msk [vmem:[%s10759_s16 + $0x30] sm:$0xff] %vm5028_vm3, %v4999_v54 }
0x22be   :  { %v5001_v17 = vpop.f32.mrf.mxu3 }
0x22bf   :  { %v5002_v18 = vadd.f32 %v5493_v29, %v5001_v17 }
0x22c1   :  { %5036 = vst.msk [vmem:[%s10759_s16 + $0x38] sm:$0xff] %vm5028_vm3, %v5002_v18 }
0x22c6   :  { %v5004_v5 = vpop.f32.mrf.mxu3 }
0x22c7   :  { %v5005_v43 = vadd.f32 %v5493_v29, %v5004_v5 }
0x22c9   :  { %5037 = vst.msk [vmem:[%s10759_s16 + $0x40] sm:$0xff] %vm5028_vm3, %v5005_v43 }
0x22ce   :  { %v5007_v19 = vpop.f32.mrf.mxu3 }
0x22cf   :  { %v5008_v9 = vadd.f32 %v5493_v29, %v5007_v19 }
0x22d1   :  { %5038 = vst.msk [vmem:[%s10759_s16 + $0x48] sm:$0xff] %vm5028_vm3, %v5008_v9 }
0x22d6   :  { %v5010_v33 = vpop.f32.mrf.mxu3 }
0x22d7   :  { %v5011_v44 = vadd.f32 %v5493_v29, %v5010_v33 }
0x22d9   :  { %5039 = vst.msk [vmem:[%s10759_s16 + $0x50] sm:$0xff] %vm5028_vm3, %v5011_v44 }
0x22de   :  { %v5013_v15 = vpop.f32.mrf.mxu3 }
0x22df   :  { %v5014_v10 = vadd.f32 %v5493_v29, %v5013_v15 }
0x22e1   :  { %5040 = vst.msk [vmem:[%s10759_s16 + $0x58] sm:$0xff] %vm5028_vm3, %v5014_v10 }
0x22e6   :  { %v5016_v40 = vpop.f32.mrf.mxu3 }
0x22e7   :  { %v5017_v16 = vadd.f32 %v5493_v29, %v5016_v40 }
0x22e9   :  { %5041 = vst.msk [vmem:[%s10759_s16 + $0x60] sm:$0xff] %vm5028_vm3, %v5017_v16 }
0x22ee   :  { %v5019_v7 = vpop.f32.mrf.mxu3 }
0x22ef   :  { %v5020_v35 = vadd.f32 %v5493_v29, %v5019_v7 }
0x22f1   :  { %5042 = vst.msk [vmem:[%s10759_s16 + $0x68] sm:$0xff] %vm5028_vm3, %v5020_v35 }
0x22f6   :  { %v5022_v32 = vpop.f32.mrf.mxu3 }
0x22f7   :  { %v5023_v57 = vadd.f32 %v5493_v29, %v5022_v32 }
0x22f9   :  { %5043 = vst.msk [vmem:[%s10759_s16 + $0x70] sm:$0xff] %vm5028_vm3, %v5023_v57 }
0x22fe   :  { %v5025_v2 = vpop.f32.mrf.mxu3 }
0x22ff   :  { %v5026_v52 = vadd.f32 %v5493_v29, %v5025_v2 }
0x2301   :  { %5044 = vst.msk [vmem:[%s10759_s16 + $0x78] sm:$0xff] %vm5028_vm3, %v5026_v52 }
0x2302   :  { %5835 = dma.done.wait [#allocation5], 16  }
0x2303   :  { %5836 = vsyncadd [#allocation5], 4294967280 }
0x2304   :  { %5837 = dma.done.wait [#allocation7], 16  }
0x2305   :  { %5838 = vsyncadd [#allocation7], 4294967280 }
0x2306   :  { %5083 = vsyncpa [#allocation5], 1 }
0x2307   :  { %5084 = vsyncpa [#allocation7], 1 }

</bundles_post_ra>
